<compile_context>
chip_gen: v5e
topology: v5e:2x2
jax: 0.10.0
libtpu: 0.0.40
codegen_flags: <defaults>
</compile_context>

<pallas_src>
import functools

import jax
import jax.numpy as jnp
from jax.experimental import pallas as pl
from jax.experimental.pallas import tpu as pltpu

HIGHEST = jax.lax.Precision.HIGHEST  # reference only


def _num_steps(num_groups, w):
    """Chip-aware grid split: 1 step on single-TC chips (v5e/v6e); 2 'parallel'
    steps only when the chip has two TensorCores (v7x-class)."""
    try:
        kind = jax.devices()[0].device_kind.lower()
    except Exception:
        return 1
    two_cores = ("v7" in kind) or ("7x" in kind)
    if two_cores and num_groups % 2 == 0 and ((num_groups // 2) * w) % 128 == 0:
        return 2
    return 1


# ----------------------------------------------------------------------------
# The fused kernel.
#
# Layouts (all channel-major, pixels on lanes):
#   x_ref  : (Cin, G*W)           columns = (b, h, w) for this step's G rows
#   w1_ref : (C,   Cin)           1x1 conv weight, BN scale folded in (bf16)
#   wd_ref : (20*C, C)            BOTH deconvs, rows = (branch, kw, kh, c),
#                                 BN scale folded in (bf16)
#   b_ref  : (21*C, 1)            conv bias rows [0:C), deconv bias rows [C:21C)
#   g*w*_ref: gate Linear weights, width-permuted to (kw, w) column order (bf16)
#   g*b_ref : (2, N)              row 0 = hidden bias, row 1 = output bias
#   o1_ref : (G*2*C, 2*W)         rows = (g, kh, c), cols = (kw, w)
#   o2_ref : (G*4*C, 4*W)         rows = (g, kh, c), cols = (kw, w)
#   d_scr  : (20*C, G*W)          VMEM scratch for the deconv output
# ----------------------------------------------------------------------------
def _msrm_kernel(x_ref, w1_ref, wd_ref, b_ref,
                 g1w1_ref, g1w2_ref, g1b_ref,
                 g2w1_ref, g2w2_ref, g2b_ref,
                 o1_ref, o2_ref, d_scr, *, G, W, C):
    k1, k2 = 2, 4
    R1, R2 = k1 * C, k2 * C           # gate rows produced per (b,h) group
    DR1 = k1 * k1 * C                 # deconv1 rows in the merged weight
    DR = DR1 + k2 * k2 * C            # total merged deconv rows

    # Stage 1: 1x1 conv + BN + ReLU (channels on sublanes, pixels on lanes).
    x = x_ref[...].astype(jnp.bfloat16)
    t = jnp.dot(w1_ref[...], x, preferred_element_type=jnp.float32)   # (C, G*W)
    t = jnp.maximum(t + b_ref[0:C, :], 0.0)

    # Stage 2: BOTH ConvTranspose2d's, every (kw, kh) tap, in ONE matmul.
    d = jnp.dot(wd_ref[...], t.astype(jnp.bfloat16),
                preferred_element_type=jnp.float32)                   # (DR, G*W)
    d_scr[...] = jnp.maximum(d + b_ref[C:C + DR, :], 0.0)

    # Depth-to-space: stage the gate inputs directly inside the output blocks
    # (output VMEM doubles as the y buffer -> no extra scratch, no HBM trip).
    for g in range(G):
        for kw in range(k1):
            o1_ref[g * R1:(g + 1) * R1, kw * W:(kw + 1) * W] = \
                d_scr[kw * R1:(kw + 1) * R1, g * W:(g + 1) * W]
        for kw in range(k2):
            o2_ref[g * R2:(g + 1) * R2, kw * W:(kw + 1) * W] = \
                d_scr[DR1 + kw * R2:DR1 + (kw + 1) * R2, g * W:(g + 1) * W]

    # Gate MLP (Linear -> ReLU -> Linear -> Tanh along the upscaled width),
    # fused with the elementwise multiply gate(y) * y (multiply kept in f32).
    def gate_mul(o_ref, w1r, w2r, br):
        y = o_ref[...]
        h = jnp.dot(y.astype(jnp.bfloat16), w1r[...],
                    preferred_element_type=jnp.float32) + br[0:1, :]
        h = jnp.maximum(h, 0.0).astype(jnp.bfloat16)
        gz = jnp.dot(h, w2r[...], preferred_element_type=jnp.float32) + br[1:2, :]
        o_ref[...] = jnp.tanh(gz) * y

    gate_mul(o1_ref, g1w1_ref, g1w2_ref, g1b_ref)
    gate_mul(o2_ref, g2w1_ref, g2w2_ref, g2b_ref)


def fused_msrm(x_t, prep, B, H, W):
    C = prep["C"]
    BH = B * H
    R1, R2, DR = 2 * C, 4 * C, 20 * C
    steps = _num_steps(BH, W)
    G = BH // steps

    kernel = functools.partial(_msrm_kernel, G=G, W=W, C=C)
    return pl.pallas_call(
        kernel,
        out_shape=(jax.ShapeDtypeStruct((BH * R1, 2 * W), jnp.float32),
                   jax.ShapeDtypeStruct((BH * R2, 4 * W), jnp.float32)),
        grid=(steps,),
        in_specs=[
            pl.BlockSpec((x_t.shape[0], G * W), lambda i: (0, i)),   # x (channel-major)
            pl.BlockSpec((C, x_t.shape[0]), lambda i: (0, 0)),       # w1 (scale folded)
            pl.BlockSpec((DR, C), lambda i: (0, 0)),                 # merged deconv weight
            pl.BlockSpec((C + DR, 1), lambda i: (0, 0)),             # all conv/deconv biases
            pl.BlockSpec((2 * W, 2 * W), lambda i: (0, 0)),          # gate1 W1 (permuted)
            pl.BlockSpec((2 * W, 2 * W), lambda i: (0, 0)),          # gate1 W2 (permuted)
            pl.BlockSpec((2, 2 * W), lambda i: (0, 0)),              # gate1 biases
            pl.BlockSpec((4 * W, 4 * W), lambda i: (0, 0)),          # gate2 W1 (permuted)
            pl.BlockSpec((4 * W, 4 * W), lambda i: (0, 0)),          # gate2 W2 (permuted)
            pl.BlockSpec((2, 4 * W), lambda i: (0, 0)),              # gate2 biases
        ],
        out_specs=(pl.BlockSpec((G * R1, 2 * W), lambda i: (i, 0)),
                   pl.BlockSpec((G * R2, 4 * W), lambda i: (i, 0))),
        scratch_shapes=[pltpu.VMEM((DR, G * W), jnp.float32)],
        compiler_params=pltpu.CompilerParams(dimension_semantics=("parallel",)),
    )(x_t, prep["w1f"], prep["wd"], prep["bias"],
      prep["g1_w1k"], prep["g1_w2k"], prep["g1_b"],
      prep["g2_w1k"], prep["g2_w2k"], prep["g2_b"])


# ----------------------------------------------------------------------------
# Parameter preparation (trace-time constants).
#   * BN(eval) scale folded into conv / deconv weights, shifts packed into one
#     bias column.
#   * Both deconvs merged into one weight, rows ordered (branch, kw, kh, c).
#   * Gate Linear weights pre-permuted to the kernel's (kw, w) width ordering.
# ----------------------------------------------------------------------------
def prepare_params(params, eps=1e-5):
    C = params["conv1_w"].shape[0]
    scale = params["bn_gamma"] / jnp.sqrt(params["bn_var"] + eps)
    shift = params["bn_beta"] - params["bn_mean"] * scale

    w1f = (params["conv1_w"][:, :, 0, 0] * scale[:, None]).astype(jnp.bfloat16)
    b1 = params["conv1_b"] * scale + shift

    def deconv_rows(wd, bd, k):
        # wd: (c_in, c_out, kh, kw) -> rows (kw, kh, c_out), cols c_in; fold scale
        m = jnp.transpose(wd, (3, 2, 1, 0)) * scale[None, None, :, None]
        m = m.reshape(k * k * C, C)
        b = jnp.tile(bd * scale + shift, k * k)
        return m, b

    wd1, bd1 = deconv_rows(params["deconv1_w"], params["deconv1_b"], 2)
    wd2, bd2 = deconv_rows(params["deconv2_w"], params["deconv2_b"], 4)
    wd = jnp.concatenate([wd1, wd2], axis=0).astype(jnp.bfloat16)      # (20C, C)
    bias = jnp.concatenate([b1, bd1, bd2])[:, None].astype(jnp.float32)  # (21C, 1)

    def gate(w1, b1_, w2, b2_, k):
        n = w1.shape[0]
        Wcols = n // k
        # kernel width order is (kw, w); original order is w_hi = k*w + kw
        perm = (k * jnp.arange(Wcols)[None, :] + jnp.arange(k)[:, None]).reshape(-1)
        w1k = w1.T[perm, :].astype(jnp.bfloat16)       # (n_in_perm, hidden)
        w2k = w2.T[:, perm].astype(jnp.bfloat16)       # (hidden, n_out_perm)
        gb = jnp.stack([b1_, b2_[perm]], axis=0).astype(jnp.float32)   # (2, n)
        return w1k, w2k, gb

    g1_w1k, g1_w2k, g1_b = gate(params["g1_w1"], params["g1_b1"],
                                params["g1_w2"], params["g1_b2"], 2)
    g2_w1k, g2_w2k, g2_b = gate(params["g2_w1"], params["g2_b1"],
                                params["g2_w2"], params["g2_b2"], 4)

    return {"C": C, "w1f": w1f, "wd": wd, "bias": bias,
            "g1_w1k": g1_w1k, "g1_w2k": g1_w2k, "g1_b": g1_b,
            "g2_w1k": g2_w1k, "g2_w2k": g2_w2k, "g2_b": g2_b}


# ----------------------------------------------------------------------------
# Full forward.  The only XLA data-movement left is the tiny channel-major
# input permute (the module's own first op) and ONE layout transpose per
# branch to NHWC, into which the +mrm residual add is fused.
# ----------------------------------------------------------------------------
def multi_scale_refine_forward(prep, vit1, mrm1=None, mrm2=None):
    B, H, W, Cin = vit1.shape
    C = prep["C"]
    # gate1/gate2 are hard-wired Linear(128)/Linear(256) in the PyTorch module
    assert 2 * W == prep["g1_w1k"].shape[0] and 4 * W == prep["g2_w1k"].shape[0], \
        "gate Linear(128)/Linear(256) require W == 64"

    # channel-major (the module itself starts with permute(0,3,1,2)); 32 KB op.
    x_t = jnp.transpose(vit1, (3, 0, 1, 2)).reshape(Cin, B * H * W)

    o1, o2 = fused_msrm(x_t, prep, B, H, W)

    def to_nhwc(o, k, mrm):
        # o rows = (b, h, kh, c), cols = (kw, w)  ->  NHWC (b, kh*H..., kw*W..., c)
        o6 = o.reshape(B, H, k, C, k, W)
        out = jnp.transpose(o6, (0, 1, 2, 5, 4, 3)).reshape(B, k * H, k * W, C)
        if mrm is not None:
            out = out + mrm            # fused into the transpose copy by XLA
        return out

    return to_nhwc(o1, 2, mrm1), to_nhwc(o2, 4, mrm2)


# ----------------------------------------------------------------------------
# Pure-JAX reference (independent formulation, f32 HIGHEST) for correctness.
# ----------------------------------------------------------------------------
def reference_forward(params, vit1, mrm1, mrm2):
    eps = 1e-5
    x = jnp.transpose(vit1, (0, 3, 1, 2))
    m1 = jnp.transpose(mrm1, (0, 3, 1, 2))
    m2 = jnp.transpose(mrm2, (0, 3, 1, 2))
    scale = params["bn_gamma"] / jnp.sqrt(params["bn_var"] + eps)
    shift = params["bn_beta"] - params["bn_mean"] * scale

    def bn_relu(t):
        return jnp.maximum(t * scale[None, :, None, None] + shift[None, :, None, None], 0.0)

    t = jnp.einsum("oc,bchw->bohw", params["conv1_w"][:, :, 0, 0], x,
                   precision=HIGHEST) + params["conv1_b"][None, :, None, None]
    t = bn_relu(t)

    def deconv(t_, wd, bd, k):
        B, C, H, W = t_.shape
        O = wd.shape[1]
        y = jnp.einsum("bchw,coij->bohiwj", t_, wd, precision=HIGHEST)
        return y.reshape(B, O, k * H, k * W) + bd[None, :, None, None]

    hr1 = bn_relu(deconv(t, params["deconv1_w"], params["deconv1_b"], 2))
    hr2 = bn_relu(deconv(t, params["deconv2_w"], params["deconv2_b"], 4))

    def gate(y, w1, b1, w2, b2):
        h = jnp.maximum(jnp.einsum("...i,oi->...o", y, w1, precision=HIGHEST) + b1, 0.0)
        return jnp.tanh(jnp.einsum("...i,oi->...o", h, w2, precision=HIGHEST) + b2)

    o1 = gate(hr1, params["g1_w1"], params["g1_b1"], params["g1_w2"], params["g1_b2"]) * hr1 + m1
    o2 = gate(hr2, params["g2_w1"], params["g2_b1"], params["g2_w2"], params["g2_b2"]) * hr2 + m2
    return jnp.transpose(o1, (0, 2, 3, 1)), jnp.transpose(o2, (0, 2, 3, 1))


# ----------------------------------------------------------------------------
def make_params(key, c_in, c_out):
    ks = jax.random.split(key, 16)
    f32 = jnp.float32
    p = {
        "conv1_w": 0.1 * jax.random.normal(ks[0], (c_out, c_in, 1, 1), f32),
        "conv1_b": 0.05 * jax.random.normal(ks[1], (c_out,), f32),
        "bn_gamma": 1.0 + 0.1 * jax.random.normal(ks[2], (c_out,), f32),
        "bn_beta": 0.1 * jax.random.normal(ks[3], (c_out,), f32),
        "bn_mean": 0.1 * jax.random.normal(ks[4], (c_out,), f32),
        "bn_var": 1.0 + jnp.abs(0.1 * jax.random.normal(ks[5], (c_out,), f32)),
        "deconv1_w": 0.1 * jax.random.normal(ks[6], (c_out, c_out, 2, 2), f32),
        "deconv1_b": 0.05 * jax.random.normal(ks[7], (c_out,), f32),
        "deconv2_w": 0.1 * jax.random.normal(ks[8], (c_out, c_out, 4, 4), f32),
        "deconv2_b": 0.05 * jax.random.normal(ks[9], (c_out,), f32),
        "g1_w1": 0.05 * jax.random.normal(ks[10], (128, 128), f32),
        "g1_b1": 0.05 * jax.random.normal(ks[11], (128,), f32),
        "g1_w2": 0.05 * jax.random.normal(ks[12], (128, 128), f32),
        "g1_b2": 0.05 * jax.random.normal(ks[13], (128,), f32),
        "g2_w1": 0.05 * jax.random.normal(ks[14], (256, 256), f32),
        "g2_b1": 0.05 * jax.random.normal(ks[15], (256,), f32),
    }
    ks2 = jax.random.split(ks[15], 2)
    p["g2_w2"] = 0.05 * jax.random.normal(ks2[0], (256, 256), f32)
    p["g2_b2"] = 0.05 * jax.random.normal(ks2[1], (256,), f32)
    return p


if __name__ == "__main__":
    # W must be 64 so the upscaled widths hit the hard-coded Linear(128)/Linear(256).
    B, H, W, C_IN, C_OUT = 2, 8, 64, 8, 8

    key = jax.random.PRNGKey(0)
    kp, kx, km1, km2 = jax.random.split(key, 4)
    params = make_params(kp, C_IN, C_OUT)
    prep = prepare_params(params)

    vit1 = jax.random.normal(kx, (B, H, W, C_IN), jnp.float32)          # NHWC
    mrm1 = 0.5 * jax.random.normal(km1, (B, 2 * H, 2 * W, C_OUT), jnp.float32)
    mrm2 = 0.5 * jax.random.normal(km2, (B, 4 * H, 4 * W, C_OUT), jnp.float32)

    fwd = jax.jit(functools.partial(multi_scale_refine_forward, prep))
    out1, out2 = fwd(vit1, mrm1, mrm2)
    jax.block_until_ready((out1, out2))

    ref1, ref2 = reference_forward(params, vit1, mrm1, mrm2)
    assert out1.shape == (B, 2 * H, 2 * W, C_OUT) and out2.shape == (B, 4 * H, 4 * W, C_OUT)
    # Matmuls run with bf16 MXU operands + f32 accumulation (BN scale folded
    # into bf16 weights), so compare against the f32-HIGHEST reference with a
    # bf16-class tolerance.
    err1 = float(jnp.max(jnp.abs(out1 - ref1)))
    err2 = float(jnp.max(jnp.abs(out2 - ref2)))
    assert jnp.allclose(out1, ref1, rtol=1e-2, atol=1e-2), err1
    assert jnp.allclose(out2, ref2, rtol=1e-2, atol=1e-2), err2

    print("KERNEL_OK")
</pallas_src>

<mosaic_0001>
module attributes {stable_mosaic.version = 11 : i64} {
  func.func @_msrm_kernel(%arg0: i32, %arg1: memref<8x1024xf32, #tpu.memory_space<vmem>>, %arg2: memref<8x8xbf16, #tpu.memory_space<vmem>>, %arg3: memref<160x8xbf16, #tpu.memory_space<vmem>>, %arg4: memref<168x1xf32, #tpu.memory_space<vmem>>, %arg5: memref<128x128xbf16, #tpu.memory_space<vmem>>, %arg6: memref<128x128xbf16, #tpu.memory_space<vmem>>, %arg7: memref<2x128xf32, #tpu.memory_space<vmem>>, %arg8: memref<256x256xbf16, #tpu.memory_space<vmem>>, %arg9: memref<256x256xbf16, #tpu.memory_space<vmem>>, %arg10: memref<2x256xf32, #tpu.memory_space<vmem>>, %arg11: memref<256x128xf32, #tpu.memory_space<vmem>>, %arg12: memref<512x256xf32, #tpu.memory_space<vmem>>, %arg13: memref<160x1024xf32, #tpu.memory_space<vmem>>) attributes {dimension_semantics = [#tpu.dimension_semantics<parallel>], iteration_bounds = array<i64: 1>, scalar_prefetch = 0 : i64, scratch_operands = 1 : i64, tpu.core_type = #tpu.core_type<tc>, window_params = [{transform_indices = @transform_0, window_bounds = array<i64: 8, 1024>}, {pipeline_mode = #tpu.pipeline_mode<synchronous>, transform_indices = @transform_1, window_bounds = array<i64: 8, 8>}, {pipeline_mode = #tpu.pipeline_mode<synchronous>, transform_indices = @transform_2, window_bounds = array<i64: 160, 8>}, {pipeline_mode = #tpu.pipeline_mode<synchronous>, transform_indices = @transform_3, window_bounds = array<i64: 168, 1>}, {pipeline_mode = #tpu.pipeline_mode<synchronous>, transform_indices = @transform_4, window_bounds = array<i64: 128, 128>}, {pipeline_mode = #tpu.pipeline_mode<synchronous>, transform_indices = @transform_5, window_bounds = array<i64: 128, 128>}, {pipeline_mode = #tpu.pipeline_mode<synchronous>, transform_indices = @transform_6, window_bounds = array<i64: 2, 128>}, {pipeline_mode = #tpu.pipeline_mode<synchronous>, transform_indices = @transform_7, window_bounds = array<i64: 256, 256>}, {pipeline_mode = #tpu.pipeline_mode<synchronous>, transform_indices = @transform_8, window_bounds = array<i64: 256, 256>}, {pipeline_mode = #tpu.pipeline_mode<synchronous>, transform_indices = @transform_9, window_bounds = array<i64: 2, 256>}, {transform_indices = @transform_10, window_bounds = array<i64: 256, 128>}, {transform_indices = @transform_11, window_bounds = array<i64: 512, 256>}]} {
    %c0 = arith.constant 0 : index
    %c0_0 = arith.constant 0 : index
    %0 = vector.load %arg1[%c0, %c0_0] : memref<8x1024xf32, #tpu.memory_space<vmem>>, vector<8x1024xf32>
    %1 = arith.truncf %0 : vector<8x1024xf32> to vector<8x1024xbf16>
    %c0_1 = arith.constant 0 : index
    %c0_2 = arith.constant 0 : index
    %2 = vector.load %arg2[%c0_1, %c0_2] : memref<8x8xbf16, #tpu.memory_space<vmem>>, vector<8x8xbf16>
    %cst = arith.constant dense<0.000000e+00> : vector<8x1024xf32>
    %3 = tpu.matmul %2, %1, %cst {dimension_numbers = #tpu.dot_dimension_numbers<[1], [0], [0], [1], [0, 0, 1, 1], [], []>} : vector<8x8xbf16>, vector<8x1024xbf16>, vector<8x1024xf32> -> vector<8x1024xf32>
    %c0_3 = arith.constant 0 : index
    %c0_4 = arith.constant 0 : index
    %4 = vector.load %arg4[%c0_3, %c0_4] : memref<168x1xf32, #tpu.memory_space<vmem>>, vector<8x1xf32>
    %5 = vector.broadcast %4 : vector<8x1xf32> to vector<8x1024xf32>
    %6 = arith.addf %3, %5 : vector<8x1024xf32>
    %cst_5 = arith.constant 0.000000e+00 : f32
    %7 = vector.broadcast %cst_5 : f32 to vector<8x1024xf32>
    %8 = arith.maximumf %6, %7 : vector<8x1024xf32>
    %c0_6 = arith.constant 0 : index
    %c0_7 = arith.constant 0 : index
    %9 = vector.load %arg3[%c0_6, %c0_7] : memref<160x8xbf16, #tpu.memory_space<vmem>>, vector<160x8xbf16>
    %10 = arith.truncf %8 : vector<8x1024xf32> to vector<8x1024xbf16>
    %cst_8 = arith.constant dense<0.000000e+00> : vector<160x1024xf32>
    %11 = tpu.matmul %9, %10, %cst_8 {dimension_numbers = #tpu.dot_dimension_numbers<[1], [0], [0], [1], [0, 0, 1, 1], [], []>} : vector<160x8xbf16>, vector<8x1024xbf16>, vector<160x1024xf32> -> vector<160x1024xf32>
    %c8 = arith.constant 8 : index
    %c0_9 = arith.constant 0 : index
    %12 = vector.load %arg4[%c8, %c0_9] : memref<168x1xf32, #tpu.memory_space<vmem>>, vector<160x1xf32>
    %13 = vector.broadcast %12 : vector<160x1xf32> to vector<160x1024xf32>
    %14 = arith.addf %11, %13 : vector<160x1024xf32>
    %cst_10 = arith.constant 0.000000e+00 : f32
    %15 = vector.broadcast %cst_10 : f32 to vector<160x1024xf32>
    %16 = arith.maximumf %14, %15 : vector<160x1024xf32>
    %c0_11 = arith.constant 0 : index
    %c0_12 = arith.constant 0 : index
    %17 = vector.load %arg13[%c0_11, %c0_12] : memref<160x1024xf32, #tpu.memory_space<vmem>>, vector<160x1024xf32>
    tpu.vector_store %arg13[%c0_11, %c0_12], %16 {strides = array<i32>} : memref<160x1024xf32, #tpu.memory_space<vmem>>, vector<160x1024xf32>,
    %c0_13 = arith.constant 0 : index
    %c0_14 = arith.constant 0 : index
    %18 = vector.load %arg13[%c0_13, %c0_14] : memref<160x1024xf32, #tpu.memory_space<vmem>>, vector<16x64xf32>
    %c0_15 = arith.constant 0 : index
    %c0_16 = arith.constant 0 : index
    %19 = vector.load %arg11[%c0_15, %c0_16] : memref<256x128xf32, #tpu.memory_space<vmem>>, vector<16x64xf32>
    tpu.vector_store %arg11[%c0_15, %c0_16], %18 {strides = array<i32>} : memref<256x128xf32, #tpu.memory_space<vmem>>, vector<16x64xf32>,
    %c16 = arith.constant 16 : index
    %c0_17 = arith.constant 0 : index
    %20 = vector.load %arg13[%c16, %c0_17] : memref<160x1024xf32, #tpu.memory_space<vmem>>, vector<16x64xf32>
    %c0_18 = arith.constant 0 : index
    %c64 = arith.constant 64 : index
    %21 = vector.load %arg11[%c0_18, %c64] : memref<256x128xf32, #tpu.memory_space<vmem>>, vector<16x64xf32>
    tpu.vector_store %arg11[%c0_18, %c64], %20 {strides = array<i32>} : memref<256x128xf32, #tpu.memory_space<vmem>>, vector<16x64xf32>,
    %c32 = arith.constant 32 : index
    %c0_19 = arith.constant 0 : index
    %22 = vector.load %arg13[%c32, %c0_19] : memref<160x1024xf32, #tpu.memory_space<vmem>>, vector<32x64xf32>
    %c0_20 = arith.constant 0 : index
    %c0_21 = arith.constant 0 : index
    %23 = vector.load %arg12[%c0_20, %c0_21] : memref<512x256xf32, #tpu.memory_space<vmem>>, vector<32x64xf32>
    tpu.vector_store %arg12[%c0_20, %c0_21], %22 {strides = array<i32>} : memref<512x256xf32, #tpu.memory_space<vmem>>, vector<32x64xf32>,
    %c64_22 = arith.constant 64 : index
    %c0_23 = arith.constant 0 : index
    %24 = vector.load %arg13[%c64_22, %c0_23] : memref<160x1024xf32, #tpu.memory_space<vmem>>, vector<32x64xf32>
    %c0_24 = arith.constant 0 : index
    %c64_25 = arith.constant 64 : index
    %25 = vector.load %arg12[%c0_24, %c64_25] : memref<512x256xf32, #tpu.memory_space<vmem>>, vector<32x64xf32>
    tpu.vector_store %arg12[%c0_24, %c64_25], %24 {strides = array<i32>} : memref<512x256xf32, #tpu.memory_space<vmem>>, vector<32x64xf32>,
    %c96 = arith.constant 96 : index
    %c0_26 = arith.constant 0 : index
    %26 = vector.load %arg13[%c96, %c0_26] : memref<160x1024xf32, #tpu.memory_space<vmem>>, vector<32x64xf32>
    %c0_27 = arith.constant 0 : index
    %c128 = arith.constant 128 : index
    %27 = vector.load %arg12[%c0_27, %c128] : memref<512x256xf32, #tpu.memory_space<vmem>>, vector<32x64xf32>
    tpu.vector_store %arg12[%c0_27, %c128], %26 {strides = array<i32>} : memref<512x256xf32, #tpu.memory_space<vmem>>, vector<32x64xf32>,
    %c128_28 = arith.constant 128 : index
    %c0_29 = arith.constant 0 : index
    %28 = vector.load %arg13[%c128_28, %c0_29] : memref<160x1024xf32, #tpu.memory_space<vmem>>, vector<32x64xf32>
    %c0_30 = arith.constant 0 : index
    %c192 = arith.constant 192 : index
    %29 = vector.load %arg12[%c0_30, %c192] : memref<512x256xf32, #tpu.memory_space<vmem>>, vector<32x64xf32>
    tpu.vector_store %arg12[%c0_30, %c192], %28 {strides = array<i32>} : memref<512x256xf32, #tpu.memory_space<vmem>>, vector<32x64xf32>,
    %c0_31 = arith.constant 0 : index
    %c64_32 = arith.constant 64 : index
    %30 = vector.load %arg13[%c0_31, %c64_32] : memref<160x1024xf32, #tpu.memory_space<vmem>>, vector<16x64xf32>
    %c16_33 = arith.constant 16 : index
    %c0_34 = arith.constant 0 : index
    %31 = vector.load %arg11[%c16_33, %c0_34] : memref<256x128xf32, #tpu.memory_space<vmem>>, vector<16x64xf32>
    tpu.vector_store %arg11[%c16_33, %c0_34], %30 {strides = array<i32>} : memref<256x128xf32, #tpu.memory_space<vmem>>, vector<16x64xf32>,
    %c16_35 = arith.constant 16 : index
    %c64_36 = arith.constant 64 : index
    %32 = vector.load %arg13[%c16_35, %c64_36] : memref<160x1024xf32, #tpu.memory_space<vmem>>, vector<16x64xf32>
    %c16_37 = arith.constant 16 : index
    %c64_38 = arith.constant 64 : index
    %33 = vector.load %arg11[%c16_37, %c64_38] : memref<256x128xf32, #tpu.memory_space<vmem>>, vector<16x64xf32>
    tpu.vector_store %arg11[%c16_37, %c64_38], %32 {strides = array<i32>} : memref<256x128xf32, #tpu.memory_space<vmem>>, vector<16x64xf32>,
    %c32_39 = arith.constant 32 : index
    %c64_40 = arith.constant 64 : index
    %34 = vector.load %arg13[%c32_39, %c64_40] : memref<160x1024xf32, #tpu.memory_space<vmem>>, vector<32x64xf32>
    %c32_41 = arith.constant 32 : index
    %c0_42 = arith.constant 0 : index
    %35 = vector.load %arg12[%c32_41, %c0_42] : memref<512x256xf32, #tpu.memory_space<vmem>>, vector<32x64xf32>
    tpu.vector_store %arg12[%c32_41, %c0_42], %34 {strides = array<i32>} : memref<512x256xf32, #tpu.memory_space<vmem>>, vector<32x64xf32>,
    %c64_43 = arith.constant 64 : index
    %c64_44 = arith.constant 64 : index
    %36 = vector.load %arg13[%c64_43, %c64_44] : memref<160x1024xf32, #tpu.memory_space<vmem>>, vector<32x64xf32>
    %c32_45 = arith.constant 32 : index
    %c64_46 = arith.constant 64 : index
    %37 = vector.load %arg12[%c32_45, %c64_46] : memref<512x256xf32, #tpu.memory_space<vmem>>, vector<32x64xf32>
    tpu.vector_store %arg12[%c32_45, %c64_46], %36 {strides = array<i32>} : memref<512x256xf32, #tpu.memory_space<vmem>>, vector<32x64xf32>,
    %c96_47 = arith.constant 96 : index
    %c64_48 = arith.constant 64 : index
    %38 = vector.load %arg13[%c96_47, %c64_48] : memref<160x1024xf32, #tpu.memory_space<vmem>>, vector<32x64xf32>
    %c32_49 = arith.constant 32 : index
    %c128_50 = arith.constant 128 : index
    %39 = vector.load %arg12[%c32_49, %c128_50] : memref<512x256xf32, #tpu.memory_space<vmem>>, vector<32x64xf32>
    tpu.vector_store %arg12[%c32_49, %c128_50], %38 {strides = array<i32>} : memref<512x256xf32, #tpu.memory_space<vmem>>, vector<32x64xf32>,
    %c128_51 = arith.constant 128 : index
    %c64_52 = arith.constant 64 : index
    %40 = vector.load %arg13[%c128_51, %c64_52] : memref<160x1024xf32, #tpu.memory_space<vmem>>, vector<32x64xf32>
    %c32_53 = arith.constant 32 : index
    %c192_54 = arith.constant 192 : index
    %41 = vector.load %arg12[%c32_53, %c192_54] : memref<512x256xf32, #tpu.memory_space<vmem>>, vector<32x64xf32>
    tpu.vector_store %arg12[%c32_53, %c192_54], %40 {strides = array<i32>} : memref<512x256xf32, #tpu.memory_space<vmem>>, vector<32x64xf32>,
    %c0_55 = arith.constant 0 : index
    %c128_56 = arith.constant 128 : index
    %42 = vector.load %arg13[%c0_55, %c128_56] : memref<160x1024xf32, #tpu.memory_space<vmem>>, vector<16x64xf32>
    %c32_57 = arith.constant 32 : index
    %c0_58 = arith.constant 0 : index
    %43 = vector.load %arg11[%c32_57, %c0_58] : memref<256x128xf32, #tpu.memory_space<vmem>>, vector<16x64xf32>
    tpu.vector_store %arg11[%c32_57, %c0_58], %42 {strides = array<i32>} : memref<256x128xf32, #tpu.memory_space<vmem>>, vector<16x64xf32>,
    %c16_59 = arith.constant 16 : index
    %c128_60 = arith.constant 128 : index
    %44 = vector.load %arg13[%c16_59, %c128_60] : memref<160x1024xf32, #tpu.memory_space<vmem>>, vector<16x64xf32>
    %c32_61 = arith.constant 32 : index
    %c64_62 = arith.constant 64 : index
    %45 = vector.load %arg11[%c32_61, %c64_62] : memref<256x128xf32, #tpu.memory_space<vmem>>, vector<16x64xf32>
    tpu.vector_store %arg11[%c32_61, %c64_62], %44 {strides = array<i32>} : memref<256x128xf32, #tpu.memory_space<vmem>>, vector<16x64xf32>,
    %c32_63 = arith.constant 32 : index
    %c128_64 = arith.constant 128 : index
    %46 = vector.load %arg13[%c32_63, %c128_64] : memref<160x1024xf32, #tpu.memory_space<vmem>>, vector<32x64xf32>
    %c64_65 = arith.constant 64 : index
    %c0_66 = arith.constant 0 : index
    %47 = vector.load %arg12[%c64_65, %c0_66] : memref<512x256xf32, #tpu.memory_space<vmem>>, vector<32x64xf32>
    tpu.vector_store %arg12[%c64_65, %c0_66], %46 {strides = array<i32>} : memref<512x256xf32, #tpu.memory_space<vmem>>, vector<32x64xf32>,
    %c64_67 = arith.constant 64 : index
    %c128_68 = arith.constant 128 : index
    %48 = vector.load %arg13[%c64_67, %c128_68] : memref<160x1024xf32, #tpu.memory_space<vmem>>, vector<32x64xf32>
    %c64_69 = arith.constant 64 : index
    %c64_70 = arith.constant 64 : index
    %49 = vector.load %arg12[%c64_69, %c64_70] : memref<512x256xf32, #tpu.memory_space<vmem>>, vector<32x64xf32>
    tpu.vector_store %arg12[%c64_69, %c64_70], %48 {strides = array<i32>} : memref<512x256xf32, #tpu.memory_space<vmem>>, vector<32x64xf32>,
    %c96_71 = arith.constant 96 : index
    %c128_72 = arith.constant 128 : index
    %50 = vector.load %arg13[%c96_71, %c128_72] : memref<160x1024xf32, #tpu.memory_space<vmem>>, vector<32x64xf32>
    %c64_73 = arith.constant 64 : index
    %c128_74 = arith.constant 128 : index
    %51 = vector.load %arg12[%c64_73, %c128_74] : memref<512x256xf32, #tpu.memory_space<vmem>>, vector<32x64xf32>
    tpu.vector_store %arg12[%c64_73, %c128_74], %50 {strides = array<i32>} : memref<512x256xf32, #tpu.memory_space<vmem>>, vector<32x64xf32>,
    %c128_75 = arith.constant 128 : index
    %c128_76 = arith.constant 128 : index
    %52 = vector.load %arg13[%c128_75, %c128_76] : memref<160x1024xf32, #tpu.memory_space<vmem>>, vector<32x64xf32>
    %c64_77 = arith.constant 64 : index
    %c192_78 = arith.constant 192 : index
    %53 = vector.load %arg12[%c64_77, %c192_78] : memref<512x256xf32, #tpu.memory_space<vmem>>, vector<32x64xf32>
    tpu.vector_store %arg12[%c64_77, %c192_78], %52 {strides = array<i32>} : memref<512x256xf32, #tpu.memory_space<vmem>>, vector<32x64xf32>,
    %c0_79 = arith.constant 0 : index
    %c192_80 = arith.constant 192 : index
    %54 = vector.load %arg13[%c0_79, %c192_80] : memref<160x1024xf32, #tpu.memory_space<vmem>>, vector<16x64xf32>
    %c48 = arith.constant 48 : index
    %c0_81 = arith.constant 0 : index
    %55 = vector.load %arg11[%c48, %c0_81] : memref<256x128xf32, #tpu.memory_space<vmem>>, vector<16x64xf32>
    tpu.vector_store %arg11[%c48, %c0_81], %54 {strides = array<i32>} : memref<256x128xf32, #tpu.memory_space<vmem>>, vector<16x64xf32>,
    %c16_82 = arith.constant 16 : index
    %c192_83 = arith.constant 192 : index
    %56 = vector.load %arg13[%c16_82, %c192_83] : memref<160x1024xf32, #tpu.memory_space<vmem>>, vector<16x64xf32>
    %c48_84 = arith.constant 48 : index
    %c64_85 = arith.constant 64 : index
    %57 = vector.load %arg11[%c48_84, %c64_85] : memref<256x128xf32, #tpu.memory_space<vmem>>, vector<16x64xf32>
    tpu.vector_store %arg11[%c48_84, %c64_85], %56 {strides = array<i32>} : memref<256x128xf32, #tpu.memory_space<vmem>>, vector<16x64xf32>,
    %c32_86 = arith.constant 32 : index
    %c192_87 = arith.constant 192 : index
    %58 = vector.load %arg13[%c32_86, %c192_87] : memref<160x1024xf32, #tpu.memory_space<vmem>>, vector<32x64xf32>
    %c96_88 = arith.constant 96 : index
    %c0_89 = arith.constant 0 : index
    %59 = vector.load %arg12[%c96_88, %c0_89] : memref<512x256xf32, #tpu.memory_space<vmem>>, vector<32x64xf32>
    tpu.vector_store %arg12[%c96_88, %c0_89], %58 {strides = array<i32>} : memref<512x256xf32, #tpu.memory_space<vmem>>, vector<32x64xf32>,
    %c64_90 = arith.constant 64 : index
    %c192_91 = arith.constant 192 : index
    %60 = vector.load %arg13[%c64_90, %c192_91] : memref<160x1024xf32, #tpu.memory_space<vmem>>, vector<32x64xf32>
    %c96_92 = arith.constant 96 : index
    %c64_93 = arith.constant 64 : index
    %61 = vector.load %arg12[%c96_92, %c64_93] : memref<512x256xf32, #tpu.memory_space<vmem>>, vector<32x64xf32>
    tpu.vector_store %arg12[%c96_92, %c64_93], %60 {strides = array<i32>} : memref<512x256xf32, #tpu.memory_space<vmem>>, vector<32x64xf32>,
    %c96_94 = arith.constant 96 : index
    %c192_95 = arith.constant 192 : index
    %62 = vector.load %arg13[%c96_94, %c192_95] : memref<160x1024xf32, #tpu.memory_space<vmem>>, vector<32x64xf32>
    %c96_96 = arith.constant 96 : index
    %c128_97 = arith.constant 128 : index
    %63 = vector.load %arg12[%c96_96, %c128_97] : memref<512x256xf32, #tpu.memory_space<vmem>>, vector<32x64xf32>
    tpu.vector_store %arg12[%c96_96, %c128_97], %62 {strides = array<i32>} : memref<512x256xf32, #tpu.memory_space<vmem>>, vector<32x64xf32>,
    %c128_98 = arith.constant 128 : index
    %c192_99 = arith.constant 192 : index
    %64 = vector.load %arg13[%c128_98, %c192_99] : memref<160x1024xf32, #tpu.memory_space<vmem>>, vector<32x64xf32>
    %c96_100 = arith.constant 96 : index
    %c192_101 = arith.constant 192 : index
    %65 = vector.load %arg12[%c96_100, %c192_101] : memref<512x256xf32, #tpu.memory_space<vmem>>, vector<32x64xf32>
    tpu.vector_store %arg12[%c96_100, %c192_101], %64 {strides = array<i32>} : memref<512x256xf32, #tpu.memory_space<vmem>>, vector<32x64xf32>,
    %c0_102 = arith.constant 0 : index
    %c256 = arith.constant 256 : index
    %66 = vector.load %arg13[%c0_102, %c256] : memref<160x1024xf32, #tpu.memory_space<vmem>>, vector<16x64xf32>
    %c64_103 = arith.constant 64 : index
    %c0_104 = arith.constant 0 : index
    %67 = vector.load %arg11[%c64_103, %c0_104] : memref<256x128xf32, #tpu.memory_space<vmem>>, vector<16x64xf32>
    tpu.vector_store %arg11[%c64_103, %c0_104], %66 {strides = array<i32>} : memref<256x128xf32, #tpu.memory_space<vmem>>, vector<16x64xf32>,
    %c16_105 = arith.constant 16 : index
    %c256_106 = arith.constant 256 : index
    %68 = vector.load %arg13[%c16_105, %c256_106] : memref<160x1024xf32, #tpu.memory_space<vmem>>, vector<16x64xf32>
    %c64_107 = arith.constant 64 : index
    %c64_108 = arith.constant 64 : index
    %69 = vector.load %arg11[%c64_107, %c64_108] : memref<256x128xf32, #tpu.memory_space<vmem>>, vector<16x64xf32>
    tpu.vector_store %arg11[%c64_107, %c64_108], %68 {strides = array<i32>} : memref<256x128xf32, #tpu.memory_space<vmem>>, vector<16x64xf32>,
    %c32_109 = arith.constant 32 : index
    %c256_110 = arith.constant 256 : index
    %70 = vector.load %arg13[%c32_109, %c256_110] : memref<160x1024xf32, #tpu.memory_space<vmem>>, vector<32x64xf32>
    %c128_111 = arith.constant 128 : index
    %c0_112 = arith.constant 0 : index
    %71 = vector.load %arg12[%c128_111, %c0_112] : memref<512x256xf32, #tpu.memory_space<vmem>>, vector<32x64xf32>
    tpu.vector_store %arg12[%c128_111, %c0_112], %70 {strides = array<i32>} : memref<512x256xf32, #tpu.memory_space<vmem>>, vector<32x64xf32>,
    %c64_113 = arith.constant 64 : index
    %c256_114 = arith.constant 256 : index
    %72 = vector.load %arg13[%c64_113, %c256_114] : memref<160x1024xf32, #tpu.memory_space<vmem>>, vector<32x64xf32>
    %c128_115 = arith.constant 128 : index
    %c64_116 = arith.constant 64 : index
    %73 = vector.load %arg12[%c128_115, %c64_116] : memref<512x256xf32, #tpu.memory_space<vmem>>, vector<32x64xf32>
    tpu.vector_store %arg12[%c128_115, %c64_116], %72 {strides = array<i32>} : memref<512x256xf32, #tpu.memory_space<vmem>>, vector<32x64xf32>,
    %c96_117 = arith.constant 96 : index
    %c256_118 = arith.constant 256 : index
    %74 = vector.load %arg13[%c96_117, %c256_118] : memref<160x1024xf32, #tpu.memory_space<vmem>>, vector<32x64xf32>
    %c128_119 = arith.constant 128 : index
    %c128_120 = arith.constant 128 : index
    %75 = vector.load %arg12[%c128_119, %c128_120] : memref<512x256xf32, #tpu.memory_space<vmem>>, vector<32x64xf32>
    tpu.vector_store %arg12[%c128_119, %c128_120], %74 {strides = array<i32>} : memref<512x256xf32, #tpu.memory_space<vmem>>, vector<32x64xf32>,
    %c128_121 = arith.constant 128 : index
    %c256_122 = arith.constant 256 : index
    %76 = vector.load %arg13[%c128_121, %c256_122] : memref<160x1024xf32, #tpu.memory_space<vmem>>, vector<32x64xf32>
    %c128_123 = arith.constant 128 : index
    %c192_124 = arith.constant 192 : index
    %77 = vector.load %arg12[%c128_123, %c192_124] : memref<512x256xf32, #tpu.memory_space<vmem>>, vector<32x64xf32>
    tpu.vector_store %arg12[%c128_123, %c192_124], %76 {strides = array<i32>} : memref<512x256xf32, #tpu.memory_space<vmem>>, vector<32x64xf32>,
    %c0_125 = arith.constant 0 : index
    %c320 = arith.constant 320 : index
    %78 = vector.load %arg13[%c0_125, %c320] : memref<160x1024xf32, #tpu.memory_space<vmem>>, vector<16x64xf32>
    %c80 = arith.constant 80 : index
    %c0_126 = arith.constant 0 : index
    %79 = vector.load %arg11[%c80, %c0_126] : memref<256x128xf32, #tpu.memory_space<vmem>>, vector<16x64xf32>
    tpu.vector_store %arg11[%c80, %c0_126], %78 {strides = array<i32>} : memref<256x128xf32, #tpu.memory_space<vmem>>, vector<16x64xf32>,
    %c16_127 = arith.constant 16 : index
    %c320_128 = arith.constant 320 : index
    %80 = vector.load %arg13[%c16_127, %c320_128] : memref<160x1024xf32, #tpu.memory_space<vmem>>, vector<16x64xf32>
    %c80_129 = arith.constant 80 : index
    %c64_130 = arith.constant 64 : index
    %81 = vector.load %arg11[%c80_129, %c64_130] : memref<256x128xf32, #tpu.memory_space<vmem>>, vector<16x64xf32>
    tpu.vector_store %arg11[%c80_129, %c64_130], %80 {strides = array<i32>} : memref<256x128xf32, #tpu.memory_space<vmem>>, vector<16x64xf32>,
    %c32_131 = arith.constant 32 : index
    %c320_132 = arith.constant 320 : index
    %82 = vector.load %arg13[%c32_131, %c320_132] : memref<160x1024xf32, #tpu.memory_space<vmem>>, vector<32x64xf32>
    %c160 = arith.constant 160 : index
    %c0_133 = arith.constant 0 : index
    %83 = vector.load %arg12[%c160, %c0_133] : memref<512x256xf32, #tpu.memory_space<vmem>>, vector<32x64xf32>
    tpu.vector_store %arg12[%c160, %c0_133], %82 {strides = array<i32>} : memref<512x256xf32, #tpu.memory_space<vmem>>, vector<32x64xf32>,
    %c64_134 = arith.constant 64 : index
    %c320_135 = arith.constant 320 : index
    %84 = vector.load %arg13[%c64_134, %c320_135] : memref<160x1024xf32, #tpu.memory_space<vmem>>, vector<32x64xf32>
    %c160_136 = arith.constant 160 : index
    %c64_137 = arith.constant 64 : index
    %85 = vector.load %arg12[%c160_136, %c64_137] : memref<512x256xf32, #tpu.memory_space<vmem>>, vector<32x64xf32>
    tpu.vector_store %arg12[%c160_136, %c64_137], %84 {strides = array<i32>} : memref<512x256xf32, #tpu.memory_space<vmem>>, vector<32x64xf32>,
    %c96_138 = arith.constant 96 : index
    %c320_139 = arith.constant 320 : index
    %86 = vector.load %arg13[%c96_138, %c320_139] : memref<160x1024xf32, #tpu.memory_space<vmem>>, vector<32x64xf32>
    %c160_140 = arith.constant 160 : index
    %c128_141 = arith.constant 128 : index
    %87 = vector.load %arg12[%c160_140, %c128_141] : memref<512x256xf32, #tpu.memory_space<vmem>>, vector<32x64xf32>
    tpu.vector_store %arg12[%c160_140, %c128_141], %86 {strides = array<i32>} : memref<512x256xf32, #tpu.memory_space<vmem>>, vector<32x64xf32>,
    %c128_142 = arith.constant 128 : index
    %c320_143 = arith.constant 320 : index
    %88 = vector.load %arg13[%c128_142, %c320_143] : memref<160x1024xf32, #tpu.memory_space<vmem>>, vector<32x64xf32>
    %c160_144 = arith.constant 160 : index
    %c192_145 = arith.constant 192 : index
    %89 = vector.load %arg12[%c160_144, %c192_145] : memref<512x256xf32, #tpu.memory_space<vmem>>, vector<32x64xf32>
    tpu.vector_store %arg12[%c160_144, %c192_145], %88 {strides = array<i32>} : memref<512x256xf32, #tpu.memory_space<vmem>>, vector<32x64xf32>,
    %c0_146 = arith.constant 0 : index
    %c384 = arith.constant 384 : index
    %90 = vector.load %arg13[%c0_146, %c384] : memref<160x1024xf32, #tpu.memory_space<vmem>>, vector<16x64xf32>
    %c96_147 = arith.constant 96 : index
    %c0_148 = arith.constant 0 : index
    %91 = vector.load %arg11[%c96_147, %c0_148] : memref<256x128xf32, #tpu.memory_space<vmem>>, vector<16x64xf32>
    tpu.vector_store %arg11[%c96_147, %c0_148], %90 {strides = array<i32>} : memref<256x128xf32, #tpu.memory_space<vmem>>, vector<16x64xf32>,
    %c16_149 = arith.constant 16 : index
    %c384_150 = arith.constant 384 : index
    %92 = vector.load %arg13[%c16_149, %c384_150] : memref<160x1024xf32, #tpu.memory_space<vmem>>, vector<16x64xf32>
    %c96_151 = arith.constant 96 : index
    %c64_152 = arith.constant 64 : index
    %93 = vector.load %arg11[%c96_151, %c64_152] : memref<256x128xf32, #tpu.memory_space<vmem>>, vector<16x64xf32>
    tpu.vector_store %arg11[%c96_151, %c64_152], %92 {strides = array<i32>} : memref<256x128xf32, #tpu.memory_space<vmem>>, vector<16x64xf32>,
    %c32_153 = arith.constant 32 : index
    %c384_154 = arith.constant 384 : index
    %94 = vector.load %arg13[%c32_153, %c384_154] : memref<160x1024xf32, #tpu.memory_space<vmem>>, vector<32x64xf32>
    %c192_155 = arith.constant 192 : index
    %c0_156 = arith.constant 0 : index
    %95 = vector.load %arg12[%c192_155, %c0_156] : memref<512x256xf32, #tpu.memory_space<vmem>>, vector<32x64xf32>
    tpu.vector_store %arg12[%c192_155, %c0_156], %94 {strides = array<i32>} : memref<512x256xf32, #tpu.memory_space<vmem>>, vector<32x64xf32>,
    %c64_157 = arith.constant 64 : index
    %c384_158 = arith.constant 384 : index
    %96 = vector.load %arg13[%c64_157, %c384_158] : memref<160x1024xf32, #tpu.memory_space<vmem>>, vector<32x64xf32>
    %c192_159 = arith.constant 192 : index
    %c64_160 = arith.constant 64 : index
    %97 = vector.load %arg12[%c192_159, %c64_160] : memref<512x256xf32, #tpu.memory_space<vmem>>, vector<32x64xf32>
    tpu.vector_store %arg12[%c192_159, %c64_160], %96 {strides = array<i32>} : memref<512x256xf32, #tpu.memory_space<vmem>>, vector<32x64xf32>,
    %c96_161 = arith.constant 96 : index
    %c384_162 = arith.constant 384 : index
    %98 = vector.load %arg13[%c96_161, %c384_162] : memref<160x1024xf32, #tpu.memory_space<vmem>>, vector<32x64xf32>
    %c192_163 = arith.constant 192 : index
    %c128_164 = arith.constant 128 : index
    %99 = vector.load %arg12[%c192_163, %c128_164] : memref<512x256xf32, #tpu.memory_space<vmem>>, vector<32x64xf32>
    tpu.vector_store %arg12[%c192_163, %c128_164], %98 {strides = array<i32>} : memref<512x256xf32, #tpu.memory_space<vmem>>, vector<32x64xf32>,
    %c128_165 = arith.constant 128 : index
    %c384_166 = arith.constant 384 : index
    %100 = vector.load %arg13[%c128_165, %c384_166] : memref<160x1024xf32, #tpu.memory_space<vmem>>, vector<32x64xf32>
    %c192_167 = arith.constant 192 : index
    %c192_168 = arith.constant 192 : index
    %101 = vector.load %arg12[%c192_167, %c192_168] : memref<512x256xf32, #tpu.memory_space<vmem>>, vector<32x64xf32>
    tpu.vector_store %arg12[%c192_167, %c192_168], %100 {strides = array<i32>} : memref<512x256xf32, #tpu.memory_space<vmem>>, vector<32x64xf32>,
    %c0_169 = arith.constant 0 : index
    %c448 = arith.constant 448 : index
    %102 = vector.load %arg13[%c0_169, %c448] : memref<160x1024xf32, #tpu.memory_space<vmem>>, vector<16x64xf32>
    %c112 = arith.constant 112 : index
    %c0_170 = arith.constant 0 : index
    %103 = vector.load %arg11[%c112, %c0_170] : memref<256x128xf32, #tpu.memory_space<vmem>>, vector<16x64xf32>
    tpu.vector_store %arg11[%c112, %c0_170], %102 {strides = array<i32>} : memref<256x128xf32, #tpu.memory_space<vmem>>, vector<16x64xf32>,
    %c16_171 = arith.constant 16 : index
    %c448_172 = arith.constant 448 : index
    %104 = vector.load %arg13[%c16_171, %c448_172] : memref<160x1024xf32, #tpu.memory_space<vmem>>, vector<16x64xf32>
    %c112_173 = arith.constant 112 : index
    %c64_174 = arith.constant 64 : index
    %105 = vector.load %arg11[%c112_173, %c64_174] : memref<256x128xf32, #tpu.memory_space<vmem>>, vector<16x64xf32>
    tpu.vector_store %arg11[%c112_173, %c64_174], %104 {strides = array<i32>} : memref<256x128xf32, #tpu.memory_space<vmem>>, vector<16x64xf32>,
    %c32_175 = arith.constant 32 : index
    %c448_176 = arith.constant 448 : index
    %106 = vector.load %arg13[%c32_175, %c448_176] : memref<160x1024xf32, #tpu.memory_space<vmem>>, vector<32x64xf32>
    %c224 = arith.constant 224 : index
    %c0_177 = arith.constant 0 : index
    %107 = vector.load %arg12[%c224, %c0_177] : memref<512x256xf32, #tpu.memory_space<vmem>>, vector<32x64xf32>
    tpu.vector_store %arg12[%c224, %c0_177], %106 {strides = array<i32>} : memref<512x256xf32, #tpu.memory_space<vmem>>, vector<32x64xf32>,
    %c64_178 = arith.constant 64 : index
    %c448_179 = arith.constant 448 : index
    %108 = vector.load %arg13[%c64_178, %c448_179] : memref<160x1024xf32, #tpu.memory_space<vmem>>, vector<32x64xf32>
    %c224_180 = arith.constant 224 : index
    %c64_181 = arith.constant 64 : index
    %109 = vector.load %arg12[%c224_180, %c64_181] : memref<512x256xf32, #tpu.memory_space<vmem>>, vector<32x64xf32>
    tpu.vector_store %arg12[%c224_180, %c64_181], %108 {strides = array<i32>} : memref<512x256xf32, #tpu.memory_space<vmem>>, vector<32x64xf32>,
    %c96_182 = arith.constant 96 : index
    %c448_183 = arith.constant 448 : index
    %110 = vector.load %arg13[%c96_182, %c448_183] : memref<160x1024xf32, #tpu.memory_space<vmem>>, vector<32x64xf32>
    %c224_184 = arith.constant 224 : index
    %c128_185 = arith.constant 128 : index
    %111 = vector.load %arg12[%c224_184, %c128_185] : memref<512x256xf32, #tpu.memory_space<vmem>>, vector<32x64xf32>
    tpu.vector_store %arg12[%c224_184, %c128_185], %110 {strides = array<i32>} : memref<512x256xf32, #tpu.memory_space<vmem>>, vector<32x64xf32>,
    %c128_186 = arith.constant 128 : index
    %c448_187 = arith.constant 448 : index
    %112 = vector.load %arg13[%c128_186, %c448_187] : memref<160x1024xf32, #tpu.memory_space<vmem>>, vector<32x64xf32>
    %c224_188 = arith.constant 224 : index
    %c192_189 = arith.constant 192 : index
    %113 = vector.load %arg12[%c224_188, %c192_189] : memref<512x256xf32, #tpu.memory_space<vmem>>, vector<32x64xf32>
    tpu.vector_store %arg12[%c224_188, %c192_189], %112 {strides = array<i32>} : memref<512x256xf32, #tpu.memory_space<vmem>>, vector<32x64xf32>,
    %c0_190 = arith.constant 0 : index
    %c512 = arith.constant 512 : index
    %114 = vector.load %arg13[%c0_190, %c512] : memref<160x1024xf32, #tpu.memory_space<vmem>>, vector<16x64xf32>
    %c128_191 = arith.constant 128 : index
    %c0_192 = arith.constant 0 : index
    %115 = vector.load %arg11[%c128_191, %c0_192] : memref<256x128xf32, #tpu.memory_space<vmem>>, vector<16x64xf32>
    tpu.vector_store %arg11[%c128_191, %c0_192], %114 {strides = array<i32>} : memref<256x128xf32, #tpu.memory_space<vmem>>, vector<16x64xf32>,
    %c16_193 = arith.constant 16 : index
    %c512_194 = arith.constant 512 : index
    %116 = vector.load %arg13[%c16_193, %c512_194] : memref<160x1024xf32, #tpu.memory_space<vmem>>, vector<16x64xf32>
    %c128_195 = arith.constant 128 : index
    %c64_196 = arith.constant 64 : index
    %117 = vector.load %arg11[%c128_195, %c64_196] : memref<256x128xf32, #tpu.memory_space<vmem>>, vector<16x64xf32>
    tpu.vector_store %arg11[%c128_195, %c64_196], %116 {strides = array<i32>} : memref<256x128xf32, #tpu.memory_space<vmem>>, vector<16x64xf32>,
    %c32_197 = arith.constant 32 : index
    %c512_198 = arith.constant 512 : index
    %118 = vector.load %arg13[%c32_197, %c512_198] : memref<160x1024xf32, #tpu.memory_space<vmem>>, vector<32x64xf32>
    %c256_199 = arith.constant 256 : index
    %c0_200 = arith.constant 0 : index
    %119 = vector.load %arg12[%c256_199, %c0_200] : memref<512x256xf32, #tpu.memory_space<vmem>>, vector<32x64xf32>
    tpu.vector_store %arg12[%c256_199, %c0_200], %118 {strides = array<i32>} : memref<512x256xf32, #tpu.memory_space<vmem>>, vector<32x64xf32>,
    %c64_201 = arith.constant 64 : index
    %c512_202 = arith.constant 512 : index
    %120 = vector.load %arg13[%c64_201, %c512_202] : memref<160x1024xf32, #tpu.memory_space<vmem>>, vector<32x64xf32>
    %c256_203 = arith.constant 256 : index
    %c64_204 = arith.constant 64 : index
    %121 = vector.load %arg12[%c256_203, %c64_204] : memref<512x256xf32, #tpu.memory_space<vmem>>, vector<32x64xf32>
    tpu.vector_store %arg12[%c256_203, %c64_204], %120 {strides = array<i32>} : memref<512x256xf32, #tpu.memory_space<vmem>>, vector<32x64xf32>,
    %c96_205 = arith.constant 96 : index
    %c512_206 = arith.constant 512 : index
    %122 = vector.load %arg13[%c96_205, %c512_206] : memref<160x1024xf32, #tpu.memory_space<vmem>>, vector<32x64xf32>
    %c256_207 = arith.constant 256 : index
    %c128_208 = arith.constant 128 : index
    %123 = vector.load %arg12[%c256_207, %c128_208] : memref<512x256xf32, #tpu.memory_space<vmem>>, vector<32x64xf32>
    tpu.vector_store %arg12[%c256_207, %c128_208], %122 {strides = array<i32>} : memref<512x256xf32, #tpu.memory_space<vmem>>, vector<32x64xf32>,
    %c128_209 = arith.constant 128 : index
    %c512_210 = arith.constant 512 : index
    %124 = vector.load %arg13[%c128_209, %c512_210] : memref<160x1024xf32, #tpu.memory_space<vmem>>, vector<32x64xf32>
    %c256_211 = arith.constant 256 : index
    %c192_212 = arith.constant 192 : index
    %125 = vector.load %arg12[%c256_211, %c192_212] : memref<512x256xf32, #tpu.memory_space<vmem>>, vector<32x64xf32>
    tpu.vector_store %arg12[%c256_211, %c192_212], %124 {strides = array<i32>} : memref<512x256xf32, #tpu.memory_space<vmem>>, vector<32x64xf32>,
    %c0_213 = arith.constant 0 : index
    %c576 = arith.constant 576 : index
    %126 = vector.load %arg13[%c0_213, %c576] : memref<160x1024xf32, #tpu.memory_space<vmem>>, vector<16x64xf32>
    %c144 = arith.constant 144 : index
    %c0_214 = arith.constant 0 : index
    %127 = vector.load %arg11[%c144, %c0_214] : memref<256x128xf32, #tpu.memory_space<vmem>>, vector<16x64xf32>
    tpu.vector_store %arg11[%c144, %c0_214], %126 {strides = array<i32>} : memref<256x128xf32, #tpu.memory_space<vmem>>, vector<16x64xf32>,
    %c16_215 = arith.constant 16 : index
    %c576_216 = arith.constant 576 : index
    %128 = vector.load %arg13[%c16_215, %c576_216] : memref<160x1024xf32, #tpu.memory_space<vmem>>, vector<16x64xf32>
    %c144_217 = arith.constant 144 : index
    %c64_218 = arith.constant 64 : index
    %129 = vector.load %arg11[%c144_217, %c64_218] : memref<256x128xf32, #tpu.memory_space<vmem>>, vector<16x64xf32>
    tpu.vector_store %arg11[%c144_217, %c64_218], %128 {strides = array<i32>} : memref<256x128xf32, #tpu.memory_space<vmem>>, vector<16x64xf32>,
    %c32_219 = arith.constant 32 : index
    %c576_220 = arith.constant 576 : index
    %130 = vector.load %arg13[%c32_219, %c576_220] : memref<160x1024xf32, #tpu.memory_space<vmem>>, vector<32x64xf32>
    %c288 = arith.constant 288 : index
    %c0_221 = arith.constant 0 : index
    %131 = vector.load %arg12[%c288, %c0_221] : memref<512x256xf32, #tpu.memory_space<vmem>>, vector<32x64xf32>
    tpu.vector_store %arg12[%c288, %c0_221], %130 {strides = array<i32>} : memref<512x256xf32, #tpu.memory_space<vmem>>, vector<32x64xf32>,
    %c64_222 = arith.constant 64 : index
    %c576_223 = arith.constant 576 : index
    %132 = vector.load %arg13[%c64_222, %c576_223] : memref<160x1024xf32, #tpu.memory_space<vmem>>, vector<32x64xf32>
    %c288_224 = arith.constant 288 : index
    %c64_225 = arith.constant 64 : index
    %133 = vector.load %arg12[%c288_224, %c64_225] : memref<512x256xf32, #tpu.memory_space<vmem>>, vector<32x64xf32>
    tpu.vector_store %arg12[%c288_224, %c64_225], %132 {strides = array<i32>} : memref<512x256xf32, #tpu.memory_space<vmem>>, vector<32x64xf32>,
    %c96_226 = arith.constant 96 : index
    %c576_227 = arith.constant 576 : index
    %134 = vector.load %arg13[%c96_226, %c576_227] : memref<160x1024xf32, #tpu.memory_space<vmem>>, vector<32x64xf32>
    %c288_228 = arith.constant 288 : index
    %c128_229 = arith.constant 128 : index
    %135 = vector.load %arg12[%c288_228, %c128_229] : memref<512x256xf32, #tpu.memory_space<vmem>>, vector<32x64xf32>
    tpu.vector_store %arg12[%c288_228, %c128_229], %134 {strides = array<i32>} : memref<512x256xf32, #tpu.memory_space<vmem>>, vector<32x64xf32>,
    %c128_230 = arith.constant 128 : index
    %c576_231 = arith.constant 576 : index
    %136 = vector.load %arg13[%c128_230, %c576_231] : memref<160x1024xf32, #tpu.memory_space<vmem>>, vector<32x64xf32>
    %c288_232 = arith.constant 288 : index
    %c192_233 = arith.constant 192 : index
    %137 = vector.load %arg12[%c288_232, %c192_233] : memref<512x256xf32, #tpu.memory_space<vmem>>, vector<32x64xf32>
    tpu.vector_store %arg12[%c288_232, %c192_233], %136 {strides = array<i32>} : memref<512x256xf32, #tpu.memory_space<vmem>>, vector<32x64xf32>,
    %c0_234 = arith.constant 0 : index
    %c640 = arith.constant 640 : index
    %138 = vector.load %arg13[%c0_234, %c640] : memref<160x1024xf32, #tpu.memory_space<vmem>>, vector<16x64xf32>
    %c160_235 = arith.constant 160 : index
    %c0_236 = arith.constant 0 : index
    %139 = vector.load %arg11[%c160_235, %c0_236] : memref<256x128xf32, #tpu.memory_space<vmem>>, vector<16x64xf32>
    tpu.vector_store %arg11[%c160_235, %c0_236], %138 {strides = array<i32>} : memref<256x128xf32, #tpu.memory_space<vmem>>, vector<16x64xf32>,
    %c16_237 = arith.constant 16 : index
    %c640_238 = arith.constant 640 : index
    %140 = vector.load %arg13[%c16_237, %c640_238] : memref<160x1024xf32, #tpu.memory_space<vmem>>, vector<16x64xf32>
    %c160_239 = arith.constant 160 : index
    %c64_240 = arith.constant 64 : index
    %141 = vector.load %arg11[%c160_239, %c64_240] : memref<256x128xf32, #tpu.memory_space<vmem>>, vector<16x64xf32>
    tpu.vector_store %arg11[%c160_239, %c64_240], %140 {strides = array<i32>} : memref<256x128xf32, #tpu.memory_space<vmem>>, vector<16x64xf32>,
    %c32_241 = arith.constant 32 : index
    %c640_242 = arith.constant 640 : index
    %142 = vector.load %arg13[%c32_241, %c640_242] : memref<160x1024xf32, #tpu.memory_space<vmem>>, vector<32x64xf32>
    %c320_243 = arith.constant 320 : index
    %c0_244 = arith.constant 0 : index
    %143 = vector.load %arg12[%c320_243, %c0_244] : memref<512x256xf32, #tpu.memory_space<vmem>>, vector<32x64xf32>
    tpu.vector_store %arg12[%c320_243, %c0_244], %142 {strides = array<i32>} : memref<512x256xf32, #tpu.memory_space<vmem>>, vector<32x64xf32>,
    %c64_245 = arith.constant 64 : index
    %c640_246 = arith.constant 640 : index
    %144 = vector.load %arg13[%c64_245, %c640_246] : memref<160x1024xf32, #tpu.memory_space<vmem>>, vector<32x64xf32>
    %c320_247 = arith.constant 320 : index
    %c64_248 = arith.constant 64 : index
    %145 = vector.load %arg12[%c320_247, %c64_248] : memref<512x256xf32, #tpu.memory_space<vmem>>, vector<32x64xf32>
    tpu.vector_store %arg12[%c320_247, %c64_248], %144 {strides = array<i32>} : memref<512x256xf32, #tpu.memory_space<vmem>>, vector<32x64xf32>,
    %c96_249 = arith.constant 96 : index
    %c640_250 = arith.constant 640 : index
    %146 = vector.load %arg13[%c96_249, %c640_250] : memref<160x1024xf32, #tpu.memory_space<vmem>>, vector<32x64xf32>
    %c320_251 = arith.constant 320 : index
    %c128_252 = arith.constant 128 : index
    %147 = vector.load %arg12[%c320_251, %c128_252] : memref<512x256xf32, #tpu.memory_space<vmem>>, vector<32x64xf32>
    tpu.vector_store %arg12[%c320_251, %c128_252], %146 {strides = array<i32>} : memref<512x256xf32, #tpu.memory_space<vmem>>, vector<32x64xf32>,
    %c128_253 = arith.constant 128 : index
    %c640_254 = arith.constant 640 : index
    %148 = vector.load %arg13[%c128_253, %c640_254] : memref<160x1024xf32, #tpu.memory_space<vmem>>, vector<32x64xf32>
    %c320_255 = arith.constant 320 : index
    %c192_256 = arith.constant 192 : index
    %149 = vector.load %arg12[%c320_255, %c192_256] : memref<512x256xf32, #tpu.memory_space<vmem>>, vector<32x64xf32>
    tpu.vector_store %arg12[%c320_255, %c192_256], %148 {strides = array<i32>} : memref<512x256xf32, #tpu.memory_space<vmem>>, vector<32x64xf32>,
    %c0_257 = arith.constant 0 : index
    %c704 = arith.constant 704 : index
    %150 = vector.load %arg13[%c0_257, %c704] : memref<160x1024xf32, #tpu.memory_space<vmem>>, vector<16x64xf32>
    %c176 = arith.constant 176 : index
    %c0_258 = arith.constant 0 : index
    %151 = vector.load %arg11[%c176, %c0_258] : memref<256x128xf32, #tpu.memory_space<vmem>>, vector<16x64xf32>
    tpu.vector_store %arg11[%c176, %c0_258], %150 {strides = array<i32>} : memref<256x128xf32, #tpu.memory_space<vmem>>, vector<16x64xf32>,
    %c16_259 = arith.constant 16 : index
    %c704_260 = arith.constant 704 : index
    %152 = vector.load %arg13[%c16_259, %c704_260] : memref<160x1024xf32, #tpu.memory_space<vmem>>, vector<16x64xf32>
    %c176_261 = arith.constant 176 : index
    %c64_262 = arith.constant 64 : index
    %153 = vector.load %arg11[%c176_261, %c64_262] : memref<256x128xf32, #tpu.memory_space<vmem>>, vector<16x64xf32>
    tpu.vector_store %arg11[%c176_261, %c64_262], %152 {strides = array<i32>} : memref<256x128xf32, #tpu.memory_space<vmem>>, vector<16x64xf32>,
    %c32_263 = arith.constant 32 : index
    %c704_264 = arith.constant 704 : index
    %154 = vector.load %arg13[%c32_263, %c704_264] : memref<160x1024xf32, #tpu.memory_space<vmem>>, vector<32x64xf32>
    %c352 = arith.constant 352 : index
    %c0_265 = arith.constant 0 : index
    %155 = vector.load %arg12[%c352, %c0_265] : memref<512x256xf32, #tpu.memory_space<vmem>>, vector<32x64xf32>
    tpu.vector_store %arg12[%c352, %c0_265], %154 {strides = array<i32>} : memref<512x256xf32, #tpu.memory_space<vmem>>, vector<32x64xf32>,
    %c64_266 = arith.constant 64 : index
    %c704_267 = arith.constant 704 : index
    %156 = vector.load %arg13[%c64_266, %c704_267] : memref<160x1024xf32, #tpu.memory_space<vmem>>, vector<32x64xf32>
    %c352_268 = arith.constant 352 : index
    %c64_269 = arith.constant 64 : index
    %157 = vector.load %arg12[%c352_268, %c64_269] : memref<512x256xf32, #tpu.memory_space<vmem>>, vector<32x64xf32>
    tpu.vector_store %arg12[%c352_268, %c64_269], %156 {strides = array<i32>} : memref<512x256xf32, #tpu.memory_space<vmem>>, vector<32x64xf32>,
    %c96_270 = arith.constant 96 : index
    %c704_271 = arith.constant 704 : index
    %158 = vector.load %arg13[%c96_270, %c704_271] : memref<160x1024xf32, #tpu.memory_space<vmem>>, vector<32x64xf32>
    %c352_272 = arith.constant 352 : index
    %c128_273 = arith.constant 128 : index
    %159 = vector.load %arg12[%c352_272, %c128_273] : memref<512x256xf32, #tpu.memory_space<vmem>>, vector<32x64xf32>
    tpu.vector_store %arg12[%c352_272, %c128_273], %158 {strides = array<i32>} : memref<512x256xf32, #tpu.memory_space<vmem>>, vector<32x64xf32>,
    %c128_274 = arith.constant 128 : index
    %c704_275 = arith.constant 704 : index
    %160 = vector.load %arg13[%c128_274, %c704_275] : memref<160x1024xf32, #tpu.memory_space<vmem>>, vector<32x64xf32>
    %c352_276 = arith.constant 352 : index
    %c192_277 = arith.constant 192 : index
    %161 = vector.load %arg12[%c352_276, %c192_277] : memref<512x256xf32, #tpu.memory_space<vmem>>, vector<32x64xf32>
    tpu.vector_store %arg12[%c352_276, %c192_277], %160 {strides = array<i32>} : memref<512x256xf32, #tpu.memory_space<vmem>>, vector<32x64xf32>,
    %c0_278 = arith.constant 0 : index
    %c768 = arith.constant 768 : index
    %162 = vector.load %arg13[%c0_278, %c768] : memref<160x1024xf32, #tpu.memory_space<vmem>>, vector<16x64xf32>
    %c192_279 = arith.constant 192 : index
    %c0_280 = arith.constant 0 : index
    %163 = vector.load %arg11[%c192_279, %c0_280] : memref<256x128xf32, #tpu.memory_space<vmem>>, vector<16x64xf32>
    tpu.vector_store %arg11[%c192_279, %c0_280], %162 {strides = array<i32>} : memref<256x128xf32, #tpu.memory_space<vmem>>, vector<16x64xf32>,
    %c16_281 = arith.constant 16 : index
    %c768_282 = arith.constant 768 : index
    %164 = vector.load %arg13[%c16_281, %c768_282] : memref<160x1024xf32, #tpu.memory_space<vmem>>, vector<16x64xf32>
    %c192_283 = arith.constant 192 : index
    %c64_284 = arith.constant 64 : index
    %165 = vector.load %arg11[%c192_283, %c64_284] : memref<256x128xf32, #tpu.memory_space<vmem>>, vector<16x64xf32>
    tpu.vector_store %arg11[%c192_283, %c64_284], %164 {strides = array<i32>} : memref<256x128xf32, #tpu.memory_space<vmem>>, vector<16x64xf32>,
    %c32_285 = arith.constant 32 : index
    %c768_286 = arith.constant 768 : index
    %166 = vector.load %arg13[%c32_285, %c768_286] : memref<160x1024xf32, #tpu.memory_space<vmem>>, vector<32x64xf32>
    %c384_287 = arith.constant 384 : index
    %c0_288 = arith.constant 0 : index
    %167 = vector.load %arg12[%c384_287, %c0_288] : memref<512x256xf32, #tpu.memory_space<vmem>>, vector<32x64xf32>
    tpu.vector_store %arg12[%c384_287, %c0_288], %166 {strides = array<i32>} : memref<512x256xf32, #tpu.memory_space<vmem>>, vector<32x64xf32>,
    %c64_289 = arith.constant 64 : index
    %c768_290 = arith.constant 768 : index
    %168 = vector.load %arg13[%c64_289, %c768_290] : memref<160x1024xf32, #tpu.memory_space<vmem>>, vector<32x64xf32>
    %c384_291 = arith.constant 384 : index
    %c64_292 = arith.constant 64 : index
    %169 = vector.load %arg12[%c384_291, %c64_292] : memref<512x256xf32, #tpu.memory_space<vmem>>, vector<32x64xf32>
    tpu.vector_store %arg12[%c384_291, %c64_292], %168 {strides = array<i32>} : memref<512x256xf32, #tpu.memory_space<vmem>>, vector<32x64xf32>,
    %c96_293 = arith.constant 96 : index
    %c768_294 = arith.constant 768 : index
    %170 = vector.load %arg13[%c96_293, %c768_294] : memref<160x1024xf32, #tpu.memory_space<vmem>>, vector<32x64xf32>
    %c384_295 = arith.constant 384 : index
    %c128_296 = arith.constant 128 : index
    %171 = vector.load %arg12[%c384_295, %c128_296] : memref<512x256xf32, #tpu.memory_space<vmem>>, vector<32x64xf32>
    tpu.vector_store %arg12[%c384_295, %c128_296], %170 {strides = array<i32>} : memref<512x256xf32, #tpu.memory_space<vmem>>, vector<32x64xf32>,
    %c128_297 = arith.constant 128 : index
    %c768_298 = arith.constant 768 : index
    %172 = vector.load %arg13[%c128_297, %c768_298] : memref<160x1024xf32, #tpu.memory_space<vmem>>, vector<32x64xf32>
    %c384_299 = arith.constant 384 : index
    %c192_300 = arith.constant 192 : index
    %173 = vector.load %arg12[%c384_299, %c192_300] : memref<512x256xf32, #tpu.memory_space<vmem>>, vector<32x64xf32>
    tpu.vector_store %arg12[%c384_299, %c192_300], %172 {strides = array<i32>} : memref<512x256xf32, #tpu.memory_space<vmem>>, vector<32x64xf32>,
    %c0_301 = arith.constant 0 : index
    %c832 = arith.constant 832 : index
    %174 = vector.load %arg13[%c0_301, %c832] : memref<160x1024xf32, #tpu.memory_space<vmem>>, vector<16x64xf32>
    %c208 = arith.constant 208 : index
    %c0_302 = arith.constant 0 : index
    %175 = vector.load %arg11[%c208, %c0_302] : memref<256x128xf32, #tpu.memory_space<vmem>>, vector<16x64xf32>
    tpu.vector_store %arg11[%c208, %c0_302], %174 {strides = array<i32>} : memref<256x128xf32, #tpu.memory_space<vmem>>, vector<16x64xf32>,
    %c16_303 = arith.constant 16 : index
    %c832_304 = arith.constant 832 : index
    %176 = vector.load %arg13[%c16_303, %c832_304] : memref<160x1024xf32, #tpu.memory_space<vmem>>, vector<16x64xf32>
    %c208_305 = arith.constant 208 : index
    %c64_306 = arith.constant 64 : index
    %177 = vector.load %arg11[%c208_305, %c64_306] : memref<256x128xf32, #tpu.memory_space<vmem>>, vector<16x64xf32>
    tpu.vector_store %arg11[%c208_305, %c64_306], %176 {strides = array<i32>} : memref<256x128xf32, #tpu.memory_space<vmem>>, vector<16x64xf32>,
    %c32_307 = arith.constant 32 : index
    %c832_308 = arith.constant 832 : index
    %178 = vector.load %arg13[%c32_307, %c832_308] : memref<160x1024xf32, #tpu.memory_space<vmem>>, vector<32x64xf32>
    %c416 = arith.constant 416 : index
    %c0_309 = arith.constant 0 : index
    %179 = vector.load %arg12[%c416, %c0_309] : memref<512x256xf32, #tpu.memory_space<vmem>>, vector<32x64xf32>
    tpu.vector_store %arg12[%c416, %c0_309], %178 {strides = array<i32>} : memref<512x256xf32, #tpu.memory_space<vmem>>, vector<32x64xf32>,
    %c64_310 = arith.constant 64 : index
    %c832_311 = arith.constant 832 : index
    %180 = vector.load %arg13[%c64_310, %c832_311] : memref<160x1024xf32, #tpu.memory_space<vmem>>, vector<32x64xf32>
    %c416_312 = arith.constant 416 : index
    %c64_313 = arith.constant 64 : index
    %181 = vector.load %arg12[%c416_312, %c64_313] : memref<512x256xf32, #tpu.memory_space<vmem>>, vector<32x64xf32>
    tpu.vector_store %arg12[%c416_312, %c64_313], %180 {strides = array<i32>} : memref<512x256xf32, #tpu.memory_space<vmem>>, vector<32x64xf32>,
    %c96_314 = arith.constant 96 : index
    %c832_315 = arith.constant 832 : index
    %182 = vector.load %arg13[%c96_314, %c832_315] : memref<160x1024xf32, #tpu.memory_space<vmem>>, vector<32x64xf32>
    %c416_316 = arith.constant 416 : index
    %c128_317 = arith.constant 128 : index
    %183 = vector.load %arg12[%c416_316, %c128_317] : memref<512x256xf32, #tpu.memory_space<vmem>>, vector<32x64xf32>
    tpu.vector_store %arg12[%c416_316, %c128_317], %182 {strides = array<i32>} : memref<512x256xf32, #tpu.memory_space<vmem>>, vector<32x64xf32>,
    %c128_318 = arith.constant 128 : index
    %c832_319 = arith.constant 832 : index
    %184 = vector.load %arg13[%c128_318, %c832_319] : memref<160x1024xf32, #tpu.memory_space<vmem>>, vector<32x64xf32>
    %c416_320 = arith.constant 416 : index
    %c192_321 = arith.constant 192 : index
    %185 = vector.load %arg12[%c416_320, %c192_321] : memref<512x256xf32, #tpu.memory_space<vmem>>, vector<32x64xf32>
    tpu.vector_store %arg12[%c416_320, %c192_321], %184 {strides = array<i32>} : memref<512x256xf32, #tpu.memory_space<vmem>>, vector<32x64xf32>,
    %c0_322 = arith.constant 0 : index
    %c896 = arith.constant 896 : index
    %186 = vector.load %arg13[%c0_322, %c896] : memref<160x1024xf32, #tpu.memory_space<vmem>>, vector<16x64xf32>
    %c224_323 = arith.constant 224 : index
    %c0_324 = arith.constant 0 : index
    %187 = vector.load %arg11[%c224_323, %c0_324] : memref<256x128xf32, #tpu.memory_space<vmem>>, vector<16x64xf32>
    tpu.vector_store %arg11[%c224_323, %c0_324], %186 {strides = array<i32>} : memref<256x128xf32, #tpu.memory_space<vmem>>, vector<16x64xf32>,
    %c16_325 = arith.constant 16 : index
    %c896_326 = arith.constant 896 : index
    %188 = vector.load %arg13[%c16_325, %c896_326] : memref<160x1024xf32, #tpu.memory_space<vmem>>, vector<16x64xf32>
    %c224_327 = arith.constant 224 : index
    %c64_328 = arith.constant 64 : index
    %189 = vector.load %arg11[%c224_327, %c64_328] : memref<256x128xf32, #tpu.memory_space<vmem>>, vector<16x64xf32>
    tpu.vector_store %arg11[%c224_327, %c64_328], %188 {strides = array<i32>} : memref<256x128xf32, #tpu.memory_space<vmem>>, vector<16x64xf32>,
    %c32_329 = arith.constant 32 : index
    %c896_330 = arith.constant 896 : index
    %190 = vector.load %arg13[%c32_329, %c896_330] : memref<160x1024xf32, #tpu.memory_space<vmem>>, vector<32x64xf32>
    %c448_331 = arith.constant 448 : index
    %c0_332 = arith.constant 0 : index
    %191 = vector.load %arg12[%c448_331, %c0_332] : memref<512x256xf32, #tpu.memory_space<vmem>>, vector<32x64xf32>
    tpu.vector_store %arg12[%c448_331, %c0_332], %190 {strides = array<i32>} : memref<512x256xf32, #tpu.memory_space<vmem>>, vector<32x64xf32>,
    %c64_333 = arith.constant 64 : index
    %c896_334 = arith.constant 896 : index
    %192 = vector.load %arg13[%c64_333, %c896_334] : memref<160x1024xf32, #tpu.memory_space<vmem>>, vector<32x64xf32>
    %c448_335 = arith.constant 448 : index
    %c64_336 = arith.constant 64 : index
    %193 = vector.load %arg12[%c448_335, %c64_336] : memref<512x256xf32, #tpu.memory_space<vmem>>, vector<32x64xf32>
    tpu.vector_store %arg12[%c448_335, %c64_336], %192 {strides = array<i32>} : memref<512x256xf32, #tpu.memory_space<vmem>>, vector<32x64xf32>,
    %c96_337 = arith.constant 96 : index
    %c896_338 = arith.constant 896 : index
    %194 = vector.load %arg13[%c96_337, %c896_338] : memref<160x1024xf32, #tpu.memory_space<vmem>>, vector<32x64xf32>
    %c448_339 = arith.constant 448 : index
    %c128_340 = arith.constant 128 : index
    %195 = vector.load %arg12[%c448_339, %c128_340] : memref<512x256xf32, #tpu.memory_space<vmem>>, vector<32x64xf32>
    tpu.vector_store %arg12[%c448_339, %c128_340], %194 {strides = array<i32>} : memref<512x256xf32, #tpu.memory_space<vmem>>, vector<32x64xf32>,
    %c128_341 = arith.constant 128 : index
    %c896_342 = arith.constant 896 : index
    %196 = vector.load %arg13[%c128_341, %c896_342] : memref<160x1024xf32, #tpu.memory_space<vmem>>, vector<32x64xf32>
    %c448_343 = arith.constant 448 : index
    %c192_344 = arith.constant 192 : index
    %197 = vector.load %arg12[%c448_343, %c192_344] : memref<512x256xf32, #tpu.memory_space<vmem>>, vector<32x64xf32>
    tpu.vector_store %arg12[%c448_343, %c192_344], %196 {strides = array<i32>} : memref<512x256xf32, #tpu.memory_space<vmem>>, vector<32x64xf32>,
    %c0_345 = arith.constant 0 : index
    %c960 = arith.constant 960 : index
    %198 = vector.load %arg13[%c0_345, %c960] : memref<160x1024xf32, #tpu.memory_space<vmem>>, vector<16x64xf32>
    %c240 = arith.constant 240 : index
    %c0_346 = arith.constant 0 : index
    %199 = vector.load %arg11[%c240, %c0_346] : memref<256x128xf32, #tpu.memory_space<vmem>>, vector<16x64xf32>
    tpu.vector_store %arg11[%c240, %c0_346], %198 {strides = array<i32>} : memref<256x128xf32, #tpu.memory_space<vmem>>, vector<16x64xf32>,
    %c16_347 = arith.constant 16 : index
    %c960_348 = arith.constant 960 : index
    %200 = vector.load %arg13[%c16_347, %c960_348] : memref<160x1024xf32, #tpu.memory_space<vmem>>, vector<16x64xf32>
    %c240_349 = arith.constant 240 : index
    %c64_350 = arith.constant 64 : index
    %201 = vector.load %arg11[%c240_349, %c64_350] : memref<256x128xf32, #tpu.memory_space<vmem>>, vector<16x64xf32>
    tpu.vector_store %arg11[%c240_349, %c64_350], %200 {strides = array<i32>} : memref<256x128xf32, #tpu.memory_space<vmem>>, vector<16x64xf32>,
    %c32_351 = arith.constant 32 : index
    %c960_352 = arith.constant 960 : index
    %202 = vector.load %arg13[%c32_351, %c960_352] : memref<160x1024xf32, #tpu.memory_space<vmem>>, vector<32x64xf32>
    %c480 = arith.constant 480 : index
    %c0_353 = arith.constant 0 : index
    %203 = vector.load %arg12[%c480, %c0_353] : memref<512x256xf32, #tpu.memory_space<vmem>>, vector<32x64xf32>
    tpu.vector_store %arg12[%c480, %c0_353], %202 {strides = array<i32>} : memref<512x256xf32, #tpu.memory_space<vmem>>, vector<32x64xf32>,
    %c64_354 = arith.constant 64 : index
    %c960_355 = arith.constant 960 : index
    %204 = vector.load %arg13[%c64_354, %c960_355] : memref<160x1024xf32, #tpu.memory_space<vmem>>, vector<32x64xf32>
    %c480_356 = arith.constant 480 : index
    %c64_357 = arith.constant 64 : index
    %205 = vector.load %arg12[%c480_356, %c64_357] : memref<512x256xf32, #tpu.memory_space<vmem>>, vector<32x64xf32>
    tpu.vector_store %arg12[%c480_356, %c64_357], %204 {strides = array<i32>} : memref<512x256xf32, #tpu.memory_space<vmem>>, vector<32x64xf32>,
    %c96_358 = arith.constant 96 : index
    %c960_359 = arith.constant 960 : index
    %206 = vector.load %arg13[%c96_358, %c960_359] : memref<160x1024xf32, #tpu.memory_space<vmem>>, vector<32x64xf32>
    %c480_360 = arith.constant 480 : index
    %c128_361 = arith.constant 128 : index
    %207 = vector.load %arg12[%c480_360, %c128_361] : memref<512x256xf32, #tpu.memory_space<vmem>>, vector<32x64xf32>
    tpu.vector_store %arg12[%c480_360, %c128_361], %206 {strides = array<i32>} : memref<512x256xf32, #tpu.memory_space<vmem>>, vector<32x64xf32>,
    %c128_362 = arith.constant 128 : index
    %c960_363 = arith.constant 960 : index
    %208 = vector.load %arg13[%c128_362, %c960_363] : memref<160x1024xf32, #tpu.memory_space<vmem>>, vector<32x64xf32>
    %c480_364 = arith.constant 480 : index
    %c192_365 = arith.constant 192 : index
    %209 = vector.load %arg12[%c480_364, %c192_365] : memref<512x256xf32, #tpu.memory_space<vmem>>, vector<32x64xf32>
    tpu.vector_store %arg12[%c480_364, %c192_365], %208 {strides = array<i32>} : memref<512x256xf32, #tpu.memory_space<vmem>>, vector<32x64xf32>,
    %c0_366 = arith.constant 0 : index
    %c0_367 = arith.constant 0 : index
    %210 = vector.load %arg11[%c0_366, %c0_367] : memref<256x128xf32, #tpu.memory_space<vmem>>, vector<256x128xf32>
    %211 = arith.truncf %210 : vector<256x128xf32> to vector<256x128xbf16>
    %c0_368 = arith.constant 0 : index
    %c0_369 = arith.constant 0 : index
    %212 = vector.load %arg5[%c0_368, %c0_369] : memref<128x128xbf16, #tpu.memory_space<vmem>>, vector<128x128xbf16>
    %cst_370 = arith.constant dense<0.000000e+00> : vector<256x128xf32>
    %213 = tpu.matmul %211, %212, %cst_370 {dimension_numbers = #tpu.dot_dimension_numbers<[1], [0], [0], [1], [0, 0, 1, 1], [], []>} : vector<256x128xbf16>, vector<128x128xbf16>, vector<256x128xf32> -> vector<256x128xf32>
    %c0_371 = arith.constant 0 : index
    %c0_372 = arith.constant 0 : index
    %214 = vector.load %arg7[%c0_371, %c0_372] : memref<2x128xf32, #tpu.memory_space<vmem>>, vector<1x128xf32>
    %215 = vector.broadcast %214 : vector<1x128xf32> to vector<256x128xf32>
    %216 = arith.addf %213, %215 : vector<256x128xf32>
    %cst_373 = arith.constant 0.000000e+00 : f32
    %217 = vector.broadcast %cst_373 : f32 to vector<256x128xf32>
    %218 = arith.maximumf %216, %217 : vector<256x128xf32>
    %219 = arith.truncf %218 : vector<256x128xf32> to vector<256x128xbf16>
    %c0_374 = arith.constant 0 : index
    %c0_375 = arith.constant 0 : index
    %220 = vector.load %arg6[%c0_374, %c0_375] : memref<128x128xbf16, #tpu.memory_space<vmem>>, vector<128x128xbf16>
    %cst_376 = arith.constant dense<0.000000e+00> : vector<256x128xf32>
    %221 = tpu.matmul %219, %220, %cst_376 {dimension_numbers = #tpu.dot_dimension_numbers<[1], [0], [0], [1], [0, 0, 1, 1], [], []>} : vector<256x128xbf16>, vector<128x128xbf16>, vector<256x128xf32> -> vector<256x128xf32>
    %c1 = arith.constant 1 : index
    %c0_377 = arith.constant 0 : index
    %222 = vector.load %arg7[%c1, %c0_377] : memref<2x128xf32, #tpu.memory_space<vmem>>, vector<1x128xf32>
    %223 = vector.broadcast %222 : vector<1x128xf32> to vector<256x128xf32>
    %224 = arith.addf %221, %223 : vector<256x128xf32>
    %225 = math.tanh %224 : vector<256x128xf32>
    %226 = arith.mulf %225, %210 : vector<256x128xf32>
    %c0_378 = arith.constant 0 : index
    %c0_379 = arith.constant 0 : index
    %227 = vector.load %arg11[%c0_378, %c0_379] : memref<256x128xf32, #tpu.memory_space<vmem>>, vector<256x128xf32>
    tpu.vector_store %arg11[%c0_378, %c0_379], %226 {strides = array<i32>} : memref<256x128xf32, #tpu.memory_space<vmem>>, vector<256x128xf32>,
    %c0_380 = arith.constant 0 : index
    %c0_381 = arith.constant 0 : index
    %228 = vector.load %arg12[%c0_380, %c0_381] : memref<512x256xf32, #tpu.memory_space<vmem>>, vector<512x256xf32>
    %229 = arith.truncf %228 : vector<512x256xf32> to vector<512x256xbf16>
    %c0_382 = arith.constant 0 : index
    %c0_383 = arith.constant 0 : index
    %230 = vector.load %arg8[%c0_382, %c0_383] : memref<256x256xbf16, #tpu.memory_space<vmem>>, vector<256x256xbf16>
    %cst_384 = arith.constant dense<0.000000e+00> : vector<512x256xf32>
    %231 = tpu.matmul %229, %230, %cst_384 {dimension_numbers = #tpu.dot_dimension_numbers<[1], [0], [0], [1], [0, 0, 1, 1], [], []>} : vector<512x256xbf16>, vector<256x256xbf16>, vector<512x256xf32> -> vector<512x256xf32>
    %c0_385 = arith.constant 0 : index
    %c0_386 = arith.constant 0 : index
    %232 = vector.load %arg10[%c0_385, %c0_386] : memref<2x256xf32, #tpu.memory_space<vmem>>, vector<1x256xf32>
    %233 = vector.broadcast %232 : vector<1x256xf32> to vector<512x256xf32>
    %234 = arith.addf %231, %233 : vector<512x256xf32>
    %cst_387 = arith.constant 0.000000e+00 : f32
    %235 = vector.broadcast %cst_387 : f32 to vector<512x256xf32>
    %236 = arith.maximumf %234, %235 : vector<512x256xf32>
    %237 = arith.truncf %236 : vector<512x256xf32> to vector<512x256xbf16>
    %c0_388 = arith.constant 0 : index
    %c0_389 = arith.constant 0 : index
    %238 = vector.load %arg9[%c0_388, %c0_389] : memref<256x256xbf16, #tpu.memory_space<vmem>>, vector<256x256xbf16>
    %cst_390 = arith.constant dense<0.000000e+00> : vector<512x256xf32>
    %239 = tpu.matmul %237, %238, %cst_390 {dimension_numbers = #tpu.dot_dimension_numbers<[1], [0], [0], [1], [0, 0, 1, 1], [], []>} : vector<512x256xbf16>, vector<256x256xbf16>, vector<512x256xf32> -> vector<512x256xf32>
    %c1_391 = arith.constant 1 : index
    %c0_392 = arith.constant 0 : index
    %240 = vector.load %arg10[%c1_391, %c0_392] : memref<2x256xf32, #tpu.memory_space<vmem>>, vector<1x256xf32>
    %241 = vector.broadcast %240 : vector<1x256xf32> to vector<512x256xf32>
    %242 = arith.addf %239, %241 : vector<512x256xf32>
    %243 = math.tanh %242 : vector<512x256xf32>
    %244 = arith.mulf %243, %228 : vector<512x256xf32>
    %c0_393 = arith.constant 0 : index
    %c0_394 = arith.constant 0 : index
    %245 = vector.load %arg12[%c0_393, %c0_394] : memref<512x256xf32, #tpu.memory_space<vmem>>, vector<512x256xf32>
    tpu.vector_store %arg12[%c0_393, %c0_394], %244 {strides = array<i32>} : memref<512x256xf32, #tpu.memory_space<vmem>>, vector<512x256xf32>,
    return
  }
  func.func @transform_0(%arg0: i32) -> (i32, i32) {
    %c0_i32 = arith.constant 0 : i32
    %c0_i32_0 = arith.constant 0 : i32
    return %c0_i32, %arg0 : i32, i32
  }
  func.func @transform_1(%arg0: i32) -> (i32, i32) {
    %c0_i32 = arith.constant 0 : i32
    %c0_i32_0 = arith.constant 0 : i32
    %c0_i32_1 = arith.constant 0 : i32
    return %c0_i32, %c0_i32_0 : i32, i32
  }
  func.func @transform_2(%arg0: i32) -> (i32, i32) {
    %c0_i32 = arith.constant 0 : i32
    %c0_i32_0 = arith.constant 0 : i32
    %c0_i32_1 = arith.constant 0 : i32
    return %c0_i32, %c0_i32_0 : i32, i32
  }
  func.func @transform_3(%arg0: i32) -> (i32, i32) {
    %c0_i32 = arith.constant 0 : i32
    %c0_i32_0 = arith.constant 0 : i32
    %c0_i32_1 = arith.constant 0 : i32
    return %c0_i32, %c0_i32_0 : i32, i32
  }
  func.func @transform_4(%arg0: i32) -> (i32, i32) {
    %c0_i32 = arith.constant 0 : i32
    %c0_i32_0 = arith.constant 0 : i32
    %c0_i32_1 = arith.constant 0 : i32
    return %c0_i32, %c0_i32_0 : i32, i32
  }
  func.func @transform_5(%arg0: i32) -> (i32, i32) {
    %c0_i32 = arith.constant 0 : i32
    %c0_i32_0 = arith.constant 0 : i32
    %c0_i32_1 = arith.constant 0 : i32
    return %c0_i32, %c0_i32_0 : i32, i32
  }
  func.func @transform_6(%arg0: i32) -> (i32, i32) {
    %c0_i32 = arith.constant 0 : i32
    %c0_i32_0 = arith.constant 0 : i32
    %c0_i32_1 = arith.constant 0 : i32
    return %c0_i32, %c0_i32_0 : i32, i32
  }
  func.func @transform_7(%arg0: i32) -> (i32, i32) {
    %c0_i32 = arith.constant 0 : i32
    %c0_i32_0 = arith.constant 0 : i32
    %c0_i32_1 = arith.constant 0 : i32
    return %c0_i32, %c0_i32_0 : i32, i32
  }
  func.func @transform_8(%arg0: i32) -> (i32, i32) {
    %c0_i32 = arith.constant 0 : i32
    %c0_i32_0 = arith.constant 0 : i32
    %c0_i32_1 = arith.constant 0 : i32
    return %c0_i32, %c0_i32_0 : i32, i32
  }
  func.func @transform_9(%arg0: i32) -> (i32, i32) {
    %c0_i32 = arith.constant 0 : i32
    %c0_i32_0 = arith.constant 0 : i32
    %c0_i32_1 = arith.constant 0 : i32
    return %c0_i32, %c0_i32_0 : i32, i32
  }
  func.func @transform_10(%arg0: i32) -> (i32, i32) {
    %c0_i32 = arith.constant 0 : i32
    %c0_i32_0 = arith.constant 0 : i32
    return %arg0, %c0_i32 : i32, i32
  }
  func.func @transform_11(%arg0: i32) -> (i32, i32) {
    %c0_i32 = arith.constant 0 : i32
    %c0_i32_0 = arith.constant 0 : i32
    return %arg0, %c0_i32 : i32, i32
  }
}

</mosaic_0001>

<bundles_post_ra>
// kernel: multi_scale_refine_forward.1
= control target key start
LH: loop header
LB: loop body
LE: loop exit
PB: predicated region body
PF: predicated region fallthrough
CT: control target
= control target key end

     0   :  { %17 = vsyncpa [#allocation4], 0  ;;  %s12596_s0 = inlined_call_operand.vmem [shape: f32[8,1024], index: 0, kind: input, shape index: {}]   ;;  %s12597_s1 = inlined_call_operand.hbm [shape: bf16[8,8], index: 1, kind: input, shape index: {}]   ;;  %s12598_s2 = inlined_call_operand.hbm [shape: bf16[160,8], index: 2, kind: input, shape index: {}]   ;;  %s12599_s3 = inlined_call_operand.hbm [shape: f32[168,1], index: 3, kind: input, shape index: {}]   ;;  %s12600_s4 = inlined_call_operand.hbm [shape: bf16[128,128], index: 4, kind: input, shape index: {}]   ;;  %s12601_s5 = inlined_call_operand.hbm [shape: bf16[128,128], index: 5, kind: input, shape index: {}]   ;;  %s12602_s6 = inlined_call_operand.hbm [shape: f32[2,128], index: 6, kind: input, shape index: {}]   ;;  %s12603_s7 = inlined_call_operand.hbm [shape: bf16[256,256], index: 7, kind: input, shape index: {}]   ;;  %s12604_s8 = inlined_call_operand.hbm [shape: bf16[256,256], index: 8, kind: input, shape index: {}]   ;;  %s12605_s9 = inlined_call_operand.hbm [shape: f32[2,256], index: 9, kind: input, shape index: {}]   ;;  %s12606_s10 = inlined_call_operand.vmem [shape: f32[256,128], index: 10, kind: output, shape index: {0}]   ;;  %s12607_s11 = inlined_call_operand.vmem [shape: f32[512,256], index: 11, kind: output, shape index: {1}]  }
   0x1   :  { %18 = vsyncpa [#allocation6], 0 }
   0x2   :  { %19 = vsyncpa [#allocation9], 0 }
   0x3   :  { %20 = vsyncpa [#allocation12], 0  ;;  %s39_s19 = sshll.u32 %s12598_s2, 4  ;;  %s40_s19 = int_to_ptr.hbm [resolvable:$true] %s39_s19 }
   0x4   :  { %21 = vsyncpa [#allocation15], 0  ;;  %s6954_s20 = smov [#allocation5]   ;;  %s65_s24 = sshll.u32 %s12600_s4, 4  ;;  %s66_s24 = int_to_ptr.hbm [resolvable:$true] %s65_s24 }
   0x5   :  { %s41_s21 = sshll.u32 %s6954_s20, 4  ;;  %s6955_s25 = smov 64   ;;  %s42_s21 = int_to_ptr.vmem [resolvable:$true] %s41_s21 }
   0x6   :  { %s6956_s26 = smov 4   ;;  %s6957_s27 = smov [#allocation8]  }
   0x7   :  { %47 = dma.hbm_to_vmem [thread:$0]  %s40_s19, 1280, %s42_s21, [#allocation6], %s6955_s25, %s6955_s25, %s6956_s26  }
   0x8   :  { %s67_s28 = sshll.u32 %s6957_s27, 4  ;;  %s92_s30 = sshll.u32 %s12602_s6, 4  ;;  %s68_s28 = int_to_ptr.vmem [resolvable:$true] %s67_s28  ;;  %s93_s30 = int_to_ptr.hbm [resolvable:$true] %s92_s30 }
   0x9   :  { %73 = dma.hbm_to_vmem [thread:$0]  %s66_s24, 1024, %s68_s28, [#allocation9], %s6955_s25, %s6955_s25, %s6956_s26  }
   0xa   :  { %s6958_s4 = smov [#allocation11]   ;;  %s115_s15 = sshll.u32 %s12604_s8, 4  ;;  %s116_s15 = int_to_ptr.hbm [resolvable:$true] %s115_s15 }
   0xb   :  { %s94_s12 = sshll.u32 %s6958_s4, 4  ;;  %s6959_s16 = smov [#allocation14]   ;;  %s95_s12 = int_to_ptr.vmem [resolvable:$true] %s94_s12 }
   0xc   :  { %97 = dma.hbm_to_vmem [thread:$0]  %s93_s30, 32, %s95_s12, [#allocation12]  }
   0xd   :  { %s117_s17 = sshll.u32 %s6959_s16, 4  ;;  %s29_s6 = sshll.u32 %s12597_s1, 4  ;;  %s118_s17 = int_to_ptr.vmem [resolvable:$true] %s117_s17  ;;  %s30_s6 = int_to_ptr.hbm [resolvable:$true] %s29_s6 }
   0xe   :  { %s6960_s20 = smov 128   ;;  %s6961_s21 = smov 8  }
   0xf   :  { %123 = dma.hbm_to_vmem [thread:$0]  %s116_s15, 4096, %s118_s17, [#allocation15], %s6960_s20, %s6960_s20, %s6961_s21  }
  0x10   :  { %s52_s24 = sshll.u32 %s12599_s3, 4  ;;  %s6962_s27 = smov [#allocation3]   ;;  %s53_s24 = int_to_ptr.hbm [resolvable:$true] %s52_s24 }
  0x11   :  { %s31_s28 = sshll.u32 %s6962_s27, 4  ;;  %s6963_s8 = smov [#allocation7]   ;;  %s32_s28 = int_to_ptr.vmem [resolvable:$true] %s31_s28 }
  0x12   :  { %34 = dma.hbm_to_vmem [thread:$0]  %s30_s6, 64, %s32_s28, [#allocation4]  }
  0x13   :  { %s54_s29 = sshll.u32 %s6963_s8, 4  ;;  %s78_s1 = sshll.u32 %s12601_s5, 4  ;;  %s55_s29 = int_to_ptr.vmem [resolvable:$true] %s54_s29  ;;  %s79_s1 = int_to_ptr.hbm [resolvable:$true] %s78_s1 }
  0x14   :  { %60 = dma.hbm_to_vmem [thread:$0]  %s53_s24, 2688, %s55_s29, [#allocation6], %s6960_s20, %s6960_s20, %s6961_s21  }
  0x15   :  { %s102_s13 = sshll.u32 %s12603_s7, 4  ;;  %s6964_s14 = smov [#allocation10]   ;;  %s103_s13 = int_to_ptr.hbm [resolvable:$true] %s102_s13 }
  0x16   :  { %s80_s3 = sshll.u32 %s6964_s14, 4  ;;  %s6965_s15 = smov [#allocation13]   ;;  %s81_s3 = int_to_ptr.vmem [resolvable:$true] %s80_s3 }
  0x17   :  { %86 = dma.hbm_to_vmem [thread:$0]  %s79_s1, 1024, %s81_s3, [#allocation9], %s6955_s25, %s6955_s25, %s6956_s26  }
  0x18   :  { %s104_s16 = sshll.u32 %s6965_s15, 4  ;;  %s129_s5 = sshll.u32 %s12605_s9, 4  ;;  %s105_s16 = int_to_ptr.vmem [resolvable:$true] %s104_s16  ;;  %s130_s5 = int_to_ptr.hbm [resolvable:$true] %s129_s5 }
  0x19   :  { %110 = dma.hbm_to_vmem [thread:$0]  %s103_s13, 4096, %s105_s16, [#allocation12], %s6960_s20, %s6960_s20, %s6961_s21  }
  0x1a   :  { %s6966_s19 = smov [#allocation16]  }
  0x1b   :  { %s131_s6 = sshll.u32 %s6966_s19, 4  ;;  %s132_s6 = int_to_ptr.vmem [resolvable:$true] %s131_s6 }
  0x1c   :  { %134 = dma.hbm_to_vmem [thread:$0]  %s130_s5, 64, %s132_s6, [#allocation15]  }
  0x1d   :  { %6944 = dma.done.wait [#allocation4], 64  }
  0x1e   :  { %6945 = vsyncadd [#allocation4], 4294967232 }
  0x1f   :  { %6946 = dma.done.wait [#allocation6], 3968  }
  0x20   :  { %6947 = vsyncadd [#allocation6], 4294963328 }
  0x21   :  { %6948 = dma.done.wait [#allocation9], 2048  }
  0x22   :  { %6949 = vsyncadd [#allocation9], 4294965248 }
  0x23   :  { %6950 = dma.done.wait [#allocation12], 4128  }
  0x24   :  { %6951 = vsyncadd [#allocation12], 4294963168 }
  0x25   :  { %6952 = dma.done.wait [#allocation15], 4160  }
  0x26   :  { %6953 = vsyncadd [#allocation15], 4294963136  ;;  %v6967_v0 = vmov 0   ;;  %v172_v1 = vld [vmem:[%s12596_s0] sm:$0xff]  ;;  %vm199_vm0 = vcmask 1043456   ;;  %v173_v2 = vld [vmem:[%s12596_s0 + $0x8] sm:$0xff] }
  0x27   :  { %6248 = vset.pattern.permute.xlu0 %v6967_v0  ;;  %6249 = vset.pattern.permute.xlu1 %v6967_v0  ;;  %v174_v3 = vld [vmem:[%s12596_s0 + $0x10] sm:$0xff]  ;;  %v180_v4 = vpack.c.bf16 %v172_v1, %v172_v1  ;;  %v181_v5 = vpack.c.bf16 %v173_v2, %v173_v2  ;;  %v175_v7 = vld [vmem:[%s12596_s0 + $0x18] sm:$0xff]  ;;  %v188_v10 = vld [vmem:[#allocation3] sm:$0xf]  ;;  %vm195_vm1 = vcmask 64512   ;;  %vm1382_vm2 = vcmask 523264  }
  0x28   :  { %6250 = vset.pattern.permute.xlu2 %v6967_v0  ;;  %v182_v6 = vpack.c.bf16 %v174_v3, %v174_v3  ;;  %v189_v8 = vld [vmem:[#allocation7] sm:$0xff]  ;;  %v183_v9 = vpack.c.bf16 %v175_v7, %v175_v7  ;;  %v176_v11 = vld [vmem:[%s12596_s0 + $0x20] sm:$0xff]  ;;  %v177_v12 = vld [vmem:[%s12596_s0 + $0x28] sm:$0xff]  ;;  %vm1395_vm3 = vcmask 1048064  }
  0x29   :  { %192 = vperm.xlu0 %6248, %v189_v8   ;;  %v201_v13 = vsel %vm199_vm0, %v180_v4, 0  ;;  %v204_v14 = vsel %vm199_vm0, %v181_v5, 0  ;;  %v184_v16 = vpack.c.bf16 %v176_v11, %v176_v11  ;;  %v178_v17 = vld [vmem:[%s12596_s0 + $0x30] sm:$0xff]  ;;  %v179_v18 = vld [vmem:[%s12596_s0 + $0x38] sm:$0xff]  ;;  %v185_v20 = vpack.c.bf16 %v177_v12, %v177_v12  ;;  %v7106_v43 = vld [vmem:[#allocation5] sm:$0xff] }
  0x2a   :  { %v207_v15 = vsel %vm199_vm0, %v182_v6, 0  ;;  %231 = vmatpush.bf16.msra.mxu0 %v201_v13  ;;  %244 = vmatpush.bf16.msra.mxu1 %v204_v14  ;;  %v210_v19 = vsel %vm199_vm0, %v183_v9, 0  ;;  %v186_v21 = vpack.c.bf16 %v178_v17, %v178_v17  ;;  %v187_v22 = vpack.c.bf16 %v179_v18, %v179_v18  ;;  %v366_v26 = vld [vmem:[#allocation7 + $0x18] sm:$0xff]  ;;  %v367_v28 = vld [vmem:[#allocation7 + $0x20] sm:$0xff]  ;;  %v364_v29 = vld [vmem:[#allocation7 + $0x8] sm:$0xff] }
  0x2b   :  { %257 = vmatpush.bf16.msra.mxu2 %v207_v15  ;;  %270 = vmatpush.bf16.msra.mxu3 %v210_v19  ;;  %v213_v23 = vsel %vm199_vm0, %v184_v16, 0  ;;  %v216_v24 = vsel %vm199_vm0, %v185_v20, 0  ;;  %v7108_v44 = vld [vmem:[#allocation5 + $0x10] sm:$0xff]  ;;  %v7122_v5 = vld [vmem:[#allocation5 + $0x8] sm:$0xff]  ;;  %v7124_v6 = vld [vmem:[#allocation5 + $0x18] sm:$0xff] }
  0x2c   :  { %v219_v25 = vsel %vm199_vm0, %v186_v21, 0  ;;  %v222_v27 = vsel %vm199_vm0, %v187_v22, 0  ;;  %401 = vperm.xlu1 %6249, %v367_v28   ;;  %v365_v15 = vld [vmem:[#allocation7 + $0x10] sm:$0xff]  ;;  %v7146_v21 = vld [vmem:[#allocation5 + $0x28] sm:$0xff]  ;;  %v7156_v22 = vld [vmem:[#allocation5 + $0x30] sm:$0xff] }
  0x2d   :  { %5694 = vmatmul.msk.bf16.vlgmr.msra.gmra.mxu0 %vm195_vm1, %v188_v10  ;;  %5695 = vmatmul.msk.bf16.vlgmr.msra.gmra.mxu1 %vm195_vm1, %v188_v10  ;;  %v7136_v20 = vld [vmem:[#allocation5 + $0x20] sm:$0xff] }
  0x2e   :  { %283 = vmatpush.bf16.msrb.mxu0 %v213_v23  ;;  %5696 = vmatmul.msk.bf16.vlgmr.msra.gmra.mxu2 %vm195_vm1, %v188_v10  ;;  %v7166_v23 = vld [vmem:[#allocation5 + $0x38] sm:$0xff] }
  0x2f   :  { %5697 = vmatmul.msk.bf16.vlgmr.msra.gmra.mxu3 %vm195_vm1, %v188_v10  ;;  %296 = vmatpush.bf16.msrb.mxu1 %v216_v24  ;;  %v7176_v24 = vld [vmem:[#allocation5 + $0x40] sm:$0xff] }
  0x30   :  { %309 = vmatpush.bf16.msrb.mxu2 %v219_v25  ;;  %322 = vmatpush.bf16.msrb.mxu3 %v222_v27  ;;  %v7186_v25 = vld [vmem:[#allocation5 + $0x48] sm:$0xff] }
  0x31   :  { %396 = vperm.xlu0 %6248, %v366_v26   ;;  %391 = vperm.xlu2 %6250, %v365_v15  }
  0x34   :  { %386 = vperm.xlu1 %6249, %v364_v29  }
  0x3d   :  { %5698 = vmatmul.msk.bf16.vlgmr.msrb.gmra.mxu0 %vm195_vm1, %v188_v10  ;;  %5699 = vmatmul.msk.bf16.vlgmr.msrb.gmra.mxu1 %vm195_vm1, %v188_v10 }
  0x3e   :  { %5700 = vmatmul.msk.bf16.vlgmr.msrb.gmra.mxu2 %vm195_vm1, %v188_v10 }
  0x3f   :  { %5701 = vmatmul.msk.bf16.vlgmr.msrb.gmra.mxu3 %vm195_vm1, %v188_v10 }
  0x9b   :  { %v193_v30 = vpop.permute.xlu0 %192 }
  0x9e   :  { %v7194_v26 = vpop.permute.xlu1 %401 }
  0xa6   :  { %v7198_v27 = vpop.permute.xlu1 %386 }
  0xaa   :  { %v233_v31 = vpop.f32.mrf.mxu0  ;;  %v246_v32 = vpop.f32.mrf.mxu1 }
  0xab   :  { %v234_v33 = vadd.f32 %v233_v31, %v193_v30  ;;  %v247_v34 = vadd.f32 %v246_v32, %v193_v30 }
  0xad   :  { %v328_v35 = vmax.f32 %v234_v33, 0.0  ;;  %v329_v36 = vmax.f32 %v247_v34, 0.0 }
  0xaf   :  { %v356_v37 = vpack.c.bf16 %v328_v35, %v328_v35  ;;  %v357_v38 = vpack.c.bf16 %v329_v36, %v329_v36  ;;  %v7221_v35 = vpop.permute.xlu2 %391 }
  0xb1   :  { %v259_v39 = vpop.f32.mrf.mxu2  ;;  %v565_v41 = vsel %vm199_vm0, %v356_v37, 0  ;;  %v568_v42 = vsel %vm199_vm0, %v357_v38, 0 }
  0xb2   :  { %v272_v40 = vpop.f32.mrf.mxu3  ;;  %v260_v45 = vadd.f32 %v259_v39, %v193_v30  ;;  %v235_v47 = vpop.f32.mrf.mxu0  ;;  %595 = vmatpush.bf16.msra.mxu0 %v565_v41  ;;  %6232 = vmatpush.bf16.msra.mxu2 %v565_v41 }
  0xb3   :  { %v273_v46 = vadd.f32 %v272_v40, %v193_v30  ;;  %v248_v48 = vpop.f32.mrf.mxu1  ;;  %654 = vmatpush.bf16.msra.mxu1 %v568_v42  ;;  %6233 = vmatpush.bf16.msra.mxu3 %v568_v42  ;;  %v7239_v47 = vpop.permute.xlu0 %396 }
  0xb4   :  { %v330_v49 = vmax.f32 %v260_v45, 0.0 }
  0xb5   :  { %v331_v50 = vmax.f32 %v273_v46, 0.0  ;;  %5742 = vmatmul.msk.bf16.vlgmr.msra.gmra.mxu0 %vm195_vm1, %v7106_v43  ;;  %5744 = vmatmul.msk.bf16.vlgmr.msra.gmra.mxu2 %vm195_vm1, %v7108_v44 }
  0xb6   :  { %v358_v51 = vpack.c.bf16 %v330_v49, %v330_v49  ;;  %5752 = vmatmul.msk.bf16.vlgmr.msra.gmra.mxu1 %vm195_vm1, %v7106_v43  ;;  %5754 = vmatmul.msk.bf16.vlgmr.msra.gmra.mxu3 %vm195_vm1, %v7108_v44 }
  0xb7   :  { %v359_v52 = vpack.c.bf16 %v331_v50, %v331_v50 }
  0xb8   :  { %v571_v53 = vsel %vm199_vm0, %v358_v51, 0 }
  0xb9   :  { %v574_v54 = vsel %vm199_vm0, %v359_v52, 0  ;;  %v261_v55 = vpop.f32.mrf.mxu2  ;;  %713 = vmatpush.bf16.msrb.mxu2 %v571_v53 }
  0xba   :  { %v274_v56 = vpop.f32.mrf.mxu3  ;;  %772 = vmatpush.bf16.msrb.mxu3 %v574_v54  ;;  %v285_v57 = vpop.f32.mrf.mxu0 }
  0xbb   :  { %v298_v58 = vpop.f32.mrf.mxu1  ;;  %v286_v59 = vadd.f32 %v285_v57, %v193_v30 }
  0xbc   :  { %v299_v60 = vadd.f32 %v298_v58, %v193_v30 }
  0xbd   :  { %v332_v61 = vmax.f32 %v286_v59, 0.0 }
  0xbe   :  { %v333_v62 = vmax.f32 %v299_v60, 0.0 }
  0xbf   :  { %v360_v63 = vpack.c.bf16 %v332_v61, %v332_v61 }
  0xc0   :  { %v361_v0 = vpack.c.bf16 %v333_v62, %v333_v62 }
  0xc1   :  { %v311_v1 = vpop.f32.mrf.mxu2  ;;  %v577_v3 = vsel %vm199_vm0, %v360_v63, 0 }
  0xc2   :  { %v324_v2 = vpop.f32.mrf.mxu3  ;;  %v580_v4 = vsel %vm199_vm0, %v361_v0, 0  ;;  %v312_v7 = vadd.f32 %v311_v1, %v193_v30  ;;  %831 = vmatpush.bf16.msrb.mxu0 %v577_v3  ;;  %v287_v9 = vpop.f32.mrf.mxu0 }
  0xc3   :  { %v325_v8 = vadd.f32 %v324_v2, %v193_v30  ;;  %890 = vmatpush.bf16.msrb.mxu1 %v580_v4  ;;  %v300_v10 = vpop.f32.mrf.mxu1 }
  0xc4   :  { %v334_v11 = vmax.f32 %v312_v7, 0.0 }
  0xc5   :  { %v335_v12 = vmax.f32 %v325_v8, 0.0  ;;  %5743 = vmatmul.msk.bf16.gmra.mxu0 %vm195_vm1, %v7122_v5  ;;  %5745 = vmatmul.msk.bf16.gmra.mxu2 %vm195_vm1, %v7124_v6 }
  0xc6   :  { %v362_v13 = vpack.c.bf16 %v334_v11, %v334_v11  ;;  %5753 = vmatmul.msk.bf16.gmra.mxu1 %vm195_vm1, %v7122_v5  ;;  %5755 = vmatmul.msk.bf16.gmra.mxu3 %vm195_vm1, %v7124_v6 }
  0xc7   :  { %v363_v14 = vpack.c.bf16 %v335_v12, %v335_v12 }
  0xc8   :  { %v583_v16 = vsel %vm199_vm0, %v362_v13, 0 }
  0xc9   :  { %v586_v17 = vsel %vm199_vm0, %v363_v14, 0  ;;  %949 = vmatpush.bf16.msra.mxu2 %v583_v16  ;;  %v313_v18 = vpop.f32.mrf.mxu2 }
  0xca   :  { %1008 = vmatpush.bf16.msra.mxu3 %v586_v17  ;;  %v326_v19 = vpop.f32.mrf.mxu3 }
  0xd5   :  { %5746 = vmatmul.msk.bf16.gmra.mxu2 %vm195_vm1, %v7136_v20  ;;  %5782 = vmatmul.msk.bf16.vlgmr.msrb.gmra.mxu0 %vm195_vm1, %v7106_v43 }
  0xd6   :  { %5756 = vmatmul.msk.bf16.gmra.mxu3 %vm195_vm1, %v7136_v20  ;;  %5792 = vmatmul.msk.bf16.vlgmr.msrb.gmra.mxu1 %vm195_vm1, %v7106_v43 }
  0xe5   :  { %5747 = vmatmul.msk.bf16.gmra.mxu2 %vm195_vm1, %v7146_v21  ;;  %5783 = vmatmul.msk.bf16.gmra.mxu0 %vm195_vm1, %v7122_v5 }
  0xe6   :  { %5757 = vmatmul.msk.bf16.gmra.mxu3 %vm195_vm1, %v7146_v21  ;;  %5793 = vmatmul.msk.bf16.gmra.mxu1 %vm195_vm1, %v7122_v5 }
  0xf5   :  { %5748 = vmatmul.msk.bf16.gmra.mxu2 %vm195_vm1, %v7156_v22  ;;  %5784 = vmatmul.msk.bf16.gmra.mxu0 %vm195_vm1, %v7108_v44 }
  0xf6   :  { %5758 = vmatmul.msk.bf16.gmra.mxu3 %vm195_vm1, %v7156_v22  ;;  %5794 = vmatmul.msk.bf16.gmra.mxu1 %vm195_vm1, %v7108_v44 }
 0x105   :  { %5749 = vmatmul.msk.bf16.gmra.mxu2 %vm195_vm1, %v7166_v23  ;;  %5785 = vmatmul.msk.bf16.gmra.mxu0 %vm195_vm1, %v7124_v6 }
 0x106   :  { %5759 = vmatmul.msk.bf16.gmra.mxu3 %vm195_vm1, %v7166_v23  ;;  %5795 = vmatmul.msk.bf16.gmra.mxu1 %vm195_vm1, %v7124_v6 }
 0x115   :  { %5750 = vmatmul.msk.bf16.gmra.mxu2 %vm195_vm1, %v7176_v24  ;;  %5786 = vmatmul.msk.bf16.gmra.mxu0 %vm195_vm1, %v7136_v20 }
 0x116   :  { %5760 = vmatmul.msk.bf16.gmra.mxu3 %vm195_vm1, %v7176_v24  ;;  %5796 = vmatmul.msk.bf16.gmra.mxu1 %vm195_vm1, %v7136_v20 }
 0x125   :  { %5751 = vmatmul.msk.bf16.gmra.mxu2 %vm195_vm1, %v7186_v25  ;;  %5787 = vmatmul.msk.bf16.gmra.mxu0 %vm195_vm1, %v7146_v21 }
 0x126   :  { %5761 = vmatmul.msk.bf16.gmra.mxu3 %vm195_vm1, %v7186_v25  ;;  %5797 = vmatmul.msk.bf16.gmra.mxu1 %vm195_vm1, %v7146_v21 }
 0x132   :  { %v597_v28 = vpop.f32.mrf.mxu0 }
 0x133   :  { %v598_v29 = vadd.f32 %v597_v28, %v7198_v27  ;;  %v656_v30 = vpop.f32.mrf.mxu1 }
 0x134   :  { %v657_v31 = vadd.f32 %v656_v30, %v7198_v27  ;;  %v6159_v30 = vld [vmem:[#allocation8 + $0x38] sm:$0xff] }
 0x135   :  { %v1060_v32 = vmax.f32 %v598_v29, 0.0  ;;  %5762 = vmatmul.msk.bf16.vlgmr.msrb.gmra.mxu2 %vm195_vm1, %v7106_v43  ;;  %5788 = vmatmul.msk.bf16.gmra.mxu0 %vm195_vm1, %v7156_v22 }
 0x136   :  { %v1061_v33 = vmax.f32 %v657_v31, 0.0  ;;  %5772 = vmatmul.msk.bf16.vlgmr.msrb.gmra.mxu3 %vm195_vm1, %v7106_v43  ;;  %5798 = vmatmul.msk.bf16.gmra.mxu1 %vm195_vm1, %v7156_v22 }
 0x137   :  { %1383 = vst.msk [vmem:[%s12606_s10] sm:$0xff] %vm1382_vm2, %v1060_v32  ;;  %1466 = vrot.lane.b32.xlu1 %v1060_v32, %s6955_s25  ;;  %2776 = vmatpush.bf16.msra.mxu0 %v6159_v30  ;;  %v6153_v30 = vld [vmem:[#allocation8 + $0x8] sm:$0xff] }
 0x138   :  { %1544 = vst.msk [vmem:[%s12606_s10 + $0x20] sm:$0xff] %vm1382_vm2, %v1061_v33  ;;  %v7219_v34 = vpop.f32.mrf.mxu2 }
 0x139   :  { %v7223_v36 = vpop.f32.mrf.mxu3 }
 0x13a   :  { %v599_v37 = vpop.f32.mrf.mxu0 }
 0x13b   :  { %v658_v38 = vpop.f32.mrf.mxu1  ;;  %v600_v39 = vadd.f32 %v599_v37, %v7221_v35  ;;  %v6158_v37 = vld [vmem:[#allocation8 + $0x30] sm:$0xff] }
 0x13c   :  { %v659_v40 = vadd.f32 %v658_v38, %v7221_v35  ;;  %2777 = vmatpush.bf16.msra.mxu0 %v6158_v37  ;;  %v6157_v38 = vld [vmem:[#allocation8 + $0x28] sm:$0xff] }
 0x13d   :  { %v1068_v41 = vmax.f32 %v600_v39, 0.0 }
 0x13e   :  { %v1069_v42 = vmax.f32 %v659_v40, 0.0 }
 0x13f   :  { %1384 = vst.msk [vmem:[%s12606_s10 + $0x8] sm:$0xff] %vm1382_vm2, %v1068_v41 }
 0x140   :  { %v7231_v45 = vpop.f32.mrf.mxu2  ;;  %1545 = vst.msk [vmem:[%s12606_s10 + $0x28] sm:$0xff] %vm1382_vm2, %v1069_v42  ;;  %2778 = vmatpush.bf16.msra.mxu0 %v6157_v38 }
 0x141   :  { %v7237_v46 = vpop.f32.mrf.mxu3 }
 0x142   :  { %v602_v48 = vpop.f32.mrf.mxu0 }
 0x143   :  { %v7242_v49 = vadd.f32 %v602_v48, %v7239_v47  ;;  %v661_v50 = vpop.f32.mrf.mxu1  ;;  %v6155_v48 = vld [vmem:[#allocation8 + $0x18] sm:$0xff] }
 0x144   :  { %v7278_v61 = vadd.f32 %v661_v50, %v7239_v47 }
 0x145   :  { %v1076_v51 = vmax.f32 %v7242_v49, 0.0  ;;  %5763 = vmatmul.msk.bf16.gmra.mxu2 %vm195_vm1, %v7122_v5  ;;  %5789 = vmatmul.msk.bf16.gmra.mxu0 %vm195_vm1, %v7166_v23 }
 0x146   :  { %5773 = vmatmul.msk.bf16.gmra.mxu3 %vm195_vm1, %v7122_v5  ;;  %5799 = vmatmul.msk.bf16.gmra.mxu1 %vm195_vm1, %v7166_v23  ;;  %v1077_v3 = vmax.f32 %v7278_v61, 0.0 }
 0x147   :  { %1389 = vrot.lane.b32.xlu2 %v1076_v51, %s6955_s25 }
 0x148   :  { %v7256_v52 = vpop.f32.mrf.mxu2 }
 0x149   :  { %12781 = vst [vmem:[#allocation22_spill] sm:$0xff] %v7256_v52  ;;  %v7258_v53 = vpop.f32.mrf.mxu3 }
 0x14a   :  { %12782 = vst [vmem:[#allocation23_spill] sm:$0xff] %v7258_v53  ;;  %v604_v54 = vpop.f32.mrf.mxu0 }
 0x14b   :  { %v7261_v55 = vadd.f32 %v604_v54, %v7194_v26  ;;  %v663_v56 = vpop.f32.mrf.mxu1 }
 0x14c   :  { %v7264_v57 = vadd.f32 %v663_v56, %v7194_v26 }
 0x14d   :  { %v1084_v58 = vmax.f32 %v7261_v55, 0.0 }
 0x14e   :  { %v12610_v59 = vmax.f32 %v7264_v57, 0.0 }
 0x14f   :  { %1391 = vrot.lane.b32.xlu0 %v1084_v58, %s6955_s25  ;;  %1468 = vrot.lane.b32.xlu2 %v1068_v41, %s6955_s25  ;;  %v6156_v41 = vld [vmem:[#allocation8 + $0x20] sm:$0xff] }
 0x150   :  { %v7272_v60 = vpop.f32.mrf.mxu2  ;;  %1552 = vrot.lane.b32.xlu1 %v12610_v59, %s6955_s25  ;;  %2779 = vmatpush.bf16.msra.mxu0 %v6156_v41 }
 0x151   :  { %12783 = vst [vmem:[#allocation24_spill] sm:$0xff] %v7272_v60  ;;  %v7280_v62 = vpop.f32.mrf.mxu3 }
 0x152   :  { %12784 = vst [vmem:[#allocation25_spill] sm:$0xff] %v7280_v62  ;;  %v833_v63 = vpop.f32.mrf.mxu0 }
 0x153   :  { %v7283_v0 = vadd.f32 %v833_v63, %v7198_v27  ;;  %v892_v1 = vpop.f32.mrf.mxu1  ;;  %v6154_v63 = vld [vmem:[#allocation8 + $0x10] sm:$0xff] }
 0x154   :  { %v7286_v2 = vadd.f32 %v892_v1, %v7198_v27  ;;  %2780 = vmatpush.bf16.msra.mxu0 %v6155_v48  ;;  %v6152_v48 = vld [vmem:[#allocation8] sm:$0xff] }
 0x155   :  { %v12609_v4 = vmax.f32 %v7283_v0, 0.0  ;;  %5764 = vmatmul.msk.bf16.gmra.mxu2 %vm195_vm1, %v7108_v44  ;;  %5790 = vmatmul.msk.bf16.gmra.mxu0 %vm195_vm1, %v7176_v24 }
 0x156   :  { %v12608_v7 = vmax.f32 %v7286_v2, 0.0  ;;  %5774 = vmatmul.msk.bf16.gmra.mxu3 %vm195_vm1, %v7108_v44  ;;  %5800 = vmatmul.msk.bf16.gmra.mxu1 %vm195_vm1, %v7176_v24 }
 0x157   :  { %2024 = vst.msk [vmem:[%s12606_s10 + $0x80] sm:$0xff] %vm1382_vm2, %v12609_v4  ;;  %1550 = vrot.lane.b32.xlu0 %v1077_v3, %s6955_s25  ;;  %1626 = vrot.lane.b32.xlu2 %v1061_v33, %s6955_s25 }
 0x158   :  { %2184 = vst.msk [vmem:[%s12606_s10 + $0xa0] sm:$0xff] %vm1382_vm2, %v12608_v7  ;;  %v7315_v8 = vpop.f32.mrf.mxu2  ;;  %2781 = vmatpush.bf16.msra.mxu0 %v6154_v63 }
 0x159   :  { %v7317_v9 = vpop.f32.mrf.mxu3 }
 0x15a   :  { %12785 = vst [vmem:[#allocation26_spill] sm:$0xff] %v7317_v9  ;;  %v835_v31 = vpop.f32.mrf.mxu0 }
 0x15c   :  { %2782 = vmatpush.bf16.msra.mxu0 %v6153_v30 }
 0x15f   :  { %1628 = vrot.lane.b32.xlu0 %v1069_v42, %s6955_s25 }
 0x160   :  { %v7320_v10 = vpop.f32.mrf.mxu2  ;;  %2783 = vmatpush.bf16.msra.mxu0 %v6152_v48 }
 0x161   :  { %v7322_v11 = vpop.f32.mrf.mxu3 }
 0x162   :  { %12786 = vst [vmem:[#allocation27_spill] sm:$0xff] %v7322_v11  ;;  %v7372_v42 = vpop.f32.mrf.mxu0 }
 0x165   :  { %5765 = vmatmul.msk.bf16.gmra.mxu2 %vm195_vm1, %v7124_v6  ;;  %5791 = vmatmul.msk.bf16.gmra.mxu0 %vm195_vm1, %v7186_v25 }
 0x166   :  { %5775 = vmatmul.msk.bf16.gmra.mxu3 %vm195_vm1, %v7124_v6  ;;  %5801 = vmatmul.msk.bf16.gmra.mxu1 %vm195_vm1, %v7186_v25 }
 0x168   :  { %v7332_v12 = vpop.f32.mrf.mxu2 }
 0x169   :  { %v7334_v13 = vpop.f32.mrf.mxu3 }
 0x16a   :  { %12787 = vst [vmem:[#allocation28_spill] sm:$0xff] %v7334_v13  ;;  %v7382_v1 = vpop.f32.mrf.mxu0 }
 0x170   :  { %v7336_v14 = vpop.f32.mrf.mxu2 }
 0x171   :  { %v7338_v15 = vpop.f32.mrf.mxu3 }
 0x172   :  { %12788 = vst [vmem:[#allocation29_spill] sm:$0xff] %v7338_v15  ;;  %v7402_v63 = vpop.f32.mrf.mxu0  ;;  %v12807_v15 = vmax.f32 %v7286_v2, 0.0 }
 0x175   :  { %5766 = vmatmul.msk.bf16.gmra.mxu2 %vm195_vm1, %v7136_v20 }
 0x176   :  { %5776 = vmatmul.msk.bf16.gmra.mxu3 %vm195_vm1, %v7136_v20 }
 0x178   :  { %v7344_v16 = vpop.f32.mrf.mxu2 }
 0x179   :  { %v7346_v17 = vpop.f32.mrf.mxu3 }
 0x17a   :  { %v7428_v49 = vpop.f32.mrf.mxu0 }
 0x180   :  { %v7348_v18 = vpop.f32.mrf.mxu2 }
 0x181   :  { %v7350_v19 = vpop.f32.mrf.mxu3 }
 0x182   :  { %v7439_v7 = vpop.f32.mrf.mxu0 }
 0x183   :  { %12797 = vst [vmem:[#allocation38_spill] sm:$0xff] %v7439_v7  ;;  %v6163_v7 = vld [vmem:[#allocation10 + $0x18] sm:$0xff] }
 0x185   :  { %5767 = vmatmul.msk.bf16.gmra.mxu2 %vm195_vm1, %v7146_v21 }
 0x186   :  { %5777 = vmatmul.msk.bf16.gmra.mxu3 %vm195_vm1, %v7146_v21 }
 0x188   :  { %v7356_v28 = vpop.f32.mrf.mxu2 }
 0x189   :  { %12789 = vst [vmem:[#allocation30_spill] sm:$0xff] %v7356_v28  ;;  %v7358_v29 = vpop.f32.mrf.mxu3 }
 0x18a   :  { %12790 = vst [vmem:[#allocation31_spill] sm:$0xff] %v7358_v29 }
 0x190   :  { %v7360_v32 = vpop.f32.mrf.mxu2 }
 0x191   :  { %12791 = vst [vmem:[#allocation32_spill] sm:$0xff] %v7360_v32  ;;  %v7362_v33 = vpop.f32.mrf.mxu3  ;;  %v6165_v32 = vld [vmem:[#allocation10 + $0x28] sm:$0xff] }
 0x192   :  { %12792 = vst [vmem:[#allocation33_spill] sm:$0xff] %v7362_v33 }
 0x195   :  { %5768 = vmatmul.msk.bf16.gmra.mxu2 %vm195_vm1, %v7156_v22 }
 0x196   :  { %5778 = vmatmul.msk.bf16.gmra.mxu3 %vm195_vm1, %v7156_v22 }
 0x198   :  { %v7368_v39 = vpop.f32.mrf.mxu2 }
 0x199   :  { %v7370_v40 = vpop.f32.mrf.mxu3 }
 0x19a   :  { %12793 = vst [vmem:[#allocation34_spill] sm:$0xff] %v7370_v40 }
 0x1a0   :  { %v7374_v50 = vpop.f32.mrf.mxu2 }
 0x1a1   :  { %v7376_v54 = vpop.f32.mrf.mxu3  ;;  %v1390_v56 = vpop.permute.xlu2 %1389 }
 0x1a2   :  { %12794 = vst [vmem:[#allocation35_spill] sm:$0xff] %v7376_v54  ;;  %v894_v54 = vpop.f32.mrf.mxu1 }
 0x1a3   :  { %1396 = vst.msk [vmem:[%s12606_s10] sm:$0xff] %vm1395_vm3, %v1390_v56  ;;  %v895_v9 = vadd.f32 %v894_v54, %v7221_v35 }
 0x1a5   :  { %5769 = vmatmul.msk.bf16.gmra.mxu2 %vm195_vm1, %v7166_v23 }
 0x1a6   :  { %5779 = vmatmul.msk.bf16.gmra.mxu3 %vm195_vm1, %v7166_v23 }
 0x1a8   :  { %v7388_v37 = vpop.f32.mrf.mxu2 }
 0x1a9   :  { %v7390_v38 = vpop.f32.mrf.mxu3  ;;  %v1469_v41 = vpop.permute.xlu2 %1468 }
 0x1aa   :  { %12795 = vst [vmem:[#allocation36_spill] sm:$0xff] %v7390_v38  ;;  %v1467_v56 = vpop.permute.xlu1 %1466 }
 0x1ab   :  { %1473 = vst.msk [vmem:[%s12606_s10 + $0x18] sm:$0xff] %vm1382_vm2, %v1469_v41 }
 0x1ac   :  { %1477 = vst.msk [vmem:[%s12606_s10 + $0x18] sm:$0xff] %vm1395_vm3, %v1084_v58 }
 0x1ad   :  { %1472 = vst.msk [vmem:[%s12606_s10 + $0x10] sm:$0xff] %vm1382_vm2, %v1467_v56 }
 0x1ae   :  { %1476 = vst.msk [vmem:[%s12606_s10 + $0x10] sm:$0xff] %vm1395_vm3, %v1076_v51 }
 0x1b0   :  { %v7414_v55 = vpop.f32.mrf.mxu2 }
 0x1b1   :  { %v7416_v30 = vpop.f32.mrf.mxu3  ;;  %v1627_v58 = vpop.permute.xlu2 %1626 }
 0x1b2   :  { %12796 = vst [vmem:[#allocation37_spill] sm:$0xff] %v7416_v30 }
 0x1b3   :  { %1632 = vst.msk [vmem:[%s12606_s10 + $0x30] sm:$0xff] %vm1382_vm2, %v1627_v58 }
 0x1b4   :  { %1636 = vst.msk [vmem:[%s12606_s10 + $0x30] sm:$0xff] %vm1395_vm3, %v1077_v3 }
 0x1b5   :  { %5770 = vmatmul.msk.bf16.gmra.mxu2 %vm195_vm1, %v7176_v24 }
 0x1b6   :  { %5780 = vmatmul.msk.bf16.gmra.mxu3 %vm195_vm1, %v7176_v24 }
 0x1b8   :  { %v715_v51 = vpop.f32.mrf.mxu2 }
 0x1b9   :  { %v716_v41 = vadd.f32 %v715_v51, %v7198_v27  ;;  %v774_v48 = vpop.f32.mrf.mxu3  ;;  %v7453_v51 = vadd.f32 %v835_v31, %v7221_v35 }
 0x1ba   :  { %v7436_v56 = vadd.f32 %v774_v48, %v7198_v27 }
 0x1bb   :  { %v1062_v61 = vmax.f32 %v716_v41, 0.0 }
 0x1bc   :  { %v12611_v58 = vmax.f32 %v7436_v56, 0.0 }
 0x1bd   :  { %1704 = vst.msk [vmem:[%s12606_s10 + $0x40] sm:$0xff] %vm1382_vm2, %v1062_v61  ;;  %1786 = vrot.lane.b32.xlu0 %v1062_v61, %s6955_s25 }
 0x1be   :  { %1864 = vst.msk [vmem:[%s12606_s10 + $0x60] sm:$0xff] %vm1382_vm2, %v12611_v58 }
 0x1c0   :  { %v717_v3 = vpop.f32.mrf.mxu2 }
 0x1c1   :  { %v718_v41 = vadd.f32 %v717_v3, %v7221_v35  ;;  %v776_v48 = vpop.f32.mrf.mxu3  ;;  %v1392_v4 = vpop.permute.xlu0 %1391  ;;  %v1072_v3 = vmax.f32 %v7453_v51, 0.0 }
 0x1c2   :  { %v7457_v59 = vadd.f32 %v776_v48, %v7221_v35  ;;  %1397 = vst.msk [vmem:[%s12606_s10 + $0x8] sm:$0xff] %vm1395_vm3, %v1392_v4  ;;  %v1553_v61 = vpop.permute.xlu1 %1552  ;;  %v7477_v4 = vpop.f32.mrf.mxu0 }
 0x1c3   :  { %1557 = vst.msk [vmem:[%s12606_s10 + $0x28] sm:$0xff] %vm1395_vm3, %v1553_v61  ;;  %v1070_v31 = vmax.f32 %v718_v41, 0.0  ;;  %v7493_v61 = vld [vmem:[%s12606_s10] sm:$0xff] }
 0x1c4   :  { %v1071_v58 = vmax.f32 %v7457_v59, 0.0  ;;  %12798 = vst [vmem:[#allocation39_spill] sm:$0xff] %v7477_v4 }
 0x1c5   :  { %5771 = vmatmul.msk.bf16.gmra.mxu2 %vm195_vm1, %v7186_v25  ;;  %1705 = vst.msk [vmem:[%s12606_s10 + $0x48] sm:$0xff] %vm1382_vm2, %v1070_v31 }
 0x1c6   :  { %5781 = vmatmul.msk.bf16.gmra.mxu3 %vm195_vm1, %v7186_v25  ;;  %1865 = vst.msk [vmem:[%s12606_s10 + $0x68] sm:$0xff] %vm1382_vm2, %v1071_v58 }
 0x1c7   :  { %2025 = vst.msk [vmem:[%s12606_s10 + $0x88] sm:$0xff] %vm1382_vm2, %v1072_v3 }
 0x1c8   :  { %v720_v59 = vpop.f32.mrf.mxu2 }
 0x1c9   :  { %v7488_v41 = vadd.f32 %v720_v59, %v7239_v47  ;;  %v779_v51 = vpop.f32.mrf.mxu3  ;;  %v1551_v48 = vpop.permute.xlu0 %1550  ;;  %v7498_v38 = vld [vmem:[%s12606_s10 + $0x8] sm:$0xff] }
 0x1ca   :  { %1556 = vst.msk [vmem:[%s12606_s10 + $0x20] sm:$0xff] %vm1395_vm3, %v1551_v48  ;;  %v2694_v59 = vpack.c.bf16 %v7498_v38, %v7493_v61  ;;  %v7510_v4 = vpop.f32.mrf.mxu0 }
 0x1cb   :  { %v12614_v30 = vmax.f32 %v7488_v41, 0.0  ;;  %12799 = vst [vmem:[#allocation40_spill] sm:$0xff] %v7510_v4 }
 0x1cc   :  { %2784 = vmatmul.bf16.vlgmr.msra.gmra.mxu0 %v2694_v59  ;;  %v12800_v59 = vmax.f32 %v7264_v57, 0.0  ;;  %v7542_v57 = vadd.f32 %v779_v51, %v7239_v47 }
 0x1cd   :  { %1710 = vrot.lane.b32.xlu1 %v12614_v30, %s6955_s25 }
 0x1d0   :  { %v722_v13 = vpop.f32.mrf.mxu2 }
 0x1d1   :  { %v7514_v62 = vadd.f32 %v722_v13, %v7194_v26  ;;  %v781_v48 = vpop.f32.mrf.mxu3  ;;  %v1629_v60 = vpop.permute.xlu0 %1628 }
 0x1d2   :  { %v7517_v11 = vadd.f32 %v781_v48, %v7194_v26  ;;  %1633 = vst.msk [vmem:[%s12606_s10 + $0x38] sm:$0xff] %vm1382_vm2, %v1629_v60  ;;  %v1073_v48 = vmax.f32 %v895_v9, 0.0  ;;  %v7548_v60 = vld [vmem:[%s12606_s10 + $0x10] sm:$0xff]  ;;  %v7553_v9 = vld [vmem:[%s12606_s10 + $0x18] sm:$0xff] }
 0x1d3   :  { %1637 = vst.msk [vmem:[%s12606_s10 + $0x38] sm:$0xff] %vm1395_vm3, %v12800_v59  ;;  %v12612_v13 = vmax.f32 %v7514_v62, 0.0  ;;  %v2695_v59 = vpack.c.bf16 %v7553_v9, %v7548_v60 }
 0x1d4   :  { %v12613_v54 = vmax.f32 %v7517_v11, 0.0  ;;  %2185 = vst.msk [vmem:[%s12606_s10 + $0xa8] sm:$0xff] %vm1382_vm2, %v1073_v48 }
 0x1d5   :  { %5802 = vmatmul.msk.bf16.vlgmr.msra.gmra.mxu2 %vm195_vm1, %v7106_v43  ;;  %1712 = vrot.lane.b32.xlu2 %v12612_v13, %s6955_s25  ;;  %v7569_v13 = vpop.f32.mrf.mxu0 }
 0x1d6   :  { %5812 = vmatmul.msk.bf16.vlgmr.msra.gmra.mxu3 %vm195_vm1, %v7106_v43  ;;  %1872 = vrot.lane.b32.xlu0 %v12613_v54, %s6955_s25  ;;  %v7561_v43 = vadd.f32 %v7372_v42, %v7239_v47  ;;  %12801 = vst [vmem:[#allocation41_spill] sm:$0xff] %v7569_v13  ;;  %v12615_v54 = vmax.f32 %v7542_v57, 0.0  ;;  %v12802_v42 = vmax.f32 %v7436_v56, 0.0  ;;  %v7586_v13 = vadd.f32 %v7382_v1, %v7194_v26  ;;  %v7605_v1 = vld [vmem:[%s12606_s10 + $0x20] sm:$0xff]  ;;  %v7610_v56 = vld [vmem:[%s12606_s10 + $0x28] sm:$0xff] }
 0x1d7   :  { %1788 = vrot.lane.b32.xlu1 %v1070_v31, %s6955_s25 }
 0x1d8   :  { %v7563_v31 = vpop.f32.mrf.mxu2  ;;  %v12617_v30 = vmax.f32 %v7561_v43, 0.0 }
 0x1d9   :  { %v7565_v51 = vpop.f32.mrf.mxu3 }
 0x1da   :  { %v7652_v2 = vld [vmem:[%s12606_s10 + $0x38] sm:$0xff] }
 0x1dc   :  { %2789 = vmatmul.bf16.gmra.mxu0 %v2695_v59  ;;  %v897_v59 = vpop.f32.mrf.mxu1 }
 0x1dd   :  { %1870 = vrot.lane.b32.xlu2 %v12615_v54, %s6955_s25  ;;  %v7590_v29 = vpop.f32.mrf.mxu0  ;;  %v12616_v54 = vmax.f32 %v7586_v13, 0.0 }
 0x1de   :  { %2030 = vrot.lane.b32.xlu0 %v12617_v30, %s6955_s25  ;;  %12803 = vst [vmem:[#allocation42_spill] sm:$0xff] %v7590_v29  ;;  %v12806_v29 = vmax.f32 %v7283_v0, 0.0 }
 0x1df   :  { %1946 = vrot.lane.b32.xlu1 %v12802_v42, %s6955_s25  ;;  %v2696_v42 = vpack.c.bf16 %v7610_v56, %v7605_v1 }
 0x1e0   :  { %v7582_v4 = vpop.f32.mrf.mxu2 }
 0x1e1   :  { %v7588_v28 = vpop.f32.mrf.mxu3 }
 0x1e5   :  { %5803 = vmatmul.msk.bf16.gmra.mxu2 %vm195_vm1, %v7122_v5  ;;  %1948 = vrot.lane.b32.xlu2 %v1071_v58, %s6955_s25  ;;  %v7628_v40 = vpop.f32.mrf.mxu0 }
 0x1e6   :  { %5813 = vmatmul.msk.bf16.gmra.mxu3 %vm195_vm1, %v7122_v5  ;;  %2108 = vrot.lane.b32.xlu0 %v1072_v3, %s6955_s25  ;;  %v7615_v5 = vadd.f32 %v897_v59, %v7239_v47  ;;  %12808 = vst [vmem:[#allocation45_spill] sm:$0xff] %v7628_v40 }
 0x1e7   :  { %2032 = vrot.lane.b32.xlu1 %v12616_v54, %s6955_s25  ;;  %v899_v54 = vpop.f32.mrf.mxu1 }
 0x1e8   :  { %v7612_v58 = vpop.f32.mrf.mxu2  ;;  %v12619_v30 = vmax.f32 %v7615_v5, 0.0  ;;  %v7631_v59 = vadd.f32 %v899_v54, %v7194_v26 }
 0x1e9   :  { %12804 = vst [vmem:[#allocation43_spill] sm:$0xff] %v7612_v58  ;;  %v7617_v3 = vpop.f32.mrf.mxu3 }
 0x1ea   :  { %12805 = vst [vmem:[#allocation44_spill] sm:$0xff] %v7617_v3  ;;  %v12618_v0 = vmax.f32 %v7631_v59, 0.0 }
 0x1ec   :  { %2794 = vmatmul.bf16.gmra.mxu0 %v2696_v42 }
 0x1ed   :  { %2106 = vrot.lane.b32.xlu2 %v12806_v29, %s6955_s25  ;;  %v7656_v29 = vpop.f32.mrf.mxu0 }
 0x1ee   :  { %2266 = vrot.lane.b32.xlu0 %v12807_v15, %s6955_s25 }
 0x1ef   :  { %2190 = vrot.lane.b32.xlu1 %v12619_v30, %s6955_s25 }
 0x1f0   :  { %v7636_v42 = vpop.f32.mrf.mxu2 }
 0x1f1   :  { %12809 = vst [vmem:[#allocation46_spill] sm:$0xff] %v7636_v42  ;;  %v7638_v33 = vpop.f32.mrf.mxu3 }
 0x1f2   :  { %12810 = vst [vmem:[#allocation47_spill] sm:$0xff] %v7638_v33 }
 0x1f5   :  { %5804 = vmatmul.msk.bf16.gmra.mxu2 %vm195_vm1, %v7108_v44  ;;  %2192 = vrot.lane.b32.xlu2 %v12618_v0, %s6955_s25  ;;  %v7663_v0 = vld [vmem:[%s12606_s10 + $0x30] sm:$0xff]  ;;  %v7671_v40 = vpop.f32.mrf.mxu0 }
 0x1f6   :  { %5814 = vmatmul.msk.bf16.gmra.mxu3 %vm195_vm1, %v7108_v44  ;;  %v2697_v44 = vpack.c.bf16 %v7652_v2, %v7663_v0 }
 0x1f7   :  { %2268 = vrot.lane.b32.xlu1 %v1073_v48, %s6955_s25 }
 0x1f8   :  { %v7654_v15 = vpop.f32.mrf.mxu2 }
 0x1f9   :  { %12811 = vst [vmem:[#allocation48_spill] sm:$0xff] %v7654_v15  ;;  %v7658_v54 = vpop.f32.mrf.mxu3 }
 0x1fa   :  { %12812 = vst [vmem:[#allocation49_spill] sm:$0xff] %v7658_v54 }
 0x1fc   :  { %2799 = vmatmul.bf16.gmra.mxu0 %v2697_v44 }
 0x1fd   :  { %v7681_v33 = vpop.f32.mrf.mxu0 }
 0x1fe   :  { %12817 = vst [vmem:[#allocation54_spill] sm:$0xff] %v7681_v33 }
 0x200   :  { %v7667_v48 = vpop.f32.mrf.mxu2 }
 0x201   :  { %12813 = vst [vmem:[#allocation50_spill] sm:$0xff] %v7667_v48  ;;  %v7669_v30 = vpop.f32.mrf.mxu3 }
 0x202   :  { %12814 = vst [vmem:[#allocation51_spill] sm:$0xff] %v7669_v30 }
 0x205   :  { %5805 = vmatmul.msk.bf16.gmra.mxu2 %vm195_vm1, %v7124_v6  ;;  %v7691_v30 = vpop.f32.mrf.mxu0 }
 0x206   :  { %5815 = vmatmul.msk.bf16.gmra.mxu3 %vm195_vm1, %v7124_v6  ;;  %12820 = vst [vmem:[#allocation57_spill] sm:$0xff] %v7691_v30 }
 0x208   :  { %v7677_v15 = vpop.f32.mrf.mxu2 }
 0x209   :  { %12815 = vst [vmem:[#allocation52_spill] sm:$0xff] %v7677_v15  ;;  %v7679_v54 = vpop.f32.mrf.mxu3  ;;  %v6167_v15 = vld [vmem:[#allocation10 + $0x38] sm:$0xff] }
 0x20a   :  { %12816 = vst [vmem:[#allocation53_spill] sm:$0xff] %v7679_v54  ;;  %2979 = vmatpush.bf16.msra.mxu1 %v6167_v15  ;;  %v6166_v54 = vld [vmem:[#allocation10 + $0x30] sm:$0xff] }
 0x20e   :  { %2980 = vmatpush.bf16.msra.mxu1 %v6166_v54 }
 0x210   :  { %v7683_v42 = vpop.f32.mrf.mxu2 }
 0x211   :  { %12818 = vst [vmem:[#allocation55_spill] sm:$0xff] %v7683_v42  ;;  %v7685_v44 = vpop.f32.mrf.mxu3  ;;  %v7699_v42 = vpop.f32.mrf.mxu0 }
 0x212   :  { %12819 = vst [vmem:[#allocation56_spill] sm:$0xff] %v7685_v44  ;;  %2981 = vmatpush.bf16.msra.mxu1 %v6165_v32 }
 0x213   :  { %12821 = vst [vmem:[#allocation58_spill] sm:$0xff] %v7699_v42  ;;  %v6162_v42 = vld [vmem:[#allocation10 + $0x10] sm:$0xff] }
 0x215   :  { %5806 = vmatmul.msk.bf16.gmra.mxu2 %vm195_vm1, %v7136_v20 }
 0x216   :  { %5816 = vmatmul.msk.bf16.gmra.mxu3 %vm195_vm1, %v7136_v20  ;;  %v6164_v20 = vld [vmem:[#allocation10 + $0x20] sm:$0xff] }
 0x217   :  { %2982 = vmatpush.bf16.msra.mxu1 %v6164_v20 }
 0x218   :  { %v7693_v48 = vpop.f32.mrf.mxu2 }
 0x219   :  { %v7695_v6 = vpop.f32.mrf.mxu3  ;;  %v7711_v54 = vpop.f32.mrf.mxu0 }
 0x21a   :  { %12824 = vst [vmem:[#allocation61_spill] sm:$0xff] %v7711_v54 }
 0x21b   :  { %2983 = vmatpush.bf16.msra.mxu1 %v6163_v7  ;;  %v6161_v7 = vld [vmem:[#allocation10 + $0x8] sm:$0xff] }
 0x21f   :  { %2984 = vmatpush.bf16.msra.mxu1 %v6162_v42  ;;  %v7737_v42 = vpop.f32.mrf.mxu1 }
 0x220   :  { %v7697_v33 = vpop.f32.mrf.mxu2 }
 0x221   :  { %v7701_v44 = vpop.f32.mrf.mxu3  ;;  %v7731_v54 = vpop.f32.mrf.mxu0 }
 0x222   :  { %12828 = vst [vmem:[#allocation64_spill] sm:$0xff] %v7731_v54 }
 0x223   :  { %2985 = vmatpush.bf16.msra.mxu1 %v6161_v7 }
 0x225   :  { %5807 = vmatmul.msk.bf16.gmra.mxu2 %vm195_vm1, %v7146_v21 }
 0x226   :  { %5817 = vmatmul.msk.bf16.gmra.mxu3 %vm195_vm1, %v7146_v21  ;;  %v12826_v21 = vmax.f32 %v7488_v41, 0.0  ;;  %v6160_v41 = vld [vmem:[#allocation10] sm:$0xff] }
 0x227   :  { %2986 = vmatpush.bf16.msra.mxu1 %v6160_v41 }
 0x228   :  { %v7707_v30 = vpop.f32.mrf.mxu2 }
 0x229   :  { %12822 = vst [vmem:[#allocation59_spill] sm:$0xff] %v7707_v30  ;;  %v7709_v15 = vpop.f32.mrf.mxu3  ;;  %v7747_v7 = vpop.f32.mrf.mxu0 }
 0x22a   :  { %12823 = vst [vmem:[#allocation60_spill] sm:$0xff] %v7709_v15  ;;  %v7755_v30 = vpop.f32.mrf.mxu1 }
 0x22b   :  { %12831 = vst [vmem:[#allocation67_spill] sm:$0xff] %v7747_v7 }
 0x22f   :  { %v1787_v58 = vpop.permute.xlu0 %1786  ;;  %v1713_v3 = vpop.permute.xlu2 %1712 }
 0x230   :  { %1792 = vst.msk [vmem:[%s12606_s10 + $0x50] sm:$0xff] %vm1382_vm2, %v1787_v58  ;;  %v7717_v32 = vpop.f32.mrf.mxu2 }
 0x231   :  { %12825 = vst [vmem:[#allocation62_spill] sm:$0xff] %v7717_v32  ;;  %v7725_v20 = vpop.f32.mrf.mxu3  ;;  %v6182_v32 = vld [vmem:[#allocation13 + $0x74] sm:$0xf] }
 0x232   :  { %1796 = vst.msk [vmem:[%s12606_s10 + $0x50] sm:$0xff] %vm1395_vm3, %v12826_v21 }
 0x233   :  { %12827 = vst [vmem:[#allocation63_spill] sm:$0xff] %v7725_v20 }
 0x234   :  { %1717 = vst.msk [vmem:[%s12606_s10 + $0x48] sm:$0xff] %vm1395_vm3, %v1713_v3 }
 0x235   :  { %5808 = vmatmul.msk.bf16.gmra.mxu2 %vm195_vm1, %v7156_v22 }
 0x236   :  { %5818 = vmatmul.msk.bf16.gmra.mxu3 %vm195_vm1, %v7156_v22 }
 0x237   :  { %v1871_v58 = vpop.permute.xlu2 %1870 }
 0x238   :  { %1876 = vst.msk [vmem:[%s12606_s10 + $0x60] sm:$0xff] %vm1395_vm3, %v1871_v58  ;;  %v7743_v3 = vpop.f32.mrf.mxu2  ;;  %v12833_v58 = vmax.f32 %v7517_v11, 0.0 }
 0x239   :  { %12829 = vst [vmem:[#allocation65_spill] sm:$0xff] %v7743_v3  ;;  %v7745_v21 = vpop.f32.mrf.mxu3  ;;  %v7797_v3 = vpop.f32.mrf.mxu1 }
 0x23a   :  { %12830 = vst [vmem:[#allocation66_spill] sm:$0xff] %v7745_v21 }
 0x23b   :  { %v2671_v21 = vld [vmem:[%s12606_s10 + $0x48] sm:$0xff]  ;;  %12838 = vst [vmem:[#allocation72_spill] sm:$0xff] %v7797_v3 }
 0x23f   :  { %v1949_v54 = vpop.permute.xlu2 %1948  ;;  %v1711_v15 = vpop.permute.xlu1 %1710 }
 0x240   :  { %1953 = vst.msk [vmem:[%s12606_s10 + $0x78] sm:$0xff] %vm1382_vm2, %v1949_v54  ;;  %v7753_v22 = vpop.f32.mrf.mxu2 }
 0x241   :  { %12832 = vst [vmem:[#allocation68_spill] sm:$0xff] %v7753_v22  ;;  %v7763_v41 = vpop.f32.mrf.mxu3 }
 0x242   :  { %1957 = vst.msk [vmem:[%s12606_s10 + $0x78] sm:$0xff] %vm1395_vm3, %v12833_v58 }
 0x243   :  { %12834 = vst [vmem:[#allocation69_spill] sm:$0xff] %v7763_v41 }
 0x244   :  { %1716 = vst.msk [vmem:[%s12606_s10 + $0x40] sm:$0xff] %vm1395_vm3, %v1711_v15 }
 0x245   :  { %5809 = vmatmul.msk.bf16.gmra.mxu2 %vm195_vm1, %v7166_v23 }
 0x246   :  { %5819 = vmatmul.msk.bf16.gmra.mxu3 %vm195_vm1, %v7166_v23 }
 0x247   :  { %v2107_v54 = vpop.permute.xlu2 %2106 }
 0x248   :  { %v1873_v11 = vpop.permute.xlu0 %1872  ;;  %2112 = vst.msk [vmem:[%s12606_s10 + $0x90] sm:$0xff] %vm1382_vm2, %v2107_v54  ;;  %v7777_v58 = vpop.f32.mrf.mxu2  ;;  %v12837_v54 = vmax.f32 %v7561_v43, 0.0  ;;  %v7809_v43 = vld [vmem:[#allocation11] ss:$0 sm:$0xff] }
 0x249   :  { %12835 = vst [vmem:[#allocation70_spill] sm:$0xff] %v7777_v58  ;;  %v1789_v15 = vpop.permute.xlu1 %1788  ;;  %v7783_v7 = vpop.f32.mrf.mxu3 }
 0x24a   :  { %1877 = vst.msk [vmem:[%s12606_s10 + $0x68] sm:$0xff] %vm1395_vm3, %v1873_v11  ;;  %v2785_v58 = vpop.f32.mrf.mxu0 }
 0x24b   :  { %12836 = vst [vmem:[#allocation71_spill] sm:$0xff] %v7783_v7  ;;  %v2670_v23 = vld [vmem:[%s12606_s10 + $0x40] sm:$0xff]  ;;  %v12839_v7 = vmax.f32 %v7514_v62, 0.0 }
 0x24c   :  { %2116 = vst.msk [vmem:[%s12606_s10 + $0x90] sm:$0xff] %vm1395_vm3, %v12837_v54  ;;  %v2698_v11 = vpack.c.bf16 %v2671_v21, %v2670_v23 }
 0x24d   :  { %1793 = vst.msk [vmem:[%s12606_s10 + $0x58] sm:$0xff] %vm1382_vm2, %v1789_v15  ;;  %v2786_v15 = vadd.f32 %v7809_v43, %v2785_v58 }
 0x24e   :  { %1797 = vst.msk [vmem:[%s12606_s10 + $0x58] sm:$0xff] %vm1395_vm3, %v12839_v7  ;;  %2804 = vmatmul.bf16.gmra.mxu0 %v2698_v11  ;;  %v12842_v11 = vmax.f32 %v7542_v57, 0.0 }
 0x24f   :  { %v2193_v54 = vpop.permute.xlu2 %2192 }
 0x250   :  { %v2031_v22 = vpop.permute.xlu0 %2030  ;;  %2197 = vst.msk [vmem:[%s12606_s10 + $0xa8] sm:$0xff] %vm1395_vm3, %v2193_v54  ;;  %v7815_v21 = vpop.f32.mrf.mxu2 }
 0x251   :  { %12840 = vst [vmem:[#allocation73_spill] sm:$0xff] %v7815_v21  ;;  %v1947_v62 = vpop.permute.xlu1 %1946  ;;  %v7822_v7 = vpop.f32.mrf.mxu3 }
 0x252   :  { %2036 = vst.msk [vmem:[%s12606_s10 + $0x80] sm:$0xff] %vm1395_vm3, %v2031_v22  ;;  %v2787_v23 = vpop.f32.mrf.mxu0  ;;  %v7835_v54 = vpop.f32.mrf.mxu1  ;;  %v2865_v22 = vmax.f32 %v2786_v15, 0.0 }
 0x253   :  { %12841 = vst [vmem:[#allocation74_spill] sm:$0xff] %v7822_v7  ;;  %v2788_v58 = vadd.f32 %v7809_v43, %v2787_v23 }
 0x254   :  { %1952 = vst.msk [vmem:[%s12606_s10 + $0x70] sm:$0xff] %vm1382_vm2, %v1947_v62 }
 0x255   :  { %1956 = vst.msk [vmem:[%s12606_s10 + $0x70] sm:$0xff] %vm1395_vm3, %v12842_v11  ;;  %v2866_v41 = vmax.f32 %v2788_v58, 0.0  ;;  %5810 = vmatmul.msk.bf16.gmra.mxu2 %vm195_vm1, %v7176_v24  ;;  %v2673_v57 = vld [vmem:[%s12606_s10 + $0x58] sm:$0xff] }
 0x256   :  { %12843 = vst [vmem:[#allocation75_spill] sm:$0xff] %v7835_v54  ;;  %5820 = vmatmul.msk.bf16.gmra.mxu3 %vm195_vm1, %v7176_v24  ;;  %v2672_v24 = vld [vmem:[%s12606_s10 + $0x50] sm:$0xff] }
 0x257   :  { %v2897_v62 = vpack.c.bf16 %v2866_v41, %v2865_v22  ;;  %v12844_v41 = vmax.f32 %v7586_v13, 0.0  ;;  %v2699_v22 = vpack.c.bf16 %v2673_v57, %v2672_v24 }
 0x258   :  { %v2109_v7 = vpop.permute.xlu0 %2108  ;;  %v951_v21 = vpop.f32.mrf.mxu2 }
 0x259   :  { %2113 = vst.msk [vmem:[%s12606_s10 + $0x98] sm:$0xff] %vm1382_vm2, %v2109_v7  ;;  %v2033_v15 = vpop.permute.xlu1 %2032  ;;  %v952_v23 = vadd.f32 %v951_v21, %v7198_v27  ;;  %v1010_v11 = vpop.f32.mrf.mxu3  ;;  %2987 = vmatmul.bf16.vlgmr.msra.gmra.mxu1 %v2897_v62 }
 0x25a   :  { %2117 = vst.msk [vmem:[%s12606_s10 + $0x98] sm:$0xff] %vm1395_vm3, %v12844_v41  ;;  %v7859_v58 = vadd.f32 %v1010_v11, %v7198_v27  ;;  %v2790_v7 = vpop.f32.mrf.mxu0  ;;  %v7877_v27 = vpop.f32.mrf.mxu1  ;;  %v12846_v41 = vmax.f32 %v7615_v5, 0.0 }
 0x25b   :  { %2037 = vst.msk [vmem:[%s12606_s10 + $0x88] sm:$0xff] %vm1395_vm3, %v2033_v15  ;;  %v1066_v21 = vmax.f32 %v952_v23, 0.0  ;;  %v2791_v15 = vadd.f32 %v7809_v43, %v2790_v7 }
 0x25c   :  { %v12620_v62 = vmax.f32 %v7859_v58, 0.0  ;;  %12845 = vst [vmem:[#allocation76_spill] sm:$0xff] %v7877_v27 }
 0x25d   :  { %2344 = vst.msk [vmem:[%s12606_s10 + $0xc0] sm:$0xff] %vm1382_vm2, %v1066_v21  ;;  %2426 = vrot.lane.b32.xlu1 %v1066_v21, %s6955_s25  ;;  %v2867_v5 = vmax.f32 %v2791_v15, 0.0  ;;  %v2675_v15 = vld [vmem:[%s12606_s10 + $0x68] sm:$0xff] }
 0x25e   :  { %2809 = vmatmul.bf16.gmra.mxu0 %v2699_v22  ;;  %2504 = vst.msk [vmem:[%s12606_s10 + $0xe0] sm:$0xff] %vm1382_vm2, %v12620_v62 }
 0x260   :  { %v2267_v13 = vpop.permute.xlu0 %2266  ;;  %v953_v57 = vpop.f32.mrf.mxu2 }
 0x261   :  { %2272 = vst.msk [vmem:[%s12606_s10 + $0xb0] sm:$0xff] %vm1382_vm2, %v2267_v13  ;;  %v2191_v23 = vpop.permute.xlu1 %2190  ;;  %v954_v11 = vadd.f32 %v953_v57, %v7221_v35  ;;  %v1012_v24 = vpop.f32.mrf.mxu3 }
 0x262   :  { %2276 = vst.msk [vmem:[%s12606_s10 + $0xb0] sm:$0xff] %vm1395_vm3, %v12846_v41  ;;  %v7892_v22 = vadd.f32 %v1012_v24, %v7221_v35  ;;  %v2792_v7 = vpop.f32.mrf.mxu0 }
 0x263   :  { %2196 = vst.msk [vmem:[%s12606_s10 + $0xa0] sm:$0xff] %vm1395_vm3, %v2191_v23  ;;  %v2793_v21 = vadd.f32 %v7809_v43, %v2792_v7  ;;  %v1074_v13 = vmax.f32 %v954_v11, 0.0  ;;  %v7915_v11 = vpop.f32.mrf.mxu1 }
 0x264   :  { %v1075_v57 = vmax.f32 %v7892_v22, 0.0  ;;  %12847 = vst [vmem:[#allocation77_spill] sm:$0xff] %v7915_v11 }
 0x265   :  { %v2868_v62 = vmax.f32 %v2793_v21, 0.0  ;;  %5811 = vmatmul.msk.bf16.gmra.mxu2 %vm195_vm1, %v7186_v25  ;;  %2345 = vst.msk [vmem:[%s12606_s10 + $0xc8] sm:$0xff] %vm1382_vm2, %v1074_v13  ;;  %v12848_v21 = vmax.f32 %v7631_v59, 0.0 }
 0x266   :  { %5821 = vmatmul.msk.bf16.gmra.mxu3 %vm195_vm1, %v7186_v25  ;;  %2505 = vst.msk [vmem:[%s12606_s10 + $0xe8] sm:$0xff] %vm1382_vm2, %v1075_v57  ;;  %v2674_v25 = vld [vmem:[%s12606_s10 + $0x60] sm:$0xff] }
 0x267   :  { %v2898_v35 = vpack.c.bf16 %v2868_v62, %v2867_v5  ;;  %v2700_v7 = vpack.c.bf16 %v2675_v15, %v2674_v25 }
 0x268   :  { %v956_v23 = vpop.f32.mrf.mxu2 }
 0x269   :  { %v2269_v24 = vpop.permute.xlu1 %2268  ;;  %v7918_v41 = vadd.f32 %v956_v23, %v7239_v47  ;;  %v1015_v22 = vpop.f32.mrf.mxu3  ;;  %2992 = vmatmul.bf16.gmra.mxu1 %v2898_v35 }
 0x26a   :  { %2273 = vst.msk [vmem:[%s12606_s10 + $0xb8] sm:$0xff] %vm1382_vm2, %v2269_v24  ;;  %v2795_v62 = vpop.f32.mrf.mxu0 }
 0x26b   :  { %2277 = vst.msk [vmem:[%s12606_s10 + $0xb8] sm:$0xff] %vm1395_vm3, %v12848_v21  ;;  %v12621_v5 = vmax.f32 %v7918_v41, 0.0  ;;  %v2796_v23 = vadd.f32 %v7809_v43, %v2795_v62  ;;  %v7944_v27 = vpop.f32.mrf.mxu1 }
 0x26c   :  { %12849 = vst [vmem:[#allocation78_spill] sm:$0xff] %v7944_v27  ;;  %v369_v27 = vld [vmem:[#allocation7 + $0x30] sm:$0xff] }
 0x26d   :  { %2350 = vrot.lane.b32.xlu2 %v12621_v5, %s6955_s25  ;;  %v2869_v5 = vmax.f32 %v2796_v23, 0.0 }
 0x26e   :  { %2814 = vmatmul.bf16.gmra.mxu0 %v2700_v7 }
 0x270   :  { %v958_v35 = vpop.f32.mrf.mxu2 }
 0x271   :  { %v7939_v24 = vadd.f32 %v958_v35, %v7194_v26  ;;  %v1017_v15 = vpop.f32.mrf.mxu3  ;;  %v2676_v35 = vld [vmem:[%s12606_s10 + $0x70] sm:$0xff] }
 0x272   :  { %v7942_v59 = vadd.f32 %v1017_v15, %v7194_v26  ;;  %v2797_v25 = vpop.f32.mrf.mxu0  ;;  %v7957_v26 = vadd.f32 %v1015_v22, %v7239_v47  ;;  %v2677_v15 = vld [vmem:[%s12606_s10 + $0x78] sm:$0xff] }
 0x273   :  { %v2798_v21 = vadd.f32 %v7809_v43, %v2797_v25  ;;  %v12623_v7 = vmax.f32 %v7939_v24, 0.0  ;;  %v2701_v25 = vpack.c.bf16 %v2677_v15, %v2676_v35  ;;  %v7968_v47 = vpop.f32.mrf.mxu1  ;;  %v373_v35 = vld [vmem:[#allocation7 + $0x50] sm:$0xff] }
 0x274   :  { %v12622_v11 = vmax.f32 %v7942_v59, 0.0  ;;  %12850 = vst [vmem:[#allocation79_spill] sm:$0xff] %v7968_v47 }
 0x275   :  { %v2870_v54 = vmax.f32 %v2798_v21, 0.0  ;;  %2352 = vrot.lane.b32.xlu0 %v12623_v7, %s6955_s25  ;;  %2428 = vrot.lane.b32.xlu2 %v1074_v13, %s6955_s25  ;;  %v12624_v21 = vmax.f32 %v7957_v26, 0.0 }
 0x276   :  { %2512 = vrot.lane.b32.xlu1 %v12622_v11, %s6955_s25  ;;  %v372_v11 = vld [vmem:[#allocation7 + $0x48] sm:$0xff] }
 0x277   :  { %v2899_v62 = vpack.c.bf16 %v2870_v54, %v2869_v5  ;;  %v12851_v54 = vmax.f32 %v7859_v58, 0.0 }
 0x279   :  { %v7962_v23 = vpop.f32.mrf.mxu3  ;;  %2997 = vmatmul.bf16.gmra.mxu1 %v2899_v62 }
 0x27a   :  { %v2800_v13 = vpop.f32.mrf.mxu0 }
 0x27b   :  { %v2801_v22 = vadd.f32 %v7809_v43, %v2800_v13 }
 0x27d   :  { %2510 = vrot.lane.b32.xlu0 %v12624_v21, %s6955_s25  ;;  %2586 = vrot.lane.b32.xlu2 %v12851_v54, %s6955_s25  ;;  %v2871_v7 = vmax.f32 %v2801_v22, 0.0  ;;  %v7981_v21 = vpop.f32.mrf.mxu1  ;;  %v2678_v54 = vld [vmem:[%s12606_s10 + $0x80] sm:$0xff] }
 0x27e   :  { %2819 = vmatmul.bf16.gmra.mxu0 %v2701_v25  ;;  %426 = vperm.xlu1 %6249, %v372_v11   ;;  %v381_v25 = vld [vmem:[#allocation7 + $0x90] sm:$0xff] }
 0x27f   :  { %v2679_v11 = vld [vmem:[%s12606_s10 + $0x88] sm:$0xff] }
 0x280   :  { %v2702_v22 = vpack.c.bf16 %v2679_v11, %v2678_v54  ;;  %v2680_v54 = vld [vmem:[%s12606_s10 + $0x90] sm:$0xff] }
 0x281   :  { %v7977_v5 = vpop.f32.mrf.mxu3 }
 0x282   :  { %v2802_v62 = vpop.f32.mrf.mxu0 }
 0x283   :  { %v2803_v15 = vadd.f32 %v7809_v43, %v2802_v62  ;;  %v380_v62 = vld [vmem:[#allocation7 + $0x88] sm:$0xff] }
 0x285   :  { %v2872_v47 = vmax.f32 %v2803_v15, 0.0  ;;  %2588 = vrot.lane.b32.xlu0 %v1075_v57, %s6955_s25  ;;  %431 = vperm.xlu2 %6250, %v373_v35   ;;  %v374_v15 = vld [vmem:[#allocation7 + $0x58] sm:$0xff]  ;;  %v375_v35 = vld [vmem:[#allocation7 + $0x60] sm:$0xff] }
 0x286   :  { %471 = vperm.xlu1 %6249, %v381_v25   ;;  %v382_v57 = vld [vmem:[#allocation7 + $0x98] sm:$0xff]  ;;  %v383_v25 = vld [vmem:[#allocation7 + $0xa0] sm:$0xff] }
 0x287   :  { %v2900_v58 = vpack.c.bf16 %v2872_v47, %v2871_v7  ;;  %v7991_v7 = vpop.f32.mrf.mxu1 }
 0x289   :  { %v7986_v13 = vpop.f32.mrf.mxu3  ;;  %3002 = vmatmul.bf16.gmra.mxu1 %v2900_v58  ;;  %v2681_v58 = vld [vmem:[%s12606_s10 + $0x98] sm:$0xff] }
 0x28a   :  { %12852 = vst [vmem:[#allocation80_spill] sm:$0xff] %v7986_v13 }
 0x28d   :  { %466 = vperm.xlu0 %6248, %v380_v62   ;;  %436 = vperm.xlu2 %6250, %v374_v15   ;;  %v368_v62 = vld [vmem:[#allocation7 + $0x28] sm:$0xff] }
 0x28e   :  { %2824 = vmatmul.bf16.gmra.mxu0 %v2702_v22  ;;  %476 = vperm.xlu1 %6249, %v382_v57   ;;  %v2703_v22 = vpack.c.bf16 %v2681_v58, %v2680_v54  ;;  %v376_v15 = vld [vmem:[#allocation7 + $0x68] sm:$0xff]  ;;  %v2683_v58 = vld [vmem:[%s12606_s10 + $0xa8] sm:$0xff] }
 0x28f   :  { %v8003_v57 = vpop.f32.mrf.mxu1 }
 0x290   :  { %12855 = vst [vmem:[#allocation83_spill] sm:$0xff] %v8003_v57 }
 0x291   :  { %v7993_v47 = vpop.f32.mrf.mxu3 }
 0x292   :  { %12853 = vst [vmem:[#allocation81_spill] sm:$0xff] %v7993_v47 }
 0x295   :  { %441 = vperm.xlu0 %6248, %v375_v35   ;;  %481 = vperm.xlu2 %6250, %v383_v25  }
 0x296   :  { %411 = vperm.xlu1 %6249, %v369_v27   ;;  %v377_v27 = vld [vmem:[#allocation7 + $0x70] sm:$0xff] }
 0x297   :  { %v8007_v25 = vpop.f32.mrf.mxu1 }
 0x298   :  { %12857 = vst [vmem:[#allocation85_spill] sm:$0xff] %v8007_v25 }
 0x299   :  { %v7998_v11 = vpop.f32.mrf.mxu3 }
 0x29a   :  { %12854 = vst [vmem:[#allocation82_spill] sm:$0xff] %v7998_v11  ;;  %v2682_v11 = vld [vmem:[%s12606_s10 + $0xa0] sm:$0xff] }
 0x29b   :  { %v2704_v54 = vpack.c.bf16 %v2683_v58, %v2682_v11  ;;  %v2684_v11 = vld [vmem:[%s12606_s10 + $0xb0] sm:$0xff] }
 0x29d   :  { %406 = vperm.xlu0 %6248, %v368_v62   ;;  %446 = vperm.xlu2 %6250, %v376_v15  }
 0x29e   :  { %2829 = vmatmul.bf16.gmra.mxu0 %v2703_v22  ;;  %v8017_v22 = vpop.f32.mrf.mxu2 }
 0x29f   :  { %v8019_v62 = vpop.f32.mrf.mxu1 }
 0x2a0   :  { %12859 = vst [vmem:[#allocation87_spill] sm:$0xff] %v8019_v62 }
 0x2a1   :  { %v8005_v35 = vpop.f32.mrf.mxu3 }
 0x2a2   :  { %12856 = vst [vmem:[#allocation84_spill] sm:$0xff] %v8005_v35 }
 0x2a5   :  { %451 = vperm.xlu0 %6248, %v377_v27   ;;  %v2685_v27 = vld [vmem:[%s12606_s10 + $0xb8] sm:$0xff] }
 0x2a6   :  { %v8023_v35 = vpop.f32.mrf.mxu2  ;;  %v2705_v58 = vpack.c.bf16 %v2685_v27, %v2684_v11  ;;  %v5946_v27 = vld [vmem:[#allocation13 + $0x78] sm:$0xf0] }
 0x2a7   :  { %v8028_v57 = vpop.f32.mrf.mxu1  ;;  %v5949_v11 = vor.u32 %v6182_v32, %v5946_v27 }
 0x2a8   :  { %12861 = vst [vmem:[#allocation89_spill] sm:$0xff] %v8028_v57 }
 0x2a9   :  { %v8012_v47 = vpop.f32.mrf.mxu3  ;;  %3892 = vmatpush.bf16.msrb.mxu0 %v5949_v11  ;;  %v6198_v11 = vld [vmem:[#allocation13 + $0xf4] sm:$0xf] }
 0x2aa   :  { %12858 = vst [vmem:[#allocation86_spill] sm:$0xff] %v8012_v47 }
 0x2ae   :  { %2834 = vmatmul.bf16.gmra.mxu0 %v2704_v54  ;;  %v8035_v54 = vpop.f32.mrf.mxu2 }
 0x2af   :  { %12862 = vst [vmem:[#allocation90_spill] sm:$0xff] %v8035_v54 }
 0x2b1   :  { %v8021_v15 = vpop.f32.mrf.mxu3 }
 0x2b2   :  { %12860 = vst [vmem:[#allocation88_spill] sm:$0xff] %v8021_v15  ;;  %v8039_v15 = vpop.f32.mrf.mxu1 }
 0x2b3   :  { %12863 = vst [vmem:[#allocation91_spill] sm:$0xff] %v8039_v15 }
 0x2b6   :  { %v8047_v3 = vpop.f32.mrf.mxu2 }
 0x2b7   :  { %12865 = vst [vmem:[#allocation93_spill] sm:$0xff] %v8047_v3 }
 0x2b9   :  { %v8030_v47 = vpop.f32.mrf.mxu3 }
 0x2be   :  { %2839 = vmatmul.bf16.gmra.mxu0 %v2705_v58  ;;  %v8049_v58 = vpop.f32.mrf.mxu1  ;;  %v8077_v3 = vpop.f32.mrf.mxu2 }
 0x2bf   :  { %12866 = vst [vmem:[#allocation94_spill] sm:$0xff] %v8049_v58  ;;  %v6010_v58 = vld [vmem:[#allocation13 + $0xf8] sm:$0xf0] }
 0x2c0   :  { %12870 = vst [vmem:[#allocation96_spill] sm:$0xff] %v8077_v3 }
 0x2c1   :  { %v8037_v62 = vpop.f32.mrf.mxu3 }
 0x2c7   :  { %v2351_v13 = vpop.permute.xlu2 %2350 }
 0x2c8   :  { %2356 = vst.msk [vmem:[%s12606_s10 + $0xc0] sm:$0xff] %vm1395_vm3, %v2351_v13  ;;  %v12867_v13 = vmax.f32 %v7939_v24, 0.0  ;;  %v8075_v24 = vld [vmem:[#allocation11 + $0x1] ss:$0 sm:$0xff] }
 0x2c9   :  { %v8045_v25 = vpop.f32.mrf.mxu3 }
 0x2ca   :  { %12864 = vst [vmem:[#allocation92_spill] sm:$0xff] %v8045_v25 }
 0x2cb   :  { %v2805_v57 = vpop.f32.mrf.mxu0 }
 0x2cc   :  { %v2806_v15 = vadd.f32 %v7809_v43, %v2805_v57 }
 0x2ce   :  { %v2873_v25 = vmax.f32 %v2806_v15, 0.0 }
 0x2cf   :  { %v2429_v54 = vpop.permute.xlu2 %2428  ;;  %v2427_v20 = vpop.permute.xlu1 %2426  ;;  %v2686_v3 = vld [vmem:[%s12606_s10 + $0xc0] sm:$0xff] }
 0x2d0   :  { %2433 = vst.msk [vmem:[%s12606_s10 + $0xd8] sm:$0xff] %vm1382_vm2, %v2429_v54  ;;  %v12869_v54 = vmax.f32 %v7918_v41, 0.0  ;;  %v12871_v41 = vmax.f32 %v7957_v26, 0.0 }
 0x2d1   :  { %2437 = vst.msk [vmem:[%s12606_s10 + $0xd8] sm:$0xff] %vm1395_vm3, %v12867_v13  ;;  %v8062_v27 = vpop.f32.mrf.mxu3  ;;  %v6013_v13 = vor.u32 %v6198_v11, %v6010_v58 }
 0x2d2   :  { %12868 = vst [vmem:[#allocation95_spill] sm:$0xff] %v8062_v27 }
 0x2d3   :  { %v2807_v32 = vpop.f32.mrf.mxu0  ;;  %2432 = vst.msk [vmem:[%s12606_s10 + $0xd0] sm:$0xff] %vm1382_vm2, %v2427_v20  ;;  %4061 = vmatpush.bf16.msrb.mxu1 %v6013_v13 }
 0x2d4   :  { %v2808_v57 = vadd.f32 %v7809_v43, %v2807_v32  ;;  %2436 = vst.msk [vmem:[%s12606_s10 + $0xd0] sm:$0xff] %vm1395_vm3, %v12869_v54 }
 0x2d6   :  { %v2874_v27 = vmax.f32 %v2808_v57, 0.0  ;;  %v2988_v20 = vpop.f32.mrf.mxu1 }
 0x2d7   :  { %v2989_v32 = vadd.f32 %v8075_v24, %v2988_v20  ;;  %v2587_v52 = vpop.permute.xlu2 %2586 }
 0x2d8   :  { %v2901_v53 = vpack.c.bf16 %v2874_v27, %v2873_v25  ;;  %2592 = vst.msk [vmem:[%s12606_s10 + $0xf0] sm:$0xff] %vm1382_vm2, %v2587_v52  ;;  %v8092_v25 = vpop.f32.mrf.mxu2 }
 0x2d9   :  { %6253 = vtanh.f32 %v2989_v32  ;;  %2596 = vst.msk [vmem:[%s12606_s10 + $0xf0] sm:$0xff] %vm1395_vm3, %v12871_v41  ;;  %v8090_v58 = vpop.f32.mrf.mxu3 }
 0x2da   :  { %3007 = vmatmul.bf16.gmra.mxu1 %v2901_v53  ;;  %12872 = vst [vmem:[#allocation97_spill] sm:$0xff] %v8090_v58 }
 0x2db   :  { %v2810_v15 = vpop.f32.mrf.mxu0  ;;  %12873 = vst [vmem:[#allocation98_spill] sm:$0xff] %v8092_v25 }
 0x2dc   :  { %v2811_v26 = vadd.f32 %v7809_v43, %v2810_v15 }
 0x2de   :  { %v2990_v27 = vpop.f32.mrf.mxu1 }
 0x2df   :  { %v6254_v53 = vpop.eup %6253  ;;  %v2991_v57 = vadd.f32 %v8075_v24, %v2990_v27  ;;  %v8095_v11 = vpop.permute.xlu2 %431  ;;  %v2875_v27 = vmax.f32 %v2811_v26, 0.0 }
 0x2e0   :  { %12874 = vst [vmem:[#allocation99_spill] sm:$0xff] %v8095_v11  ;;  %v3100_v52 = vmul.f32 %v6254_v53, %v7493_v61  ;;  %v8101_v54 = vadd.f32 %v7320_v10, %v8095_v11  ;;  %v976_v58 = vpop.f32.mrf.mxu2 }
 0x2e1   :  { %6255 = vtanh.f32 %v2991_v57  ;;  %v8103_v20 = vpop.f32.mrf.mxu3 }
 0x2e2   :  { %12875 = vst [vmem:[#allocation100_spill] sm:$0xff] %v8101_v54  ;;  %v12625_v41 = vmax.f32 %v8101_v54, 0.0 }
 0x2e3   :  { %v2812_v13 = vpop.f32.mrf.mxu0  ;;  %12876 = vst [vmem:[#allocation101_spill] sm:$0xff] %v8103_v20 }
 0x2e4   :  { %3132 = vst [vmem:[%s12606_s10] sm:$0xff] %v3100_v52  ;;  %v2813_v32 = vadd.f32 %v7809_v43, %v2812_v13  ;;  %1416 = vrot.lane.b32.xlu2 %v12625_v41, %s6955_s25 }
 0x2e6   :  { %v2876_v61 = vmax.f32 %v2813_v32, 0.0  ;;  %v2993_v10 = vpop.f32.mrf.mxu1 }
 0x2e7   :  { %v6256_v53 = vpop.eup %6255  ;;  %v2994_v57 = vadd.f32 %v8075_v24, %v2993_v10  ;;  %v2353_v20 = vpop.permute.xlu0 %2352 }
 0x2e8   :  { %v2902_v15 = vpack.c.bf16 %v2876_v61, %v2875_v27  ;;  %v8114_v25 = vpop.permute.xlu2 %436  ;;  %v3101_v52 = vmul.f32 %v6256_v53, %v7498_v38  ;;  %2357 = vst.msk [vmem:[%s12606_s10 + $0xc8] sm:$0xff] %vm1395_vm3, %v2353_v20  ;;  %v2513_v26 = vpop.permute.xlu1 %2512  ;;  %v370_v27 = vld [vmem:[#allocation7 + $0x38] sm:$0xff]  ;;  %v6180_v38 = vld [vmem:[#allocation13 + $0x64] sm:$0xf] }
 0x2e9   :  { %6257 = vtanh.f32 %v2994_v57  ;;  %2517 = vst.msk [vmem:[%s12606_s10 + $0xe8] sm:$0xff] %vm1395_vm3, %v2513_v26  ;;  %v8125_v32 = vpop.f32.mrf.mxu3  ;;  %v5938_v61 = vld [vmem:[#allocation13 + $0x68] sm:$0xf0]  ;;  %v8131_v10 = vadd.f32 %v976_v58, %v8114_v25 }
 0x2ea   :  { %3012 = vmatmul.bf16.gmra.mxu1 %v2902_v15  ;;  %3133 = vst [vmem:[%s12606_s10 + $0x8] sm:$0xff] %v3101_v52  ;;  %v5941_v20 = vor.u32 %v6180_v38, %v5938_v61 }
 0x2eb   :  { %v2815_v13 = vpop.f32.mrf.mxu0  ;;  %12877 = vst [vmem:[#allocation102_spill] sm:$0xff] %v8131_v10  ;;  %v379_v10 = vld [vmem:[#allocation7 + $0x80] sm:$0xff] }
 0x2ec   :  { %416 = vperm.xlu2 %6250, %v370_v27   ;;  %3893 = vmatpush.bf16.msrb.mxu0 %v5941_v20  ;;  %v2816_v27 = vadd.f32 %v7809_v43, %v2815_v13 }
 0x2ee   :  { %v2995_v15 = vpop.f32.mrf.mxu1 }
 0x2ef   :  { %v6258_v53 = vpop.eup %6257  ;;  %v2996_v57 = vadd.f32 %v8075_v24, %v2995_v15  ;;  %v2511_v26 = vpop.permute.xlu0 %2510  ;;  %v2687_v52 = vld [vmem:[%s12606_s10 + $0xc8] sm:$0xff] }
 0x2f0   :  { %v8134_v41 = vpop.permute.xlu2 %481  ;;  %v3102_v58 = vmul.f32 %v6258_v53, %v7548_v60  ;;  %2516 = vst.msk [vmem:[%s12606_s10 + $0xe0] sm:$0xff] %vm1395_vm3, %v2511_v26  ;;  %v8148_v38 = vpop.permute.xlu1 %426  ;;  %v2706_v61 = vpack.c.bf16 %v2687_v52, %v2686_v3  ;;  %v6196_v53 = vld [vmem:[#allocation13 + $0xe4] sm:$0xf]  ;;  %v6002_v3 = vld [vmem:[#allocation13 + $0xe8] sm:$0xf0]  ;;  %v2877_v52 = vmax.f32 %v2816_v27, 0.0 }
 0x2f1   :  { %12878 = vst [vmem:[#allocation103_spill] sm:$0xff] %v8148_v38  ;;  %6259 = vtanh.f32 %v2996_v57  ;;  %v1057_v15 = vpop.f32.mrf.mxu3  ;;  %v8152_v11 = vadd.f32 %v7315_v8, %v8148_v38  ;;  %v6005_v26 = vor.u32 %v6196_v53, %v6002_v3 }
 0x2f2   :  { %3134 = vst [vmem:[%s12606_s10 + $0x10] sm:$0xff] %v3102_v58  ;;  %v8159_v13 = vadd.f32 %v1057_v15, %v8134_v41  ;;  %2844 = vmatmul.bf16.gmra.mxu0 %v2706_v61 }
 0x2f3   :  { %v2817_v20 = vpop.f32.mrf.mxu0  ;;  %v12637_v57 = vmax.f32 %v8152_v11, 0.0  ;;  %4062 = vmatpush.bf16.msrb.mxu1 %v6005_v26 }
 0x2f4   :  { %v2818_v60 = vadd.f32 %v7809_v43, %v2817_v20  ;;  %12879 = vst [vmem:[#allocation104_spill] sm:$0xff] %v8159_v13  ;;  %461 = vperm.xlu2 %6250, %v379_v10  }
 0x2f5   :  { %1414 = vrot.lane.b32.xlu1 %v12637_v57, %s6955_s25 }
 0x2f6   :  { %v2878_v54 = vmax.f32 %v2818_v60, 0.0  ;;  %v2998_v8 = vpop.f32.mrf.mxu1 }
 0x2f7   :  { %v6260_v20 = vpop.eup %6259  ;;  %v2999_v15 = vadd.f32 %v8075_v24, %v2998_v8  ;;  %v2589_v13 = vpop.permute.xlu0 %2588 }
 0x2f8   :  { %v2903_v58 = vpack.c.bf16 %v2878_v54, %v2877_v52  ;;  %v8166_v61 = vpop.permute.xlu2 %446  ;;  %v3103_v38 = vmul.f32 %v6260_v20, %v7553_v9  ;;  %2593 = vst.msk [vmem:[%s12606_s10 + $0xf8] sm:$0xff] %vm1382_vm2, %v2589_v13  ;;  %v8173_v10 = vpop.permute.xlu1 %471  ;;  %v12880_v54 = vmax.f32 %v7942_v59, 0.0 }
 0x2f9   :  { %v8177_v27 = vadd.f32 %v7344_v16, %v8166_v61  ;;  %6261 = vtanh.f32 %v2999_v15  ;;  %v8187_v60 = vadd.f32 %v7374_v50, %v8173_v10  ;;  %v8191_v13 = vadd.f32 %v7693_v48, %v8166_v61 }
 0x2fa   :  { %3017 = vmatmul.bf16.gmra.mxu1 %v2903_v58  ;;  %2597 = vst.msk [vmem:[%s12606_s10 + $0xf8] sm:$0xff] %vm1395_vm3, %v12880_v54  ;;  %v8199_v59 = vadd.f32 %v7346_v17, %v8166_v61  ;;  %v8212_v48 = vadd.f32 %v7695_v6, %v8166_v61  ;;  %v2688_v17 = vld [vmem:[%s12606_s10 + $0xd0] sm:$0xff] }
 0x2fb   :  { %v2820_v9 = vpop.f32.mrf.mxu0  ;;  %3135 = vst [vmem:[%s12606_s10 + $0x18] sm:$0xff] %v3103_v38  ;;  %v12641_v16 = vmax.f32 %v8177_v27, 0.0  ;;  %v12634_v53 = vmax.f32 %v8187_v60, 0.0  ;;  %v12633_v3 = vmax.f32 %v8191_v13, 0.0  ;;  %v2689_v38 = vld [vmem:[%s12606_s10 + $0xd8] sm:$0xff] }
 0x2fc   :  { %v12636_v50 = vmax.f32 %v8199_v59, 0.0  ;;  %v12635_v26 = vmax.f32 %v8212_v48, 0.0  ;;  %v2821_v15 = vadd.f32 %v7809_v43, %v2820_v9  ;;  %v8259_v9 = vadd.f32 %v7981_v21, %v8166_v61  ;;  %v6178_v21 = vld [vmem:[#allocation13 + $0x54] sm:$0xf] }
 0x2fd   :  { %1434 = vst.msk [vmem:[%s12607_s11 + $0x8] sm:$0xff] %vm1382_vm2, %v12641_v16  ;;  %1448 = vrot.lane.b32.xlu1 %v12634_v53, %s6955_s25 }
 0x2fe   :  { %1754 = vst.msk [vmem:[%s12607_s11 + $0x108] sm:$0xff] %vm1382_vm2, %v12633_v3  ;;  %v3000_v6 = vpop.f32.mrf.mxu1  ;;  %v2707_v3 = vpack.c.bf16 %v2689_v38, %v2688_v17  ;;  %v378_v38 = vld [vmem:[#allocation7 + $0x78] sm:$0xff] }
 0x2ff   :  { %1594 = vst.msk [vmem:[%s12607_s11 + $0x88] sm:$0xff] %vm1382_vm2, %v12636_v50  ;;  %v6262_v52 = vpop.eup %6261  ;;  %v3001_v8 = vadd.f32 %v8075_v24, %v3000_v6  ;;  %v8237_v58 = vpop.permute.xlu0 %466 }
 0x300   :  { %v3104_v20 = vmul.f32 %v6262_v52, %v7605_v1  ;;  %v8241_v54 = vpop.permute.xlu1 %476  ;;  %v8245_v53 = vadd.f32 %v7368_v39, %v8237_v58  ;;  %1914 = vst.msk [vmem:[%s12607_s11 + $0x188] sm:$0xff] %vm1382_vm2, %v12635_v26 }
 0x301   :  { %6263 = vtanh.f32 %v3001_v8  ;;  %v8255_v1 = vadd.f32 %v7388_v37, %v8241_v54  ;;  %12881 = vst [vmem:[#allocation105_spill] sm:$0xff] %v8259_v9  ;;  %v8269_v37 = vadd.f32 %v7656_v29, %v8166_v61  ;;  %v2879_v8 = vmax.f32 %v2821_v15, 0.0 }
 0x302   :  { %3136 = vst [vmem:[%s12606_s10 + $0x20] sm:$0xff] %v3104_v20  ;;  %2849 = vmatmul.bf16.gmra.mxu0 %v2707_v3  ;;  %v12639_v17 = vmax.f32 %v8245_v53, 0.0  ;;  %v5930_v20 = vld [vmem:[#allocation13 + $0x58] sm:$0xf0] }
 0x303   :  { %v2822_v6 = vpop.f32.mrf.mxu0  ;;  %v12638_v52 = vmax.f32 %v8255_v1, 0.0  ;;  %12882 = vst [vmem:[#allocation106_spill] sm:$0xff] %v8269_v37  ;;  %v5933_v3 = vor.u32 %v6178_v21, %v5930_v20 }
 0x304   :  { %v2823_v39 = vadd.f32 %v7809_v43, %v2822_v6  ;;  %1446 = vrot.lane.b32.xlu0 %v12639_v17, %s6955_s25  ;;  %v12640_v6 = vmax.f32 %v8259_v9, 0.0 }
 0x305   :  { %456 = vperm.xlu1 %6249, %v378_v38   ;;  %1450 = vrot.lane.b32.xlu2 %v12638_v52, %s6955_s25  ;;  %v12642_v38 = vmax.f32 %v8269_v37, 0.0  ;;  %v371_v52 = vld [vmem:[#allocation7 + $0x40] sm:$0xff] }
 0x306   :  { %v2880_v26 = vmax.f32 %v2823_v39, 0.0  ;;  %v3003_v50 = vpop.f32.mrf.mxu1  ;;  %3894 = vmatpush.bf16.msrb.mxu0 %v5933_v3  ;;  %2234 = vst.msk [vmem:[%s12607_s11 + $0x288] sm:$0xff] %vm1382_vm2, %v12640_v6 }
 0x307   :  { %v6264_v29 = vpop.eup %6263  ;;  %v3004_v15 = vadd.f32 %v8075_v24, %v3003_v50  ;;  %v8279_v39 = vpop.permute.xlu0 %441  ;;  %2074 = vst.msk [vmem:[%s12607_s11 + $0x208] sm:$0xff] %vm1382_vm2, %v12642_v38 }
 0x308   :  { %v2904_v57 = vpack.c.bf16 %v2880_v26, %v2879_v8  ;;  %v3105_v21 = vmul.f32 %v6264_v29, %v7610_v56  ;;  %v8289_v20 = vpop.permute.xlu1 %411  ;;  %v8293_v50 = vadd.f32 %v7336_v14, %v8279_v39  ;;  %v6194_v26 = vld [vmem:[#allocation13 + $0xd4] sm:$0xf]  ;;  %v5994_v8 = vld [vmem:[#allocation13 + $0xd8] sm:$0xf0]  ;;  %v8307_v14 = vpop.f32.mrf.mxu2 }
 0x309   :  { %6265 = vtanh.f32 %v3004_v15  ;;  %v610_v17 = vadd.f32 %v7231_v45, %v8289_v20  ;;  %v5997_v6 = vor.u32 %v6194_v26, %v5994_v8  ;;  %v8299_v16 = vadd.f32 %v7237_v46, %v8289_v20  ;;  %12883 = vst [vmem:[#allocation107_spill] sm:$0xff] %v8307_v14  ;;  %v2690_v15 = vld [vmem:[%s12606_s10 + $0xe0] sm:$0xff] }
 0x30a   :  { %3022 = vmatmul.bf16.gmra.mxu1 %v2904_v57  ;;  %3137 = vst [vmem:[%s12606_s10 + $0x28] sm:$0xff] %v3105_v21  ;;  %v12643_v45 = vmax.f32 %v8293_v50, 0.0  ;;  %v8316_v57 = vadd.f32 %v7588_v28, %v8289_v20  ;;  %v8320_v29 = vadd.f32 %v7582_v4, %v8289_v20  ;;  %v8327_v21 = vadd.f32 %v7428_v49, %v8289_v20 }
 0x30b   :  { %v2825_v3 = vpop.f32.mrf.mxu0  ;;  %v1100_v56 = vmax.f32 %v610_v17, 0.0  ;;  %4063 = vmatpush.bf16.msrb.mxu1 %v5997_v6  ;;  %v12644_v46 = vmax.f32 %v8299_v16, 0.0  ;;  %v8339_v28 = vadd.f32 %v7332_v12, %v8114_v25 }
 0x30c   :  { %421 = vperm.xlu0 %6248, %v371_v52   ;;  %12884 = vst [vmem:[#allocation108_spill] sm:$0xff] %v8327_v21  ;;  %v12646_v4 = vmax.f32 %v8316_v57, 0.0  ;;  %v12645_v49 = vmax.f32 %v8320_v29, 0.0  ;;  %v2691_v52 = vld [vmem:[%s12606_s10 + $0xe8] sm:$0xff]  ;;  %v12647_v6 = vmax.f32 %v8327_v21, 0.0  ;;  %v2826_v26 = vadd.f32 %v7809_v43, %v2825_v3 }
 0x30d   :  { %1420 = vrot.lane.b32.xlu1 %v12643_v45, %s6955_s25  ;;  %1488 = vrot.lane.b32.xlu2 %v1100_v56, %s6955_s25  ;;  %1403 = vst.msk [vmem:[%s12607_s11 + $0x10] sm:$0xff] %vm1382_vm2, %v1100_v56  ;;  %v2708_v38 = vpack.c.bf16 %v2691_v52, %v2690_v15 }
 0x30e   :  { %v3005_v17 = vpop.f32.mrf.mxu1  ;;  %1563 = vst.msk [vmem:[%s12607_s11 + $0x90] sm:$0xff] %vm1382_vm2, %v12644_v46 }
 0x30f   :  { %v6266_v12 = vpop.eup %6265  ;;  %v3006_v8 = vadd.f32 %v8075_v24, %v3005_v17  ;;  %v8355_v56 = vpop.permute.xlu0 %406  ;;  %1883 = vst.msk [vmem:[%s12607_s11 + $0x190] sm:$0xff] %vm1382_vm2, %v12646_v4  ;;  %v12654_v17 = vmax.f32 %v8339_v28, 0.0 }
 0x310   :  { %v3106_v45 = vmul.f32 %v6266_v12, %v7663_v0  ;;  %v608_v46 = vadd.f32 %v7219_v34, %v8355_v56  ;;  %v8368_v3 = vadd.f32 %v7223_v36, %v8355_v56  ;;  %1723 = vst.msk [vmem:[%s12607_s11 + $0x110] sm:$0xff] %vm1382_vm2, %v12645_v49  ;;  %v8378_v15 = vadd.f32 %v7563_v31, %v8355_v56 }
 0x311   :  { %6267 = vtanh.f32 %v3006_v8  ;;  %v8383_v34 = vadd.f32 %v7402_v63, %v8355_v56  ;;  %v8387_v36 = vadd.f32 %v7565_v51, %v8355_v56  ;;  %2043 = vst.msk [vmem:[%s12607_s11 + $0x210] sm:$0xff] %vm1382_vm2, %v12647_v6  ;;  %v981_v8 = vpop.f32.mrf.mxu2  ;;  %v2881_v49 = vmax.f32 %v2826_v26, 0.0 }
 0x312   :  { %3138 = vst [vmem:[%s12606_s10 + $0x30] sm:$0xff] %v3106_v45  ;;  %2854 = vmatmul.bf16.gmra.mxu0 %v2708_v38  ;;  %v1092_v63 = vmax.f32 %v608_v46, 0.0  ;;  %v12668_v52 = vmax.f32 %v8368_v3, 0.0  ;;  %v12648_v51 = vmax.f32 %v8378_v15, 0.0  ;;  %v8411_v38 = vadd.f32 %v8023_v35, %v8289_v20 }
 0x313   :  { %v2827_v0 = vpop.f32.mrf.mxu0  ;;  %v12651_v12 = vmax.f32 %v8383_v34, 0.0  ;;  %v8416_v45 = vadd.f32 %v7414_v55, %v8134_v41  ;;  %v12649_v46 = vmax.f32 %v8387_v36, 0.0 }
 0x314   :  { %v2828_v31 = vadd.f32 %v7809_v43, %v2827_v0  ;;  %1418 = vrot.lane.b32.xlu0 %v12654_v17, %s6955_s25  ;;  %1402 = vst.msk [vmem:[%s12607_s11] sm:$0xff] %vm1382_vm2, %v1092_v63  ;;  %v12650_v0 = vmax.f32 %v8411_v38, 0.0 }
 0x315   :  { %12885 = vst [vmem:[#allocation109_spill] sm:$0xff] %v8411_v38  ;;  %1486 = vrot.lane.b32.xlu1 %v1092_v63, %s6955_s25 }
 0x316   :  { %v2882_v4 = vmax.f32 %v2828_v31, 0.0  ;;  %1562 = vst.msk [vmem:[%s12607_s11 + $0x80] sm:$0xff] %vm1382_vm2, %v12668_v52 }
 0x317   :  { %1722 = vst.msk [vmem:[%s12607_s11 + $0x100] sm:$0xff] %vm1382_vm2, %v12648_v51  ;;  %v6268_v35 = vpop.eup %6267  ;;  %v452_v55 = vpop.permute.xlu0 %451  ;;  %v12652_v51 = vmax.f32 %v8416_v45, 0.0 }
 0x318   :  { %v2905_v26 = vpack.c.bf16 %v2882_v4, %v2881_v49  ;;  %2042 = vst.msk [vmem:[%s12607_s11 + $0x200] sm:$0xff] %vm1382_vm2, %v12651_v12  ;;  %v3107_v4 = vmul.f32 %v6268_v35, %v7652_v2  ;;  %v630_v49 = vadd.f32 %v7348_v18, %v452_v55  ;;  %v8441_v31 = vadd.f32 %v7350_v19, %v452_v55 }
 0x319   :  { %v8444_v63 = vadd.f32 %v7697_v33, %v452_v55  ;;  %1882 = vst.msk [vmem:[%s12607_s11 + $0x180] sm:$0xff] %vm1382_vm2, %v12649_v46  ;;  %v8454_v2 = vadd.f32 %v7671_v40, %v452_v55  ;;  %v8457_v18 = vadd.f32 %v7701_v44, %v452_v55  ;;  %v8461_v19 = vadd.f32 %v7755_v30, %v8289_v20 }
 0x31a   :  { %3027 = vmatmul.bf16.gmra.mxu1 %v2905_v26  ;;  %3139 = vst [vmem:[%s12606_s10 + $0x38] sm:$0xff] %v3107_v4  ;;  %v1164_v33 = vmax.f32 %v630_v49, 0.0  ;;  %v12660_v26 = vmax.f32 %v8441_v31, 0.0  ;;  %v8470_v40 = vadd.f32 %v7737_v42, %v8355_v56  ;;  %v8480_v30 = vadd.f32 %v7991_v7, %v452_v55  ;;  %v5944_v42 = vld [vmem:[#allocation13 + $0x70] sm:$0xf]  ;;  %v2693_v7 = vld [vmem:[%s12606_s10 + $0xf8] sm:$0xff] }
 0x31b   :  { %v2830_v6 = vpop.f32.mrf.mxu0  ;;  %12886 = vst [vmem:[#allocation110_spill] sm:$0xff] %v8461_v19  ;;  %v12653_v35 = vmax.f32 %v8444_v63, 0.0  ;;  %v12655_v44 = vmax.f32 %v8454_v2, 0.0  ;;  %v6183_v4 = vld [vmem:[#allocation13 + $0x74] sm:$0xf0]  ;;  %v12659_v49 = vmax.f32 %v8457_v18, 0.0  ;;  %v8492_v46 = vadd.f32 %v7962_v23, %v8355_v56 }
 0x31c   :  { %12887 = vst [vmem:[#allocation111_spill] sm:$0xff] %v8470_v40  ;;  %1452 = vrot.lane.b32.xlu0 %v12652_v51, %s6955_s25  ;;  %v12658_v12 = vmax.f32 %v8461_v19, 0.0  ;;  %v983_v51 = vpop.f32.mrf.mxu2  ;;  %v2831_v23 = vadd.f32 %v7809_v43, %v2830_v6  ;;  %v12657_v6 = vmax.f32 %v8480_v30, 0.0 }
 0x31d   :  { %2363 = vst.msk [vmem:[%s12607_s11 + $0x310] sm:$0xff] %vm1382_vm2, %v12650_v0  ;;  %1520 = vrot.lane.b32.xlu1 %v1164_v33, %s6955_s25  ;;  %v5945_v0 = vor.u32 %v6183_v4, %v5944_v42  ;;  %v8515_v42 = vadd.f32 %v8017_v22, %v8355_v56  ;;  %v2692_v4 = vld [vmem:[%s12606_s10 + $0xf0] sm:$0xff]  ;;  %v8530_v17 = vadd.f32 %v983_v51, %v452_v55 }
 0x31e   :  { %12888 = vst [vmem:[#allocation112_spill] sm:$0xff] %v8480_v30  ;;  %v8533_v22 = vadd.f32 %v981_v8, %v8166_v61  ;;  %v2709_v56 = vpack.c.bf16 %v2693_v7, %v2692_v4  ;;  %v2883_v51 = vmax.f32 %v2831_v23, 0.0 }
 0x31f   :  { %1435 = vst.msk [vmem:[%s12607_s11 + $0x18] sm:$0xff] %vm1382_vm2, %v1164_v33  ;;  %v12656_v33 = vmax.f32 %v8470_v40, 0.0  ;;  %3554 = vmatpush.bf16.msrb.mxu2 %v5945_v0  ;;  %v12667_v0 = vmax.f32 %v8492_v46, 0.0  ;;  %v12663_v23 = vmax.f32 %v8530_v17, 0.0 }
 0x320   :  { %12889 = vst [vmem:[#allocation113_spill] sm:$0xff] %v8492_v46  ;;  %v12662_v4 = vmax.f32 %v8533_v22, 0.0  ;;  %v5978_v46 = vld [vmem:[#allocation13 + $0xb8] sm:$0xf0] }
 0x321   :  { %1595 = vst.msk [vmem:[%s12607_s11 + $0x98] sm:$0xff] %vm1382_vm2, %v12660_v26  ;;  %v6192_v26 = vld [vmem:[#allocation13 + $0xc4] sm:$0xf] }
 0x322   :  { %1755 = vst.msk [vmem:[%s12607_s11 + $0x118] sm:$0xff] %vm1382_vm2, %v12653_v35  ;;  %v8528_v35 = vadd.f32 %v8037_v62, %v452_v55  ;;  %2859 = vmatmul.bf16.gmra.mxu0 %v2709_v56  ;;  %v8562_v55 = vadd.f32 %v8030_v47, %v8166_v61  ;;  %v8575_v56 = vadd.f32 %v7977_v5, %v8289_v20  ;;  %v12897_v47 = vmax.f32 %v8177_v27, 0.0  ;;  %v6008_v61 = vld [vmem:[#allocation13 + $0xf0] sm:$0xf] }
 0x323   :  { %12890 = vst [vmem:[#allocation114_spill] sm:$0xff] %v8515_v42  ;;  %v2832_v62 = vpop.f32.mrf.mxu0 }
 0x324   :  { %2075 = vst.msk [vmem:[%s12607_s11 + $0x218] sm:$0xff] %vm1382_vm2, %v12655_v44  ;;  %v8544_v44 = vadd.f32 %v8125_v32, %v8241_v54  ;;  %v2833_v8 = vadd.f32 %v7809_v43, %v2832_v62  ;;  %v12666_v32 = vmax.f32 %v8515_v42, 0.0  ;;  %v12664_v7 = vmax.f32 %v8528_v35, 0.0  ;;  %1518 = vrot.lane.b32.xlu0 %v12897_v47, %s6955_s25 }
 0x325   :  { %12891 = vst [vmem:[#allocation115_spill] sm:$0xff] %v8528_v35  ;;  %v12661_v27 = vmax.f32 %v8562_v55, 0.0 }
 0x326   :  { %12892 = vst [vmem:[#allocation116_spill] sm:$0xff] %v8530_v17  ;;  %v2884_v62 = vmax.f32 %v2833_v8, 0.0  ;;  %v5986_v8 = vld [vmem:[#allocation13 + $0xc8] sm:$0xf0] }
 0x327   :  { %12893 = vst [vmem:[#allocation117_spill] sm:$0xff] %v8533_v22  ;;  %v5989_v47 = vor.u32 %v6192_v26, %v5986_v8  ;;  %v5936_v26 = vld [vmem:[#allocation13 + $0x60] sm:$0xf] }
 0x328   :  { %1915 = vst.msk [vmem:[%s12607_s11 + $0x198] sm:$0xff] %vm1382_vm2, %v12659_v49  ;;  %v5922_v49 = vld [vmem:[#allocation13 + $0x48] sm:$0xf0]  ;;  %v2906_v5 = vpack.c.bf16 %v2884_v62, %v2883_v51  ;;  %v12908_v22 = vld [vmem:[#allocation57_spill] sm:$0xff] }
 0x329   :  { %12894 = vst [vmem:[#allocation118_spill] sm:$0xff] %v8544_v44  ;;  %4064 = vmatpush.bf16.msrb.mxu1 %v5989_v47  ;;  %v6193_v44 = vld [vmem:[#allocation13 + $0xc4] sm:$0xf0] }
 0x32a   :  { %2203 = vst.msk [vmem:[%s12607_s11 + $0x290] sm:$0xff] %vm1382_vm2, %v12658_v12  ;;  %v6176_v12 = vld [vmem:[#allocation13 + $0x44] sm:$0xf]  ;;  %3032 = vmatmul.bf16.gmra.mxu1 %v2906_v5 }
 0x32b   :  { %2202 = vst.msk [vmem:[%s12607_s11 + $0x280] sm:$0xff] %vm1382_vm2, %v12656_v33  ;;  %v6199_v33 = vld [vmem:[#allocation13 + $0xf4] sm:$0xf0]  ;;  %v5925_v20 = vor.u32 %v6176_v12, %v5922_v49  ;;  %v12665_v12 = vmax.f32 %v8575_v56, 0.0  ;;  %v2835_v49 = vpop.f32.mrf.mxu0 }
 0x32c   :  { %12895 = vst [vmem:[#allocation119_spill] sm:$0xff] %v8562_v55  ;;  %v2836_v51 = vadd.f32 %v7809_v43, %v2835_v49 }
 0x32d   :  { %2235 = vst.msk [vmem:[%s12607_s11 + $0x298] sm:$0xff] %vm1382_vm2, %v12657_v6  ;;  %v6009_v6 = vor.u32 %v6199_v33, %v6008_v61  ;;  %3895 = vmatpush.bf16.msrb.mxu0 %v5925_v20  ;;  %v6181_v33 = vld [vmem:[#allocation13 + $0x64] sm:$0xf0]  ;;  %v8625_v61 = vld [vmem:[#allocation11] ss:$0 sm:$0xff] }
 0x32e   :  { %12896 = vst [vmem:[#allocation120_spill] sm:$0xff] %v8575_v56  ;;  %v2885_v20 = vmax.f32 %v2836_v51, 0.0  ;;  %v6197_v51 = vld [vmem:[#allocation13 + $0xe4] sm:$0xf0]  ;;  %v5906_v56 = vld [vmem:[#allocation13 + $0x28] sm:$0xf0] }
 0x32f   :  { %2522 = vst.msk [vmem:[%s12607_s11 + $0x380] sm:$0xff] %vm1382_vm2, %v12667_v0  ;;  %3723 = vmatpush.bf16.msrb.mxu3 %v6009_v6  ;;  %v5937_v6 = vor.u32 %v6181_v33, %v5936_v26  ;;  %v6177_v26 = vld [vmem:[#allocation13 + $0x44] sm:$0xf0] }
 0x330   :  { %2362 = vst.msk [vmem:[%s12607_s11 + $0x300] sm:$0xff] %vm1382_vm2, %v12666_v32  ;;  %v5920_v32 = vld [vmem:[#allocation13 + $0x40] sm:$0xf] }
 0x331   :  { %2555 = vst.msk [vmem:[%s12607_s11 + $0x398] sm:$0xff] %vm1382_vm2, %v12664_v7  ;;  %3555 = vmatpush.bf16.msrb.mxu2 %v5937_v6  ;;  %v5921_v43 = vor.u32 %v6177_v26, %v5920_v32  ;;  %v6000_v6 = vld [vmem:[#allocation13 + $0xe0] sm:$0xf]  ;;  %v6173_v26 = vld [vmem:[#allocation13 + $0x24] sm:$0xf0] }
 0x332   :  { %2395 = vst.msk [vmem:[%s12607_s11 + $0x318] sm:$0xff] %vm1382_vm2, %v12663_v23  ;;  %v6179_v23 = vld [vmem:[#allocation13 + $0x54] sm:$0xf0] }
 0x333   :  { %2394 = vst.msk [vmem:[%s12607_s11 + $0x308] sm:$0xff] %vm1382_vm2, %v12662_v4  ;;  %v2837_v62 = vpop.f32.mrf.mxu0  ;;  %v5928_v4 = vld [vmem:[#allocation13 + $0x50] sm:$0xf] }
 0x334   :  { %2554 = vst.msk [vmem:[%s12607_s11 + $0x388] sm:$0xff] %vm1382_vm2, %v12661_v27  ;;  %v2838_v5 = vadd.f32 %v8625_v61, %v2837_v62  ;;  %v5929_v7 = vor.u32 %v6179_v23, %v5928_v4  ;;  %v5912_v23 = vld [vmem:[#allocation13 + $0x30] sm:$0xf]  ;;  %v6174_v4 = vld [vmem:[#allocation13 + $0x34] sm:$0xf] }
 0x335   :  { %2523 = vst.msk [vmem:[%s12607_s11 + $0x390] sm:$0xff] %vm1382_vm2, %v12665_v12 }
 0x336   :  { %v2886_v8 = vmax.f32 %v2838_v5, 0.0  ;;  %3556 = vmatpush.bf16.msrb.mxu2 %v5929_v7  ;;  %v6001_v5 = vor.u32 %v6197_v51, %v6000_v6  ;;  %v6175_v7 = vld [vmem:[#allocation13 + $0x34] sm:$0xf0] }
 0x338   :  { %v2907_v47 = vpack.c.bf16 %v2886_v8, %v2885_v20  ;;  %v5913_v20 = vor.u32 %v6175_v7, %v5912_v23  ;;  %v5914_v8 = vld [vmem:[#allocation13 + $0x38] sm:$0xf0]  ;;  %3724 = vmatpush.bf16.msrb.mxu3 %v6001_v5  ;;  %v12899_v23 = vld [vmem:[#allocation23_spill] sm:$0xff]  ;;  %v8646_v5 = vpop.f32.mrf.mxu2 }
 0x339   :  { %v5917_v52 = vor.u32 %v6174_v4, %v5914_v8  ;;  %v12901_v8 = vld [vmem:[#allocation43_spill] sm:$0xff] }
 0x33a   :  { %3037 = vmatmul.bf16.gmra.mxu1 %v2907_v47  ;;  %3557 = vmatpush.bf16.msrb.mxu2 %v5921_v43  ;;  %v6172_v43 = vld [vmem:[#allocation13 + $0x24] sm:$0xf] }
 0x33b   :  { %v2840_v27 = vpop.f32.mrf.mxu0  ;;  %3896 = vmatpush.bf16.msrb.mxu0 %v5917_v52  ;;  %v5909_v52 = vor.u32 %v6172_v43, %v5906_v56  ;;  %v6195_v56 = vld [vmem:[#allocation13 + $0xd4] sm:$0xf0] }
 0x33c   :  { %v2841_v49 = vadd.f32 %v8625_v61, %v2840_v27  ;;  %v6171_v43 = vld [vmem:[#allocation13 + $0x14] sm:$0xf0] }
 0x33e   :  { %v1417_v12 = vpop.permute.xlu2 %1416  ;;  %v2887_v47 = vmax.f32 %v2841_v49, 0.0  ;;  %3558 = vmatpush.bf16.msrb.mxu2 %v5913_v20  ;;  %v12900_v49 = vld [vmem:[#allocation44_spill] sm:$0xff] }
 0x33f   :  { %1427 = vst.msk [vmem:[%s12607_s11 + $0x10] sm:$0xff] %vm1395_vm3, %v1417_v12  ;;  %v5904_v12 = vld [vmem:[#allocation13 + $0x20] sm:$0xf]  ;;  %3897 = vmatpush.bf16.msrb.mxu0 %v5909_v52  ;;  %v12907_v52 = vld [vmem:[#allocation62_spill] sm:$0xff] }
 0x340   :  { %v5905_v51 = vor.u32 %v6173_v26, %v5904_v12  ;;  %v5896_v26 = vld [vmem:[#allocation13 + $0x10] sm:$0xf] }
 0x342   :  { %3559 = vmatpush.bf16.msrb.mxu2 %v5905_v51  ;;  %v5898_v51 = vld [vmem:[#allocation13 + $0x18] sm:$0xf0] }
 0x343   :  { %v2842_v33 = vpop.f32.mrf.mxu0 }
 0x344   :  { %v2843_v62 = vadd.f32 %v8625_v61, %v2842_v33  ;;  %v12898_v33 = vld [vmem:[#allocation22_spill] sm:$0xff] }
 0x346   :  { %v2888_v0 = vmax.f32 %v2843_v62, 0.0  ;;  %v8634_v32 = vpop.permute.xlu2 %416 }
 0x347   :  { %v613_v6 = vadd.f32 %v12898_v33, %v8634_v32  ;;  %v8640_v7 = vadd.f32 %v12899_v23, %v8634_v32  ;;  %v8644_v62 = vadd.f32 %v12900_v49, %v8634_v32  ;;  %v6170_v33 = vld [vmem:[#allocation13 + $0x14] sm:$0xf] }
 0x348   :  { %v2908_v27 = vpack.c.bf16 %v2888_v0, %v2887_v47  ;;  %v8652_v47 = vadd.f32 %v12901_v8, %v8634_v32  ;;  %v5901_v49 = vor.u32 %v6170_v33, %v5898_v51  ;;  %v12905_v33 = vld [vmem:[#allocation33_spill] sm:$0xff] }
 0x349   :  { %v1108_v0 = vmax.f32 %v613_v6, 0.0  ;;  %v12670_v4 = vmax.f32 %v8640_v7, 0.0  ;;  %v12671_v20 = vmax.f32 %v8644_v62, 0.0  ;;  %v5897_v6 = vor.u32 %v6171_v43, %v5896_v26  ;;  %v5888_v26 = vld [vmem:[#allocation13] sm:$0xf] }
 0x34a   :  { %3042 = vmatmul.bf16.gmra.mxu1 %v2908_v27  ;;  %v5992_v27 = vld [vmem:[#allocation13 + $0xd0] sm:$0xf]  ;;  %v5984_v43 = vld [vmem:[#allocation13 + $0xc0] sm:$0xf]  ;;  %3898 = vmatpush.bf16.msrb.mxu0 %v5901_v49  ;;  %v988_v49 = vpop.f32.mrf.mxu2 }
 0x34b   :  { %1404 = vst.msk [vmem:[%s12607_s11 + $0x20] sm:$0xff] %vm1382_vm2, %v1108_v0  ;;  %1490 = vrot.lane.b32.xlu2 %v1108_v0, %s6955_s25  ;;  %v5993_v12 = vor.u32 %v6195_v56, %v5992_v27  ;;  %v12902_v0 = vld [vmem:[#allocation38_spill] sm:$0xff]  ;;  %v12904_v27 = vld [vmem:[#allocation32_spill] sm:$0xff]  ;;  %3560 = vmatpush.bf16.msrb.mxu2 %v5897_v6  ;;  %v5890_v6 = vld [vmem:[#allocation13 + $0x8] sm:$0xf0]  ;;  %v5985_v14 = vor.u32 %v6193_v44, %v5984_v43 }
 0x34c   :  { %1564 = vst.msk [vmem:[%s12607_s11 + $0xa0] sm:$0xff] %vm1382_vm2, %v12670_v4  ;;  %v8676_v8 = vadd.f32 %v12902_v0, %v8634_v32  ;;  %v12906_v4 = vld [vmem:[#allocation63_spill] sm:$0xff]  ;;  %v6191_v44 = vld [vmem:[#allocation13 + $0xb4] sm:$0xf0] }
 0x34d   :  { %3725 = vmatpush.bf16.msrb.mxu3 %v5993_v12  ;;  %1884 = vst.msk [vmem:[%s12607_s11 + $0x1a0] sm:$0xff] %vm1382_vm2, %v12671_v20  ;;  %v6169_v12 = vld [vmem:[#allocation13 + $0x4] sm:$0xf0] }
 0x34e   :  { %v8665_v23 = vpop.permute.xlu2 %461  ;;  %12903 = vst [vmem:[#allocation22_spill] sm:$0xff] %v8676_v8  ;;  %v5889_v0 = vor.u32 %v6169_v12, %v5888_v26  ;;  %v12912_v12 = vmax.f32 %v8652_v47, 0.0  ;;  %v12685_v43 = vmax.f32 %v8676_v8, 0.0 }
 0x34f   :  { %v635_v56 = vadd.f32 %v12904_v27, %v8665_v23  ;;  %v8682_v51 = vadd.f32 %v12905_v33, %v8665_v23  ;;  %v8686_v20 = vadd.f32 %v12906_v4, %v8665_v23  ;;  %v8690_v55 = vadd.f32 %v12907_v52, %v8665_v23  ;;  %v6168_v27 = vld [vmem:[#allocation13 + $0x4] sm:$0xf]  ;;  %v6190_v4 = vld [vmem:[#allocation13 + $0xb4] sm:$0xf] }
 0x350   :  { %v8694_v17 = vadd.f32 %v12908_v22, %v8665_v23  ;;  %v12910_v33 = vld [vmem:[#allocation90_spill] sm:$0xff]  ;;  %v5893_v30 = vor.u32 %v6168_v27, %v5890_v6  ;;  %v5981_v26 = vor.u32 %v6190_v4, %v5978_v46  ;;  %1724 = vst.msk [vmem:[%s12607_s11 + $0x120] sm:$0xff] %vm1382_vm2, %v12912_v12  ;;  %3561 = vmatpush.bf16.msrb.mxu2 %v5889_v0  ;;  %v5976_v46 = vld [vmem:[#allocation13 + $0xb0] sm:$0xf]  ;;  %v12916_v0 = vld [vmem:[#allocation85_spill] sm:$0xff] }
 0x351   :  { %v8698_v35 = vadd.f32 %v12910_v33, %v8634_v32  ;;  %v1180_v42 = vmax.f32 %v635_v56, 0.0  ;;  %v12690_v52 = vmax.f32 %v8682_v51, 0.0  ;;  %v12689_v22 = vmax.f32 %v8686_v20, 0.0  ;;  %v12913_v56 = vld [vmem:[#allocation72_spill] sm:$0xff]  ;;  %3726 = vmatpush.bf16.msrb.mxu3 %v5985_v14  ;;  %2044 = vst.msk [vmem:[%s12607_s11 + $0x220] sm:$0xff] %vm1382_vm2, %v12685_v43 }
 0x352   :  { %12909 = vst [vmem:[#allocation23_spill] sm:$0xff] %v8694_v17  ;;  %v12681_v33 = vmax.f32 %v8690_v55, 0.0  ;;  %v8711_v40 = vadd.f32 %v12913_v56, %v8634_v32  ;;  %v8720_v27 = vadd.f32 %v988_v49, %v8665_v23  ;;  %4065 = vmatpush.bf16.msrb.mxu1 %v5981_v26  ;;  %v5977_v6 = vor.u32 %v6191_v44, %v5976_v46  ;;  %v12918_v49 = vld [vmem:[#allocation34_spill] sm:$0xff]  ;;  %v5968_v46 = vld [vmem:[#allocation13 + $0xa0] sm:$0xf] }
 0x353   :  { %12911 = vst [vmem:[#allocation44_spill] sm:$0xff] %v8698_v35  ;;  %1524 = vrot.lane.b32.xlu2 %v1180_v42, %s6955_s25  ;;  %v8731_v4 = vadd.f32 %v12916_v0, %v8665_v23  ;;  %v8735_v56 = vadd.f32 %v12918_v49, %v8237_v58  ;;  %3899 = vmatpush.bf16.msrb.mxu0 %v5893_v30  ;;  %v12683_v14 = vmax.f32 %v8698_v35, 0.0  ;;  %v6189_v44 = vld [vmem:[#allocation13 + $0xa4] sm:$0xf0]  ;;  %v12938_v35 = vld [vmem:[#allocation24_spill] sm:$0xff] }
 0x354   :  { %12914 = vst [vmem:[#allocation43_spill] sm:$0xff] %v8711_v40  ;;  %v12682_v30 = vmax.f32 %v8711_v40, 0.0  ;;  %v12687_v0 = vmax.f32 %v8720_v27, 0.0 }
 0x355   :  { %1437 = vst.msk [vmem:[%s12607_s11 + $0x38] sm:$0xff] %vm1382_vm2, %v1180_v42  ;;  %v12684_v42 = vmax.f32 %v8694_v17, 0.0  ;;  %3727 = vmatpush.bf16.msrb.mxu3 %v5977_v6  ;;  %v12688_v49 = vmax.f32 %v8731_v4, 0.0  ;;  %v5960_v6 = vld [vmem:[#allocation13 + $0x90] sm:$0xf] }
 0x356   :  { %12915 = vst [vmem:[#allocation38_spill] sm:$0xff] %v8720_v27 }
 0x357   :  { %1597 = vst.msk [vmem:[%s12607_s11 + $0xb8] sm:$0xff] %vm1382_vm2, %v12690_v52  ;;  %v3008_v12 = vpop.f32.mrf.mxu1 }
 0x358   :  { %12917 = vst [vmem:[#allocation32_spill] sm:$0xff] %v8731_v4  ;;  %v3009_v26 = vadd.f32 %v8075_v24, %v3008_v12  ;;  %v5969_v12 = vor.u32 %v6189_v44, %v5968_v46 }
 0x359   :  { %1917 = vst.msk [vmem:[%s12607_s11 + $0x1b8] sm:$0xff] %vm1382_vm2, %v12689_v22  ;;  %v6185_v22 = vld [vmem:[#allocation13 + $0x84] sm:$0xf0] }
 0x35a   :  { %1757 = vst.msk [vmem:[%s12607_s11 + $0x138] sm:$0xff] %vm1382_vm2, %v12681_v33  ;;  %6269 = vtanh.f32 %v3009_v26  ;;  %v12686_v33 = vmax.f32 %v8735_v56, 0.0  ;;  %v6187_v26 = vld [vmem:[#allocation13 + $0x94] sm:$0xf0]  ;;  %3728 = vmatpush.bf16.msrb.mxu3 %v5969_v12  ;;  %v6574_v12 = vld [vmem:[%s12606_s10 + $0x40] sm:$0xff] }
 0x35b   :  { %2077 = vst.msk [vmem:[%s12607_s11 + $0x238] sm:$0xff] %vm1382_vm2, %v12684_v42  ;;  %v5961_v46 = vor.u32 %v6187_v26, %v5960_v6 }
 0x35c   :  { %2364 = vst.msk [vmem:[%s12607_s11 + $0x320] sm:$0xff] %vm1382_vm2, %v12683_v14  ;;  %1606 = vrot.lane.b32.xlu2 %v12686_v33, %s6955_s25  ;;  %v12921_v33 = vld [vmem:[#allocation80_spill] sm:$0xff] }
 0x35d   :  { %2204 = vst.msk [vmem:[%s12607_s11 + $0x2a0] sm:$0xff] %vm1382_vm2, %v12682_v30  ;;  %v12919_v30 = vld [vmem:[#allocation29_spill] sm:$0xff] }
 0x35e   :  { %2397 = vst.msk [vmem:[%s12607_s11 + $0x338] sm:$0xff] %vm1382_vm2, %v12687_v0  ;;  %v8796_v14 = vadd.f32 %v12919_v30, %v8279_v39  ;;  %v8801_v0 = vadd.f32 %v12921_v33, %v8634_v32  ;;  %3729 = vmatpush.bf16.msrb.mxu3 %v5961_v46  ;;  %v6575_v46 = vld [vmem:[%s12606_s10 + $0x48] sm:$0xff] }
 0x35f   :  { %2237 = vst.msk [vmem:[%s12607_s11 + $0x2b8] sm:$0xff] %vm1382_vm2, %v12688_v49  ;;  %v3010_v44 = vpop.f32.mrf.mxu1  ;;  %v8806_v26 = vpop.permute.xlu2 %1450  ;;  %v5952_v49 = vld [vmem:[#allocation13 + $0x80] sm:$0xf] }
 0x360   :  { %12920 = vst [vmem:[#allocation33_spill] sm:$0xff] %v8796_v14  ;;  %v6270_v42 = vpop.eup %6269  ;;  %v3011_v43 = vadd.f32 %v8075_v24, %v3010_v44  ;;  %v5953_v30 = vor.u32 %v6185_v22, %v5952_v49  ;;  %v12692_v52 = vmax.f32 %v8801_v0, 0.0  ;;  %v12693_v32 = vmax.f32 %v8796_v14, 0.0 }
 0x361   :  { %12922 = vst [vmem:[#allocation63_spill] sm:$0xff] %v8801_v0  ;;  %v3108_v6 = vmul.f32 %v6574_v12, %v6270_v42  ;;  %v12923_v42 = vld [vmem:[#allocation95_spill] sm:$0xff]  ;;  %v12957_v14 = vmax.f32 %v8152_v11, 0.0  ;;  %v12959_v11 = vld [vmem:[#allocation92_spill] sm:$0xff] }
 0x362   :  { %6271 = vtanh.f32 %v3011_v43  ;;  %2524 = vst.msk [vmem:[%s12607_s11 + $0x3a0] sm:$0xff] %vm1382_vm2, %v12692_v52  ;;  %3730 = vmatpush.bf16.msrb.mxu3 %v5953_v30  ;;  %v8825_v49 = vadd.f32 %v12923_v42, %v8665_v23  ;;  %v12925_v23 = vld [vmem:[#allocation100_spill] sm:$0xff] }
 0x363   :  { %3140 = vst [vmem:[%s12606_s10 + $0x40] sm:$0xff] %v3108_v6 }
 0x364   :  { %1580 = vrot.lane.b32.xlu2 %v12693_v32, %s6955_s25  ;;  %12924 = vst [vmem:[#allocation62_spill] sm:$0xff] %v8825_v49  ;;  %v12691_v30 = vmax.f32 %v8825_v49, 0.0  ;;  %v6577_v49 = vld [vmem:[%s12606_s10 + $0x58] sm:$0xff] }
 0x366   :  { %2557 = vst.msk [vmem:[%s12607_s11 + $0x3b8] sm:$0xff] %vm1382_vm2, %v12691_v30 }
 0x367   :  { %v3013_v22 = vpop.f32.mrf.mxu1  ;;  %v1489_v12 = vpop.permute.xlu2 %1488 }
 0x368   :  { %v6272_v33 = vpop.eup %6271  ;;  %v3014_v43 = vadd.f32 %v8075_v24, %v3013_v22  ;;  %v1415_v6 = vpop.permute.xlu1 %1414  ;;  %1499 = vst.msk [vmem:[%s12607_s11 + $0x50] sm:$0xff] %vm1382_vm2, %v1489_v12  ;;  %v12926_v22 = vmax.f32 %v12925_v23, 0.0 }
 0x369   :  { %v3109_v44 = vmul.f32 %v6575_v46, %v6272_v33  ;;  %1426 = vst.msk [vmem:[%s12607_s11] sm:$0xff] %vm1395_vm3, %v1415_v6  ;;  %v12927_v33 = vmax.f32 %v8368_v3, 0.0  ;;  %v6188_v3 = vld [vmem:[#allocation13 + $0xa4] sm:$0xf] }
 0x36a   :  { %6273 = vtanh.f32 %v3014_v43  ;;  %1507 = vst.msk [vmem:[%s12607_s11 + $0x50] sm:$0xff] %vm1395_vm3, %v12926_v22  ;;  %v5970_v22 = vld [vmem:[#allocation13 + $0xa8] sm:$0xf0] }
 0x36b   :  { %3141 = vst [vmem:[%s12606_s10 + $0x48] sm:$0xff] %v3109_v44  ;;  %v6576_v44 = vld [vmem:[%s12606_s10 + $0x50] sm:$0xff] }
 0x36c   :  { %1646 = vrot.lane.b32.xlu2 %v12927_v33, %s6955_s25 }
 0x36f   :  { %v3015_v43 = vpop.f32.mrf.mxu1  ;;  %v2845_v23 = vpop.f32.mrf.mxu0 }
 0x370   :  { %v6274_v42 = vpop.eup %6273  ;;  %v3016_v46 = vadd.f32 %v8075_v24, %v3015_v43  ;;  %v1449_v6 = vpop.permute.xlu1 %1448  ;;  %v3164_v33 = vld [vmem:[%s12607_s11] sm:$0xff]  ;;  %v3166_v43 = vld [vmem:[%s12607_s11 + $0x10] sm:$0xff] }
 0x371   :  { %v3110_v12 = vmul.f32 %v6576_v44, %v6274_v42  ;;  %1459 = vst.msk [vmem:[%s12607_s11 + $0x18] sm:$0xff] %vm1395_vm3, %v1449_v6  ;;  %v5973_v42 = vor.u32 %v6188_v3, %v5970_v22  ;;  %v12928_v44 = vmax.f32 %v8441_v31, 0.0  ;;  %v2846_v6 = vadd.f32 %v8625_v61, %v2845_v23 }
 0x372   :  { %6275 = vtanh.f32 %v3016_v46  ;;  %v3292_v46 = vpack.c.bf16 %v3166_v43, %v3164_v33  ;;  %v12929_v33 = vld [vmem:[#allocation31_spill] sm:$0xff]  ;;  %v12930_v43 = vld [vmem:[#allocation30_spill] sm:$0xff] }
 0x373   :  { %3142 = vst [vmem:[%s12606_s10 + $0x50] sm:$0xff] %v3110_v12  ;;  %4066 = vmatpush.bf16.msrb.mxu1 %v5973_v42 }
 0x374   :  { %1680 = vrot.lane.b32.xlu2 %v12928_v44, %s6955_s25  ;;  %3562 = vmatmul.bf16.vlgmr.msrb.gmra.mxu2 %v3292_v46 }
 0x375   :  { %3900 = vmatmul.bf16.vlgmr.msrb.gmra.mxu0 %v3292_v46  ;;  %v12932_v46 = vld [vmem:[#allocation54_spill] sm:$0xff] }
 0x376   :  { %v1447_v32 = vpop.permute.xlu0 %1446 }
 0x377   :  { %v3018_v12 = vpop.f32.mrf.mxu1  ;;  %1458 = vst.msk [vmem:[%s12607_s11 + $0x8] sm:$0xff] %vm1395_vm3, %v1447_v32  ;;  %v2847_v23 = vpop.f32.mrf.mxu0 }
 0x378   :  { %v6276_v30 = vpop.eup %6275  ;;  %v3019_v52 = vadd.f32 %v8075_v24, %v3018_v12  ;;  %v8886_v31 = vpop.permute.xlu1 %456  ;;  %v2848_v22 = vadd.f32 %v8625_v61, %v2847_v23 }
 0x379   :  { %v3111_v3 = vmul.f32 %v6577_v49, %v6276_v30  ;;  %v692_v24 = vadd.f32 %v12929_v33, %v8886_v31  ;;  %v633_v42 = vadd.f32 %v12930_v43, %v8886_v31  ;;  %v2889_v49 = vmax.f32 %v2846_v6, 0.0  ;;  %v12931_v30 = vld [vmem:[#allocation59_spill] sm:$0xff]  ;;  %v12933_v33 = vld [vmem:[#allocation60_spill] sm:$0xff] }
 0x37a   :  { %6277 = vtanh.f32 %v3019_v52  ;;  %v8898_v32 = vadd.f32 %v12931_v30, %v8886_v31  ;;  %v8902_v52 = vadd.f32 %v12932_v46, %v8886_v31  ;;  %v2890_v44 = vmax.f32 %v2848_v22, 0.0 }
 0x37b   :  { %3143 = vst [vmem:[%s12606_s10 + $0x58] sm:$0xff] %v3111_v3  ;;  %v1173_v12 = vmax.f32 %v692_v24, 0.0  ;;  %v1172_v23 = vmax.f32 %v633_v42, 0.0  ;;  %v8906_v0 = vadd.f32 %v12933_v33, %v8886_v31  ;;  %v8925_v42 = vld [vmem:[#allocation11 + $0x1] ss:$0 sm:$0xff] }
 0x37c   :  { %v2909_v6 = vpack.c.bf16 %v2890_v44, %v2889_v49  ;;  %v3167_v44 = vld [vmem:[%s12607_s11 + $0x18] sm:$0xff] }
 0x37d   :  { %1682 = vrot.lane.b32.xlu2 %v1173_v12, %s6955_s25  ;;  %1596 = vst.msk [vmem:[%s12607_s11 + $0xa8] sm:$0xff] %vm1382_vm2, %v1173_v12  ;;  %1522 = vrot.lane.b32.xlu1 %v1172_v23, %s6955_s25  ;;  %v12934_v12 = vld [vmem:[#allocation99_spill] sm:$0xff] }
 0x37e   :  { %1436 = vst.msk [vmem:[%s12607_s11 + $0x28] sm:$0xff] %vm1382_vm2, %v1172_v23  ;;  %v8928_v49 = vpop.permute.xlu0 %421  ;;  %3047 = vmatmul.bf16.gmra.mxu1 %v2909_v6  ;;  %v3165_v46 = vld [vmem:[%s12607_s11 + $0x8] sm:$0xff]  ;;  %v6579_v6 = vld [vmem:[%s12606_s10 + $0x60] sm:$0xff] }
 0x37f   :  { %v3020_v22 = vpop.f32.mrf.mxu1  ;;  %1460 = vst.msk [vmem:[%s12607_s11 + $0x28] sm:$0xff] %vm1395_vm3, %v8806_v26  ;;  %v12935_v23 = vld [vmem:[#allocation50_spill] sm:$0xff]  ;;  %v12937_v26 = vld [vmem:[#allocation27_spill] sm:$0xff]  ;;  %v2850_v27 = vpop.f32.mrf.mxu0  ;;  %v8948_v40 = vpack.c.bf16 %v3167_v44, %v3165_v46  ;;  %v615_v19 = vadd.f32 %v12938_v35, %v8928_v49  ;;  %v12942_v46 = vmax.f32 %v8902_v52, 0.0 }
 0x380   :  { %v6278_v24 = vpop.eup %6277  ;;  %v3021_v30 = vadd.f32 %v8925_v42, %v3020_v22  ;;  %v8938_v33 = vadd.f32 %v12935_v23, %v12934_v12  ;;  %v8942_v3 = vadd.f32 %v12937_v26, %v12934_v12  ;;  %v12702_v22 = vmax.f32 %v8906_v0, 0.0  ;;  %v1421_v4 = vpop.permute.xlu1 %1420  ;;  %v12939_v23 = vld [vmem:[#allocation46_spill] sm:$0xff] }
 0x381   :  { %v3112_v43 = vmul.f32 %v6579_v6, %v6278_v24  ;;  %v8954_v38 = vadd.f32 %v12939_v23, %v8928_v49  ;;  %v12940_v26 = vmax.f32 %v8898_v32, 0.0  ;;  %v12941_v24 = vld [vmem:[#allocation25_spill] sm:$0xff]  ;;  %2076 = vst.msk [vmem:[%s12607_s11 + $0x228] sm:$0xff] %vm1382_vm2, %v12942_v46  ;;  %3731 = vmatmul.bf16.vlgmr.msrb.gmra.mxu3 %v8948_v40  ;;  %v1116_v35 = vmax.f32 %v615_v19, 0.0  ;;  %v12943_v19 = vld [vmem:[#allocation47_spill] sm:$0xff] }
 0x382   :  { %12936 = vst [vmem:[#allocation57_spill] sm:$0xff] %v8938_v33  ;;  %6279 = vtanh.f32 %v3021_v30  ;;  %v8964_v6 = vadd.f32 %v12941_v24, %v8928_v49  ;;  %v12704_v44 = vmax.f32 %v8938_v33, 0.0  ;;  %v12705_v23 = vmax.f32 %v8942_v3, 0.0  ;;  %v12944_v24 = vld [vmem:[#allocation75_spill] sm:$0xff]  ;;  %v12948_v30 = vld [vmem:[#allocation52_spill] sm:$0xff] }
 0x383   :  { %1756 = vst.msk [vmem:[%s12607_s11 + $0x128] sm:$0xff] %vm1382_vm2, %v12940_v26  ;;  %1492 = vrot.lane.b32.xlu0 %v1116_v35, %s6955_s25  ;;  %v9007_v46 = vadd.f32 %v12944_v24, %v8928_v49  ;;  %v12950_v33 = vmax.f32 %v8954_v38, 0.0  ;;  %v2851_v17 = vadd.f32 %v8625_v61, %v2850_v27  ;;  %v6580_v27 = vld [vmem:[%s12606_s10 + $0x68] sm:$0xff] }
 0x384   :  { %3144 = vst [vmem:[%s12606_s10 + $0x60] sm:$0xff] %v3112_v43  ;;  %v8993_v43 = vadd.f32 %v12943_v19, %v8928_v49  ;;  %v12946_v19 = vld [vmem:[#allocation103_spill] sm:$0xff]  ;;  %v12954_v37 = vmax.f32 %v8964_v6, 0.0 }
 0x385   :  { %1916 = vst.msk [vmem:[%s12607_s11 + $0x1a8] sm:$0xff] %vm1382_vm2, %v12702_v22  ;;  %1736 = vrot.lane.b32.xlu2 %v12704_v44, %s6955_s25  ;;  %1576 = vrot.lane.b32.xlu1 %v12705_v23, %s6955_s25  ;;  %v12947_v22 = vld [vmem:[#allocation26_spill] sm:$0xff]  ;;  %v12951_v44 = vld [vmem:[#allocation39_spill] sm:$0xff] }
 0x386   :  { %1405 = vst.msk [vmem:[%s12607_s11 + $0x30] sm:$0xff] %vm1382_vm2, %v1116_v35  ;;  %v9011_v26 = vadd.f32 %v12947_v22, %v12946_v19  ;;  %v9025_v24 = vadd.f32 %v12951_v44, %v8928_v49  ;;  %v1419_v8 = vpop.permute.xlu0 %1418 }
 0x387   :  { %1429 = vst.msk [vmem:[%s12607_s11 + $0x30] sm:$0xff] %vm1395_vm3, %v1421_v4  ;;  %v3023_v35 = vpop.f32.mrf.mxu1  ;;  %v9015_v4 = vadd.f32 %v12948_v30, %v8114_v25  ;;  %v12953_v30 = vld [vmem:[#allocation28_spill] sm:$0xff]  ;;  %v2852_v9 = vpop.f32.mrf.mxu0 }
 0x388   :  { %12945 = vst [vmem:[#allocation90_spill] sm:$0xff] %v9007_v46  ;;  %v6280_v23 = vpop.eup %6279  ;;  %v3024_v22 = vadd.f32 %v8925_v42, %v3023_v35  ;;  %v9031_v21 = vadd.f32 %v12953_v30, %v8114_v25  ;;  %v1487_v30 = vpop.permute.xlu1 %1486 }
 0x389   :  { %12949 = vst [vmem:[#allocation72_spill] sm:$0xff] %v9015_v4  ;;  %v3113_v35 = vmul.f32 %v6580_v27, %v6280_v23  ;;  %v12713_v23 = vmax.f32 %v9015_v4, 0.0  ;;  %v12715_v27 = vmax.f32 %v9025_v24, 0.0 }
 0x38a   :  { %1725 = vst.msk [vmem:[%s12607_s11 + $0x130] sm:$0xff] %vm1382_vm2, %v12950_v33  ;;  %v12955_v33 = vld [vmem:[#allocation83_spill] sm:$0xff]  ;;  %6281 = vtanh.f32 %v3024_v22  ;;  %v2891_v22 = vmax.f32 %v2851_v17, 0.0  ;;  %v9082_v17 = vadd.f32 %v12959_v11, %v8886_v31 }
 0x38b   :  { %12952 = vst [vmem:[#allocation85_spill] sm:$0xff] %v9025_v24  ;;  %v9041_v44 = vadd.f32 %v12955_v33, %v8886_v31  ;;  %v12961_v33 = vmax.f32 %v9007_v46, 0.0 }
 0x38c   :  { %1565 = vst.msk [vmem:[%s12607_s11 + $0xb0] sm:$0xff] %vm1382_vm2, %v12954_v37  ;;  %v2853_v37 = vadd.f32 %v8625_v61, %v2852_v9 }
 0x38d   :  { %12956 = vst [vmem:[#allocation34_spill] sm:$0xff] %v9041_v44  ;;  %1738 = vrot.lane.b32.xlu2 %v12713_v23, %s6955_s25 }
 0x38e   :  { %1428 = vst.msk [vmem:[%s12607_s11 + $0x20] sm:$0xff] %vm1395_vm3, %v1419_v8  ;;  %v12712_v8 = vmax.f32 %v9011_v26, 0.0  ;;  %v2892_v9 = vmax.f32 %v2853_v37, 0.0  ;;  %v12960_v37 = vld [vmem:[#allocation35_spill] sm:$0xff] }
 0x38f   :  { %1498 = vst.msk [vmem:[%s12607_s11 + $0x40] sm:$0xff] %vm1382_vm2, %v1487_v30  ;;  %v12714_v30 = vmax.f32 %v9031_v21, 0.0  ;;  %v3025_v11 = vpop.f32.mrf.mxu1 }
 0x390   :  { %3145 = vst [vmem:[%s12606_s10 + $0x68] sm:$0xff] %v3113_v35  ;;  %1574 = vrot.lane.b32.xlu0 %v12712_v8, %s6955_s25  ;;  %v12958_v35 = vmax.f32 %v8993_v43, 0.0  ;;  %v9092_v8 = vadd.f32 %v12960_v37, %v8173_v10  ;;  %v6282_v37 = vpop.eup %6281  ;;  %v3026_v23 = vadd.f32 %v8925_v42, %v3025_v11  ;;  %v12966_v11 = vmax.f32 %v9041_v44, 0.0 }
 0x391   :  { %1506 = vst.msk [vmem:[%s12607_s11 + $0x40] sm:$0xff] %vm1395_vm3, %v12957_v14  ;;  %1578 = vrot.lane.b32.xlu1 %v12714_v30, %s6955_s25  ;;  %v2910_v14 = vpack.c.bf16 %v2892_v9, %v2891_v22  ;;  %v12962_v22 = vld [vmem:[#allocation93_spill] sm:$0xff]  ;;  %v12720_v44 = vmax.f32 %v9082_v17, 0.0 }
 0x392   :  { %1885 = vst.msk [vmem:[%s12607_s11 + $0x1b0] sm:$0xff] %vm1382_vm2, %v12958_v35  ;;  %v9102_v35 = vadd.f32 %v8646_v5, %v8886_v31  ;;  %v9112_v9 = vadd.f32 %v12962_v22, %v8928_v49  ;;  %v3170_v31 = vld [vmem:[%s12607_s11 + $0x30] sm:$0xff]  ;;  %v12964_v30 = vld [vmem:[#allocation73_spill] sm:$0xff]  ;;  %6283 = vtanh.f32 %v3026_v23  ;;  %v12967_v23 = vmax.f32 %v8187_v60, 0.0 }
 0x393   :  { %2205 = vst.msk [vmem:[%s12607_s11 + $0x2b0] sm:$0xff] %vm1382_vm2, %v12961_v33  ;;  %v1453_v33 = vpop.permute.xlu0 %1452  ;;  %3052 = vmatmul.bf16.gmra.mxu1 %v2910_v14  ;;  %v12965_v22 = vld [vmem:[#allocation37_spill] sm:$0xff]  ;;  %v6581_v14 = vld [vmem:[%s12606_s10 + $0x70] sm:$0xff] }
 0x394   :  { %2045 = vst.msk [vmem:[%s12607_s11 + $0x230] sm:$0xff] %vm1382_vm2, %v12715_v27  ;;  %v9123_v27 = vadd.f32 %v12964_v30, %v8134_v41  ;;  %v9127_v4 = vadd.f32 %v12965_v22, %v8134_v41  ;;  %v3114_v24 = vmul.f32 %v6581_v14, %v6282_v37  ;;  %v1521_v30 = vpop.permute.xlu1 %1520  ;;  %v2855_v22 = vpop.f32.mrf.mxu0  ;;  %v12968_v60 = vmax.f32 %v9102_v35, 0.0 }
 0x395   :  { %12963 = vst [vmem:[#allocation29_spill] sm:$0xff] %v9112_v9  ;;  %v3168_v5 = vld [vmem:[%s12607_s11 + $0x20] sm:$0xff] }
 0x396   :  { %2236 = vst.msk [vmem:[%s12607_s11 + $0x2a8] sm:$0xff] %vm1382_vm2, %v12966_v11  ;;  %v3294_v46 = vpack.c.bf16 %v3170_v31, %v3168_v5  ;;  %v12724_v11 = vmax.f32 %v9092_v8, 0.0  ;;  %v5962_v5 = vld [vmem:[#allocation13 + $0x98] sm:$0xf0]  ;;  %v12723_v31 = vmax.f32 %v9112_v9, 0.0  ;;  %v12721_v14 = vmax.f32 %v9123_v27, 0.0 }
 0x397   :  { %1461 = vst.msk [vmem:[%s12607_s11 + $0x38] sm:$0xff] %vm1395_vm3, %v1453_v33  ;;  %v6186_v33 = vld [vmem:[#allocation13 + $0x94] sm:$0xf]  ;;  %v12971_v9 = vmax.f32 %v8245_v53, 0.0  ;;  %v12972_v53 = vmax.f32 %v8191_v13, 0.0 }
 0x398   :  { %1531 = vst.msk [vmem:[%s12607_s11 + $0x58] sm:$0xff] %vm1382_vm2, %v1521_v30  ;;  %3567 = vmatmul.bf16.gmra.mxu2 %v3294_v46  ;;  %3905 = vmatmul.bf16.gmra.mxu0 %v3294_v46  ;;  %v12722_v30 = vmax.f32 %v9127_v4, 0.0  ;;  %v5965_v37 = vor.u32 %v6186_v33, %v5962_v5  ;;  %v3028_v46 = vpop.f32.mrf.mxu1  ;;  %v6284_v5 = vpop.eup %6283  ;;  %v3174_v13 = vld [vmem:[%s12607_s11 + $0x50] sm:$0xff] }
 0x399   :  { %3146 = vst [vmem:[%s12606_s10 + $0x70] sm:$0xff] %v3114_v24  ;;  %1608 = vrot.lane.b32.xlu0 %v12724_v11, %s6955_s25  ;;  %1772 = vrot.lane.b32.xlu2 %v12721_v14, %s6955_s25  ;;  %v12969_v24 = vld [vmem:[#allocation36_spill] sm:$0xff] }
 0x39a   :  { %1539 = vst.msk [vmem:[%s12607_s11 + $0x58] sm:$0xff] %vm1395_vm3, %v12967_v23  ;;  %1612 = vrot.lane.b32.xlu1 %v12722_v30, %s6955_s25  ;;  %v9184_v33 = vadd.f32 %v12969_v24, %v8241_v54  ;;  %4067 = vmatpush.bf16.msrb.mxu1 %v5965_v37  ;;  %v2856_v23 = vadd.f32 %v8625_v61, %v2855_v22  ;;  %v12970_v24 = vld [vmem:[#allocation81_spill] sm:$0xff] }
 0x39b   :  { %2556 = vst.msk [vmem:[%s12607_s11 + $0x3a8] sm:$0xff] %vm1382_vm2, %v12720_v44  ;;  %v3029_v44 = vadd.f32 %v8925_v42, %v3028_v46  ;;  %v1519_v14 = vpop.permute.xlu0 %1518  ;;  %v9202_v30 = vadd.f32 %v12970_v24, %v8928_v49  ;;  %v6184_v24 = vld [vmem:[#allocation13 + $0x84] sm:$0xf] }
 0x39c   :  { %2396 = vst.msk [vmem:[%s12607_s11 + $0x328] sm:$0xff] %vm1382_vm2, %v12968_v60  ;;  %v3169_v60 = vld [vmem:[%s12607_s11 + $0x28] sm:$0xff]  ;;  %v2857_v46 = vpop.f32.mrf.mxu0 }
 0x39d   :  { %2365 = vst.msk [vmem:[%s12607_s11 + $0x330] sm:$0xff] %vm1382_vm2, %v12723_v31  ;;  %v6582_v31 = vld [vmem:[%s12606_s10 + $0x78] sm:$0xff]  ;;  %6285 = vtanh.f32 %v3029_v44  ;;  %v2858_v49 = vadd.f32 %v8625_v61, %v2857_v46  ;;  %v2893_v44 = vmax.f32 %v2856_v23, 0.0 }
 0x39e   :  { %v3171_v37 = vld [vmem:[%s12607_s11 + $0x38] sm:$0xff]  ;;  %v3115_v22 = vmul.f32 %v6582_v31, %v6284_v5  ;;  %1530 = vst.msk [vmem:[%s12607_s11 + $0x48] sm:$0xff] %vm1382_vm2, %v1519_v14  ;;  %v12726_v31 = vmax.f32 %v9202_v30, 0.0  ;;  %v1205_v14 = vmax.f32 %v9184_v33, 0.0  ;;  %v13002_v33 = vld [vmem:[#allocation51_spill] sm:$0xff] }
 0x39f   :  { %v9211_v11 = vpack.c.bf16 %v3171_v37, %v3169_v60  ;;  %1538 = vst.msk [vmem:[%s12607_s11 + $0x48] sm:$0xff] %vm1395_vm3, %v12971_v9  ;;  %v2894_v5 = vmax.f32 %v2858_v49, 0.0  ;;  %v12973_v9 = vmax.f32 %v8199_v59, 0.0  ;;  %v3172_v60 = vld [vmem:[%s12607_s11 + $0x40] sm:$0xff] }
 0x3a0   :  { %3147 = vst [vmem:[%s12606_s10 + $0x78] sm:$0xff] %v3115_v22  ;;  %v3030_v37 = vpop.f32.mrf.mxu1  ;;  %v5954_v22 = vld [vmem:[#allocation13 + $0x88] sm:$0xf0]  ;;  %v6583_v59 = vld [vmem:[%s12606_s10 + $0x80] sm:$0xff] }
 0x3a1   :  { %3736 = vmatmul.bf16.gmra.mxu3 %v9211_v11  ;;  %2525 = vst.msk [vmem:[%s12607_s11 + $0x3b0] sm:$0xff] %vm1382_vm2, %v12726_v31  ;;  %1610 = vrot.lane.b32.xlu0 %v1205_v14, %s6955_s25  ;;  %v2911_v23 = vpack.c.bf16 %v2894_v5, %v2893_v44  ;;  %v3031_v49 = vadd.f32 %v8925_v42, %v3030_v37  ;;  %v12975_v37 = vmax.f32 %v8954_v38, 0.0  ;;  %v3175_v38 = vld [vmem:[%s12607_s11 + $0x58] sm:$0xff]  ;;  %v6587_v31 = vld [vmem:[%s12606_s10 + $0xa0] sm:$0xff] }
 0x3a2   :  { %1838 = vrot.lane.b32.xlu2 %v12972_v53, %s6955_s25  ;;  %1678 = vrot.lane.b32.xlu1 %v12973_v9, %s6955_s25  ;;  %v5957_v53 = vor.u32 %v6184_v24, %v5954_v22  ;;  %v3296_v9 = vpack.c.bf16 %v3174_v13, %v3172_v60  ;;  %v12976_v24 = vmax.f32 %v8964_v6, 0.0  ;;  %v12977_v6 = vld [vmem:[#allocation49_spill] sm:$0xff] }
 0x3a3   :  { %v6286_v46 = vpop.eup %6285  ;;  %3057 = vmatmul.bf16.gmra.mxu1 %v2911_v23  ;;  %6287 = vtanh.f32 %v3031_v49  ;;  %v12974_v23 = vmax.f32 %v8299_v16, 0.0 }
 0x3a4   :  { %v3116_v44 = vmul.f32 %v6583_v59, %v6286_v46  ;;  %v2860_v5 = vpop.f32.mrf.mxu0  ;;  %4068 = vmatpush.bf16.msrb.mxu1 %v5957_v53  ;;  %v9277_v53 = vadd.f32 %v12977_v6, %v12946_v19  ;;  %v12978_v59 = vld [vmem:[#allocation48_spill] sm:$0xff] }
 0x3a5   :  { %v1491_v46 = vpop.permute.xlu2 %1490  ;;  %v2861_v13 = vadd.f32 %v8625_v61, %v2860_v5  ;;  %v6584_v5 = vld [vmem:[%s12606_s10 + $0x88] sm:$0xff] }
 0x3a6   :  { %3148 = vst [vmem:[%s12606_s10 + $0x80] sm:$0xff] %v3116_v44  ;;  %v3173_v60 = vld [vmem:[%s12607_s11 + $0x48] sm:$0xff]  ;;  %v9281_v44 = vadd.f32 %v12978_v59, %v12946_v19  ;;  %v12980_v59 = vmax.f32 %v8640_v7, 0.0  ;;  %v12981_v7 = vld [vmem:[#allocation69_spill] sm:$0xff] }
 0x3a7   :  { %1500 = vst.msk [vmem:[%s12607_s11 + $0x60] sm:$0xff] %vm1382_vm2, %v1491_v46  ;;  %v2895_v46 = vmax.f32 %v2861_v13, 0.0 }
 0x3a8   :  { %3572 = vmatmul.bf16.gmra.mxu2 %v3296_v9  ;;  %3910 = vmatmul.bf16.gmra.mxu0 %v3296_v9  ;;  %v3033_v22 = vpop.f32.mrf.mxu1  ;;  %v12745_v6 = vmax.f32 %v9281_v44, 0.0 }
 0x3a9   :  { %1648 = vrot.lane.b32.xlu0 %v12974_v23, %s6955_s25  ;;  %v6288_v49 = vpop.eup %6287  ;;  %v3034_v16 = vadd.f32 %v8925_v42, %v3033_v22  ;;  %v12979_v23 = vmax.f32 %v8339_v28, 0.0  ;;  %v12729_v28 = vmax.f32 %v9277_v53, 0.0 }
 0x3aa   :  { %1812 = vrot.lane.b32.xlu2 %v12975_v37, %s6955_s25  ;;  %1652 = vrot.lane.b32.xlu1 %v12976_v24, %s6955_s25  ;;  %v3117_v9 = vmul.f32 %v6584_v5, %v6288_v49  ;;  %v9292_v24 = vpack.c.bf16 %v3175_v38, %v3173_v60  ;;  %v9317_v5 = vadd.f32 %v12981_v7, %v8173_v10 }
 0x3ab   :  { %1508 = vst.msk [vmem:[%s12607_s11 + $0x60] sm:$0xff] %vm1395_vm3, %v12979_v23  ;;  %6289 = vtanh.f32 %v3034_v16 }
 0x3ac   :  { %v2862_v37 = vpop.f32.mrf.mxu0  ;;  %3149 = vst [vmem:[%s12606_s10 + $0x88] sm:$0xff] %v3117_v9  ;;  %v12982_v9 = vld [vmem:[#allocation68_spill] sm:$0xff] }
 0x3ad   :  { %v2863_v22 = vadd.f32 %v8625_v61, %v2862_v37  ;;  %v1525_v13 = vpop.permute.xlu2 %1524  ;;  %v9321_v23 = vadd.f32 %v12982_v9, %v8173_v10  ;;  %v6585_v37 = vld [vmem:[%s12606_s10 + $0x90] sm:$0xff] }
 0x3ae   :  { %1533 = vst.msk [vmem:[%s12607_s11 + $0x78] sm:$0xff] %vm1382_vm2, %v1525_v13  ;;  %v12985_v13 = vld [vmem:[#allocation65_spill] sm:$0xff] }
 0x3af   :  { %v2896_v49 = vmax.f32 %v2863_v22, 0.0 }
 0x3b0   :  { %v3035_v60 = vpop.f32.mrf.mxu1 }
 0x3b1   :  { %3741 = vmatmul.bf16.gmra.mxu3 %v9292_v24  ;;  %1650 = vrot.lane.b32.xlu0 %v12980_v59, %s6955_s25  ;;  %v2912_v61 = vpack.c.bf16 %v2896_v49, %v2895_v46  ;;  %v6290_v16 = vpop.eup %6289  ;;  %v3036_v38 = vadd.f32 %v8925_v42, %v3035_v60  ;;  %v12983_v46 = vmax.f32 %v8416_v45, 0.0  ;;  %v12728_v49 = vmax.f32 %v9317_v5, 0.0 }
 0x3b2   :  { %1894 = vrot.lane.b32.xlu2 %v12729_v28, %s6955_s25  ;;  %1734 = vrot.lane.b32.xlu1 %v12745_v6, %s6955_s25  ;;  %v3118_v22 = vmul.f32 %v6585_v37, %v6290_v16  ;;  %v12731_v59 = vmax.f32 %v9321_v23, 0.0  ;;  %v9348_v16 = vadd.f32 %v12985_v13, %v8237_v58  ;;  %v12987_v37 = vld [vmem:[#allocation70_spill] sm:$0xff]  ;;  %v6215_v28 = vld [vmem:[#allocation14 + $0x74] sm:$0xf0] }
 0x3b3   :  { %3062 = vmatmul.bf16.gmra.mxu1 %v2912_v61  ;;  %1541 = vst.msk [vmem:[%s12607_s11 + $0x78] sm:$0xff] %vm1395_vm3, %v12983_v46  ;;  %6291 = vtanh.f32 %v3036_v38  ;;  %v12984_v61 = vmax.f32 %v8682_v51, 0.0  ;;  %v12986_v51 = vld [vmem:[#allocation71_spill] sm:$0xff]  ;;  %v6586_v46 = vld [vmem:[%s12606_s10 + $0x98] sm:$0xff] }
 0x3b4   :  { %3150 = vst [vmem:[%s12606_s10 + $0x90] sm:$0xff] %v3118_v22  ;;  %v9357_v9 = vadd.f32 %v12986_v51, %v8241_v54  ;;  %v9361_v22 = vadd.f32 %v12987_v37, %v8241_v54  ;;  %v12988_v51 = vld [vmem:[#allocation55_spill] sm:$0xff] }
 0x3b5   :  { %v9383_v37 = vadd.f32 %v12988_v51, %v8279_v39 }
 0x3b6   :  { %v1607_v60 = vpop.permute.xlu2 %1606  ;;  %v12730_v13 = vmax.f32 %v9361_v22, 0.0 }
 0x3b7   :  { %1618 = vst.msk [vmem:[%s12607_s11 + $0x88] sm:$0xff] %vm1395_vm3, %v1607_v60  ;;  %v12727_v60 = vmax.f32 %v9357_v9, 0.0 }
 0x3b8   :  { %v3038_v45 = vpop.f32.mrf.mxu1 }
 0x3b9   :  { %1684 = vrot.lane.b32.xlu0 %v12984_v61, %s6955_s25  ;;  %v6292_v38 = vpop.eup %6291  ;;  %v3039_v7 = vadd.f32 %v8925_v42, %v3038_v45  ;;  %v1190_v45 = vmax.f32 %v9348_v16, 0.0  ;;  %v13014_v16 = vmax.f32 %v8902_v52, 0.0  ;;  %v3176_v52 = vld [vmem:[%s12607_s11 + $0x60] sm:$0xff] }
 0x3ba   :  { %1928 = vrot.lane.b32.xlu2 %v12728_v49, %s6955_s25  ;;  %1768 = vrot.lane.b32.xlu1 %v12731_v59, %s6955_s25  ;;  %v3119_v61 = vmul.f32 %v6586_v46, %v6292_v38  ;;  %v6072_v49 = vld [vmem:[#allocation14 + $0x70] sm:$0xf]  ;;  %v6231_v59 = vld [vmem:[#allocation14 + $0xf4] sm:$0xf0] }
 0x3bb   :  { %6293 = vtanh.f32 %v3039_v7  ;;  %v6073_v51 = vor.u32 %v6215_v28, %v6072_v49  ;;  %v6214_v28 = vld [vmem:[#allocation14 + $0x74] sm:$0xf]  ;;  %v6074_v49 = vld [vmem:[#allocation14 + $0x78] sm:$0xf0] }
 0x3bc   :  { %3151 = vst [vmem:[%s12606_s10 + $0x98] sm:$0xff] %v3119_v61 }
 0x3bd   :  { %4621 = vmatpush.bf16.msra.mxu2 %v6073_v51 }
 0x3be   :  { %v1581_v7 = vpop.permute.xlu2 %1580 }
 0x3bf   :  { %1589 = vst.msk [vmem:[%s12607_s11 + $0xb0] sm:$0xff] %vm1395_vm3, %v1581_v7 }
 0x3c0   :  { %v3040_v38 = vpop.f32.mrf.mxu1 }
 0x3c1   :  { %1766 = vrot.lane.b32.xlu0 %v1190_v45, %s6955_s25  ;;  %v6294_v46 = vpop.eup %6293  ;;  %v3041_v61 = vadd.f32 %v8925_v42, %v3040_v38  ;;  %v1150_v38 = vmax.f32 %v9383_v37, 0.0 }
 0x3c2   :  { %1930 = vrot.lane.b32.xlu2 %v12727_v60, %s6955_s25  ;;  %1770 = vrot.lane.b32.xlu1 %v12730_v13, %s6955_s25  ;;  %v3120_v60 = vmul.f32 %v6587_v31, %v6294_v46  ;;  %v6136_v13 = vld [vmem:[#allocation14 + $0xf0] sm:$0xf]  ;;  %v12990_v31 = vmax.f32 %v8320_v29, 0.0  ;;  %v12991_v29 = vmax.f32 %v9011_v26, 0.0  ;;  %v12993_v26 = vmax.f32 %v8644_v62, 0.0 }
 0x3c3   :  { %4069 = vmatmul.bf16.vlgmr.msrb.gmra.mxu1 %v8948_v40  ;;  %6295 = vtanh.f32 %v3041_v61  ;;  %v6137_v7 = vor.u32 %v6231_v59, %v6136_v13  ;;  %v12989_v40 = vmax.f32 %v8316_v57, 0.0  ;;  %v6077_v61 = vor.u32 %v6214_v28, %v6074_v49  ;;  %v6588_v57 = vld [vmem:[%s12606_s10 + $0xa8] sm:$0xff] }
 0x3c4   :  { %3152 = vst [vmem:[%s12606_s10 + $0xa0] sm:$0xff] %v3120_v60  ;;  %v12992_v28 = vmax.f32 %v8378_v15, 0.0  ;;  %v12994_v49 = vmax.f32 %v8652_v47, 0.0  ;;  %v6589_v15 = vld [vmem:[%s12606_s10 + $0xb0] sm:$0xff]  ;;  %v12995_v47 = vmax.f32 %v9092_v8, 0.0  ;;  %v12998_v8 = vmax.f32 %v8690_v55, 0.0  ;;  %v9481_v55 = vpop.f32.mrf.mxu2 }
 0x3c5   :  { %4790 = vmatpush.bf16.msra.mxu3 %v6137_v7  ;;  %4959 = vmatpush.bf16.msra.mxu0 %v6077_v61  ;;  %v6230_v7 = vld [vmem:[#allocation14 + $0xf4] sm:$0xf] }
 0x3c6   :  { %v1647_v46 = vpop.permute.xlu2 %1646 }
 0x3c7   :  { %1658 = vst.msk [vmem:[%s12607_s11 + $0xc0] sm:$0xff] %vm1382_vm2, %v1647_v46 }
 0x3c8   :  { %v3043_v60 = vpop.f32.mrf.mxu1  ;;  %1666 = vst.msk [vmem:[%s12607_s11 + $0xc0] sm:$0xff] %vm1395_vm3, %v12991_v29  ;;  %v12999_v29 = vld [vmem:[#allocation58_spill] sm:$0xff] }
 0x3c9   :  { %1740 = vrot.lane.b32.xlu0 %v1150_v38, %s6955_s25  ;;  %v6296_v59 = vpop.eup %6295  ;;  %v3044_v13 = vadd.f32 %v8925_v42, %v3043_v60 }
 0x3ca   :  { %1968 = vrot.lane.b32.xlu2 %v12989_v40, %s6955_s25  ;;  %1808 = vrot.lane.b32.xlu1 %v12990_v31, %s6955_s25  ;;  %v3121_v51 = vmul.f32 %v6588_v57, %v6296_v59  ;;  %v6138_v40 = vld [vmem:[#allocation14 + $0xf8] sm:$0xf0] }
 0x3cb   :  { %6297 = vtanh.f32 %v3044_v13  ;;  %v6141_v31 = vor.u32 %v6230_v7, %v6138_v40  ;;  %v12997_v13 = vmax.f32 %v8686_v20, 0.0  ;;  %v9462_v7 = vadd.f32 %v12999_v29, %v8237_v58  ;;  %v13000_v40 = vld [vmem:[#allocation66_spill] sm:$0xff] }
 0x3cc   :  { %3153 = vst [vmem:[%s12606_s10 + $0xa8] sm:$0xff] %v3121_v51  ;;  %v13007_v29 = vmax.f32 %v8387_v36, 0.0 }
 0x3cd   :  { %5128 = vmatpush.bf16.msra.mxu1 %v6141_v31  ;;  %v9466_v31 = vadd.f32 %v13000_v40, %v8237_v58 }
 0x3ce   :  { %v1681_v46 = vpop.permute.xlu2 %1680 }
 0x3cf   :  { %1691 = vst.msk [vmem:[%s12607_s11 + $0xd8] sm:$0xff] %vm1382_vm2, %v1681_v46  ;;  %v13003_v46 = vld [vmem:[#allocation45_spill] sm:$0xff] }
 0x3d0   :  { %v3045_v60 = vpop.f32.mrf.mxu1  ;;  %1699 = vst.msk [vmem:[%s12607_s11 + $0xd8] sm:$0xff] %vm1395_vm3, %v12995_v47 }
 0x3d1   :  { %1806 = vrot.lane.b32.xlu0 %v12992_v28, %s6955_s25  ;;  %v6298_v61 = vpop.eup %6297  ;;  %v3046_v59 = vadd.f32 %v8925_v42, %v3045_v60  ;;  %v12737_v28 = vmax.f32 %v9462_v7, 0.0 }
 0x3d2   :  { %1970 = vrot.lane.b32.xlu2 %v12993_v26, %s6955_s25  ;;  %1810 = vrot.lane.b32.xlu1 %v12994_v49, %s6955_s25  ;;  %v3122_v62 = vmul.f32 %v6589_v15, %v6298_v61  ;;  %v12739_v26 = vmax.f32 %v9466_v31, 0.0  ;;  %v13001_v49 = vmax.f32 %v8898_v32, 0.0  ;;  %v9504_v61 = vadd.f32 %v13003_v46, %v8279_v39  ;;  %v13004_v32 = vld [vmem:[#allocation56_spill] sm:$0xff] }
 0x3d3   :  { %4074 = vmatmul.bf16.gmra.mxu1 %v9211_v11  ;;  %6299 = vtanh.f32 %v3046_v59  ;;  %v12996_v11 = vmax.f32 %v8444_v63, 0.0  ;;  %v6590_v63 = vld [vmem:[%s12606_s10 + $0xb8] sm:$0xff]  ;;  %v9508_v59 = vadd.f32 %v13004_v32, %v8279_v39  ;;  %v13011_v46 = vmax.f32 %v8457_v18, 0.0 }
 0x3d4   :  { %3154 = vst [vmem:[%s12606_s10 + $0xb0] sm:$0xff] %v3122_v62  ;;  %v12735_v62 = vmax.f32 %v9504_v61, 0.0 }
 0x3d5   :  { %v12738_v47 = vmax.f32 %v9508_v59, 0.0 }
 0x3d7   :  { %v1683_v51 = vpop.permute.xlu2 %1682 }
 0x3d8   :  { %1692 = vst.msk [vmem:[%s12607_s11 + $0xe8] sm:$0xff] %vm1382_vm2, %v1683_v51  ;;  %v13006_v51 = vmax.f32 %v8383_v34, 0.0  ;;  %v13009_v34 = vmax.f32 %v8255_v1, 0.0 }
 0x3d9   :  { %1840 = vrot.lane.b32.xlu0 %v12996_v11, %s6955_s25  ;;  %v6300_v57 = vpop.eup %6299  ;;  %1700 = vst.msk [vmem:[%s12607_s11 + $0xe8] sm:$0xff] %vm1395_vm3, %v1205_v14  ;;  %v9499_v14 = vadd.f32 %v13002_v33, %v12934_v12  ;;  %v13005_v11 = vld [vmem:[#allocation53_spill] sm:$0xff] }
 0x3da   :  { %2004 = vrot.lane.b32.xlu2 %v12997_v13, %s6955_s25  ;;  %1844 = vrot.lane.b32.xlu1 %v12998_v8, %s6955_s25  ;;  %v3123_v20 = vmul.f32 %v6590_v63, %v6300_v57  ;;  %v9530_v13 = vadd.f32 %v13005_v11, %v8114_v25  ;;  %v13008_v63 = vld [vmem:[#allocation74_spill] sm:$0xff] }
 0x3db   :  { %v1135_v15 = vmax.f32 %v9499_v14, 0.0 }
 0x3dc   :  { %3155 = vst [vmem:[%s12606_s10 + $0xb8] sm:$0xff] %v3123_v20  ;;  %v1143_v57 = vmax.f32 %v9530_v13, 0.0  ;;  %v9550_v20 = vadd.f32 %v13008_v63, %v8134_v41  ;;  %v13013_v63 = vmax.f32 %v8212_v48, 0.0 }
 0x3de   :  { %v1215_v36 = vmax.f32 %v9550_v20, 0.0  ;;  %v13048_v20 = vld [vmem:[#allocation23_spill] sm:$0xff] }
 0x3df   :  { %v1737_v60 = vpop.permute.xlu2 %1736 }
 0x3e0   :  { %1747 = vst.msk [vmem:[%s12607_s11 + $0x110] sm:$0xff] %vm1395_vm3, %v1737_v60  ;;  %v13010_v60 = vmax.f32 %v8454_v2, 0.0 }
 0x3e1   :  { %1842 = vrot.lane.b32.xlu0 %v13001_v49, %s6955_s25 }
 0x3e2   :  { %2086 = vrot.lane.b32.xlu2 %v12737_v28, %s6955_s25  ;;  %1926 = vrot.lane.b32.xlu1 %v12739_v26, %s6955_s25  ;;  %v6130_v26 = vld [vmem:[#allocation14 + $0xe8] sm:$0xf0] }
 0x3e3   :  { %4079 = vmatmul.bf16.gmra.mxu1 %v9292_v24  ;;  %v9517_v24 = vpop.f32.mrf.mxu2 }
 0x3e7   :  { %v1739_v8 = vpop.permute.xlu2 %1738 }
 0x3e8   :  { %1748 = vst.msk [vmem:[%s12607_s11 + $0x120] sm:$0xff] %vm1395_vm3, %v1739_v8  ;;  %v13012_v8 = vmax.f32 %v8293_v50, 0.0  ;;  %v3179_v50 = vld [vmem:[%s12607_s11 + $0x78] sm:$0xff] }
 0x3e9   :  { %1896 = vrot.lane.b32.xlu0 %v1135_v15, %s6955_s25 }
 0x3ea   :  { %2060 = vrot.lane.b32.xlu2 %v12735_v62, %s6955_s25  ;;  %1900 = vrot.lane.b32.xlu1 %v12738_v47, %s6955_s25  ;;  %v6066_v47 = vld [vmem:[#allocation14 + $0x68] sm:$0xf0] }
 0x3eb   :  { %v9546_v40 = vpop.f32.mrf.mxu2 }
 0x3ef   :  { %v1523_v33 = vpop.permute.xlu1 %1522 }
 0x3f0   :  { %1532 = vst.msk [vmem:[%s12607_s11 + $0x68] sm:$0xff] %vm1382_vm2, %v1523_v33 }
 0x3f1   :  { %1898 = vrot.lane.b32.xlu0 %v1143_v57, %s6955_s25  ;;  %1540 = vst.msk [vmem:[%s12607_s11 + $0x68] sm:$0xff] %vm1395_vm3, %v13009_v34  ;;  %v9618_v34 = vld [vmem:[#allocation16] ss:$2 sm:$0x3] }
 0x3f2   :  { %2126 = vrot.lane.b32.xlu2 %v13006_v51, %s6955_s25  ;;  %1966 = vrot.lane.b32.xlu1 %v13007_v29, %s6955_s25 }
 0x3f3   :  { %v1773_v49 = vpop.permute.xlu2 %1772  ;;  %v9586_v2 = vpop.f32.mrf.mxu2 }
 0x3f4   :  { %1781 = vst.msk [vmem:[%s12607_s11 + $0x138] sm:$0xff] %vm1395_vm3, %v1773_v49 }
 0x3f5   :  { %v1493_v1 = vpop.permute.xlu0 %1492 }
 0x3f6   :  { %1501 = vst.msk [vmem:[%s12607_s11 + $0x70] sm:$0xff] %vm1382_vm2, %v1493_v1 }
 0x3f7   :  { %v1577_v11 = vpop.permute.xlu1 %1576  ;;  %1509 = vst.msk [vmem:[%s12607_s11 + $0x70] sm:$0xff] %vm1395_vm3, %v13012_v8  ;;  %v13017_v8 = vld [vmem:[#allocation41_spill] sm:$0xff] }
 0x3f8   :  { %v3177_v18 = vld [vmem:[%s12607_s11 + $0x68] sm:$0xff]  ;;  %1587 = vst.msk [vmem:[%s12607_s11 + $0x90] sm:$0xff] %vm1395_vm3, %v1577_v11 }
 0x3f9   :  { %1932 = vrot.lane.b32.xlu0 %v1215_v36, %s6955_s25  ;;  %v3299_v51 = vpack.c.bf16 %v3179_v50, %v3177_v18  ;;  %v9643_v18 = vadd.f32 %v13017_v8, %v12934_v12  ;;  %v13020_v8 = vld [vmem:[#allocation78_spill] sm:$0xff] }
 0x3fa   :  { %2160 = vrot.lane.b32.xlu2 %v13010_v60, %s6955_s25  ;;  %2000 = vrot.lane.b32.xlu1 %v13011_v46, %s6955_s25  ;;  %v13016_v46 = vld [vmem:[#allocation77_spill] sm:$0xff] }
 0x3fb   :  { %3746 = vmatmul.bf16.gmra.mxu3 %v3299_v51  ;;  %4084 = vmatmul.bf16.gmra.mxu1 %v3299_v51  ;;  %v3048_v29 = vpop.f32.mrf.mxu1  ;;  %v9632_v1 = vadd.f32 %v13016_v46, %v12934_v12  ;;  %v3563_v50 = vpop.f32.mrf.mxu2  ;;  %v13019_v46 = vld [vmem:[#allocation40_spill] sm:$0xff] }
 0x3fc   :  { %v1839_v32 = vpop.permute.xlu2 %1838  ;;  %v3049_v49 = vadd.f32 %v8925_v42, %v3048_v29 }
 0x3fd   :  { %1850 = vst.msk [vmem:[%s12607_s11 + $0x148] sm:$0xff] %vm1382_vm2, %v1839_v32  ;;  %v9635_v32 = vperm.slane %v9618_v34, 0  ;;  %v12732_v51 = vmax.f32 %v9632_v1, 0.0 }
 0x3fe   :  { %1858 = vst.msk [vmem:[%s12607_s11 + $0x148] sm:$0xff] %vm1395_vm3, %v1190_v45  ;;  %v13015_v45 = vmax.f32 %v8906_v0, 0.0  ;;  %6301 = vtanh.f32 %v3049_v49  ;;  %v3178_v0 = vld [vmem:[%s12607_s11 + $0x70] sm:$0xff]  ;;  %v13018_v49 = vmax.f32 %v8993_v43, 0.0 }
 0x3ff   :  { %v3298_v11 = vpack.c.bf16 %v3178_v0, %v3176_v52  ;;  %v3564_v29 = vadd.f32 %v3563_v50, %v9635_v32  ;;  %v9683_v50 = vadd.f32 %v13020_v8, %v8114_v25 }
 0x401   :  { %1998 = vrot.lane.b32.xlu0 %v13013_v63, %s6955_s25  ;;  %3577 = vmatmul.bf16.gmra.mxu2 %v3298_v11  ;;  %v12736_v63 = vmax.f32 %v9643_v18, 0.0 }
 0x402   :  { %2162 = vrot.lane.b32.xlu2 %v13014_v16, %s6955_s25  ;;  %2002 = vrot.lane.b32.xlu1 %v13015_v45, %s6955_s25  ;;  %v1575_v33 = vpop.permute.xlu0 %1574 }
 0x403   :  { %1586 = vst.msk [vmem:[%s12607_s11 + $0x80] sm:$0xff] %vm1395_vm3, %v1575_v33  ;;  %v1579_v60 = vpop.permute.xlu1 %1578  ;;  %3915 = vmatmul.bf16.gmra.mxu0 %v3298_v11  ;;  %v3050_v16 = vpop.f32.mrf.mxu1  ;;  %v6591_v33 = vld [vmem:[%s12606_s10 + $0xc0] sm:$0xff]  ;;  %v9679_v11 = vadd.f32 %v13019_v46, %v12946_v19  ;;  %v12733_v46 = vmax.f32 %v9683_v50, 0.0 }
 0x404   :  { %v1813_v48 = vpop.permute.xlu2 %1812  ;;  %1588 = vst.msk [vmem:[%s12607_s11 + $0xa0] sm:$0xff] %vm1395_vm3, %v1579_v60  ;;  %v6302_v37 = vpop.eup %6301 }
 0x405   :  { %1821 = vst.msk [vmem:[%s12607_s11 + $0x170] sm:$0xff] %vm1382_vm2, %v1813_v48  ;;  %v3732_v45 = vpop.f32.mrf.mxu3  ;;  %v3124_v48 = vmul.f32 %v6591_v33, %v6302_v37  ;;  %v6064_v37 = vld [vmem:[#allocation14 + $0x60] sm:$0xf]  ;;  %v6229_v33 = vld [vmem:[#allocation14 + $0xe4] sm:$0xf0] }
 0x406   :  { %1829 = vst.msk [vmem:[%s12607_s11 + $0x170] sm:$0xff] %vm1395_vm3, %v1150_v38  ;;  %v3051_v38 = vadd.f32 %v8925_v42, %v3050_v16  ;;  %v9671_v60 = vadd.f32 %v3732_v45, %v3564_v29  ;;  %v13021_v29 = vld [vmem:[#allocation42_spill] sm:$0xff]  ;;  %v6128_v45 = vld [vmem:[#allocation14 + $0xe0] sm:$0xf] }
 0x407   :  { %3156 = vst [vmem:[%s12606_s10 + $0xc0] sm:$0xff] %v3124_v48  ;;  %v9690_v16 = vadd.f32 %v13021_v29, %v8114_v25  ;;  %v6129_v48 = vor.u32 %v6229_v33, %v6128_v45  ;;  %v3181_v33 = vld [vmem:[%s12607_s11 + $0x88] sm:$0xff] }
 0x408   :  { %6303 = vtanh.f32 %v3051_v38 }
 0x409   :  { %1972 = vrot.lane.b32.xlu0 %v13018_v49, %s6955_s25  ;;  %v6213_v49 = vld [vmem:[#allocation14 + $0x64] sm:$0xf0]  ;;  %v12734_v8 = vmax.f32 %v9690_v16, 0.0  ;;  %4791 = vmatpush.bf16.msra.mxu3 %v6129_v48 }
 0x40a   :  { %2216 = vrot.lane.b32.xlu2 %v12732_v51, %s6955_s25  ;;  %2056 = vrot.lane.b32.xlu1 %v12736_v63, %s6955_s25  ;;  %v6065_v38 = vor.u32 %v6213_v49, %v6064_v37  ;;  %v3180_v37 = vld [vmem:[%s12607_s11 + $0x80] sm:$0xff]  ;;  %v6592_v49 = vld [vmem:[%s12606_s10 + $0xc8] sm:$0xff] }
 0x40b   :  { %v1609_v43 = vpop.permute.xlu0 %1608  ;;  %v13023_v63 = vld [vmem:[#allocation94_spill] sm:$0xff] }
 0x40c   :  { %1619 = vst.msk [vmem:[%s12607_s11 + $0x98] sm:$0xff] %vm1395_vm3, %v1609_v43  ;;  %v1895_v52 = vpop.permute.xlu2 %1894  ;;  %v1613_v0 = vpop.permute.xlu1 %1612  ;;  %v12743_v43 = vmax.f32 %v9679_v11, 0.0  ;;  %4622 = vmatpush.bf16.msra.mxu2 %v6065_v38  ;;  %v9740_v28 = vadd.f32 %v13023_v63, %v8134_v41 }
 0x40d   :  { %1906 = vst.msk [vmem:[%s12607_s11 + $0x180] sm:$0xff] %vm1395_vm3, %v1895_v52  ;;  %v9703_v52 = vpop.f32.mrf.mxu2 }
 0x40e   :  { %1621 = vst.msk [vmem:[%s12607_s11 + $0xb8] sm:$0xff] %vm1395_vm3, %v1613_v0  ;;  %v6304_v51 = vpop.eup %6303 }
 0x40f   :  { %v3125_v38 = vmul.f32 %v6592_v49, %v6304_v51 }
 0x410   :  { %v3053_v29 = vpop.f32.mrf.mxu1 }
 0x411   :  { %2054 = vrot.lane.b32.xlu0 %v12743_v43, %s6955_s25  ;;  %v3054_v0 = vadd.f32 %v8925_v42, %v3053_v29  ;;  %3157 = vst [vmem:[%s12606_s10 + $0xc8] sm:$0xff] %v3125_v38 }
 0x412   :  { %2218 = vrot.lane.b32.xlu2 %v12733_v46, %s6955_s25  ;;  %2058 = vrot.lane.b32.xlu1 %v12734_v8, %s6955_s25  ;;  %v3182_v46 = vld [vmem:[%s12607_s11 + $0x90] sm:$0xff]  ;;  %v13022_v8 = vld [vmem:[#allocation61_spill] sm:$0xff] }
 0x413   :  { %v1611_v45 = vpop.permute.xlu0 %1610  ;;  %v3183_v48 = vld [vmem:[%s12607_s11 + $0x98] sm:$0xff]  ;;  %6305 = vtanh.f32 %v3054_v0  ;;  %v9736_v62 = vadd.f32 %v13022_v8, %v8173_v10  ;;  %v3300_v0 = vpack.c.bf16 %v3182_v46, %v3180_v37  ;;  %v6228_v8 = vld [vmem:[#allocation14 + $0xe4] sm:$0xf]  ;;  %v13025_v37 = vmax.f32 %v8735_v56, 0.0 }
 0x414   :  { %1620 = vst.msk [vmem:[%s12607_s11 + $0xa8] sm:$0xff] %vm1395_vm3, %v1611_v45  ;;  %v1929_v51 = vpop.permute.xlu2 %1928  ;;  %v1679_v29 = vpop.permute.xlu1 %1678  ;;  %v3301_v49 = vpack.c.bf16 %v3183_v48, %v3181_v33  ;;  %v13024_v45 = vld [vmem:[#allocation67_spill] sm:$0xff]  ;;  %v6212_v48 = vld [vmem:[#allocation14 + $0x64] sm:$0xf]  ;;  %v6133_v46 = vor.u32 %v6228_v8, %v6130_v26 }
 0x415   :  { %v9747_v33 = vadd.f32 %v13024_v45, %v8134_v41  ;;  %1939 = vst.msk [vmem:[%s12607_s11 + $0x198] sm:$0xff] %vm1395_vm3, %v1929_v51  ;;  %v6069_v63 = vor.u32 %v6212_v48, %v6066_v47  ;;  %3582 = vmatmul.bf16.gmra.mxu2 %v3300_v0  ;;  %3920 = vmatmul.bf16.gmra.mxu0 %v3300_v0  ;;  %v12742_v38 = vmax.f32 %v9736_v62, 0.0  ;;  %v12740_v47 = vmax.f32 %v9740_v28, 0.0  ;;  %v9766_v45 = vpop.f32.mrf.mxu3  ;;  %v6593_v0 = vld [vmem:[%s12606_s10 + $0xd0] sm:$0xff] }
 0x416   :  { %3751 = vmatmul.bf16.gmra.mxu3 %v3301_v49  ;;  %4089 = vmatmul.bf16.gmra.mxu1 %v3301_v49  ;;  %1690 = vst.msk [vmem:[%s12607_s11 + $0xc8] sm:$0xff] %vm1382_vm2, %v1679_v29 }
 0x417   :  { %1698 = vst.msk [vmem:[%s12607_s11 + $0xc8] sm:$0xff] %vm1395_vm3, %v13025_v37  ;;  %4960 = vmatpush.bf16.msra.mxu0 %v6069_v63  ;;  %v12741_v51 = vmax.f32 %v9747_v33, 0.0  ;;  %5129 = vmatpush.bf16.msra.mxu1 %v6133_v46  ;;  %v13026_v37 = vld [vmem:[#allocation64_spill] sm:$0xff] }
 0x418   :  { %v3055_v49 = vpop.f32.mrf.mxu1 }
 0x419   :  { %v6306_v29 = vpop.eup %6305  ;;  %2088 = vrot.lane.b32.xlu0 %v12742_v38, %s6955_s25  ;;  %v3056_v56 = vadd.f32 %v8925_v42, %v3055_v49  ;;  %v9787_v49 = vadd.f32 %v13026_v37, %v8241_v54  ;;  %v13032_v38 = vld [vmem:[#allocation106_spill] sm:$0xff] }
 0x41a   :  { %2252 = vrot.lane.b32.xlu2 %v12740_v47, %s6955_s25  ;;  %v3126_v48 = vmul.f32 %v6593_v0, %v6306_v29  ;;  %2092 = vrot.lane.b32.xlu1 %v12741_v51, %s6955_s25  ;;  %v13027_v29 = vmax.f32 %v8942_v3, 0.0  ;;  %v13028_v3 = vld [vmem:[#allocation33_spill] sm:$0xff]  ;;  %v13033_v43 = vmax.f32 %v13032_v38, 0.0 }
 0x41b   :  { %v3568_v26 = vpop.f32.mrf.mxu2  ;;  %v1649_v63 = vpop.permute.xlu0 %1648  ;;  %6307 = vtanh.f32 %v3056_v56  ;;  %v12744_v56 = vmax.f32 %v9787_v49, 0.0  ;;  %v6594_v47 = vld [vmem:[%s12606_s10 + $0xd8] sm:$0xff] }
 0x41c   :  { %1659 = vst.msk [vmem:[%s12607_s11 + $0xd0] sm:$0xff] %vm1382_vm2, %v1649_v63  ;;  %v1931_v8 = vpop.permute.xlu2 %1930  ;;  %v1653_v46 = vpop.permute.xlu1 %1652  ;;  %v3569_v0 = vadd.f32 %v3568_v26, %v9635_v32 }
 0x41d   :  { %3158 = vst [vmem:[%s12606_s10 + $0xd0] sm:$0xff] %v3126_v48  ;;  %v13029_v48 = vmax.f32 %v13028_v3, 0.0 }
 0x41e   :  { %1667 = vst.msk [vmem:[%s12607_s11 + $0xd0] sm:$0xff] %vm1395_vm3, %v13027_v29  ;;  %v3189_v13 = vld [vmem:[%s12607_s11 + $0xc8] sm:$0xff] }
 0x41f   :  { %1940 = vst.msk [vmem:[%s12607_s11 + $0x1a8] sm:$0xff] %vm1395_vm3, %v1931_v8  ;;  %v3185_v8 = vld [vmem:[%s12607_s11 + $0xa8] sm:$0xff] }
 0x420   :  { %1661 = vst.msk [vmem:[%s12607_s11 + $0xf0] sm:$0xff] %vm1382_vm2, %v1653_v46  ;;  %v3058_v63 = vpop.f32.mrf.mxu1  ;;  %v13030_v46 = vld [vmem:[#allocation105_spill] sm:$0xff] }
 0x421   :  { %1669 = vst.msk [vmem:[%s12607_s11 + $0xf0] sm:$0xff] %vm1395_vm3, %v13029_v48  ;;  %v6308_v37 = vpop.eup %6307  ;;  %2090 = vrot.lane.b32.xlu0 %v12744_v56, %s6955_s25  ;;  %v13031_v26 = vmax.f32 %v13030_v46, 0.0  ;;  %v3059_v29 = vadd.f32 %v8925_v42, %v3058_v63  ;;  %v3184_v48 = vld [vmem:[%s12607_s11 + $0xa0] sm:$0xff]  ;;  %v3187_v63 = vld [vmem:[%s12607_s11 + $0xb8] sm:$0xff] }
 0x422   :  { %v3127_v51 = vmul.f32 %v6594_v47, %v6308_v37  ;;  %2158 = vrot.lane.b32.xlu1 %v13033_v43, %s6955_s25  ;;  %v3303_v6 = vpack.c.bf16 %v3187_v63, %v3185_v8  ;;  %v3186_v43 = vld [vmem:[%s12607_s11 + $0xb0] sm:$0xff]  ;;  %v13039_v63 = vld [vmem:[#allocation85_spill] sm:$0xff] }
 0x423   :  { %2318 = vrot.lane.b32.xlu2 %v13031_v26, %s6955_s25  ;;  %v9833_v56 = vpop.f32.mrf.mxu2  ;;  %v1651_v26 = vpop.permute.xlu0 %1650  ;;  %6309 = vtanh.f32 %v3059_v29  ;;  %v3302_v38 = vpack.c.bf16 %v3186_v43, %v3184_v48  ;;  %v13037_v29 = vld [vmem:[#allocation90_spill] sm:$0xff] }
 0x424   :  { %v3737_v3 = vpop.f32.mrf.mxu3  ;;  %1660 = vst.msk [vmem:[%s12607_s11 + $0xe0] sm:$0xff] %vm1382_vm2, %v1651_v26  ;;  %v1969_v47 = vpop.permute.xlu2 %1968 }
 0x425   :  { %v9835_v46 = vadd.f32 %v3737_v3, %v3569_v0  ;;  %v1735_v37 = vpop.permute.xlu1 %1734  ;;  %3159 = vst [vmem:[%s12606_s10 + $0xd8] sm:$0xff] %v3127_v51  ;;  %v13034_v0 = vmax.f32 %v9031_v21, 0.0  ;;  %3587 = vmatmul.bf16.gmra.mxu2 %v3302_v38  ;;  %3925 = vmatmul.bf16.gmra.mxu0 %v3302_v38  ;;  %v13035_v51 = vld [vmem:[#allocation108_spill] sm:$0xff]  ;;  %v13038_v3 = vmax.f32 %v13037_v29, 0.0  ;;  %v13043_v29 = vmax.f32 %v9127_v4, 0.0 }
 0x426   :  { %3756 = vmatmul.bf16.gmra.mxu3 %v3303_v6  ;;  %4094 = vmatmul.bf16.gmra.mxu1 %v3303_v6  ;;  %1979 = vst.msk [vmem:[%s12607_s11 + $0x1d0] sm:$0xff] %vm1382_vm2, %v1969_v47  ;;  %v13036_v8 = vmax.f32 %v13035_v51, 0.0  ;;  %v13040_v47 = vmax.f32 %v13039_v63, 0.0  ;;  %v13044_v63 = vld [vmem:[#allocation22_spill] sm:$0xff] }
 0x427   :  { %1668 = vst.msk [vmem:[%s12607_s11 + $0xe0] sm:$0xff] %vm1395_vm3, %v13034_v0  ;;  %v13041_v0 = vld [vmem:[#allocation96_spill] sm:$0xff] }
 0x428   :  { %1987 = vst.msk [vmem:[%s12607_s11 + $0x1d0] sm:$0xff] %vm1395_vm3, %v1135_v15  ;;  %v3060_v21 = vpop.f32.mrf.mxu1  ;;  %v6595_v15 = vld [vmem:[%s12606_s10 + $0xe0] sm:$0xff] }
 0x429   :  { %1746 = vst.msk [vmem:[%s12607_s11 + $0x100] sm:$0xff] %vm1395_vm3, %v1735_v37  ;;  %v6310_v6 = vpop.eup %6309  ;;  %2128 = vrot.lane.b32.xlu0 %v13036_v8, %s6955_s25  ;;  %v3061_v14 = vadd.f32 %v8925_v42, %v3060_v21  ;;  %v9891_v21 = vadd.f32 %v13041_v0, %v12946_v19 }
 0x42a   :  { %v3128_v26 = vmul.f32 %v6595_v15, %v6310_v6  ;;  %2132 = vrot.lane.b32.xlu1 %v13040_v47, %s6955_s25  ;;  %v13042_v6 = vld [vmem:[#allocation76_spill] sm:$0xff] }
 0x42b   :  { %2292 = vrot.lane.b32.xlu2 %v13038_v3, %s6955_s25  ;;  %v1685_v37 = vpop.permute.xlu0 %1684  ;;  %6311 = vtanh.f32 %v3061_v14  ;;  %v9898_v51 = vadd.f32 %v13042_v6, %v12946_v19  ;;  %v3573_v8 = vpop.f32.mrf.mxu2  ;;  %v12748_v3 = vmax.f32 %v9891_v21, 0.0 }
 0x42c   :  { %v9877_v48 = vpop.f32.mrf.mxu3  ;;  %1693 = vst.msk [vmem:[%s12607_s11 + $0xf8] sm:$0xff] %vm1382_vm2, %v1685_v37  ;;  %v1971_v43 = vpop.permute.xlu2 %1970  ;;  %v3574_v4 = vadd.f32 %v3573_v8, %v9635_v32 }
 0x42d   :  { %v1769_v38 = vpop.permute.xlu1 %1768  ;;  %3160 = vst [vmem:[%s12606_s10 + $0xe0] sm:$0xff] %v3128_v26  ;;  %v12751_v14 = vmax.f32 %v9898_v51, 0.0 }
 0x42e   :  { %1701 = vst.msk [vmem:[%s12607_s11 + $0xf8] sm:$0xff] %vm1395_vm3, %v13043_v29 }
 0x42f   :  { %1980 = vst.msk [vmem:[%s12607_s11 + $0x1e0] sm:$0xff] %vm1382_vm2, %v1971_v43  ;;  %v3190_v43 = vld [vmem:[%s12607_s11 + $0xd0] sm:$0xff] }
 0x430   :  { %1988 = vst.msk [vmem:[%s12607_s11 + $0x1e0] sm:$0xff] %vm1395_vm3, %v1143_v57  ;;  %v3063_v15 = vpop.f32.mrf.mxu1  ;;  %v13045_v57 = vmax.f32 %v13044_v63, 0.0  ;;  %v3188_v63 = vld [vmem:[%s12607_s11 + $0xc0] sm:$0xff] }
 0x431   :  { %1779 = vst.msk [vmem:[%s12607_s11 + $0x118] sm:$0xff] %vm1395_vm3, %v1769_v38  ;;  %v6312_v26 = vpop.eup %6311  ;;  %v3064_v47 = vadd.f32 %v8925_v42, %v3063_v15  ;;  %v6596_v38 = vld [vmem:[%s12606_s10 + $0xe8] sm:$0xff]  ;;  %v3191_v42 = vld [vmem:[%s12607_s11 + $0xd8] sm:$0xff] }
 0x432   :  { %2130 = vrot.lane.b32.xlu0 %v13045_v57, %s6955_s25  ;;  %v3129_v0 = vmul.f32 %v6596_v38, %v6312_v26  ;;  %2214 = vrot.lane.b32.xlu1 %v12751_v14, %s6955_s25  ;;  %v3305_v26 = vpack.c.bf16 %v3191_v42, %v3189_v13  ;;  %v3304_v57 = vpack.c.bf16 %v3190_v43, %v3188_v63  ;;  %v3901_v13 = vpop.f32.mrf.mxu0  ;;  %v9994_v63 = vperm.slane %v9618_v34, 1  ;;  %v13051_v34 = vld [vmem:[#allocation91_spill] sm:$0xff] }
 0x433   :  { %2374 = vrot.lane.b32.xlu2 %v12748_v3, %s6955_s25  ;;  %v1767_v8 = vpop.permute.xlu0 %1766  ;;  %6313 = vtanh.f32 %v3064_v47  ;;  %v13047_v47 = vld [vmem:[#allocation89_spill] sm:$0xff]  ;;  %v13055_v14 = vmax.f32 %v9281_v44, 0.0 }
 0x434   :  { %v3742_v37 = vpop.f32.mrf.mxu3  ;;  %1778 = vst.msk [vmem:[%s12607_s11 + $0x108] sm:$0xff] %vm1395_vm3, %v1767_v8  ;;  %v2005_v29 = vpop.permute.xlu2 %2004  ;;  %v13049_v8 = vmax.f32 %v13048_v20, 0.0 }
 0x435   :  { %v9942_v6 = vadd.f32 %v3742_v37, %v3574_v4  ;;  %v1771_v15 = vpop.permute.xlu1 %1770  ;;  %v9956_v4 = vadd.f32 %v9517_v24, %v8173_v10  ;;  %3161 = vst [vmem:[%s12606_s10 + $0xe8] sm:$0xff] %v3129_v0  ;;  %v9963_v37 = vadd.f32 %v13047_v47, %v8173_v10  ;;  %3592 = vmatmul.bf16.gmra.mxu2 %v3304_v57 }
 0x436   :  { %2013 = vst.msk [vmem:[%s12607_s11 + $0x1f8] sm:$0xff] %vm1382_vm2, %v2005_v29  ;;  %3761 = vmatmul.bf16.gmra.mxu3 %v3305_v26  ;;  %4099 = vmatmul.bf16.gmra.mxu1 %v3305_v26  ;;  %v6598_v29 = vld [vmem:[%s12606_s10 + $0xf0] sm:$0xff] }
 0x437   :  { %13046 = vst [vmem:[#allocation80_spill] sm:$0xff] %v9942_v6  ;;  %3930 = vmatmul.bf16.gmra.mxu0 %v3304_v57  ;;  %v12746_v24 = vmax.f32 %v9956_v4, 0.0  ;;  %v12750_v43 = vmax.f32 %v9963_v37, 0.0 }
 0x438   :  { %2021 = vst.msk [vmem:[%s12607_s11 + $0x1f8] sm:$0xff] %vm1395_vm3, %v1215_v36  ;;  %v3065_v38 = vpop.f32.mrf.mxu1  ;;  %v6597_v36 = vld [vmem:[#allocation11 + $0x1] ss:$0 sm:$0xff] }
 0x439   :  { %1780 = vst.msk [vmem:[%s12607_s11 + $0x128] sm:$0xff] %vm1395_vm3, %v1771_v15  ;;  %v6314_v0 = vpop.eup %6313  ;;  %v3066_v42 = vadd.f32 %v6597_v36, %v3065_v38  ;;  %v13050_v38 = vld [vmem:[#allocation87_spill] sm:$0xff]  ;;  %v13052_v36 = vld [vmem:[#allocation57_spill] sm:$0xff] }
 0x43a   :  { %2164 = vrot.lane.b32.xlu0 %v13049_v8, %s6955_s25  ;;  %v3130_v15 = vmul.f32 %v6598_v29, %v6314_v0  ;;  %2248 = vrot.lane.b32.xlu1 %v12750_v43, %s6955_s25  ;;  %v10002_v20 = vadd.f32 %v13050_v38, %v8237_v58  ;;  %v10006_v0 = vadd.f32 %v9546_v40, %v8241_v54 }
 0x43b   :  { %2408 = vrot.lane.b32.xlu2 %v12746_v24, %s6955_s25  ;;  %v1741_v26 = vpop.permute.xlu0 %1740  ;;  %6315 = vtanh.f32 %v3066_v42  ;;  %v10013_v8 = vadd.f32 %v13051_v34, %v8241_v54  ;;  %v3902_v40 = vadd.f32 %v3901_v13, %v9994_v63  ;;  %v13053_v42 = vmax.f32 %v13052_v36, 0.0  ;;  %v3195_v13 = vld [vmem:[%s12607_s11 + $0xf8] sm:$0xff]  ;;  %v3192_v34 = vld [vmem:[%s12607_s11 + $0xe0] sm:$0xff] }
 0x43c   :  { %1749 = vst.msk [vmem:[%s12607_s11 + $0x130] sm:$0xff] %vm1395_vm3, %v1741_v26  ;;  %v2087_v57 = vpop.permute.xlu2 %2086  ;;  %v12753_v54 = vmax.f32 %v10002_v20, 0.0  ;;  %v12747_v29 = vmax.f32 %v10006_v0, 0.0  ;;  %v6599_v36 = vld [vmem:[%s12606_s10 + $0xf8] sm:$0xff] }
 0x43d   :  { %v1809_v47 = vpop.permute.xlu1 %1808  ;;  %3162 = vst [vmem:[%s12606_s10 + $0xf0] sm:$0xff] %v3130_v15  ;;  %v10032_v15 = vpop.f32.mrf.mxu0  ;;  %v12749_v26 = vmax.f32 %v10013_v8, 0.0 }
 0x43e   :  { %2098 = vst.msk [vmem:[%s12607_s11 + $0x208] sm:$0xff] %vm1395_vm3, %v2087_v57 }
 0x43f   :  { %1819 = vst.msk [vmem:[%s12607_s11 + $0x150] sm:$0xff] %vm1382_vm2, %v1809_v47 }
 0x440   :  { %1827 = vst.msk [vmem:[%s12607_s11 + $0x150] sm:$0xff] %vm1395_vm3, %v13053_v42  ;;  %v4070_v57 = vpop.f32.mrf.mxu1 }
 0x441   :  { %v6316_v47 = vpop.eup %6315  ;;  %v10044_v38 = vadd.f32 %v4070_v57, %v3902_v40 }
 0x442   :  { %2246 = vrot.lane.b32.xlu0 %v12753_v54, %s6955_s25  ;;  %v3131_v42 = vmul.f32 %v6599_v36, %v6316_v47  ;;  %2250 = vrot.lane.b32.xlu1 %v12749_v26, %s6955_s25  ;;  %v3194_v47 = vld [vmem:[%s12607_s11 + $0xf0] sm:$0xff]  ;;  %v13062_v54 = vmax.f32 %v9321_v23, 0.0 }
 0x443   :  { %2410 = vrot.lane.b32.xlu2 %v12747_v29, %s6955_s25  ;;  %v1807_v24 = vpop.permute.xlu0 %1806  ;;  %v3193_v29 = vld [vmem:[%s12607_s11 + $0xe8] sm:$0xff]  ;;  %v3306_v43 = vpack.c.bf16 %v3194_v47, %v3192_v34  ;;  %v6227_v34 = vld [vmem:[#allocation14 + $0xd4] sm:$0xf0]  ;;  %v6226_v23 = vld [vmem:[#allocation14 + $0xd4] sm:$0xf] }
 0x444   :  { %1818 = vst.msk [vmem:[%s12607_s11 + $0x140] sm:$0xff] %vm1382_vm2, %v1807_v24  ;;  %v2061_v40 = vpop.permute.xlu2 %2060  ;;  %v3307_v3 = vpack.c.bf16 %v3195_v13, %v3193_v29  ;;  %v13054_v36 = vld [vmem:[#allocation79_spill] sm:$0xff]  ;;  %v6211_v29 = vld [vmem:[#allocation14 + $0x54] sm:$0xf0] }
 0x445   :  { %v1811_v57 = vpop.permute.xlu1 %1810  ;;  %v10067_v26 = vadd.f32 %v13054_v36, %v8279_v39  ;;  %3163 = vst [vmem:[%s12606_s10 + $0xf8] sm:$0xff] %v3131_v42  ;;  %3597 = vmatmul.bf16.gmra.mxu2 %v3306_v43  ;;  %v6056_v24 = vld [vmem:[#allocation14 + $0x50] sm:$0xf]  ;;  %v13056_v42 = vld [vmem:[#allocation72_spill] sm:$0xff] }
 0x446   :  { %1826 = vst.msk [vmem:[%s12607_s11 + $0x140] sm:$0xff] %vm1395_vm3, %v13055_v14  ;;  %3766 = vmatmul.bf16.gmra.mxu3 %v3307_v3  ;;  %4104 = vmatmul.bf16.gmra.mxu1 %v3307_v3  ;;  %v6057_v13 = vor.u32 %v6211_v29, %v6056_v24  ;;  %v6120_v14 = vld [vmem:[#allocation14 + $0xd0] sm:$0xf]  ;;  %v3906_v3 = vpop.f32.mrf.mxu0  ;;  %v13057_v47 = vmax.f32 %v13056_v42, 0.0  ;;  %v13060_v24 = vld [vmem:[#allocation110_spill] sm:$0xff] }
 0x447   :  { %2069 = vst.msk [vmem:[%s12607_s11 + $0x230] sm:$0xff] %vm1395_vm3, %v2061_v40  ;;  %3935 = vmatmul.bf16.gmra.mxu0 %v3306_v43  ;;  %v12752_v44 = vmax.f32 %v10067_v26, 0.0  ;;  %v6121_v40 = vor.u32 %v6227_v34, %v6120_v14  ;;  %v13061_v29 = vmax.f32 %v13060_v24, 0.0  ;;  %v3197_v24 = vld [vmem:[%s12607_s11 + $0x108] sm:$0xff] }
 0x448   :  { %1820 = vst.msk [vmem:[%s12607_s11 + $0x160] sm:$0xff] %vm1382_vm2, %v1811_v57  ;;  %v10093_v43 = vpop.f32.mrf.mxu1  ;;  %v13058_v57 = vld [vmem:[#allocation109_spill] sm:$0xff]  ;;  %4623 = vmatpush.bf16.msra.mxu2 %v6057_v13  ;;  %v13063_v13 = vmax.f32 %v9679_v11, 0.0 }
 0x449   :  { %1828 = vst.msk [vmem:[%s12607_s11 + $0x160] sm:$0xff] %vm1395_vm3, %v13057_v47  ;;  %v13059_v36 = vmax.f32 %v13058_v57, 0.0  ;;  %4792 = vmatpush.bf16.msra.mxu3 %v6121_v40  ;;  %v6210_v47 = vld [vmem:[#allocation14 + $0x54] sm:$0xf]  ;;  %v6122_v40 = vld [vmem:[#allocation14 + $0xd8] sm:$0xf0] }
 0x44a   :  { %2220 = vrot.lane.b32.xlu0 %v12752_v44, %s6955_s25  ;;  %2288 = vrot.lane.b32.xlu1 %v13061_v29, %s6955_s25  ;;  %v6058_v44 = vld [vmem:[#allocation14 + $0x58] sm:$0xf0] }
 0x44b   :  { %2448 = vrot.lane.b32.xlu2 %v13059_v36, %s6955_s25  ;;  %v1841_v42 = vpop.permute.xlu0 %1840  ;;  %v6061_v57 = vor.u32 %v6210_v47, %v6058_v44  ;;  %v3907_v36 = vadd.f32 %v3906_v3, %v9994_v63  ;;  %v13064_v44 = vmax.f32 %v9123_v27, 0.0  ;;  %v13065_v3 = vld [vmem:[#allocation111_spill] sm:$0xff]  ;;  %v3196_v27 = vld [vmem:[%s12607_s11 + $0x100] sm:$0xff] }
 0x44c   :  { %1851 = vst.msk [vmem:[%s12607_s11 + $0x158] sm:$0xff] %vm1382_vm2, %v1841_v42  ;;  %v2127_v14 = vpop.permute.xlu2 %2126  ;;  %v13066_v29 = vmax.f32 %v13065_v3, 0.0  ;;  %v13067_v42 = vld [vmem:[#allocation44_spill] sm:$0xff] }
 0x44d   :  { %v1845_v34 = vpop.permute.xlu1 %1844  ;;  %1859 = vst.msk [vmem:[%s12607_s11 + $0x158] sm:$0xff] %vm1395_vm3, %v13062_v54  ;;  %4961 = vmatpush.bf16.msra.mxu0 %v6061_v57  ;;  %v6125_v54 = vor.u32 %v6226_v23, %v6122_v40  ;;  %v13069_v57 = vld [vmem:[#allocation43_spill] sm:$0xff]  ;;  %v3199_v40 = vld [vmem:[%s12607_s11 + $0x118] sm:$0xff] }
 0x44e   :  { %2138 = vst.msk [vmem:[%s12607_s11 + $0x240] sm:$0xff] %vm1382_vm2, %v2127_v14  ;;  %v13068_v14 = vmax.f32 %v13067_v42, 0.0  ;;  %v10149_v47 = vpop.f32.mrf.mxu0  ;;  %v3198_v3 = vld [vmem:[%s12607_s11 + $0x110] sm:$0xff] }
 0x44f   :  { %2146 = vst.msk [vmem:[%s12607_s11 + $0x240] sm:$0xff] %vm1395_vm3, %v13063_v13  ;;  %v13070_v13 = vmax.f32 %v13069_v57, 0.0  ;;  %5130 = vmatpush.bf16.msra.mxu1 %v6125_v54  ;;  %v3308_v54 = vpack.c.bf16 %v3198_v3, %v3196_v27  ;;  %v13073_v42 = vld [vmem:[#allocation112_spill] sm:$0xff] }
 0x450   :  { %1853 = vst.msk [vmem:[%s12607_s11 + $0x178] sm:$0xff] %vm1382_vm2, %v1845_v34  ;;  %v4075_v11 = vpop.f32.mrf.mxu1  ;;  %v13077_v57 = vld [vmem:[#allocation32_spill] sm:$0xff] }
 0x451   :  { %1861 = vst.msk [vmem:[%s12607_s11 + $0x178] sm:$0xff] %vm1395_vm3, %v13064_v44  ;;  %v10144_v34 = vadd.f32 %v4075_v11, %v3907_v36  ;;  %v3309_v11 = vpack.c.bf16 %v3199_v40, %v3197_v24  ;;  %v13072_v24 = vmax.f32 %v9736_v62, 0.0  ;;  %v13075_v62 = vld [vmem:[#allocation38_spill] sm:$0xff] }
 0x452   :  { %2286 = vrot.lane.b32.xlu0 %v13066_v29, %s6955_s25  ;;  %2290 = vrot.lane.b32.xlu1 %v13070_v13, %s6955_s25  ;;  %v13071_v29 = vmax.f32 %v9361_v22, 0.0  ;;  %v13076_v27 = vmax.f32 %v13075_v62, 0.0  ;;  %v13078_v13 = vmax.f32 %v13077_v57, 0.0  ;;  %v3202_v57 = vld [vmem:[%s12607_s11 + $0x130] sm:$0xff] }
 0x453   :  { %2450 = vrot.lane.b32.xlu2 %v13068_v14, %s6955_s25  ;;  %v1843_v23 = vpop.permute.xlu0 %1842  ;;  %v13074_v14 = vmax.f32 %v13073_v42, 0.0 }
 0x454   :  { %1852 = vst.msk [vmem:[%s12607_s11 + $0x168] sm:$0xff] %vm1382_vm2, %v1843_v23  ;;  %v2161_v36 = vpop.permute.xlu2 %2160 }
 0x455   :  { %v1927_v44 = vpop.permute.xlu1 %1926  ;;  %1860 = vst.msk [vmem:[%s12607_s11 + $0x168] sm:$0xff] %vm1395_vm3, %v13071_v29  ;;  %3602 = vmatmul.bf16.gmra.mxu2 %v3308_v54  ;;  %v10209_v29 = vadd.f32 %v9481_v55, %v8237_v58  ;;  %v3201_v55 = vld [vmem:[%s12607_s11 + $0x128] sm:$0xff] }
 0x456   :  { %2171 = vst.msk [vmem:[%s12607_s11 + $0x258] sm:$0xff] %vm1382_vm2, %v2161_v36  ;;  %3771 = vmatmul.bf16.gmra.mxu3 %v3309_v11  ;;  %4109 = vmatmul.bf16.gmra.mxu1 %v3309_v11  ;;  %v3911_v3 = vpop.f32.mrf.mxu0 }
 0x457   :  { %2179 = vst.msk [vmem:[%s12607_s11 + $0x258] sm:$0xff] %vm1395_vm3, %v13072_v24  ;;  %3940 = vmatmul.bf16.gmra.mxu0 %v3308_v54  ;;  %v13080_v54 = vmax.f32 %v9787_v49, 0.0  ;;  %v3912_v24 = vadd.f32 %v3911_v3, %v9994_v63  ;;  %v13081_v49 = vld [vmem:[#allocation34_spill] sm:$0xff] }
 0x458   :  { %1938 = vst.msk [vmem:[%s12607_s11 + $0x188] sm:$0xff] %vm1395_vm3, %v1927_v44  ;;  %v10184_v22 = vpop.f32.mrf.mxu1  ;;  %v13079_v44 = vld [vmem:[#allocation97_spill] sm:$0xff]  ;;  %v13082_v62 = vmax.f32 %v13081_v49, 0.0 }
 0x459   :  { %v10201_v11 = vadd.f32 %v13079_v44, %v8237_v58  ;;  %v3200_v3 = vld [vmem:[%s12607_s11 + $0x120] sm:$0xff] }
 0x45a   :  { %2320 = vrot.lane.b32.xlu0 %v13074_v14, %s6955_s25  ;;  %2324 = vrot.lane.b32.xlu1 %v13078_v13, %s6955_s25  ;;  %v12757_v14 = vmax.f32 %v10209_v29, 0.0 }
 0x45b   :  { %2484 = vrot.lane.b32.xlu2 %v13076_v27, %s6955_s25  ;;  %v1897_v23 = vpop.permute.xlu0 %1896  ;;  %v12755_v42 = vmax.f32 %v10201_v11, 0.0 }
 0x45c   :  { %1907 = vst.msk [vmem:[%s12607_s11 + $0x190] sm:$0xff] %vm1395_vm3, %v1897_v23  ;;  %v2163_v40 = vpop.permute.xlu2 %2162  ;;  %v3203_v23 = vld [vmem:[%s12607_s11 + $0x138] sm:$0xff] }
 0x45d   :  { %v1901_v36 = vpop.permute.xlu1 %1900  ;;  %2172 = vst.msk [vmem:[%s12607_s11 + $0x268] sm:$0xff] %vm1382_vm2, %v2163_v40  ;;  %v3311_v44 = vpack.c.bf16 %v3203_v23, %v3201_v55  ;;  %v13086_v55 = vld [vmem:[#allocation107_spill] sm:$0xff]  ;;  %v13087_v23 = vmax.f32 %v9277_v53, 0.0 }
 0x45e   :  { %2180 = vst.msk [vmem:[%s12607_s11 + $0x268] sm:$0xff] %vm1395_vm3, %v13080_v54  ;;  %v13084_v54 = vld [vmem:[#allocation98_spill] sm:$0xff] }
 0x45f   :  { %1909 = vst.msk [vmem:[%s12607_s11 + $0x1b0] sm:$0xff] %vm1395_vm3, %v1901_v36 }
 0x460   :  { %v4080_v58 = vpop.f32.mrf.mxu1 }
 0x461   :  { %v10233_v27 = vadd.f32 %v4080_v58, %v3912_v24  ;;  %v10253_v24 = vadd.f32 %v13084_v54, %v12934_v12  ;;  %v13085_v58 = vld [vmem:[#allocation88_spill] sm:$0xff]  ;;  %v13089_v54 = vld [vmem:[#allocation102_spill] sm:$0xff] }
 0x462   :  { %2322 = vrot.lane.b32.xlu0 %v13082_v62, %s6955_s25  ;;  %2406 = vrot.lane.b32.xlu1 %v12757_v14, %s6955_s25  ;;  %v10257_v49 = vadd.f32 %v13085_v58, %v8279_v39  ;;  %v3310_v62 = vpack.c.bf16 %v3202_v57, %v3200_v3  ;;  %v13088_v3 = vmax.f32 %v9317_v5, 0.0  ;;  %v12760_v58 = vmax.f32 %v13089_v54, 0.0  ;;  %v3204_v5 = vld [vmem:[%s12607_s11 + $0x140] sm:$0xff] }
 0x463   :  { %2566 = vrot.lane.b32.xlu2 %v12755_v42, %s6955_s25  ;;  %13083 = vst [vmem:[#allocation95_spill] sm:$0xff] %v10233_v27  ;;  %v1899_v13 = vpop.permute.xlu0 %1898  ;;  %v12761_v57 = vmax.f32 %v10253_v24, 0.0  ;;  %v6112_v14 = vld [vmem:[#allocation14 + $0xc0] sm:$0xf] }
 0x464   :  { %1908 = vst.msk [vmem:[%s12607_s11 + $0x1a0] sm:$0xff] %vm1395_vm3, %v1899_v13  ;;  %v2217_v40 = vpop.permute.xlu2 %2216  ;;  %v10265_v13 = vadd.f32 %v13086_v55, %v8279_v39  ;;  %v12754_v39 = vmax.f32 %v10257_v49, 0.0  ;;  %v13090_v55 = vld [vmem:[#allocation113_spill] sm:$0xff] }
 0x465   :  { %v1967_v36 = vpop.permute.xlu1 %1966  ;;  %2227 = vst.msk [vmem:[%s12607_s11 + $0x290] sm:$0xff] %vm1395_vm3, %v2217_v40  ;;  %3607 = vmatmul.bf16.gmra.mxu2 %v3310_v62 }
 0x466   :  { %1978 = vst.msk [vmem:[%s12607_s11 + $0x1c0] sm:$0xff] %vm1382_vm2, %v1967_v36  ;;  %3776 = vmatmul.bf16.gmra.mxu3 %v3311_v44  ;;  %4114 = vmatmul.bf16.gmra.mxu1 %v3311_v44  ;;  %v12756_v40 = vmax.f32 %v10265_v13, 0.0 }
 0x467   :  { %1986 = vst.msk [vmem:[%s12607_s11 + $0x1c0] sm:$0xff] %vm1395_vm3, %v13087_v23  ;;  %3945 = vmatmul.bf16.gmra.mxu0 %v3310_v62  ;;  %v3207_v62 = vld [vmem:[%s12607_s11 + $0x158] sm:$0xff]  ;;  %v13091_v23 = vmax.f32 %v13090_v55, 0.0 }
 0x46a   :  { %2376 = vrot.lane.b32.xlu0 %v12761_v57, %s6955_s25  ;;  %2380 = vrot.lane.b32.xlu1 %v12756_v40, %s6955_s25  ;;  %v13094_v40 = vmax.f32 %v9466_v31, 0.0  ;;  %v10352_v31 = vpop.f32.mrf.mxu1 }
 0x46b   :  { %2540 = vrot.lane.b32.xlu2 %v12754_v39, %s6955_s25  ;;  %v1933_v53 = vpop.permute.xlu0 %1932 }
 0x46c   :  { %1941 = vst.msk [vmem:[%s12607_s11 + $0x1b8] sm:$0xff] %vm1395_vm3, %v1933_v53  ;;  %v2219_v36 = vpop.permute.xlu2 %2218  ;;  %v13092_v53 = vld [vmem:[#allocation114_spill] sm:$0xff] }
 0x46d   :  { %v2001_v44 = vpop.permute.xlu1 %2000  ;;  %2228 = vst.msk [vmem:[%s12607_s11 + $0x2a0] sm:$0xff] %vm1395_vm3, %v2219_v36  ;;  %v13093_v36 = vmax.f32 %v13092_v53, 0.0 }
 0x46e   :  { %2011 = vst.msk [vmem:[%s12607_s11 + $0x1d8] sm:$0xff] %vm1382_vm2, %v2001_v44  ;;  %v3205_v44 = vld [vmem:[%s12607_s11 + $0x148] sm:$0xff] }
 0x46f   :  { %2019 = vst.msk [vmem:[%s12607_s11 + $0x1d8] sm:$0xff] %vm1395_vm3, %v13088_v3  ;;  %v10328_v3 = vadd.f32 %v9586_v2, %v8134_v41  ;;  %v3313_v55 = vpack.c.bf16 %v3207_v62, %v3205_v44  ;;  %v13095_v2 = vmax.f32 %v9357_v9, 0.0 }
 0x471   :  { %v12758_v41 = vmax.f32 %v10328_v3, 0.0 }
 0x472   :  { %2378 = vrot.lane.b32.xlu0 %v12760_v58, %s6955_s25  ;;  %2446 = vrot.lane.b32.xlu1 %v13093_v36, %s6955_s25 }
 0x473   :  { %2606 = vrot.lane.b32.xlu2 %v13091_v23, %s6955_s25  ;;  %v1999_v39 = vpop.permute.xlu0 %1998  ;;  %v3206_v23 = vld [vmem:[%s12607_s11 + $0x150] sm:$0xff] }
 0x474   :  { %v2253_v42 = vpop.permute.xlu2 %2252  ;;  %2010 = vst.msk [vmem:[%s12607_s11 + $0x1c8] sm:$0xff] %vm1382_vm2, %v1999_v39  ;;  %v3312_v36 = vpack.c.bf16 %v3206_v23, %v3204_v5  ;;  %v13100_v23 = vmax.f32 %v9508_v59, 0.0 }
 0x475   :  { %v2003_v53 = vpop.permute.xlu1 %2002  ;;  %2018 = vst.msk [vmem:[%s12607_s11 + $0x1c8] sm:$0xff] %vm1395_vm3, %v13094_v40  ;;  %v13098_v40 = vld [vmem:[#allocation116_spill] sm:$0xff] }
 0x476   :  { %3781 = vmatmul.bf16.gmra.mxu3 %v3313_v55  ;;  %4119 = vmatmul.bf16.gmra.mxu1 %v3313_v55  ;;  %2261 = vst.msk [vmem:[%s12607_s11 + $0x2b8] sm:$0xff] %vm1395_vm3, %v2253_v42  ;;  %v13096_v42 = vld [vmem:[#allocation115_spill] sm:$0xff]  ;;  %v13099_v62 = vmax.f32 %v13098_v40, 0.0  ;;  %v10373_v55 = vpop.f32.mrf.mxu0  ;;  %v13105_v40 = vmax.f32 %v9082_v17, 0.0 }
 0x477   :  { %3612 = vmatmul.bf16.gmra.mxu2 %v3312_v36  ;;  %3950 = vmatmul.bf16.gmra.mxu0 %v3312_v36  ;;  %2012 = vst.msk [vmem:[%s12607_s11 + $0x1e8] sm:$0xff] %vm1382_vm2, %v2003_v53  ;;  %v13097_v39 = vmax.f32 %v13096_v42, 0.0  ;;  %v10381_v53 = vpop.f32.mrf.mxu3  ;;  %v13102_v36 = vmax.f32 %v10002_v20, 0.0  ;;  %v10400_v42 = vpop.f32.mrf.mxu2 }
 0x478   :  { %2020 = vst.msk [vmem:[%s12607_s11 + $0x1e8] sm:$0xff] %vm1395_vm3, %v13095_v2  ;;  %v4085_v59 = vpop.f32.mrf.mxu1  ;;  %v3209_v2 = vld [vmem:[%s12607_s11 + $0x168] sm:$0xff] }
 0x479   :  { %13101 = vst [vmem:[#allocation100_spill] sm:$0xff] %v10381_v53 }
 0x47a   :  { %2412 = vrot.lane.b32.xlu0 %v12758_v41, %s6955_s25  ;;  %2480 = vrot.lane.b32.xlu1 %v13099_v62, %s6955_s25  ;;  %v3208_v62 = vld [vmem:[%s12607_s11 + $0x160] sm:$0xff] }
 0x47b   :  { %2640 = vrot.lane.b32.xlu2 %v13097_v39, %s6955_s25  ;;  %v1973_v5 = vpop.permute.xlu0 %1972  ;;  %v13103_v39 = vld [vmem:[#allocation117_spill] sm:$0xff]  ;;  %v6225_v41 = vld [vmem:[#allocation14 + $0xc4] sm:$0xf0] }
 0x47c   :  { %1981 = vst.msk [vmem:[%s12607_s11 + $0x1f0] sm:$0xff] %vm1382_vm2, %v1973_v5  ;;  %v13104_v20 = vmax.f32 %v13103_v39, 0.0  ;;  %v13106_v5 = vmax.f32 %v9102_v35, 0.0  ;;  %v13107_v35 = vld [vmem:[#allocation84_spill] sm:$0xff]  ;;  %v6113_v57 = vor.u32 %v6225_v41, %v6112_v14 }
 0x47d   :  { %v2319_v44 = vpop.permute.xlu2 %2318  ;;  %v2057_v9 = vpop.permute.xlu1 %2056  ;;  %1989 = vst.msk [vmem:[%s12607_s11 + $0x1f0] sm:$0xff] %vm1395_vm3, %v13100_v23 }
 0x47e   :  { %2330 = vst.msk [vmem:[%s12607_s11 + $0x2c8] sm:$0xff] %vm1382_vm2, %v2319_v44  ;;  %v3211_v44 = vld [vmem:[%s12607_s11 + $0x178] sm:$0xff]  ;;  %4793 = vmatpush.bf16.msra.mxu3 %v6113_v57  ;;  %v3214_v57 = vld [vmem:[%s12607_s11 + $0x190] sm:$0xff] }
 0x47f   :  { %2338 = vst.msk [vmem:[%s12607_s11 + $0x2c8] sm:$0xff] %vm1395_vm3, %v13102_v36  ;;  %v3315_v23 = vpack.c.bf16 %v3211_v44, %v3209_v2  ;;  %v3210_v36 = vld [vmem:[%s12607_s11 + $0x170] sm:$0xff]  ;;  %v13108_v44 = vmax.f32 %v10067_v26, 0.0  ;;  %v13109_v26 = vld [vmem:[#allocation29_spill] sm:$0xff] }
 0x480   :  { %2067 = vst.msk [vmem:[%s12607_s11 + $0x210] sm:$0xff] %vm1395_vm3, %v2057_v9  ;;  %v3916_v2 = vpop.f32.mrf.mxu0 }
 0x482   :  { %2478 = vrot.lane.b32.xlu0 %v13104_v20, %s6955_s25  ;;  %2482 = vrot.lane.b32.xlu1 %v13106_v5, %s6955_s25  ;;  %v3314_v20 = vpack.c.bf16 %v3210_v36, %v3208_v62  ;;  %v3747_v5 = vpop.f32.mrf.mxu3  ;;  %v3917_v62 = vadd.f32 %v3916_v2, %v9994_v63  ;;  %v6209_v2 = vld [vmem:[#allocation14 + $0x44] sm:$0xf0] }
 0x483   :  { %2642 = vrot.lane.b32.xlu2 %v13105_v40, %s6955_s25  ;;  %v2055_v9 = vpop.permute.xlu0 %2054  ;;  %v10426_v40 = vadd.f32 %v13107_v35, %v12934_v12  ;;  %v6048_v35 = vld [vmem:[#allocation14 + $0x40] sm:$0xf] }
 0x484   :  { %2066 = vst.msk [vmem:[%s12607_s11 + $0x200] sm:$0xff] %vm1395_vm3, %v2055_v9  ;;  %v10443_v12 = vadd.f32 %v4085_v59, %v3917_v62  ;;  %v3578_v36 = vpop.f32.mrf.mxu2  ;;  %v13111_v59 = vld [vmem:[#allocation82_spill] sm:$0xff]  ;;  %v6049_v62 = vor.u32 %v6209_v2, %v6048_v35  ;;  %v6050_v35 = vld [vmem:[#allocation14 + $0x48] sm:$0xf0] }
 0x485   :  { %v2293_v17 = vpop.permute.xlu2 %2292  ;;  %v2059_v39 = vpop.permute.xlu1 %2058  ;;  %v12759_v9 = vmax.f32 %v10426_v40, 0.0 }
 0x486   :  { %2301 = vst.msk [vmem:[%s12607_s11 + $0x2f0] sm:$0xff] %vm1382_vm2, %v2293_v17  ;;  %3786 = vmatmul.bf16.gmra.mxu3 %v3315_v23  ;;  %4124 = vmatmul.bf16.gmra.mxu1 %v3315_v23  ;;  %v13110_v23 = vmax.f32 %v13109_v26, 0.0  ;;  %v4087_v17 = vpop.f32.mrf.mxu1 }
 0x487   :  { %2309 = vst.msk [vmem:[%s12607_s11 + $0x2f0] sm:$0xff] %vm1395_vm3, %v13108_v44  ;;  %3617 = vmatmul.bf16.gmra.mxu2 %v3314_v20  ;;  %3955 = vmatmul.bf16.gmra.mxu0 %v3314_v20  ;;  %v3579_v20 = vadd.f32 %v3578_v36, %v9635_v32  ;;  %v13112_v36 = vld [vmem:[#allocation86_spill] sm:$0xff] }
 0x488   :  { %2068 = vst.msk [vmem:[%s12607_s11 + $0x220] sm:$0xff] %vm1395_vm3, %v2059_v39  ;;  %v10455_v39 = vadd.f32 %v13111_v59, %v12946_v19  ;;  %v10465_v58 = vadd.f32 %v13112_v36, %v8114_v25  ;;  %v3918_v19 = vpop.f32.mrf.mxu0  ;;  %4624 = vmatpush.bf16.msra.mxu2 %v6049_v62  ;;  %v3213_v59 = vld [vmem:[%s12607_s11 + $0x188] sm:$0xff]  ;;  %v6224_v36 = vld [vmem:[#allocation14 + $0xc4] sm:$0xf] }
 0x489   :  { %v10457_v26 = vadd.f32 %v3747_v5, %v3579_v20  ;;  %v3919_v5 = vadd.f32 %v3918_v19, %v9994_v63  ;;  %v6208_v20 = vld [vmem:[#allocation14 + $0x44] sm:$0xf]  ;;  %v6114_v19 = vld [vmem:[#allocation14 + $0xc8] sm:$0xf0] }
 0x48a   :  { %2452 = vrot.lane.b32.xlu0 %v13110_v23, %s6955_s25  ;;  %2536 = vrot.lane.b32.xlu1 %v12759_v9, %s6955_s25  ;;  %v12762_v25 = vmax.f32 %v10455_v39, 0.0  ;;  %v6053_v14 = vor.u32 %v6208_v20, %v6050_v35  ;;  %v3749_v41 = vpop.f32.mrf.mxu3  ;;  %v3212_v35 = vld [vmem:[%s12607_s11 + $0x180] sm:$0xff] }
 0x48b   :  { %v2089_v44 = vpop.permute.xlu0 %2088  ;;  %v10477_v2 = vadd.f32 %v4087_v17, %v3919_v5  ;;  %v3316_v53 = vpack.c.bf16 %v3214_v57, %v3212_v35  ;;  %v13116_v35 = vmax.f32 %v9643_v18, 0.0 }
 0x48c   :  { %2099 = vst.msk [vmem:[%s12607_s11 + $0x218] sm:$0xff] %vm1395_vm3, %v2089_v44  ;;  %v12763_v44 = vmax.f32 %v10465_v58, 0.0  ;;  %4962 = vmatpush.bf16.msra.mxu0 %v6053_v14  ;;  %v13113_v14 = vld [vmem:[#allocation101_spill] sm:$0xff] }
 0x48d   :  { %v2375_v23 = vpop.permute.xlu2 %2374  ;;  %v2093_v9 = vpop.permute.xlu1 %2092 }
 0x48e   :  { %2386 = vst.msk [vmem:[%s12607_s11 + $0x300] sm:$0xff] %vm1395_vm3, %v2375_v23  ;;  %v3215_v23 = vld [vmem:[%s12607_s11 + $0x198] sm:$0xff] }
 0x48f   :  { %2101 = vst.msk [vmem:[%s12607_s11 + $0x238] sm:$0xff] %vm1395_vm3, %v2093_v9  ;;  %v3580_v9 = vpop.f32.mrf.mxu2  ;;  %v3317_v20 = vpack.c.bf16 %v3215_v23, %v3213_v59 }
 0x490   :  { %v3581_v17 = vadd.f32 %v3580_v9, %v9635_v32 }
 0x492   :  { %2534 = vrot.lane.b32.xlu0 %v12762_v25, %s6955_s25  ;;  %2538 = vrot.lane.b32.xlu1 %v12763_v44, %s6955_s25  ;;  %v10501_v25 = vadd.f32 %v13113_v14, %v8173_v10  ;;  %v6117_v44 = vor.u32 %v6224_v36, %v6114_v19  ;;  %v10503_v6 = vadd.f32 %v3749_v41, %v3581_v17  ;;  %v3921_v59 = vpop.f32.mrf.mxu0  ;;  %v13114_v41 = vmax.f32 %v9462_v7, 0.0  ;;  %v13115_v17 = vld [vmem:[#allocation104_spill] sm:$0xff] }
 0x493   :  { %v4090_v62 = vpop.f32.mrf.mxu1  ;;  %v2091_v5 = vpop.permute.xlu0 %2090  ;;  %v3922_v10 = vadd.f32 %v3921_v59, %v9994_v63  ;;  %v12764_v23 = vmax.f32 %v13115_v17, 0.0  ;;  %v13117_v59 = vld [vmem:[#allocation118_spill] sm:$0xff] }
 0x494   :  { %2100 = vst.msk [vmem:[%s12607_s11 + $0x228] sm:$0xff] %vm1395_vm3, %v2091_v5  ;;  %v12766_v57 = vmax.f32 %v10501_v25, 0.0  ;;  %5131 = vmatpush.bf16.msra.mxu1 %v6117_v44  ;;  %v12765_v18 = vmax.f32 %v13117_v59, 0.0 }
 0x495   :  { %v2409_v9 = vpop.permute.xlu2 %2408  ;;  %v2159_v27 = vpop.permute.xlu1 %2158  ;;  %v10526_v36 = vadd.f32 %v4090_v62, %v3922_v10  ;;  %v13118_v10 = vmax.f32 %v9504_v61, 0.0  ;;  %v3216_v61 = vld [vmem:[%s12607_s11 + $0x1a0] sm:$0xff] }
 0x496   :  { %2419 = vst.msk [vmem:[%s12607_s11 + $0x318] sm:$0xff] %vm1395_vm3, %v2409_v9  ;;  %3791 = vmatmul.bf16.gmra.mxu3 %v3317_v20  ;;  %4129 = vmatmul.bf16.gmra.mxu1 %v3317_v20 }
 0x497   :  { %2170 = vst.msk [vmem:[%s12607_s11 + $0x248] sm:$0xff] %vm1382_vm2, %v2159_v27  ;;  %3622 = vmatmul.bf16.gmra.mxu2 %v3316_v53  ;;  %3960 = vmatmul.bf16.gmra.mxu0 %v3316_v53 }
 0x498   :  { %2178 = vst.msk [vmem:[%s12607_s11 + $0x248] sm:$0xff] %vm1395_vm3, %v13114_v41  ;;  %v3583_v27 = vpop.f32.mrf.mxu2 }
 0x499   :  { %v3752_v19 = vpop.f32.mrf.mxu3  ;;  %v3584_v7 = vadd.f32 %v3583_v27, %v9635_v32  ;;  %v3219_v27 = vld [vmem:[%s12607_s11 + $0x1b8] sm:$0xff] }
 0x49a   :  { %2568 = vrot.lane.b32.xlu0 %v12766_v57, %s6955_s25  ;;  %2572 = vrot.lane.b32.xlu1 %v12764_v23, %s6955_s25  ;;  %v3923_v14 = vpop.f32.mrf.mxu0  ;;  %v13121_v57 = vmax.f32 %v9690_v16, 0.0  ;;  %v13122_v16 = vmax.f32 %v10253_v24, 0.0  ;;  %v13125_v24 = vmax.f32 %v9202_v30, 0.0  ;;  %v13126_v30 = vmax.f32 %v9747_v33, 0.0 }
 0x49b   :  { %v4092_v53 = vpop.f32.mrf.mxu1  ;;  %v2129_v5 = vpop.permute.xlu0 %2128  ;;  %v10535_v20 = vadd.f32 %v3752_v19, %v3584_v7  ;;  %v3924_v9 = vadd.f32 %v3923_v14, %v9994_v63 }
 0x49c   :  { %2139 = vst.msk [vmem:[%s12607_s11 + $0x250] sm:$0xff] %vm1382_vm2, %v2129_v5  ;;  %v13119_v5 = vld [vmem:[#allocation119_spill] sm:$0xff] }
 0x49d   :  { %v2411_v44 = vpop.permute.xlu2 %2410  ;;  %v2133_v62 = vpop.permute.xlu1 %2132  ;;  %2147 = vst.msk [vmem:[%s12607_s11 + $0x250] sm:$0xff] %vm1395_vm3, %v13116_v35  ;;  %v10563_v41 = vadd.f32 %v4092_v53, %v3924_v9  ;;  %v3217_v35 = vld [vmem:[%s12607_s11 + $0x1a8] sm:$0xff] }
 0x49e   :  { %2420 = vst.msk [vmem:[%s12607_s11 + $0x328] sm:$0xff] %vm1395_vm3, %v2411_v44  ;;  %v13120_v44 = vmax.f32 %v13119_v5, 0.0  ;;  %v3319_v9 = vpack.c.bf16 %v3219_v27, %v3217_v35 }
 0x49f   :  { %2141 = vst.msk [vmem:[%s12607_s11 + $0x270] sm:$0xff] %vm1382_vm2, %v2133_v62 }
 0x4a0   :  { %2149 = vst.msk [vmem:[%s12607_s11 + $0x270] sm:$0xff] %vm1395_vm3, %v13118_v10  ;;  %v3585_v7 = vpop.f32.mrf.mxu2  ;;  %v3218_v10 = vld [vmem:[%s12607_s11 + $0x1b0] sm:$0xff] }
 0x4a1   :  { %v3754_v19 = vpop.f32.mrf.mxu3  ;;  %v3586_v53 = vadd.f32 %v3585_v7, %v9635_v32 }
 0x4a2   :  { %2570 = vrot.lane.b32.xlu0 %v12765_v18, %s6955_s25  ;;  %2638 = vrot.lane.b32.xlu1 %v13120_v44, %s6955_s25  ;;  %v3318_v44 = vpack.c.bf16 %v3218_v10, %v3216_v61  ;;  %v4245_v18 = vmax.f32 %v10477_v2, 0.0  ;;  %v3926_v27 = vpop.f32.mrf.mxu0  ;;  %v4243_v2 = vmax.f32 %v10443_v12, 0.0 }
 0x4a3   :  { %v4095_v62 = vpop.f32.mrf.mxu1  ;;  %v10584_v23 = vadd.f32 %v3754_v19, %v3586_v53  ;;  %v3927_v19 = vadd.f32 %v3926_v27, %v9994_v63  ;;  %v13123_v53 = vld [vmem:[#allocation120_spill] sm:$0xff]  ;;  %v4242_v27 = vmax.f32 %v10457_v26, 0.0 }
 0x4a4   :  { %v2131_v14 = vpop.permute.xlu0 %2130  ;;  %v13124_v35 = vmax.f32 %v13123_v53, 0.0 }
 0x4a5   :  { %2140 = vst.msk [vmem:[%s12607_s11 + $0x260] sm:$0xff] %vm1382_vm2, %v2131_v14  ;;  %v2449_v5 = vpop.permute.xlu2 %2448  ;;  %v2215_v7 = vpop.permute.xlu1 %2214  ;;  %v10618_v14 = vpack.c.bf16 %v4245_v18, %v4243_v2  ;;  %v13127_v2 = vmax.f32 %v13089_v54, 0.0  ;;  %v13128_v54 = vld [vmem:[#allocation63_spill] sm:$0xff] }
 0x4a6   :  { %2148 = vst.msk [vmem:[%s12607_s11 + $0x260] sm:$0xff] %vm1395_vm3, %v13121_v57  ;;  %3796 = vmatmul.bf16.gmra.mxu3 %v3319_v9  ;;  %4134 = vmatmul.bf16.gmra.mxu1 %v3319_v9  ;;  %v10613_v57 = vadd.f32 %v4095_v62, %v3927_v19  ;;  %v13129_v53 = vmax.f32 %v13128_v54, 0.0 }
 0x4a7   :  { %2459 = vst.msk [vmem:[%s12607_s11 + $0x350] sm:$0xff] %vm1382_vm2, %v2449_v5  ;;  %3627 = vmatmul.bf16.gmra.mxu2 %v3318_v44  ;;  %3965 = vmatmul.bf16.gmra.mxu0 %v3318_v44  ;;  %v4244_v5 = vmax.f32 %v10503_v6, 0.0 }
 0x4a8   :  { %2467 = vst.msk [vmem:[%s12607_s11 + $0x350] sm:$0xff] %vm1395_vm3, %v13122_v16  ;;  %v3588_v12 = vpop.f32.mrf.mxu2 }
 0x4a9   :  { %2226 = vst.msk [vmem:[%s12607_s11 + $0x280] sm:$0xff] %vm1395_vm3, %v2215_v7  ;;  %v3757_v61 = vpop.f32.mrf.mxu3  ;;  %v3589_v9 = vadd.f32 %v3588_v12, %v9635_v32  ;;  %v10649_v33 = vpack.c.bf16 %v4244_v5, %v4242_v27  ;;  %v3220_v12 = vld [vmem:[%s12607_s11 + $0x1c0] sm:$0xff] }
 0x4aa   :  { %2608 = vrot.lane.b32.xlu0 %v13124_v35, %s6955_s25  ;;  %2612 = vrot.lane.b32.xlu1 %v13125_v24, %s6955_s25  ;;  %v3928_v6 = vpop.f32.mrf.mxu0 }
 0x4ab   :  { %v4097_v10 = vpop.f32.mrf.mxu1  ;;  %v10625_v62 = vadd.f32 %v3757_v61, %v3589_v9  ;;  %v3929_v19 = vadd.f32 %v3928_v6, %v9994_v63  ;;  %v3221_v61 = vld [vmem:[%s12607_s11 + $0x1c8] sm:$0xff] }
 0x4ac   :  { %v2165_v7 = vpop.permute.xlu0 %2164 }
 0x4ad   :  { %2173 = vst.msk [vmem:[%s12607_s11 + $0x278] sm:$0xff] %vm1382_vm2, %v2165_v7  ;;  %v2451_v44 = vpop.permute.xlu2 %2450  ;;  %v2249_v18 = vpop.permute.xlu1 %2248  ;;  %v10655_v26 = vadd.f32 %v4097_v10, %v3929_v19  ;;  %v3223_v10 = vld [vmem:[%s12607_s11 + $0x1d8] sm:$0xff]  ;;  %v4249_v19 = vmax.f32 %v10563_v41, 0.0  ;;  %v4247_v41 = vmax.f32 %v10526_v36, 0.0  ;;  %v4248_v36 = vmax.f32 %v10584_v23, 0.0 }
 0x4ae   :  { %2181 = vst.msk [vmem:[%s12607_s11 + $0x278] sm:$0xff] %vm1395_vm3, %v13126_v30  ;;  %v3321_v7 = vpack.c.bf16 %v3223_v10, %v3221_v61 }
 0x4af   :  { %2460 = vst.msk [vmem:[%s12607_s11 + $0x360] sm:$0xff] %vm1382_vm2, %v2451_v44  ;;  %v3222_v44 = vld [vmem:[%s12607_s11 + $0x1d0] sm:$0xff] }
 0x4b0   :  { %2468 = vst.msk [vmem:[%s12607_s11 + $0x360] sm:$0xff] %vm1395_vm3, %v13127_v2  ;;  %v3590_v35 = vpop.f32.mrf.mxu2  ;;  %v3320_v6 = vpack.c.bf16 %v3222_v44, %v3220_v12 }
 0x4b1   :  { %2259 = vst.msk [vmem:[%s12607_s11 + $0x298] sm:$0xff] %vm1395_vm3, %v2249_v18  ;;  %v3759_v16 = vpop.f32.mrf.mxu3  ;;  %v3591_v24 = vadd.f32 %v3590_v35, %v9635_v32 }
 0x4b2   :  { %2610 = vrot.lane.b32.xlu0 %v13129_v53, %s6955_s25 }
 0x4b3   :  { %v4100_v9 = vpop.f32.mrf.mxu1  ;;  %v10673_v18 = vadd.f32 %v3759_v16, %v3591_v24  ;;  %v13130_v16 = vmax.f32 %v10328_v3, 0.0  ;;  %v13131_v3 = vld [vmem:[#allocation62_spill] sm:$0xff]  ;;  %v10701_v24 = vpack.c.bf16 %v4249_v19, %v4247_v41  ;;  %v13133_v19 = vmax.f32 %v9632_v1, 0.0 }
 0x4b4   :  { %v2247_v5 = vpop.permute.xlu0 %2246  ;;  %v3931_v2 = vpop.f32.mrf.mxu0  ;;  %v13132_v35 = vmax.f32 %v13131_v3, 0.0 }
 0x4b5   :  { %2258 = vst.msk [vmem:[%s12607_s11 + $0x288] sm:$0xff] %vm1395_vm3, %v2247_v5  ;;  %v2485_v27 = vpop.permute.xlu2 %2484  ;;  %v2251_v30 = vpop.permute.xlu1 %2250  ;;  %v3932_v61 = vadd.f32 %v3931_v2, %v9994_v63 }
 0x4b6   :  { %2493 = vst.msk [vmem:[%s12607_s11 + $0x378] sm:$0xff] %vm1382_vm2, %v2485_v27  ;;  %3801 = vmatmul.bf16.gmra.mxu3 %v3321_v7  ;;  %4139 = vmatmul.bf16.gmra.mxu1 %v3321_v7 }
 0x4b7   :  { %2501 = vst.msk [vmem:[%s12607_s11 + $0x378] sm:$0xff] %vm1395_vm3, %v13130_v16  ;;  %3632 = vmatmul.bf16.gmra.mxu2 %v3320_v6  ;;  %3970 = vmatmul.bf16.gmra.mxu0 %v3320_v6  ;;  %v10696_v54 = vadd.f32 %v4100_v9, %v3932_v61  ;;  %v3225_v61 = vld [vmem:[%s12607_s11 + $0x1e8] sm:$0xff] }
 0x4b8   :  { %2260 = vst.msk [vmem:[%s12607_s11 + $0x2a8] sm:$0xff] %vm1395_vm3, %v2251_v30  ;;  %v3593_v12 = vpop.f32.mrf.mxu2  ;;  %v4246_v30 = vmax.f32 %v10535_v20, 0.0 }
 0x4b9   :  { %v3762_v53 = vpop.f32.mrf.mxu3  ;;  %v3594_v10 = vadd.f32 %v3593_v12, %v9635_v32 }
 0x4ba   :  { %2644 = vrot.lane.b32.xlu0 %v13132_v35, %s6955_s25  ;;  %v10727_v20 = vpack.c.bf16 %v4248_v36, %v4246_v30  ;;  %v3227_v35 = vld [vmem:[%s12607_s11 + $0x1f8] sm:$0xff]  ;;  %v4253_v30 = vmax.f32 %v10655_v26, 0.0  ;;  %v4251_v26 = vmax.f32 %v10613_v57, 0.0 }
 0x4bb   :  { %v4102_v5 = vpop.f32.mrf.mxu1  ;;  %v10705_v44 = vadd.f32 %v3762_v53, %v3594_v10  ;;  %v3226_v53 = vld [vmem:[%s12607_s11 + $0x1f0] sm:$0xff]  ;;  %v3323_v10 = vpack.c.bf16 %v3227_v35, %v3225_v61 }
 0x4bc   :  { %v2221_v7 = vpop.permute.xlu0 %2220  ;;  %v3933_v6 = vpop.f32.mrf.mxu0  ;;  %v6040_v35 = vld [vmem:[#allocation14 + $0x30] sm:$0xf] }
 0x4bd   :  { %2229 = vst.msk [vmem:[%s12607_s11 + $0x2b0] sm:$0xff] %vm1395_vm3, %v2221_v7  ;;  %v2567_v9 = vpop.permute.xlu2 %2566  ;;  %v2289_v27 = vpop.permute.xlu1 %2288  ;;  %v3934_v23 = vadd.f32 %v3933_v6, %v9994_v63  ;;  %v13134_v6 = vmax.f32 %v9898_v51, 0.0  ;;  %v13135_v51 = vmax.f32 %v9683_v50, 0.0 }
 0x4be   :  { %2578 = vst.msk [vmem:[%s12607_s11 + $0x388] sm:$0xff] %vm1395_vm3, %v2567_v9 }
 0x4bf   :  { %2299 = vst.msk [vmem:[%s12607_s11 + $0x2d0] sm:$0xff] %vm1382_vm2, %v2289_v27  ;;  %v10729_v2 = vadd.f32 %v4102_v5, %v3934_v23  ;;  %v3224_v5 = vld [vmem:[%s12607_s11 + $0x1e0] sm:$0xff] }
 0x4c0   :  { %2307 = vst.msk [vmem:[%s12607_s11 + $0x2d0] sm:$0xff] %vm1395_vm3, %v13133_v19  ;;  %v3595_v41 = vpop.f32.mrf.mxu2  ;;  %v3322_v27 = vpack.c.bf16 %v3226_v53, %v3224_v5  ;;  %v10775_v53 = vpack.c.bf16 %v4253_v30, %v4251_v26 }
 0x4c1   :  { %v3764_v16 = vpop.f32.mrf.mxu3  ;;  %v3596_v1 = vadd.f32 %v3595_v41, %v9635_v32 }
 0x4c3   :  { %v4105_v3 = vpop.f32.mrf.mxu1  ;;  %v10744_v36 = vadd.f32 %v3764_v16, %v3596_v1 }
 0x4c4   :  { %v2287_v12 = vpop.permute.xlu0 %2286  ;;  %v3936_v23 = vpop.f32.mrf.mxu0 }
 0x4c5   :  { %2298 = vst.msk [vmem:[%s12607_s11 + $0x2c0] sm:$0xff] %vm1382_vm2, %v2287_v12  ;;  %v2541_v7 = vpop.permute.xlu2 %2540  ;;  %v2291_v9 = vpop.permute.xlu1 %2290  ;;  %v3937_v19 = vadd.f32 %v3936_v23, %v9994_v63  ;;  %v6207_v12 = vld [vmem:[#allocation14 + $0x34] sm:$0xf0]  ;;  %v4250_v23 = vmax.f32 %v10625_v62, 0.0  ;;  %v13137_v62 = vmax.f32 %v10455_v39, 0.0 }
 0x4c6   :  { %2306 = vst.msk [vmem:[%s12607_s11 + $0x2c0] sm:$0xff] %vm1395_vm3, %v13134_v6  ;;  %3806 = vmatmul.bf16.gmra.mxu3 %v3323_v10  ;;  %4144 = vmatmul.bf16.gmra.mxu1 %v3323_v10  ;;  %v4252_v10 = vmax.f32 %v10673_v18, 0.0  ;;  %v6041_v50 = vor.u32 %v6207_v12, %v6040_v35  ;;  %v3231_v39 = vld [vmem:[%s12607_s11 + $0x218] sm:$0xff]  ;;  %v13138_v12 = vmax.f32 %v9740_v28, 0.0 }
 0x4c7   :  { %2549 = vst.msk [vmem:[%s12607_s11 + $0x3b0] sm:$0xff] %vm1395_vm3, %v2541_v7  ;;  %3637 = vmatmul.bf16.gmra.mxu2 %v3322_v27  ;;  %3975 = vmatmul.bf16.gmra.mxu0 %v3322_v27  ;;  %v10773_v16 = vadd.f32 %v4105_v3, %v3937_v19  ;;  %v6104_v7 = vld [vmem:[#allocation14 + $0xb0] sm:$0xf]  ;;  %v13136_v19 = vmax.f32 %v9963_v37, 0.0  ;;  %v6106_v28 = vld [vmem:[#allocation14 + $0xb8] sm:$0xf0] }
 0x4c8   :  { %2300 = vst.msk [vmem:[%s12607_s11 + $0x2e0] sm:$0xff] %vm1382_vm2, %v2291_v9  ;;  %v3598_v41 = vpop.f32.mrf.mxu2  ;;  %v6223_v9 = vld [vmem:[#allocation14 + $0xb4] sm:$0xf0]  ;;  %4625 = vmatpush.bf16.msra.mxu2 %v6041_v50 }
 0x4c9   :  { %2308 = vst.msk [vmem:[%s12607_s11 + $0x2e0] sm:$0xff] %vm1395_vm3, %v13135_v51  ;;  %v3767_v61 = vpop.f32.mrf.mxu3  ;;  %v3599_v57 = vadd.f32 %v3598_v41, %v9635_v32  ;;  %v6105_v6 = vor.u32 %v6223_v9, %v6104_v7  ;;  %v6206_v51 = vld [vmem:[#allocation14 + $0x34] sm:$0xf]  ;;  %v10803_v41 = vpack.c.bf16 %v4252_v10, %v4250_v23  ;;  %v3229_v7 = vld [vmem:[%s12607_s11 + $0x208] sm:$0xff] }
 0x4ca   :  { %v6222_v9 = vld [vmem:[#allocation14 + $0xb4] sm:$0xf] }
 0x4cb   :  { %v4107_v1 = vpop.f32.mrf.mxu1  ;;  %v10779_v27 = vadd.f32 %v3767_v61, %v3599_v57  ;;  %4794 = vmatpush.bf16.msra.mxu3 %v6105_v6  ;;  %v6042_v61 = vld [vmem:[#allocation14 + $0x38] sm:$0xf0]  ;;  %v3230_v6 = vld [vmem:[%s12607_s11 + $0x210] sm:$0xff]  ;;  %v6109_v23 = vor.u32 %v6222_v9, %v6106_v28 }
 0x4cc   :  { %v2321_v5 = vpop.permute.xlu0 %2320  ;;  %v3938_v18 = vpop.f32.mrf.mxu0  ;;  %v6045_v37 = vor.u32 %v6206_v51, %v6042_v61  ;;  %v4257_v61 = vmax.f32 %v10729_v2, 0.0  ;;  %v4255_v2 = vmax.f32 %v10696_v54, 0.0 }
 0x4cd   :  { %2331 = vst.msk [vmem:[%s12607_s11 + $0x2d8] sm:$0xff] %vm1382_vm2, %v2321_v5  ;;  %v2607_v3 = vpop.permute.xlu2 %2606  ;;  %v2325_v30 = vpop.permute.xlu1 %2324  ;;  %v3939_v26 = vadd.f32 %v3938_v18, %v9994_v63  ;;  %v3228_v5 = vld [vmem:[%s12607_s11 + $0x200] sm:$0xff]  ;;  %5132 = vmatpush.bf16.msra.mxu1 %v6109_v23 }
 0x4ce   :  { %2339 = vst.msk [vmem:[%s12607_s11 + $0x2d8] sm:$0xff] %vm1395_vm3, %v13136_v19  ;;  %4963 = vmatpush.bf16.msra.mxu0 %v6045_v37  ;;  %v3324_v51 = vpack.c.bf16 %v3230_v6, %v3228_v5  ;;  %v10861_v5 = vpack.c.bf16 %v4257_v61, %v4255_v2 }
 0x4cf   :  { %2618 = vst.msk [vmem:[%s12607_s11 + $0x3c0] sm:$0xff] %vm1382_vm2, %v2607_v3  ;;  %v10809_v57 = vadd.f32 %v4107_v1, %v3939_v26 }
 0x4d0   :  { %2626 = vst.msk [vmem:[%s12607_s11 + $0x3c0] sm:$0xff] %vm1395_vm3, %v13137_v62  ;;  %v3600_v10 = vpop.f32.mrf.mxu2  ;;  %v13139_v62 = vmax.f32 %v10013_v8, 0.0  ;;  %v13140_v8 = vmax.f32 %v10501_v25, 0.0 }
 0x4d1   :  { %2333 = vst.msk [vmem:[%s12607_s11 + $0x2f8] sm:$0xff] %vm1382_vm2, %v2325_v30  ;;  %v3769_v35 = vpop.f32.mrf.mxu3  ;;  %v3601_v1 = vadd.f32 %v3600_v10, %v9635_v32  ;;  %v3325_v30 = vpack.c.bf16 %v3231_v39, %v3229_v7 }
 0x4d2   :  { %2341 = vst.msk [vmem:[%s12607_s11 + $0x2f8] sm:$0xff] %vm1395_vm3, %v13138_v12 }
 0x4d3   :  { %v4110_v50 = vpop.f32.mrf.mxu1  ;;  %v10830_v19 = vadd.f32 %v3769_v35, %v3601_v1  ;;  %v4256_v1 = vmax.f32 %v10744_v36, 0.0  ;;  %v13141_v36 = vmax.f32 %v13117_v59, 0.0  ;;  %v3233_v59 = vld [vmem:[%s12607_s11 + $0x228] sm:$0xff] }
 0x4d4   :  { %v2323_v3 = vpop.permute.xlu0 %2322  ;;  %v3941_v37 = vpop.f32.mrf.mxu0 }
 0x4d5   :  { %2332 = vst.msk [vmem:[%s12607_s11 + $0x2e8] sm:$0xff] %vm1382_vm2, %v2323_v3  ;;  %v2641_v18 = vpop.permute.xlu2 %2640  ;;  %v2407_v26 = vpop.permute.xlu1 %2406  ;;  %v3942_v35 = vadd.f32 %v3941_v37, %v9994_v63  ;;  %v4254_v3 = vmax.f32 %v10705_v44, 0.0  ;;  %v3235_v37 = vld [vmem:[%s12607_s11 + $0x238] sm:$0xff] }
 0x4d6   :  { %2340 = vst.msk [vmem:[%s12607_s11 + $0x2e8] sm:$0xff] %vm1395_vm3, %v13139_v62  ;;  %3811 = vmatmul.bf16.gmra.mxu3 %v3325_v30  ;;  %4149 = vmatmul.bf16.gmra.mxu1 %v3325_v30  ;;  %v3327_v2 = vpack.c.bf16 %v3235_v37, %v3233_v59 }
 0x4d7   :  { %2651 = vst.msk [vmem:[%s12607_s11 + $0x3d8] sm:$0xff] %vm1382_vm2, %v2641_v18  ;;  %3642 = vmatmul.bf16.gmra.mxu2 %v3324_v51  ;;  %3980 = vmatmul.bf16.gmra.mxu0 %v3324_v51  ;;  %v10859_v39 = vadd.f32 %v4110_v50, %v3942_v35  ;;  %v10887_v44 = vpack.c.bf16 %v4256_v1, %v4254_v3  ;;  %v3232_v51 = vld [vmem:[%s12607_s11 + $0x220] sm:$0xff] }
 0x4d8   :  { %2659 = vst.msk [vmem:[%s12607_s11 + $0x3d8] sm:$0xff] %vm1395_vm3, %v13140_v8  ;;  %v3603_v10 = vpop.f32.mrf.mxu2  ;;  %v3234_v8 = vld [vmem:[%s12607_s11 + $0x230] sm:$0xff] }
 0x4d9   :  { %2418 = vst.msk [vmem:[%s12607_s11 + $0x308] sm:$0xff] %vm1395_vm3, %v2407_v26  ;;  %v3772_v12 = vpop.f32.mrf.mxu3  ;;  %v3604_v54 = vadd.f32 %v3603_v10, %v9635_v32 }
 0x4db   :  { %v4112_v25 = vpop.f32.mrf.mxu1  ;;  %v10865_v9 = vadd.f32 %v3772_v12, %v3604_v54  ;;  %v3326_v54 = vpack.c.bf16 %v3234_v8, %v3232_v51  ;;  %v4258_v51 = vmax.f32 %v10779_v27, 0.0 }
 0x4dc   :  { %v2377_v7 = vpop.permute.xlu0 %2376  ;;  %v3943_v30 = vpop.f32.mrf.mxu0 }
 0x4dd   :  { %2387 = vst.msk [vmem:[%s12607_s11 + $0x310] sm:$0xff] %vm1395_vm3, %v2377_v7  ;;  %v2643_v28 = vpop.permute.xlu2 %2642  ;;  %v2381_v50 = vpop.permute.xlu1 %2380  ;;  %v3944_v6 = vadd.f32 %v3943_v30, %v9994_v63  ;;  %v13142_v7 = vmax.f32 %v9891_v21, 0.0 }
 0x4de   :  { %2652 = vst.msk [vmem:[%s12607_s11 + $0x3e8] sm:$0xff] %vm1382_vm2, %v2643_v28 }
 0x4df   :  { %2660 = vst.msk [vmem:[%s12607_s11 + $0x3e8] sm:$0xff] %vm1395_vm3, %v13141_v36  ;;  %v10889_v23 = vadd.f32 %v4112_v25, %v3944_v6  ;;  %v4261_v25 = vmax.f32 %v10809_v57, 0.0  ;;  %v4259_v57 = vmax.f32 %v10773_v16, 0.0 }
 0x4e0   :  { %2389 = vst.msk [vmem:[%s12607_s11 + $0x330] sm:$0xff] %vm1395_vm3, %v2381_v50  ;;  %v3605_v26 = vpop.f32.mrf.mxu2 }
 0x4e1   :  { %v3774_v18 = vpop.f32.mrf.mxu3  ;;  %v3606_v61 = vadd.f32 %v3605_v26, %v9635_v32  ;;  %v10925_v36 = vpack.c.bf16 %v4261_v25, %v4259_v57  ;;  %v3239_v25 = vld [vmem:[%s12607_s11 + $0x258] sm:$0xff] }
 0x4e3   :  { %v4115_v62 = vpop.f32.mrf.mxu1  ;;  %v10904_v12 = vadd.f32 %v3774_v18, %v3606_v61  ;;  %v4260_v18 = vmax.f32 %v10830_v19, 0.0 }
 0x4e4   :  { %v2379_v35 = vpop.permute.xlu0 %2378  ;;  %v3946_v1 = vpop.f32.mrf.mxu0 }
 0x4e5   :  { %2388 = vst.msk [vmem:[%s12607_s11 + $0x320] sm:$0xff] %vm1395_vm3, %v2379_v35  ;;  %v2447_v10 = vpop.permute.xlu1 %2446  ;;  %v3947_v28 = vadd.f32 %v3946_v1, %v9994_v63  ;;  %v10947_v37 = vpack.c.bf16 %v4260_v18, %v4258_v51 }
 0x4e6   :  { %2458 = vst.msk [vmem:[%s12607_s11 + $0x340] sm:$0xff] %vm1382_vm2, %v2447_v10  ;;  %3816 = vmatmul.bf16.gmra.mxu3 %v3327_v2  ;;  %4154 = vmatmul.bf16.gmra.mxu1 %v3327_v2  ;;  %v3237_v2 = vld [vmem:[%s12607_s11 + $0x248] sm:$0xff] }
 0x4e7   :  { %2466 = vst.msk [vmem:[%s12607_s11 + $0x340] sm:$0xff] %vm1395_vm3, %v13142_v7  ;;  %3647 = vmatmul.bf16.gmra.mxu2 %v3326_v54  ;;  %3985 = vmatmul.bf16.gmra.mxu0 %v3326_v54  ;;  %v10923_v50 = vadd.f32 %v4115_v62, %v3947_v28  ;;  %v13143_v62 = vmax.f32 %v9956_v4, 0.0  ;;  %v3238_v4 = vld [vmem:[%s12607_s11 + $0x250] sm:$0xff]  ;;  %v3329_v7 = vpack.c.bf16 %v3239_v25, %v3237_v2  ;;  %v3236_v28 = vld [vmem:[%s12607_s11 + $0x240] sm:$0xff]  ;;  %v4264_v2 = vmax.f32 %v10904_v12, 0.0 }
 0x4e8   :  { %v3608_v30 = vpop.f32.mrf.mxu2 }
 0x4e9   :  { %v3777_v3 = vpop.f32.mrf.mxu3  ;;  %v3609_v6 = vadd.f32 %v3608_v30, %v9635_v32  ;;  %v3328_v30 = vpack.c.bf16 %v3238_v4, %v3236_v28  ;;  %v4262_v4 = vmax.f32 %v10865_v9, 0.0  ;;  %v3240_v28 = vld [vmem:[%s12607_s11 + $0x260] sm:$0xff] }
 0x4eb   :  { %v4117_v21 = vpop.f32.mrf.mxu1  ;;  %v10929_v26 = vadd.f32 %v3777_v3, %v3609_v6  ;;  %v4265_v6 = vmax.f32 %v10889_v23, 0.0  ;;  %v4263_v23 = vmax.f32 %v10859_v39, 0.0  ;;  %v11013_v25 = vpack.c.bf16 %v4264_v2, %v4262_v4 }
 0x4ec   :  { %v2413_v59 = vpop.permute.xlu0 %2412  ;;  %v3948_v61 = vpop.f32.mrf.mxu0  ;;  %v4267_v2 = vmax.f32 %v10923_v50, 0.0 }
 0x4ed   :  { %2421 = vst.msk [vmem:[%s12607_s11 + $0x338] sm:$0xff] %vm1395_vm3, %v2413_v59  ;;  %v2481_v16 = vpop.permute.xlu1 %2480  ;;  %v3949_v19 = vadd.f32 %v3948_v61, %v9994_v63 }
 0x4ee   :  { %2491 = vst.msk [vmem:[%s12607_s11 + $0x358] sm:$0xff] %vm1382_vm2, %v2481_v16 }
 0x4ef   :  { %2499 = vst.msk [vmem:[%s12607_s11 + $0x358] sm:$0xff] %vm1395_vm3, %v13143_v62  ;;  %v10949_v35 = vadd.f32 %v4117_v21, %v3949_v19  ;;  %v13144_v21 = vmax.f32 %v10209_v29, 0.0  ;;  %v13145_v29 = vmax.f32 %v10006_v0, 0.0  ;;  %v10991_v62 = vpack.c.bf16 %v4265_v6, %v4263_v23  ;;  %v3241_v6 = vld [vmem:[%s12607_s11 + $0x268] sm:$0xff] }
 0x4f0   :  { %v3610_v8 = vpop.f32.mrf.mxu2 }
 0x4f1   :  { %v3779_v27 = vpop.f32.mrf.mxu3  ;;  %v3611_v10 = vadd.f32 %v3610_v8, %v9635_v32 }
 0x4f3   :  { %v4120_v54 = vpop.f32.mrf.mxu1  ;;  %v10964_v57 = vadd.f32 %v3779_v27, %v3611_v10  ;;  %v13146_v10 = vmax.f32 %v10265_v13, 0.0  ;;  %v3243_v13 = vld [vmem:[%s12607_s11 + $0x278] sm:$0xff] }
 0x4f4   :  { %v2479_v1 = vpop.permute.xlu0 %2478  ;;  %v3951_v18 = vpop.f32.mrf.mxu0 }
 0x4f5   :  { %2490 = vst.msk [vmem:[%s12607_s11 + $0x348] sm:$0xff] %vm1382_vm2, %v2479_v1  ;;  %v2483_v3 = vpop.permute.xlu1 %2482  ;;  %v3952_v59 = vadd.f32 %v3951_v18, %v9994_v63  ;;  %v3331_v18 = vpack.c.bf16 %v3243_v13, %v3241_v6  ;;  %v4268_v13 = vmax.f32 %v10964_v57, 0.0  ;;  %v6221_v6 = vld [vmem:[#allocation14 + $0xa4] sm:$0xf0] }
 0x4f6   :  { %2498 = vst.msk [vmem:[%s12607_s11 + $0x348] sm:$0xff] %vm1395_vm3, %v13144_v21  ;;  %3821 = vmatmul.bf16.gmra.mxu3 %v3329_v7  ;;  %4159 = vmatmul.bf16.gmra.mxu1 %v3329_v7 }
 0x4f7   :  { %2492 = vst.msk [vmem:[%s12607_s11 + $0x368] sm:$0xff] %vm1382_vm2, %v2483_v3  ;;  %3652 = vmatmul.bf16.gmra.mxu2 %v3328_v30  ;;  %3990 = vmatmul.bf16.gmra.mxu0 %v3328_v30  ;;  %v10989_v16 = vadd.f32 %v4120_v54, %v3952_v59  ;;  %v3242_v59 = vld [vmem:[%s12607_s11 + $0x270] sm:$0xff] }
 0x4f8   :  { %2500 = vst.msk [vmem:[%s12607_s11 + $0x368] sm:$0xff] %vm1395_vm3, %v13145_v29 }
 0x4f9   :  { %v3782_v51 = vpop.f32.mrf.mxu3 }
 0x4fa   :  { %v3613_v61 = vpop.f32.mrf.mxu2 }
 0x4fb   :  { %v3614_v19 = vadd.f32 %v3613_v61, %v9635_v32  ;;  %v4122_v27 = vpop.f32.mrf.mxu1  ;;  %v4269_v61 = vmax.f32 %v10949_v35, 0.0 }
 0x4fc   :  { %v2453_v8 = vpop.permute.xlu0 %2452  ;;  %v3953_v54 = vpop.f32.mrf.mxu0 }
 0x4fd   :  { %v10995_v39 = vadd.f32 %v3782_v51, %v3614_v19  ;;  %2461 = vst.msk [vmem:[%s12607_s11 + $0x370] sm:$0xff] %vm1382_vm2, %v2453_v8  ;;  %v2537_v0 = vpop.permute.xlu1 %2536  ;;  %v3954_v12 = vadd.f32 %v3953_v54, %v9994_v63  ;;  %v3330_v51 = vpack.c.bf16 %v3242_v59, %v3240_v28 }
 0x4fe   :  { %2469 = vst.msk [vmem:[%s12607_s11 + $0x370] sm:$0xff] %vm1395_vm3, %v13146_v10  ;;  %v11045_v10 = vpack.c.bf16 %v4269_v61, %v4267_v2 }
 0x4ff   :  { %2547 = vst.msk [vmem:[%s12607_s11 + $0x390] sm:$0xff] %vm1395_vm3, %v2537_v0  ;;  %v11015_v1 = vadd.f32 %v4122_v27, %v3954_v12  ;;  %v6032_v12 = vld [vmem:[#allocation14 + $0x20] sm:$0xf] }
 0x501   :  { %v3784_v9 = vpop.f32.mrf.mxu3 }
 0x502   :  { %v3615_v7 = vpop.f32.mrf.mxu2 }
 0x503   :  { %v3616_v3 = vadd.f32 %v3615_v7, %v9635_v32  ;;  %v4125_v30 = vpop.f32.mrf.mxu1 }
 0x504   :  { %v2535_v21 = vpop.permute.xlu0 %2534  ;;  %v3956_v19 = vpop.f32.mrf.mxu0 }
 0x505   :  { %v11030_v23 = vadd.f32 %v3784_v9, %v3616_v3  ;;  %2546 = vst.msk [vmem:[%s12607_s11 + $0x380] sm:$0xff] %vm1395_vm3, %v2535_v21  ;;  %v2539_v29 = vpop.permute.xlu1 %2538  ;;  %v3957_v27 = vadd.f32 %v3956_v19, %v9994_v63  ;;  %v6205_v9 = vld [vmem:[#allocation14 + $0x24] sm:$0xf0]  ;;  %v6096_v3 = vld [vmem:[#allocation14 + $0xa0] sm:$0xf] }
 0x506   :  { %2548 = vst.msk [vmem:[%s12607_s11 + $0x3a0] sm:$0xff] %vm1395_vm3, %v2539_v29  ;;  %3826 = vmatmul.bf16.gmra.mxu3 %v3331_v18  ;;  %4164 = vmatmul.bf16.gmra.mxu1 %v3331_v18  ;;  %v6033_v28 = vor.u32 %v6205_v9, %v6032_v12  ;;  %v4266_v18 = vmax.f32 %v10929_v26, 0.0  ;;  %v6204_v29 = vld [vmem:[#allocation14 + $0x24] sm:$0xf]  ;;  %v3245_v26 = vld [vmem:[%s12607_s11 + $0x288] sm:$0xff]  ;;  %v3247_v9 = vld [vmem:[%s12607_s11 + $0x298] sm:$0xff] }
 0x507   :  { %3657 = vmatmul.bf16.gmra.mxu2 %v3330_v51  ;;  %3995 = vmatmul.bf16.gmra.mxu0 %v3330_v51  ;;  %v11043_v8 = vadd.f32 %v4125_v30, %v3957_v27  ;;  %v6097_v30 = vor.u32 %v6221_v6, %v6096_v3  ;;  %v6034_v51 = vld [vmem:[#allocation14 + $0x28] sm:$0xf0]  ;;  %v3246_v3 = vld [vmem:[%s12607_s11 + $0x290] sm:$0xff] }
 0x508   :  { %4626 = vmatpush.bf16.msra.mxu2 %v6033_v28  ;;  %v6037_v61 = vor.u32 %v6204_v29, %v6034_v51  ;;  %v11061_v19 = vpack.c.bf16 %v4268_v13, %v4266_v18  ;;  %v6098_v13 = vld [vmem:[#allocation14 + $0xa8] sm:$0xf0]  ;;  %v3333_v28 = vpack.c.bf16 %v3247_v9, %v3245_v26  ;;  %v13147_v29 = vmax.f32 %v10201_v11, 0.0 }
 0x509   :  { %v3787_v0 = vpop.f32.mrf.mxu3  ;;  %4795 = vmatpush.bf16.msra.mxu3 %v6097_v30 }
 0x50a   :  { %v3618_v4 = vpop.f32.mrf.mxu2  ;;  %4964 = vmatpush.bf16.msra.mxu0 %v6037_v61 }
 0x50b   :  { %v3619_v35 = vadd.f32 %v3618_v4, %v9635_v32  ;;  %v4127_v54 = vpop.f32.mrf.mxu1  ;;  %v3244_v4 = vld [vmem:[%s12607_s11 + $0x280] sm:$0xff] }
 0x50c   :  { %v2569_v7 = vpop.permute.xlu0 %2568  ;;  %v3958_v57 = vpop.f32.mrf.mxu0  ;;  %v3332_v18 = vpack.c.bf16 %v3246_v3, %v3244_v4 }
 0x50d   :  { %v11049_v21 = vadd.f32 %v3787_v0, %v3619_v35  ;;  %2579 = vst.msk [vmem:[%s12607_s11 + $0x398] sm:$0xff] %vm1395_vm3, %v2569_v7  ;;  %v2573_v50 = vpop.permute.xlu1 %2572  ;;  %v3959_v59 = vadd.f32 %v3958_v57, %v9994_v63  ;;  %v4273_v57 = vmax.f32 %v11015_v1, 0.0  ;;  %v4271_v1 = vmax.f32 %v10989_v16, 0.0 }
 0x50e   :  { %2581 = vst.msk [vmem:[%s12607_s11 + $0x3b8] sm:$0xff] %vm1395_vm3, %v2573_v50 }
 0x50f   :  { %v11063_v27 = vadd.f32 %v4127_v54, %v3959_v59  ;;  %v6220_v54 = vld [vmem:[#allocation14 + $0xa4] sm:$0xf] }
 0x510   :  { %v6101_v6 = vor.u32 %v6220_v54, %v6098_v13  ;;  %v13148_v13 = vmax.f32 %v10426_v40, 0.0 }
 0x511   :  { %v3789_v2 = vpop.f32.mrf.mxu3 }
 0x512   :  { %v3620_v0 = vpop.f32.mrf.mxu2  ;;  %5133 = vmatpush.bf16.msra.mxu1 %v6101_v6  ;;  %v3249_v6 = vld [vmem:[%s12607_s11 + $0x2a8] sm:$0xff] }
 0x513   :  { %v3621_v35 = vadd.f32 %v3620_v0, %v9635_v32  ;;  %v4130_v12 = vpop.f32.mrf.mxu1  ;;  %v11099_v0 = vpack.c.bf16 %v4273_v57, %v4271_v1  ;;  %v3248_v1 = vld [vmem:[%s12607_s11 + $0x2a0] sm:$0xff] }
 0x514   :  { %v2571_v7 = vpop.permute.xlu0 %2570  ;;  %v3961_v59 = vpop.f32.mrf.mxu0 }
 0x515   :  { %v11078_v50 = vadd.f32 %v3789_v2, %v3621_v35  ;;  %2580 = vst.msk [vmem:[%s12607_s11 + $0x3a8] sm:$0xff] %vm1395_vm3, %v2571_v7  ;;  %v2639_v30 = vpop.permute.xlu1 %2638  ;;  %v3962_v51 = vadd.f32 %v3961_v59, %v9994_v63  ;;  %v4272_v35 = vmax.f32 %v11030_v23, 0.0  ;;  %v3251_v59 = vld [vmem:[%s12607_s11 + $0x2b8] sm:$0xff] }
 0x516   :  { %2650 = vst.msk [vmem:[%s12607_s11 + $0x3c8] sm:$0xff] %vm1382_vm2, %v2639_v30  ;;  %3831 = vmatmul.bf16.gmra.mxu3 %v3333_v28  ;;  %4169 = vmatmul.bf16.gmra.mxu1 %v3333_v28  ;;  %v13149_v28 = vmax.f32 %v10257_v49, 0.0 }
 0x517   :  { %2658 = vst.msk [vmem:[%s12607_s11 + $0x3c8] sm:$0xff] %vm1395_vm3, %v13147_v29  ;;  %3662 = vmatmul.bf16.gmra.mxu2 %v3332_v18  ;;  %4000 = vmatmul.bf16.gmra.mxu0 %v3332_v18  ;;  %v11097_v61 = vadd.f32 %v4130_v12, %v3962_v51  ;;  %v4270_v12 = vmax.f32 %v10995_v39, 0.0  ;;  %v3250_v18 = vld [vmem:[%s12607_s11 + $0x2b0] sm:$0xff]  ;;  %v3335_v51 = vpack.c.bf16 %v3251_v59, %v3249_v6 }
 0x519   :  { %v3792_v2 = vpop.f32.mrf.mxu3  ;;  %v11127_v40 = vpack.c.bf16 %v4272_v35, %v4270_v12 }
 0x51a   :  { %v3623_v26 = vpop.f32.mrf.mxu2 }
 0x51b   :  { %v3624_v11 = vadd.f32 %v3623_v26, %v9635_v32  ;;  %v4132_v4 = vpop.f32.mrf.mxu1  ;;  %v3334_v26 = vpack.c.bf16 %v3250_v18, %v3248_v1 }
 0x51c   :  { %v2609_v9 = vpop.permute.xlu0 %2608  ;;  %v3963_v7 = vpop.f32.mrf.mxu0 }
 0x51d   :  { %v11103_v54 = vadd.f32 %v3792_v2, %v3624_v11  ;;  %2619 = vst.msk [vmem:[%s12607_s11 + $0x3d0] sm:$0xff] %vm1382_vm2, %v2609_v9  ;;  %v2613_v16 = vpop.permute.xlu1 %2612  ;;  %v3964_v23 = vadd.f32 %v3963_v7, %v9994_v63  ;;  %v4277_v11 = vmax.f32 %v11063_v27, 0.0 }
 0x51e   :  { %2627 = vst.msk [vmem:[%s12607_s11 + $0x3d0] sm:$0xff] %vm1395_vm3, %v13148_v13 }
 0x51f   :  { %2621 = vst.msk [vmem:[%s12607_s11 + $0x3f0] sm:$0xff] %vm1382_vm2, %v2613_v16  ;;  %v4133_v39 = vadd.f32 %v4132_v4, %v3964_v23  ;;  %v13150_v4 = vmax.f32 %v10465_v58, 0.0  ;;  %v4275_v16 = vmax.f32 %v11043_v8, 0.0  ;;  %v4274_v8 = vmax.f32 %v11049_v21, 0.0 }
 0x520   :  { %2629 = vst.msk [vmem:[%s12607_s11 + $0x3f0] sm:$0xff] %vm1395_vm3, %v13149_v28  ;;  %v4276_v28 = vmax.f32 %v11078_v50, 0.0 }
 0x521   :  { %v3794_v3 = vpop.f32.mrf.mxu3  ;;  %v11157_v7 = vpack.c.bf16 %v4277_v11, %v4275_v16  ;;  %v4281_v16 = vmax.f32 %v4133_v39, 0.0 }
 0x522   :  { %v3625_v30 = vpop.f32.mrf.mxu2 }
 0x523   :  { %v3626_v49 = vadd.f32 %v3625_v30, %v9635_v32  ;;  %v4135_v57 = vpop.f32.mrf.mxu1  ;;  %v13151_v30 = vmax.f32 %v13115_v17, 0.0  ;;  %v3252_v17 = vld [vmem:[%s12607_s11 + $0x2c0] sm:$0xff] }
 0x524   :  { %v2611_v29 = vpop.permute.xlu0 %2610  ;;  %v3966_v35 = vpop.f32.mrf.mxu0 }
 0x525   :  { %v3795_v2 = vadd.f32 %v3794_v3, %v3626_v49  ;;  %2620 = vst.msk [vmem:[%s12607_s11 + $0x3e0] sm:$0xff] %vm1382_vm2, %v2611_v29  ;;  %v3967_v9 = vadd.f32 %v3966_v35, %v9994_v63  ;;  %v11175_v49 = vpack.c.bf16 %v4276_v28, %v4274_v8  ;;  %v3255_v29 = vld [vmem:[%s12607_s11 + $0x2d8] sm:$0xff] }
 0x526   :  { %2628 = vst.msk [vmem:[%s12607_s11 + $0x3e0] sm:$0xff] %vm1395_vm3, %v13150_v4  ;;  %3836 = vmatmul.bf16.gmra.mxu3 %v3335_v51  ;;  %4174 = vmatmul.bf16.gmra.mxu1 %v3335_v51  ;;  %v3254_v4 = vld [vmem:[%s12607_s11 + $0x2d0] sm:$0xff] }
 0x527   :  { %3667 = vmatmul.bf16.gmra.mxu2 %v3334_v26  ;;  %4005 = vmatmul.bf16.gmra.mxu0 %v3334_v26  ;;  %v11155_v12 = vadd.f32 %v4135_v57, %v3967_v9  ;;  %v3253_v26 = vld [vmem:[%s12607_s11 + $0x2c8] sm:$0xff]  ;;  %v3336_v9 = vpack.c.bf16 %v3254_v4, %v3252_v17  ;;  %v3259_v4 = vld [vmem:[%s12607_s11 + $0x2f8] sm:$0xff] }
 0x528   :  { %v3337_v11 = vpack.c.bf16 %v3255_v29, %v3253_v26 }
 0x529   :  { %v3797_v13 = vpop.f32.mrf.mxu3 }
 0x52a   :  { %v3628_v27 = vpop.f32.mrf.mxu2 }
 0x52b   :  { %v3629_v58 = vadd.f32 %v3628_v27, %v9635_v32  ;;  %v4137_v23 = vpop.f32.mrf.mxu1 }
 0x52c   :  { %v2645_v3 = vpop.permute.xlu0 %2644  ;;  %v3968_v18 = vpop.f32.mrf.mxu0 }
 0x52d   :  { %v11161_v6 = vadd.f32 %v3797_v13, %v3629_v58  ;;  %2653 = vst.msk [vmem:[%s12607_s11 + $0x3f8] sm:$0xff] %vm1382_vm2, %v2645_v3  ;;  %v3969_v50 = vadd.f32 %v3968_v18, %v9994_v63  ;;  %v4279_v58 = vmax.f32 %v11097_v61, 0.0 }
 0x52e   :  { %2661 = vst.msk [vmem:[%s12607_s11 + $0x3f8] sm:$0xff] %vm1395_vm3, %v13151_v30 }
 0x52f   :  { %v4138_v57 = vadd.f32 %v4137_v23, %v3969_v50  ;;  %v11196_v8 = vpack.c.bf16 %v4281_v16, %v4279_v58  ;;  %v4280_v50 = vmax.f32 %v3795_v2, 0.0  ;;  %v3256_v2 = vld [vmem:[%s12607_s11 + $0x2e0] sm:$0xff]  ;;  %v3258_v16 = vld [vmem:[%s12607_s11 + $0x2f0] sm:$0xff] }
 0x531   :  { %v3799_v59 = vpop.f32.mrf.mxu3  ;;  %v4285_v58 = vmax.f32 %v4138_v57, 0.0  ;;  %v6203_v57 = vld [vmem:[#allocation14 + $0x14] sm:$0xf0] }
 0x532   :  { %v3630_v51 = vpop.f32.mrf.mxu2 }
 0x533   :  { %v3631_v21 = vadd.f32 %v3630_v51, %v9635_v32  ;;  %v4140_v1 = vpop.f32.mrf.mxu1 }
 0x534   :  { %v3971_v13 = vpop.f32.mrf.mxu0 }
 0x535   :  { %v11190_v35 = vadd.f32 %v3799_v59, %v3631_v21  ;;  %v3972_v27 = vadd.f32 %v3971_v13, %v9994_v63  ;;  %v4278_v59 = vmax.f32 %v11103_v54, 0.0 }
 0x536   :  { %3841 = vmatmul.bf16.gmra.mxu3 %v3337_v11  ;;  %4179 = vmatmul.bf16.gmra.mxu1 %v3337_v11 }
 0x537   :  { %3672 = vmatmul.bf16.gmra.mxu2 %v3336_v9  ;;  %4010 = vmatmul.bf16.gmra.mxu0 %v3336_v9  ;;  %v11194_v23 = vadd.f32 %v4140_v1, %v3972_v27  ;;  %v11203_v17 = vpack.c.bf16 %v4280_v50, %v4278_v59  ;;  %v3257_v1 = vld [vmem:[%s12607_s11 + $0x2e8] sm:$0xff]  ;;  %v3338_v27 = vpack.c.bf16 %v3258_v16, %v3256_v2 }
 0x538   :  { %v3339_v9 = vpack.c.bf16 %v3259_v4, %v3257_v1  ;;  %v6024_v1 = vld [vmem:[#allocation14 + $0x10] sm:$0xf]  ;;  %v6219_v4 = vld [vmem:[#allocation14 + $0x94] sm:$0xf0] }
 0x539   :  { %v3802_v28 = vpop.f32.mrf.mxu3  ;;  %v6025_v2 = vor.u32 %v6203_v57, %v6024_v1 }
 0x53a   :  { %v3633_v3 = vpop.f32.mrf.mxu2 }
 0x53b   :  { %v3634_v30 = vadd.f32 %v3633_v3, %v9635_v32  ;;  %v4142_v18 = vpop.f32.mrf.mxu1  ;;  %4627 = vmatpush.bf16.msra.mxu2 %v6025_v2  ;;  %v6218_v2 = vld [vmem:[#allocation14 + $0x94] sm:$0xf] }
 0x53c   :  { %v3973_v29 = vpop.f32.mrf.mxu0 }
 0x53d   :  { %v11199_v39 = vadd.f32 %v3802_v28, %v3634_v30  ;;  %v3974_v51 = vadd.f32 %v3973_v29, %v9994_v63  ;;  %v4283_v30 = vmax.f32 %v11155_v12, 0.0  ;;  %v4282_v12 = vmax.f32 %v11161_v6, 0.0  ;;  %v3262_v6 = vld [vmem:[%s12607_s11 + $0x310] sm:$0xff] }
 0x53f   :  { %v11205_v61 = vadd.f32 %v4142_v18, %v3974_v51  ;;  %v11226_v29 = vpack.c.bf16 %v4285_v58, %v4283_v30  ;;  %v6202_v58 = vld [vmem:[#allocation14 + $0x14] sm:$0xf] }
 0x541   :  { %v3804_v21 = vpop.f32.mrf.mxu3 }
 0x542   :  { %v3635_v26 = vpop.f32.mrf.mxu2 }
 0x543   :  { %v3636_v11 = vadd.f32 %v3635_v26, %v9635_v32  ;;  %v4145_v54 = vpop.f32.mrf.mxu1  ;;  %v4284_v26 = vmax.f32 %v11190_v35, 0.0 }
 0x544   :  { %v3976_v28 = vpop.f32.mrf.mxu0 }
 0x545   :  { %v11220_v13 = vadd.f32 %v3804_v21, %v3636_v11  ;;  %v3977_v3 = vadd.f32 %v3976_v28, %v9994_v63  ;;  %v6088_v11 = vld [vmem:[#allocation14 + $0x90] sm:$0xf]  ;;  %v6026_v28 = vld [vmem:[#allocation14 + $0x18] sm:$0xf0]  ;;  %v11234_v30 = vpack.c.bf16 %v4284_v26, %v4282_v12 }
 0x546   :  { %3846 = vmatmul.bf16.gmra.mxu3 %v3339_v9  ;;  %4184 = vmatmul.bf16.gmra.mxu1 %v3339_v9  ;;  %v6089_v16 = vor.u32 %v6219_v4, %v6088_v11  ;;  %v3263_v26 = vld [vmem:[%s12607_s11 + $0x318] sm:$0xff]  ;;  %v3260_v4 = vld [vmem:[%s12607_s11 + $0x300] sm:$0xff] }
 0x547   :  { %3677 = vmatmul.bf16.gmra.mxu2 %v3338_v27  ;;  %4015 = vmatmul.bf16.gmra.mxu0 %v3338_v27  ;;  %v11224_v18 = vadd.f32 %v4145_v54, %v3977_v3  ;;  %v6029_v3 = vor.u32 %v6202_v58, %v6026_v28  ;;  %13152 = vst [vmem:[#allocation31_spill] sm:$0xff] %v11234_v30 }
 0x548   :  { %4796 = vmatpush.bf16.msra.mxu3 %v6089_v16 }
 0x549   :  { %v3807_v50 = vpop.f32.mrf.mxu3  ;;  %4965 = vmatpush.bf16.msra.mxu0 %v6029_v3  ;;  %v4287_v3 = vmax.f32 %v11194_v23, 0.0 }
 0x54a   :  { %v3638_v59 = vpop.f32.mrf.mxu2 }
 0x54b   :  { %v3639_v51 = vadd.f32 %v3638_v59, %v9635_v32  ;;  %v4147_v21 = vpop.f32.mrf.mxu1 }
 0x54c   :  { %v3978_v54 = vpop.f32.mrf.mxu0 }
 0x54d   :  { %v11230_v9 = vadd.f32 %v3807_v50, %v3639_v51  ;;  %v3979_v27 = vadd.f32 %v3978_v54, %v9994_v63  ;;  %v3261_v50 = vld [vmem:[%s12607_s11 + $0x308] sm:$0xff]  ;;  %v3340_v54 = vpack.c.bf16 %v3262_v6, %v3260_v4 }
 0x54e   :  { %v3341_v11 = vpack.c.bf16 %v3263_v26, %v3261_v50 }
 0x54f   :  { %v4148_v59 = vadd.f32 %v4147_v21, %v3979_v27  ;;  %v6090_v21 = vld [vmem:[#allocation14 + $0x98] sm:$0xf0]  ;;  %v4289_v27 = vmax.f32 %v11205_v61, 0.0  ;;  %v4288_v61 = vmax.f32 %v11220_v13, 0.0  ;;  %v3264_v13 = vld [vmem:[%s12607_s11 + $0x320] sm:$0xff] }
 0x550   :  { %v6093_v16 = vor.u32 %v6218_v2, %v6090_v21  ;;  %v4286_v2 = vmax.f32 %v11199_v39, 0.0  ;;  %v3265_v39 = vld [vmem:[%s12607_s11 + $0x328] sm:$0xff] }
 0x551   :  { %v3809_v35 = vpop.f32.mrf.mxu3  ;;  %v11254_v30 = vpack.c.bf16 %v4289_v27, %v4287_v3  ;;  %v3266_v3 = vld [vmem:[%s12607_s11 + $0x330] sm:$0xff] }
 0x552   :  { %v3640_v51 = vpop.f32.mrf.mxu2  ;;  %5134 = vmatpush.bf16.msra.mxu1 %v6093_v16  ;;  %v11262_v23 = vpack.c.bf16 %v4288_v61, %v4286_v2  ;;  %v3267_v16 = vld [vmem:[%s12607_s11 + $0x338] sm:$0xff]  ;;  %v4291_v2 = vmax.f32 %v11224_v18, 0.0 }
 0x553   :  { %v3641_v1 = vadd.f32 %v3640_v51, %v9635_v32  ;;  %v4150_v57 = vpop.f32.mrf.mxu1  ;;  %13153 = vst [vmem:[#allocation30_spill] sm:$0xff] %v11254_v30 }
 0x554   :  { %v3981_v58 = vpop.f32.mrf.mxu0  ;;  %13154 = vst [vmem:[#allocation59_spill] sm:$0xff] %v11262_v23 }
 0x555   :  { %v3810_v12 = vadd.f32 %v3809_v35, %v3641_v1  ;;  %v3982_v28 = vadd.f32 %v3981_v58, %v9994_v63 }
 0x556   :  { %3851 = vmatmul.bf16.gmra.mxu3 %v3341_v11  ;;  %4189 = vmatmul.bf16.gmra.mxu1 %v3341_v11 }
 0x557   :  { %3682 = vmatmul.bf16.gmra.mxu2 %v3340_v54  ;;  %4020 = vmatmul.bf16.gmra.mxu0 %v3340_v54  ;;  %v11252_v50 = vadd.f32 %v4150_v57, %v3982_v28  ;;  %v3343_v28 = vpack.c.bf16 %v3267_v16, %v3265_v39 }
 0x559   :  { %v3812_v51 = vpop.f32.mrf.mxu3 }
 0x55a   :  { %v3643_v26 = vpop.f32.mrf.mxu2 }
 0x55b   :  { %v3644_v35 = vadd.f32 %v3643_v26, %v9635_v32  ;;  %v4152_v6 = vpop.f32.mrf.mxu1  ;;  %v3342_v26 = vpack.c.bf16 %v3266_v3, %v3264_v13  ;;  %v4292_v13 = vmax.f32 %v3810_v12, 0.0  ;;  %v3268_v12 = vld [vmem:[%s12607_s11 + $0x340] sm:$0xff] }
 0x55c   :  { %v3983_v21 = vpop.f32.mrf.mxu0 }
 0x55d   :  { %v11258_v1 = vadd.f32 %v3812_v51, %v3644_v35  ;;  %v3984_v11 = vadd.f32 %v3983_v21, %v9994_v63  ;;  %v4293_v35 = vmax.f32 %v4148_v59, 0.0 }
 0x55f   :  { %v4153_v57 = vadd.f32 %v4152_v6, %v3984_v11 }
 0x561   :  { %v3814_v4 = vpop.f32.mrf.mxu3 }
 0x562   :  { %v3645_v54 = vpop.f32.mrf.mxu2 }
 0x563   :  { %v3646_v27 = vadd.f32 %v3645_v54, %v9635_v32  ;;  %v4155_v58 = vpop.f32.mrf.mxu1  ;;  %v11281_v54 = vpack.c.bf16 %v4293_v35, %v4291_v2  ;;  %v3269_v35 = vld [vmem:[%s12607_s11 + $0x348] sm:$0xff] }
 0x564   :  { %v3986_v6 = vpop.f32.mrf.mxu0 }
 0x565   :  { %v3815_v51 = vadd.f32 %v3814_v4, %v3646_v27  ;;  %v3987_v61 = vadd.f32 %v3986_v6, %v9994_v63  ;;  %13155 = vst [vmem:[#allocation54_spill] sm:$0xff] %v11281_v54  ;;  %v4290_v27 = vmax.f32 %v11230_v9, 0.0  ;;  %v3271_v9 = vld [vmem:[%s12607_s11 + $0x358] sm:$0xff] }
 0x566   :  { %3856 = vmatmul.bf16.gmra.mxu3 %v3343_v28  ;;  %4194 = vmatmul.bf16.gmra.mxu1 %v3343_v28  ;;  %v6080_v54 = vld [vmem:[#allocation14 + $0x80] sm:$0xf] }
 0x567   :  { %3687 = vmatmul.bf16.gmra.mxu2 %v3342_v26  ;;  %4025 = vmatmul.bf16.gmra.mxu0 %v3342_v26  ;;  %v11279_v21 = vadd.f32 %v4155_v58, %v3987_v61  ;;  %v11288_v26 = vpack.c.bf16 %v4292_v13, %v4290_v27  ;;  %v4297_v13 = vmax.f32 %v4153_v57, 0.0 }
 0x569   :  { %v3817_v11 = vpop.f32.mrf.mxu3  ;;  %13156 = vst [vmem:[#allocation60_spill] sm:$0xff] %v11288_v26 }
 0x56a   :  { %v3648_v16 = vpop.f32.mrf.mxu2 }
 0x56b   :  { %v3649_v39 = vadd.f32 %v3648_v16, %v9635_v32  ;;  %v4157_v4 = vpop.f32.mrf.mxu1  ;;  %v3270_v16 = vld [vmem:[%s12607_s11 + $0x350] sm:$0xff] }
 0x56c   :  { %v3988_v28 = vpop.f32.mrf.mxu0 }
 0x56d   :  { %v11284_v59 = vadd.f32 %v3817_v11, %v3649_v39  ;;  %v3989_v3 = vadd.f32 %v3988_v28, %v9994_v63  ;;  %v3345_v11 = vpack.c.bf16 %v3271_v9, %v3269_v35 }
 0x56f   :  { %v4158_v18 = vadd.f32 %v4157_v4, %v3989_v3  ;;  %v3344_v4 = vpack.c.bf16 %v3270_v16, %v3268_v12  ;;  %v4295_v3 = vmax.f32 %v11252_v50, 0.0  ;;  %v4296_v12 = vmax.f32 %v3815_v51, 0.0  ;;  %v3274_v51 = vld [vmem:[%s12607_s11 + $0x370] sm:$0xff] }
 0x571   :  { %v3819_v58 = vpop.f32.mrf.mxu3  ;;  %v11309_v26 = vpack.c.bf16 %v4297_v13, %v4295_v3  ;;  %v3273_v13 = vld [vmem:[%s12607_s11 + $0x368] sm:$0xff] }
 0x572   :  { %v3650_v6 = vpop.f32.mrf.mxu2 }
 0x573   :  { %v3651_v61 = vadd.f32 %v3650_v6, %v9635_v32  ;;  %v4160_v2 = vpop.f32.mrf.mxu1  ;;  %13157 = vst [vmem:[#allocation99_spill] sm:$0xff] %v11309_v26 }
 0x574   :  { %v3991_v27 = vpop.f32.mrf.mxu0 }
 0x575   :  { %v11303_v39 = vadd.f32 %v3819_v58, %v3651_v61  ;;  %v3992_v28 = vadd.f32 %v3991_v27, %v9994_v63 }
 0x576   :  { %3861 = vmatmul.bf16.gmra.mxu3 %v3345_v11  ;;  %4199 = vmatmul.bf16.gmra.mxu1 %v3345_v11  ;;  %v4294_v11 = vmax.f32 %v11258_v1, 0.0 }
 0x577   :  { %3692 = vmatmul.bf16.gmra.mxu2 %v3344_v4  ;;  %4030 = vmatmul.bf16.gmra.mxu0 %v3344_v4  ;;  %v11307_v6 = vadd.f32 %v4160_v2, %v3992_v28 }
 0x578   :  { %v11316_v4 = vpack.c.bf16 %v4296_v12, %v4294_v11  ;;  %v4301_v11 = vmax.f32 %v4158_v18, 0.0  ;;  %v6201_v18 = vld [vmem:[#allocation14 + $0x4] sm:$0xf0] }
 0x579   :  { %v3822_v35 = vpop.f32.mrf.mxu3 }
 0x57a   :  { %v3653_v9 = vpop.f32.mrf.mxu2  ;;  %13158 = vst [vmem:[#allocation50_spill] sm:$0xff] %v11316_v4 }
 0x57b   :  { %v3654_v58 = vadd.f32 %v3653_v9, %v9635_v32  ;;  %v4162_v61 = vpop.f32.mrf.mxu1 }
 0x57c   :  { %v3993_v16 = vpop.f32.mrf.mxu0 }
 0x57d   :  { %v11312_v57 = vadd.f32 %v3822_v35, %v3654_v58  ;;  %v3994_v27 = vadd.f32 %v3993_v16, %v9994_v63  ;;  %v3275_v35 = vld [vmem:[%s12607_s11 + $0x378] sm:$0xff]  ;;  %v3272_v58 = vld [vmem:[%s12607_s11 + $0x360] sm:$0xff] }
 0x57e   :  { %v3347_v9 = vpack.c.bf16 %v3275_v35, %v3273_v13  ;;  %v3346_v12 = vpack.c.bf16 %v3274_v51, %v3272_v58  ;;  %v6016_v51 = vld [vmem:[#allocation14] sm:$0xf]  ;;  %v4300_v58 = vmax.f32 %v11303_v39, 0.0 }
 0x57f   :  { %v11318_v50 = vadd.f32 %v4162_v61, %v3994_v27 }
 0x581   :  { %v3824_v2 = vpop.f32.mrf.mxu3 }
 0x582   :  { %v3655_v28 = vpop.f32.mrf.mxu2 }
 0x583   :  { %v3656_v3 = vadd.f32 %v3655_v28, %v9635_v32  ;;  %v4165_v1 = vpop.f32.mrf.mxu1  ;;  %v4299_v28 = vmax.f32 %v11279_v21, 0.0  ;;  %v4298_v21 = vmax.f32 %v11284_v59, 0.0 }
 0x584   :  { %v3996_v16 = vpop.f32.mrf.mxu0 }
 0x585   :  { %v11333_v61 = vadd.f32 %v3824_v2, %v3656_v3  ;;  %v3997_v27 = vadd.f32 %v3996_v16, %v9994_v63  ;;  %v11339_v26 = vpack.c.bf16 %v4301_v11, %v4299_v28  ;;  %v6217_v16 = vld [vmem:[#allocation14 + $0x84] sm:$0xf0]  ;;  %v6018_v28 = vld [vmem:[#allocation14 + $0x8] sm:$0xf0] }
 0x586   :  { %3866 = vmatmul.bf16.gmra.mxu3 %v3347_v9  ;;  %4204 = vmatmul.bf16.gmra.mxu1 %v3347_v9  ;;  %v6017_v9 = vor.u32 %v6201_v18, %v6016_v51  ;;  %v3277_v18 = vld [vmem:[%s12607_s11 + $0x388] sm:$0xff] }
 0x587   :  { %3697 = vmatmul.bf16.gmra.mxu2 %v3346_v12  ;;  %4035 = vmatmul.bf16.gmra.mxu0 %v3346_v12  ;;  %v11337_v4 = vadd.f32 %v4165_v1, %v3997_v27  ;;  %13159 = vst [vmem:[#allocation27_spill] sm:$0xff] %v11339_v26  ;;  %v6081_v12 = vor.u32 %v6217_v16, %v6080_v54  ;;  %v6200_v27 = vld [vmem:[#allocation14 + $0x4] sm:$0xf]  ;;  %v3278_v16 = vld [vmem:[%s12607_s11 + $0x390] sm:$0xff] }
 0x588   :  { %4628 = vmatpush.bf16.msra.mxu2 %v6017_v9  ;;  %v11347_v26 = vpack.c.bf16 %v4300_v58, %v4298_v21  ;;  %v3276_v54 = vld [vmem:[%s12607_s11 + $0x380] sm:$0xff] }
 0x589   :  { %v3827_v13 = vpop.f32.mrf.mxu3  ;;  %4797 = vmatpush.bf16.msra.mxu3 %v6081_v12  ;;  %v6216_v58 = vld [vmem:[#allocation14 + $0x84] sm:$0xf] }
 0x58a   :  { %v3658_v35 = vpop.f32.mrf.mxu2  ;;  %13160 = vst [vmem:[#allocation24_spill] sm:$0xff] %v11347_v26 }
 0x58b   :  { %v3659_v2 = vadd.f32 %v3658_v35, %v9635_v32  ;;  %v4167_v3 = vpop.f32.mrf.mxu1  ;;  %v6021_v35 = vor.u32 %v6200_v27, %v6018_v28 }
 0x58c   :  { %v3998_v1 = vpop.f32.mrf.mxu0 }
 0x58d   :  { %v11343_v23 = vadd.f32 %v3827_v13, %v3659_v2  ;;  %v3999_v11 = vadd.f32 %v3998_v1, %v9994_v63  ;;  %v3279_v13 = vld [vmem:[%s12607_s11 + $0x398] sm:$0xff]  ;;  %4966 = vmatpush.bf16.msra.mxu0 %v6021_v35  ;;  %v3348_v1 = vpack.c.bf16 %v3278_v16, %v3276_v54  ;;  %v4303_v35 = vmax.f32 %v11307_v6, 0.0 }
 0x58e   :  { %v3349_v9 = vpack.c.bf16 %v3279_v13, %v3277_v18 }
 0x58f   :  { %v4168_v30 = vadd.f32 %v4167_v3, %v3999_v11  ;;  %v6082_v3 = vld [vmem:[#allocation14 + $0x88] sm:$0xf0]  ;;  %v4305_v11 = vmax.f32 %v11318_v50, 0.0  ;;  %v4304_v50 = vmax.f32 %v11333_v61, 0.0  ;;  %v3280_v61 = vld [vmem:[%s12607_s11 + $0x3a0] sm:$0xff] }
 0x590   :  { %v6085_v12 = vor.u32 %v6216_v58, %v6082_v3  ;;  %v4302_v58 = vmax.f32 %v11312_v57, 0.0  ;;  %v3283_v57 = vld [vmem:[%s12607_s11 + $0x3b8] sm:$0xff] }
 0x591   :  { %v3829_v39 = vpop.f32.mrf.mxu3  ;;  %v11367_v26 = vpack.c.bf16 %v4305_v11, %v4303_v35  ;;  %v3282_v35 = vld [vmem:[%s12607_s11 + $0x3b0] sm:$0xff] }
 0x592   :  { %v3660_v2 = vpop.f32.mrf.mxu2  ;;  %5135 = vmatpush.bf16.msra.mxu1 %v6085_v12  ;;  %v11375_v6 = vpack.c.bf16 %v4304_v50, %v4302_v58  ;;  %v3281_v12 = vld [vmem:[%s12607_s11 + $0x3a8] sm:$0xff]  ;;  %v4307_v58 = vmax.f32 %v11337_v4, 0.0 }
 0x593   :  { %v3661_v59 = vadd.f32 %v3660_v2, %v9635_v32  ;;  %v4170_v51 = vpop.f32.mrf.mxu1 }
 0x594   :  { %v4001_v27 = vpop.f32.mrf.mxu0 }
 0x595   :  { %v3830_v21 = vadd.f32 %v3829_v39, %v3661_v59  ;;  %v4002_v28 = vadd.f32 %v4001_v27, %v9994_v63 }
 0x596   :  { %3871 = vmatmul.bf16.gmra.mxu3 %v3349_v9  ;;  %4209 = vmatmul.bf16.gmra.mxu1 %v3349_v9 }
 0x597   :  { %3702 = vmatmul.bf16.gmra.mxu2 %v3348_v1  ;;  %4040 = vmatmul.bf16.gmra.mxu0 %v3348_v1  ;;  %v11365_v13 = vadd.f32 %v4170_v51, %v4002_v28  ;;  %v3351_v28 = vpack.c.bf16 %v3283_v57, %v3281_v12 }
 0x599   :  { %v3832_v2 = vpop.f32.mrf.mxu3 }
 0x59a   :  { %v3663_v18 = vpop.f32.mrf.mxu2 }
 0x59b   :  { %v3664_v39 = vadd.f32 %v3663_v18, %v9635_v32  ;;  %v4172_v54 = vpop.f32.mrf.mxu1  ;;  %v3350_v18 = vpack.c.bf16 %v3282_v35, %v3280_v61  ;;  %v4308_v61 = vmax.f32 %v3830_v21, 0.0  ;;  %v3286_v21 = vld [vmem:[%s12607_s11 + $0x3d0] sm:$0xff] }
 0x59c   :  { %v4003_v3 = vpop.f32.mrf.mxu0 }
 0x59d   :  { %v11371_v59 = vadd.f32 %v3832_v2, %v3664_v39  ;;  %v4004_v9 = vadd.f32 %v4003_v3, %v9994_v63  ;;  %v4309_v39 = vmax.f32 %v4168_v30, 0.0 }
 0x59f   :  { %v4173_v51 = vadd.f32 %v4172_v54, %v4004_v9 }
 0x5a1   :  { %v3834_v16 = vpop.f32.mrf.mxu3 }
 0x5a2   :  { %v3665_v1 = vpop.f32.mrf.mxu2 }
 0x5a3   :  { %v3666_v11 = vadd.f32 %v3665_v1, %v9635_v32  ;;  %v4175_v27 = vpop.f32.mrf.mxu1  ;;  %v11394_v1 = vpack.c.bf16 %v4309_v39, %v4307_v58  ;;  %v3285_v39 = vld [vmem:[%s12607_s11 + $0x3c8] sm:$0xff] }
 0x5a4   :  { %v4006_v54 = vpop.f32.mrf.mxu0 }
 0x5a5   :  { %v3835_v2 = vadd.f32 %v3834_v16, %v3666_v11  ;;  %v4007_v50 = vadd.f32 %v4006_v54, %v9994_v63  ;;  %13161 = vst [vmem:[#allocation46_spill] sm:$0xff] %v11394_v1  ;;  %v4306_v11 = vmax.f32 %v11343_v23, 0.0  ;;  %v3287_v23 = vld [vmem:[%s12607_s11 + $0x3d8] sm:$0xff] }
 0x5a6   :  { %3876 = vmatmul.bf16.gmra.mxu3 %v3351_v28  ;;  %4214 = vmatmul.bf16.gmra.mxu1 %v3351_v28 }
 0x5a7   :  { %3707 = vmatmul.bf16.gmra.mxu2 %v3350_v18  ;;  %4045 = vmatmul.bf16.gmra.mxu0 %v3350_v18  ;;  %v11392_v3 = vadd.f32 %v4175_v27, %v4007_v50  ;;  %v11401_v18 = vpack.c.bf16 %v4308_v61, %v4306_v11  ;;  %v4313_v61 = vmax.f32 %v4173_v51, 0.0 }
 0x5a9   :  { %v3837_v9 = vpop.f32.mrf.mxu3  ;;  %13162 = vst [vmem:[#allocation25_spill] sm:$0xff] %v11401_v18 }
 0x5aa   :  { %v3668_v12 = vpop.f32.mrf.mxu2 }
 0x5ab   :  { %v3669_v57 = vadd.f32 %v3668_v12, %v9635_v32  ;;  %v4177_v16 = vpop.f32.mrf.mxu1  ;;  %v3284_v12 = vld [vmem:[%s12607_s11 + $0x3c0] sm:$0xff] }
 0x5ac   :  { %v4008_v28 = vpop.f32.mrf.mxu0 }
 0x5ad   :  { %v11397_v30 = vadd.f32 %v3837_v9, %v3669_v57  ;;  %v4009_v35 = vadd.f32 %v4008_v28, %v9994_v63  ;;  %v3353_v9 = vpack.c.bf16 %v3287_v23, %v3285_v39 }
 0x5af   :  { %v4178_v4 = vadd.f32 %v4177_v16, %v4009_v35  ;;  %v3352_v16 = vpack.c.bf16 %v3286_v21, %v3284_v12  ;;  %v4311_v35 = vmax.f32 %v11365_v13, 0.0  ;;  %v4312_v21 = vmax.f32 %v3835_v2, 0.0  ;;  %v3288_v2 = vld [vmem:[%s12607_s11 + $0x3e0] sm:$0xff] }
 0x5b1   :  { %v3839_v27 = vpop.f32.mrf.mxu3  ;;  %v11420_v23 = vpack.c.bf16 %v4313_v61, %v4311_v35  ;;  %v3291_v61 = vld [vmem:[%s12607_s11 + $0x3f8] sm:$0xff]  ;;  %v3290_v35 = vld [vmem:[%s12607_s11 + $0x3f0] sm:$0xff] }
 0x5b2   :  { %v3670_v54 = vpop.f32.mrf.mxu2 }
 0x5b3   :  { %v3671_v50 = vadd.f32 %v3670_v54, %v9635_v32  ;;  %v4180_v58 = vpop.f32.mrf.mxu1  ;;  %13163 = vst [vmem:[#allocation47_spill] sm:$0xff] %v11420_v23 }
 0x5b4   :  { %v4011_v11 = vpop.f32.mrf.mxu0 }
 0x5b5   :  { %v3840_v57 = vadd.f32 %v3839_v27, %v3671_v50  ;;  %v4012_v28 = vadd.f32 %v4011_v11, %v9994_v63  ;;  %v4310_v50 = vmax.f32 %v11371_v59, 0.0  ;;  %v3289_v59 = vld [vmem:[%s12607_s11 + $0x3e8] sm:$0xff] }
 0x5b6   :  { %3881 = vmatmul.bf16.gmra.mxu3 %v3353_v9  ;;  %4219 = vmatmul.bf16.gmra.mxu1 %v3353_v9 }
 0x5b7   :  { %3712 = vmatmul.bf16.gmra.mxu2 %v3352_v16  ;;  %4050 = vmatmul.bf16.gmra.mxu0 %v3352_v16  ;;  %v11418_v54 = vadd.f32 %v4180_v58, %v4012_v28  ;;  %v11427_v16 = vpack.c.bf16 %v4312_v21, %v4310_v50  ;;  %v3355_v28 = vpack.c.bf16 %v3291_v61, %v3289_v59  ;;  %v4317_v21 = vmax.f32 %v4178_v4, 0.0 }
 0x5b8   :  { %v3904_v59 = vadd.f32 %v10032_v15, %v9994_v63  ;;  %v3566_v4 = vadd.f32 %v9703_v52, %v9635_v32 }
 0x5b9   :  { %v3842_v18 = vpop.f32.mrf.mxu3  ;;  %13164 = vst [vmem:[#allocation75_spill] sm:$0xff] %v11427_v16 }
 0x5ba   :  { %v3673_v39 = vpop.f32.mrf.mxu2 }
 0x5bb   :  { %v3674_v1 = vadd.f32 %v3673_v39, %v9635_v32  ;;  %v4182_v27 = vpop.f32.mrf.mxu1 }
 0x5bc   :  { %v4013_v9 = vpop.f32.mrf.mxu0 }
 0x5bd   :  { %v11423_v51 = vadd.f32 %v3842_v18, %v3674_v1  ;;  %v4014_v12 = vadd.f32 %v4013_v9, %v9994_v63 }
 0x5bf   :  { %v4183_v13 = vadd.f32 %v4182_v27, %v4014_v12  ;;  %v3354_v27 = vpack.c.bf16 %v3290_v35, %v3288_v2  ;;  %v4315_v12 = vmax.f32 %v11392_v3, 0.0  ;;  %v4316_v35 = vmax.f32 %v3840_v57, 0.0 }
 0x5c0   :  { %v3735_v3 = vadd.f32 %v9766_v45, %v3566_v4 }
 0x5c1   :  { %v3844_v58 = vpop.f32.mrf.mxu3  ;;  %v4321_v4 = vmax.f32 %v4183_v13, 0.0  ;;  %v3571_v13 = vadd.f32 %v9833_v56, %v9635_v32 }
 0x5c2   :  { %v3675_v11 = vpop.f32.mrf.mxu2 }
 0x5c3   :  { %v3676_v1 = vadd.f32 %v3675_v11, %v9635_v32  ;;  %v4185_v18 = vpop.f32.mrf.mxu1 }
 0x5c4   :  { %v4016_v50 = vpop.f32.mrf.mxu0 }
 0x5c5   :  { %v11442_v39 = vadd.f32 %v3844_v58, %v3676_v1  ;;  %v4017_v9 = vadd.f32 %v4016_v50, %v9994_v63  ;;  %v11450_v58 = vpack.c.bf16 %v4317_v21, %v4315_v12  ;;  %v4232_v12 = vmax.f32 %v3735_v3, 0.0 }
 0x5c6   :  { %3886 = vmatmul.bf16.gmra.mxu3 %v3355_v28  ;;  %4224 = vmatmul.bf16.gmra.mxu1 %v3355_v28  ;;  %v4073_v28 = vadd.f32 %v10093_v43, %v3904_v59  ;;  %v4230_v43 = vmax.f32 %v9671_v60, 0.0  ;;  %v3909_v60 = vadd.f32 %v10149_v47, %v9994_v63 }
 0x5c7   :  { %3717 = vmatmul.bf16.gmra.mxu2 %v3354_v27  ;;  %4055 = vmatmul.bf16.gmra.mxu0 %v3354_v27  ;;  %v11446_v11 = vadd.f32 %v4185_v18, %v4017_v9  ;;  %13165 = vst [vmem:[#allocation103_spill] sm:$0xff] %v11450_v58  ;;  %v4314_v27 = vmax.f32 %v11397_v30, 0.0 }
 0x5c8   :  { %v4233_v21 = vmax.f32 %v4073_v28, 0.0  ;;  %v4358_v59 = vpack.c.bf16 %v4232_v12, %v4230_v43  ;;  %v4318_v12 = vmax.f32 %v11423_v51, 0.0 }
 0x5c9   :  { %v3847_v61 = vpop.f32.mrf.mxu3  ;;  %v11461_v9 = vpack.c.bf16 %v4316_v35, %v4314_v27 }
 0x5ca   :  { %v3678_v16 = vpop.f32.mrf.mxu2 }
 0x5cb   :  { %v3679_v2 = vadd.f32 %v3678_v16, %v9635_v32  ;;  %v4187_v1 = vpop.f32.mrf.mxu1  ;;  %v4231_v16 = vmax.f32 %v10044_v38, 0.0 }
 0x5cc   :  { %v4018_v50 = vpop.f32.mrf.mxu0 }
 0x5cd   :  { %v11457_v18 = vadd.f32 %v3847_v61, %v3679_v2  ;;  %v4019_v15 = vadd.f32 %v4018_v50, %v9994_v63  ;;  %v4359_v61 = vpack.c.bf16 %v4233_v21, %v4231_v16  ;;  %v4078_v50 = vadd.f32 %v10184_v22, %v3909_v60 }
 0x5cf   :  { %v4188_v52 = vadd.f32 %v4187_v1, %v4019_v15  ;;  %v4319_v1 = vmax.f32 %v11418_v54, 0.0  ;;  %v4320_v15 = vmax.f32 %v11442_v39, 0.0  ;;  %v3740_v54 = vadd.f32 %v9877_v48, %v3571_v13 }
 0x5d0   :  { %v4237_v43 = vmax.f32 %v4078_v50, 0.0  ;;  %v4234_v39 = vmax.f32 %v9835_v46, 0.0  ;;  %v3914_v46 = vadd.f32 %v10373_v55, %v9994_v63 }
 0x5d1   :  { %v3849_v58 = vpop.f32.mrf.mxu3  ;;  %v11472_v3 = vpack.c.bf16 %v4321_v4, %v4319_v1  ;;  %v4236_v56 = vmax.f32 %v3740_v54, 0.0  ;;  %v4325_v1 = vmax.f32 %v4188_v52, 0.0  ;;  %v3576_v52 = vadd.f32 %v10400_v42, %v9635_v32 }
 0x5d2   :  { %v3680_v23 = vpop.f32.mrf.mxu2  ;;  %v4083_v54 = vadd.f32 %v10352_v31, %v3914_v46  ;;  %v13168_v31 = vld [vmem:[#allocation80_spill] sm:$0xff] }
 0x5d3   :  { %v3681_v45 = vadd.f32 %v3680_v23, %v9635_v32  ;;  %v4190_v57 = vpop.f32.mrf.mxu1  ;;  %v4360_v51 = vpack.c.bf16 %v4236_v56, %v4234_v39 }
 0x5d4   :  { %v4021_v2 = vpop.f32.mrf.mxu0 }
 0x5d5   :  { %v3850_v30 = vadd.f32 %v3849_v58, %v3681_v45  ;;  %v4022_v28 = vadd.f32 %v4021_v2, %v9994_v63  ;;  %v11484_v45 = vpack.c.bf16 %v4320_v15, %v4318_v12 }
 0x5d6   :  { %4798 = vmatmul.bf16.vlgmr.msra.gmra.mxu3 %v4359_v61  ;;  %5136 = vmatmul.bf16.vlgmr.msra.gmra.mxu1 %v4359_v61 }
 0x5d7   :  { %4629 = vmatmul.bf16.vlgmr.msra.gmra.mxu2 %v4358_v59  ;;  %4967 = vmatmul.bf16.vlgmr.msra.gmra.mxu0 %v4358_v59  ;;  %v11468_v38 = vadd.f32 %v4190_v57, %v4022_v28  ;;  %v4235_v59 = vmax.f32 %v10144_v34, 0.0  ;;  %v4324_v12 = vmax.f32 %v3850_v30, 0.0  ;;  %v4238_v30 = vmax.f32 %v13168_v31, 0.0 }
 0x5d9   :  { %v3852_v35 = vpop.f32.mrf.mxu3  ;;  %v4361_v2 = vpack.c.bf16 %v4237_v43, %v4235_v59  ;;  %v4322_v43 = vmax.f32 %v11457_v18, 0.0 }
 0x5da   :  { %v3683_v23 = vpop.f32.mrf.mxu2 }
 0x5db   :  { %v3684_v58 = vadd.f32 %v3683_v23, %v9635_v32  ;;  %v4192_v27 = vpop.f32.mrf.mxu1  ;;  %v4323_v23 = vmax.f32 %v11446_v11, 0.0  ;;  %v11506_v59 = vpack.c.bf16 %v4324_v12, %v4322_v43 }
 0x5dc   :  { %v4023_v47 = vpop.f32.mrf.mxu0 }
 0x5dd   :  { %v11480_v21 = vadd.f32 %v3852_v35, %v3684_v58  ;;  %v4024_v16 = vadd.f32 %v4023_v47, %v9994_v63  ;;  %v13166_v47 = vld [vmem:[#allocation100_spill] sm:$0xff] }
 0x5de   :  { %v3745_v11 = vadd.f32 %v13166_v47, %v3576_v52 }
 0x5df   :  { %v4193_v57 = vadd.f32 %v4192_v27, %v4024_v16  ;;  %v11495_v27 = vpack.c.bf16 %v4325_v1, %v4323_v23 }
 0x5e1   :  { %v3854_v61 = vpop.f32.mrf.mxu3  ;;  %v4329_v23 = vmax.f32 %v4193_v57, 0.0  ;;  %v4326_v57 = vmax.f32 %v11480_v21, 0.0 }
 0x5e2   :  { %v3685_v22 = vpop.f32.mrf.mxu2 }
 0x5e3   :  { %v3686_v48 = vadd.f32 %v3685_v22, %v9635_v32  ;;  %v4195_v4 = vpop.f32.mrf.mxu1  ;;  %v4240_v22 = vmax.f32 %v3745_v11, 0.0 }
 0x5e4   :  { %v4026_v35 = vpop.f32.mrf.mxu0 }
 0x5e5   :  { %v3855_v28 = vadd.f32 %v3854_v61, %v3686_v48  ;;  %v4027_v60 = vadd.f32 %v4026_v35, %v9994_v63  ;;  %v4241_v61 = vmax.f32 %v4083_v54, 0.0  ;;  %v13167_v48 = vld [vmem:[#allocation95_spill] sm:$0xff]  ;;  %v4362_v18 = vpack.c.bf16 %v4240_v22, %v4238_v30 }
 0x5e6   :  { %4803 = vmatmul.bf16.gmra.mxu3 %v4361_v2  ;;  %5141 = vmatmul.bf16.gmra.mxu1 %v4361_v2 }
 0x5e7   :  { %4634 = vmatmul.bf16.gmra.mxu2 %v4360_v51  ;;  %4972 = vmatmul.bf16.gmra.mxu0 %v4360_v51  ;;  %v11491_v34 = vadd.f32 %v4195_v4, %v4027_v60  ;;  %v4239_v4 = vmax.f32 %v13167_v48, 0.0  ;;  %v4328_v11 = vmax.f32 %v3855_v28, 0.0 }
 0x5e9   :  { %v3857_v13 = vpop.f32.mrf.mxu3  ;;  %v4363_v35 = vpack.c.bf16 %v4241_v61, %v4239_v4  ;;  %v11518_v61 = vpack.c.bf16 %v4328_v11, %v4326_v57  ;;  %v4331_v28 = vmax.f32 %v11491_v34, 0.0 }
 0x5ea   :  { %v3688_v58 = vpop.f32.mrf.mxu2 }
 0x5eb   :  { %v3689_v50 = vadd.f32 %v3688_v58, %v9635_v32  ;;  %v4197_v15 = vpop.f32.mrf.mxu1  ;;  %v4327_v58 = vmax.f32 %v11468_v38, 0.0 }
 0x5ec   :  { %v4028_v56 = vpop.f32.mrf.mxu0 }
 0x5ed   :  { %v11502_v16 = vadd.f32 %v3857_v13, %v3689_v50  ;;  %v4029_v55 = vadd.f32 %v4028_v56, %v9994_v63  ;;  %v11513_v54 = vpack.c.bf16 %v4329_v23, %v4327_v58 }
 0x5ef   :  { %v4198_v42 = vadd.f32 %v4197_v15, %v4029_v55 }
 0x5f1   :  { %v3859_v39 = vpop.f32.mrf.mxu3  ;;  %v4333_v31 = vmax.f32 %v4198_v42, 0.0 }
 0x5f2   :  { %v3690_v2 = vpop.f32.mrf.mxu2 }
 0x5f3   :  { %v3691_v51 = vadd.f32 %v3690_v2, %v9635_v32  ;;  %v4200_v1 = vpop.f32.mrf.mxu1 }
 0x5f4   :  { %v4031_v13 = vpop.f32.mrf.mxu0 }
 0x5f5   :  { %v3860_v60 = vadd.f32 %v3859_v39, %v3691_v51  ;;  %v4032_v46 = vadd.f32 %v4031_v13, %v9994_v63 }
 0x5f6   :  { %4808 = vmatmul.bf16.gmra.mxu3 %v4363_v35  ;;  %5146 = vmatmul.bf16.gmra.mxu1 %v4363_v35 }
 0x5f7   :  { %4639 = vmatmul.bf16.gmra.mxu2 %v4362_v18  ;;  %4977 = vmatmul.bf16.gmra.mxu0 %v4362_v18  ;;  %v4201_v52 = vadd.f32 %v4200_v1, %v4032_v46  ;;  %v11527_v18 = vpack.c.bf16 %v4333_v31, %v4331_v28  ;;  %v4332_v13 = vmax.f32 %v3860_v60, 0.0 }
 0x5f9   :  { %v3862_v50 = vpop.f32.mrf.mxu3  ;;  %v4335_v60 = vmax.f32 %v4201_v52, 0.0 }
 0x5fa   :  { %v3693_v15 = vpop.f32.mrf.mxu2 }
 0x5fb   :  { %v3694_v12 = vadd.f32 %v3693_v15, %v9635_v32  ;;  %v4202_v47 = vpop.f32.mrf.mxu1 }
 0x5fc   :  { %v4033_v56 = vpop.f32.mrf.mxu0 }
 0x5fd   :  { %v3863_v43 = vadd.f32 %v3862_v50, %v3694_v12  ;;  %v4034_v55 = vadd.f32 %v4033_v56, %v9994_v63 }
 0x5ff   :  { %v4203_v22 = vadd.f32 %v4202_v47, %v4034_v55  ;;  %v4334_v28 = vmax.f32 %v3863_v43, 0.0 }
 0x601   :  { %v3864_v39 = vpop.f32.mrf.mxu3  ;;  %v4337_v56 = vmax.f32 %v4203_v22, 0.0 }
 0x602   :  { %v3695_v38 = vpop.f32.mrf.mxu2 }
 0x603   :  { %v3696_v48 = vadd.f32 %v3695_v38, %v9635_v32  ;;  %v4205_v4 = vpop.f32.mrf.mxu1 }
 0x604   :  { %v4036_v30 = vpop.f32.mrf.mxu0 }
 0x605   :  { %v3865_v2 = vadd.f32 %v3864_v39, %v3696_v48  ;;  %v4037_v21 = vadd.f32 %v4036_v30, %v9994_v63 }
 0x606   :  { %4813 = vmatmul.bf16.gmra.mxu3 %v10618_v14  ;;  %5151 = vmatmul.bf16.gmra.mxu1 %v10618_v14  ;;  %v4330_v14 = vmax.f32 %v11502_v16, 0.0 }
 0x607   :  { %4644 = vmatmul.bf16.gmra.mxu2 %v10649_v33  ;;  %4982 = vmatmul.bf16.gmra.mxu0 %v10649_v33  ;;  %v4206_v51 = vadd.f32 %v4205_v4, %v4037_v21  ;;  %v11540_v4 = vpack.c.bf16 %v4337_v56, %v4335_v60  ;;  %v4336_v30 = vmax.f32 %v3865_v2, 0.0 }
 0x608   :  { %v11532_v15 = vpack.c.bf16 %v4332_v13, %v4330_v14 }
 0x609   :  { %v3867_v1 = vpop.f32.mrf.mxu3  ;;  %v4339_v2 = vmax.f32 %v4206_v51, 0.0 }
 0x60a   :  { %v3698_v35 = vpop.f32.mrf.mxu2 }
 0x60b   :  { %v3699_v42 = vadd.f32 %v3698_v35, %v9635_v32  ;;  %v4207_v23 = vpop.f32.mrf.mxu1  ;;  %v11544_v35 = vpack.c.bf16 %v4336_v30, %v4334_v28 }
 0x60c   :  { %v4038_v58 = vpop.f32.mrf.mxu0 }
 0x60d   :  { %v3868_v46 = vadd.f32 %v3867_v1, %v3699_v42  ;;  %v4039_v50 = vadd.f32 %v4038_v58, %v9994_v63 }
 0x60f   :  { %v4208_v33 = vadd.f32 %v4207_v23, %v4039_v50  ;;  %v4338_v60 = vmax.f32 %v3868_v46, 0.0 }
 0x611   :  { %v3869_v12 = vpop.f32.mrf.mxu3  ;;  %v4341_v58 = vmax.f32 %v4208_v33, 0.0 }
 0x612   :  { %v3700_v34 = vpop.f32.mrf.mxu2 }
 0x613   :  { %v3701_v47 = vadd.f32 %v3700_v34, %v9635_v32  ;;  %v4210_v11 = vpop.f32.mrf.mxu1 }
 0x614   :  { %v4041_v55 = vpop.f32.mrf.mxu0 }
 0x615   :  { %v3870_v57 = vadd.f32 %v3869_v12, %v3701_v47  ;;  %v4042_v16 = vadd.f32 %v4041_v55, %v9994_v63 }
 0x616   :  { %4818 = vmatmul.bf16.gmra.mxu3 %v10701_v24  ;;  %5156 = vmatmul.bf16.gmra.mxu1 %v10701_v24 }
 0x617   :  { %4649 = vmatmul.bf16.gmra.mxu2 %v10727_v20  ;;  %4987 = vmatmul.bf16.gmra.mxu0 %v10727_v20  ;;  %v4211_v39 = vadd.f32 %v4210_v11, %v4042_v16  ;;  %v11552_v11 = vpack.c.bf16 %v4341_v58, %v4339_v2  ;;  %v4340_v55 = vmax.f32 %v3870_v57, 0.0 }
 0x619   :  { %v3872_v38 = vpop.f32.mrf.mxu3  ;;  %v4343_v57 = vmax.f32 %v4211_v39, 0.0 }
 0x61a   :  { %v3703_v48 = vpop.f32.mrf.mxu2 }
 0x61b   :  { %v3704_v31 = vadd.f32 %v3703_v48, %v9635_v32  ;;  %v4212_v22 = vpop.f32.mrf.mxu1  ;;  %v11556_v48 = vpack.c.bf16 %v4340_v55, %v4338_v60 }
 0x61c   :  { %v4043_v1 = vpop.f32.mrf.mxu0 }
 0x61d   :  { %v3873_v21 = vadd.f32 %v3872_v38, %v3704_v31  ;;  %v4044_v24 = vadd.f32 %v4043_v1, %v9994_v63 }
 0x61f   :  { %v4213_v42 = vadd.f32 %v4212_v22, %v4044_v24  ;;  %v4342_v2 = vmax.f32 %v3873_v21, 0.0 }
 0x621   :  { %v3874_v23 = vpop.f32.mrf.mxu3  ;;  %v4345_v1 = vmax.f32 %v4213_v42, 0.0 }
 0x622   :  { %v3705_v20 = vpop.f32.mrf.mxu2 }
 0x623   :  { %v3706_v52 = vadd.f32 %v3705_v20, %v9635_v32  ;;  %v4215_v13 = vpop.f32.mrf.mxu1 }
 0x624   :  { %v4046_v50 = vpop.f32.mrf.mxu0 }
 0x625   :  { %v3875_v14 = vadd.f32 %v3874_v23, %v3706_v52  ;;  %v4047_v43 = vadd.f32 %v4046_v50, %v9994_v63 }
 0x626   :  { %4823 = vmatmul.bf16.gmra.mxu3 %v10775_v53  ;;  %5161 = vmatmul.bf16.gmra.mxu1 %v10775_v53 }
 0x627   :  { %4654 = vmatmul.bf16.gmra.mxu2 %v10803_v41  ;;  %4992 = vmatmul.bf16.gmra.mxu0 %v10803_v41  ;;  %v4216_v12 = vadd.f32 %v4215_v13, %v4047_v43  ;;  %v11564_v13 = vpack.c.bf16 %v4345_v1, %v4343_v57  ;;  %v4344_v50 = vmax.f32 %v3875_v14, 0.0 }
 0x629   :  { %v3877_v34 = vpop.f32.mrf.mxu3  ;;  %v4347_v14 = vmax.f32 %v4216_v12, 0.0 }
 0x62a   :  { %v3708_v47 = vpop.f32.mrf.mxu2 }
 0x62b   :  { %v3709_v56 = vadd.f32 %v3708_v47, %v9635_v32  ;;  %v4217_v33 = vpop.f32.mrf.mxu1  ;;  %v11568_v47 = vpack.c.bf16 %v4344_v50, %v4342_v2 }
 0x62c   :  { %v4048_v38 = vpop.f32.mrf.mxu0 }
 0x62d   :  { %v3878_v16 = vadd.f32 %v3877_v34, %v3709_v56  ;;  %v4049_v53 = vadd.f32 %v4048_v38, %v9994_v63 }
 0x62f   :  { %v4218_v31 = vadd.f32 %v4217_v33, %v4049_v53 }
 0x631   :  { %v3879_v22 = vpop.f32.mrf.mxu3  ;;  %v4349_v38 = vmax.f32 %v4218_v31, 0.0 }
 0x632   :  { %v3710_v41 = vpop.f32.mrf.mxu2 }
 0x633   :  { %v3711_v51 = vadd.f32 %v3710_v41, %v9635_v32  ;;  %v4220_v30 = vpop.f32.mrf.mxu1 }
 0x634   :  { %v4051_v24 = vpop.f32.mrf.mxu0 }
 0x635   :  { %v3880_v28 = vadd.f32 %v3879_v22, %v3711_v51  ;;  %v4052_v46 = vadd.f32 %v4051_v24, %v9994_v63 }
 0x636   :  { %4828 = vmatmul.bf16.gmra.mxu3 %v10861_v5  ;;  %5166 = vmatmul.bf16.gmra.mxu1 %v10861_v5 }
 0x637   :  { %4659 = vmatmul.bf16.gmra.mxu2 %v10887_v44  ;;  %4997 = vmatmul.bf16.gmra.mxu0 %v10887_v44  ;;  %v4221_v23 = vadd.f32 %v4220_v30, %v4052_v46  ;;  %v11578_v30 = vpack.c.bf16 %v4349_v38, %v4347_v14  ;;  %v4348_v24 = vmax.f32 %v3880_v28, 0.0 }
 0x639   :  { %v3882_v20 = vpop.f32.mrf.mxu3 }
 0x63a   :  { %v3713_v52 = vpop.f32.mrf.mxu2 }
 0x63b   :  { %v3714_v58 = vadd.f32 %v3713_v52, %v9635_v32  ;;  %v4222_v42 = vpop.f32.mrf.mxu1  ;;  %v4455_v52 = vld [vmem:[#allocation16 + $0x1] ss:$2 sm:$0x3] }
 0x63c   :  { %v4053_v34 = vpop.f32.mrf.mxu0 }
 0x63d   :  { %v3883_v43 = vadd.f32 %v3882_v20, %v3714_v58  ;;  %v4054_v5 = vadd.f32 %v4053_v34, %v9994_v63  ;;  %v11587_v34 = vperm.slane %v4455_v52, 1 }
 0x63f   :  { %v4223_v56 = vadd.f32 %v4222_v42, %v4054_v5  ;;  %v4350_v14 = vmax.f32 %v3883_v43, 0.0 }
 0x641   :  { %v3884_v33 = vpop.f32.mrf.mxu3  ;;  %v4353_v28 = vmax.f32 %v4223_v56, 0.0 }
 0x642   :  { %v3715_v44 = vpop.f32.mrf.mxu2 }
 0x643   :  { %v3716_v39 = vadd.f32 %v3715_v44, %v9635_v32  ;;  %v4225_v55 = vpop.f32.mrf.mxu1 }
 0x644   :  { %v4056_v53 = vpop.f32.mrf.mxu0 }
 0x645   :  { %v3885_v60 = vadd.f32 %v3884_v33, %v3716_v39  ;;  %v4057_v21 = vadd.f32 %v4056_v53, %v9994_v63 }
 0x646   :  { %4833 = vmatmul.bf16.gmra.mxu3 %v10925_v36  ;;  %5171 = vmatmul.bf16.gmra.mxu1 %v10925_v36  ;;  %v4346_v36 = vmax.f32 %v3878_v16, 0.0  ;;  %v11596_v16 = vperm.slane %v4455_v52, 0 }
 0x647   :  { %4664 = vmatmul.bf16.gmra.mxu2 %v10947_v37  ;;  %5002 = vmatmul.bf16.gmra.mxu0 %v10947_v37  ;;  %v11576_v22 = vadd.f32 %v4225_v55, %v4057_v21  ;;  %v4352_v21 = vmax.f32 %v3885_v60, 0.0 }
 0x648   :  { %v11584_v58 = vpack.c.bf16 %v4348_v24, %v4346_v36  ;;  %v6600_v24 = vld [vmem:[%s12607_s11 + $0x8] sm:$0xff] }
 0x649   :  { %v3887_v41 = vpop.f32.mrf.mxu3 }
 0x64a   :  { %v3718_v51 = vpop.f32.mrf.mxu2 }
 0x64b   :  { %v3719_v31 = vadd.f32 %v3718_v51, %v9635_v32  ;;  %v4227_v1 = vpop.f32.mrf.mxu1 }
 0x64c   :  { %v4058_v57 = vpop.f32.mrf.mxu0 }
 0x64d   :  { %v11581_v46 = vadd.f32 %v3887_v41, %v3719_v31  ;;  %v4059_v20 = vadd.f32 %v4058_v57, %v9994_v63 }
 0x64f   :  { %v4228_v37 = vadd.f32 %v4227_v1, %v4059_v20 }
 0x651   :  { %v3889_v12 = vpop.f32.mrf.mxu3 }
 0x652   :  { %v3720_v42 = vpop.f32.mrf.mxu2 }
 0x653   :  { %v3721_v50 = vadd.f32 %v3720_v42, %v9635_v32  ;;  %v5137_v2 = vpop.f32.mrf.mxu1  ;;  %v4351_v32 = vmax.f32 %v4221_v23, 0.0  ;;  %v6601_v42 = vld [vmem:[%s12607_s11] sm:$0xff] }
 0x654   :  { %v4968_v33 = vpop.f32.mrf.mxu0 }
 0x655   :  { %v11589_v5 = vadd.f32 %v3889_v12, %v3721_v50  ;;  %v4969_v63 = vadd.f32 %v4968_v33, %v11587_v34  ;;  %v11598_v38 = vpack.c.bf16 %v4353_v28, %v4351_v32  ;;  %v4357_v12 = vmax.f32 %v4228_v37, 0.0 }
 0x656   :  { %4838 = vmatmul.bf16.gmra.mxu3 %v10991_v62  ;;  %5176 = vmatmul.bf16.gmra.mxu1 %v10991_v62  ;;  %v4355_v33 = vmax.f32 %v11576_v22, 0.0 }
 0x657   :  { %4669 = vmatmul.bf16.gmra.mxu2 %v11013_v25  ;;  %5007 = vmatmul.bf16.gmra.mxu0 %v11013_v25  ;;  %v5138_v44 = vadd.f32 %v5137_v2, %v4969_v63  ;;  %v11602_v25 = vpack.c.bf16 %v4352_v21, %v4350_v14  ;;  %v4356_v22 = vmax.f32 %v11589_v5, 0.0  ;;  %v6603_v14 = vld [vmem:[%s12607_s11 + $0x10] sm:$0xff] }
 0x659   :  { %v4799_v39 = vpop.f32.mrf.mxu3  ;;  %6317 = vtanh.f32 %v5138_v44 }
 0x65a   :  { %v4630_v55 = vpop.f32.mrf.mxu2 }
 0x65b   :  { %v4631_v56 = vadd.f32 %v4630_v55, %v11596_v16  ;;  %v5139_v53 = vpop.f32.mrf.mxu1  ;;  %v11626_v55 = vpack.c.bf16 %v4357_v12, %v4355_v33  ;;  %v6605_v12 = vld [vmem:[%s12607_s11 + $0x20] sm:$0xff] }
 0x65c   :  { %v4970_v41 = vpop.f32.mrf.mxu0 }
 0x65d   :  { %v4800_v62 = vadd.f32 %v4799_v39, %v4631_v56  ;;  %v4971_v51 = vadd.f32 %v4970_v41, %v11587_v34 }
 0x65f   :  { %6319 = vtanh.f32 %v4800_v62  ;;  %v6318_v31 = vpop.eup %6317  ;;  %v5140_v23 = vadd.f32 %v5139_v53, %v4971_v51  ;;  %v4354_v62 = vmax.f32 %v11581_v46, 0.0  ;;  %v6604_v46 = vld [vmem:[%s12607_s11 + $0x28] sm:$0xff] }
 0x660   :  { %v5426_v36 = vmul.f32 %v6600_v24, %v6318_v31 }
 0x661   :  { %v4801_v1 = vpop.f32.mrf.mxu3  ;;  %6321 = vtanh.f32 %v5140_v23  ;;  %v11641_v5 = vpack.c.bf16 %v4356_v22, %v4354_v62 }
 0x662   :  { %v4632_v57 = vpop.f32.mrf.mxu2  ;;  %5554 = vst [vmem:[%s12607_s11 + $0x8] sm:$0xff] %v5426_v36 }
 0x663   :  { %v4633_v60 = vadd.f32 %v4632_v57, %v11596_v16  ;;  %v5142_v20 = vpop.f32.mrf.mxu1 }
 0x664   :  { %v4973_v2 = vpop.f32.mrf.mxu0 }
 0x665   :  { %v6320_v43 = vpop.eup %6319  ;;  %v4802_v52 = vadd.f32 %v4801_v1, %v4633_v60  ;;  %v4974_v28 = vadd.f32 %v4973_v2, %v11587_v34 }
 0x666   :  { %v5425_v50 = vmul.f32 %v6601_v42, %v6320_v43  ;;  %4843 = vmatmul.bf16.gmra.mxu3 %v11045_v10  ;;  %5181 = vmatmul.bf16.gmra.mxu1 %v11045_v10  ;;  %v6602_v10 = vld [vmem:[%s12607_s11 + $0x18] sm:$0xff] }
 0x667   :  { %6323 = vtanh.f32 %v4802_v52  ;;  %4674 = vmatmul.bf16.gmra.mxu2 %v11061_v19  ;;  %5012 = vmatmul.bf16.gmra.mxu0 %v11061_v19  ;;  %v6322_v37 = vpop.eup %6321  ;;  %v5143_v63 = vadd.f32 %v5142_v20, %v4974_v28 }
 0x668   :  { %5553 = vst [vmem:[%s12607_s11] sm:$0xff] %v5425_v50  ;;  %v5428_v44 = vmul.f32 %v6602_v10, %v6322_v37 }
 0x669   :  { %v4804_v32 = vpop.f32.mrf.mxu3  ;;  %6325 = vtanh.f32 %v5143_v63  ;;  %v6606_v63 = vld [vmem:[%s12607_s11 + $0x38] sm:$0xff] }
 0x66a   :  { %v4635_v39 = vpop.f32.mrf.mxu2  ;;  %5556 = vst [vmem:[%s12607_s11 + $0x18] sm:$0xff] %v5428_v44 }
 0x66b   :  { %v4636_v19 = vadd.f32 %v4635_v39, %v11596_v16  ;;  %v5144_v56 = vpop.f32.mrf.mxu1 }
 0x66c   :  { %v4975_v51 = vpop.f32.mrf.mxu0 }
 0x66d   :  { %v6324_v53 = vpop.eup %6323  ;;  %v4805_v21 = vadd.f32 %v4804_v32, %v4636_v19  ;;  %v4976_v31 = vadd.f32 %v4975_v51, %v11587_v34  ;;  %v6607_v19 = vld [vmem:[%s12607_s11 + $0x30] sm:$0xff] }
 0x66e   :  { %v5427_v41 = vmul.f32 %v6603_v14, %v6324_v53 }
 0x66f   :  { %6327 = vtanh.f32 %v4805_v21  ;;  %v6326_v23 = vpop.eup %6325  ;;  %v5145_v1 = vadd.f32 %v5144_v56, %v4976_v31 }
 0x670   :  { %5555 = vst [vmem:[%s12607_s11 + $0x10] sm:$0xff] %v5427_v41  ;;  %v5430_v36 = vmul.f32 %v6604_v46, %v6326_v23  ;;  %v6608_v41 = vld [vmem:[%s12607_s11 + $0x48] sm:$0xff] }
 0x671   :  { %v4806_v24 = vpop.f32.mrf.mxu3  ;;  %6329 = vtanh.f32 %v5145_v1 }
 0x672   :  { %v4637_v57 = vpop.f32.mrf.mxu2  ;;  %5558 = vst [vmem:[%s12607_s11 + $0x28] sm:$0xff] %v5430_v36  ;;  %v6609_v36 = vld [vmem:[%s12607_s11 + $0x40] sm:$0xff] }
 0x673   :  { %v4638_v60 = vadd.f32 %v4637_v57, %v11596_v16  ;;  %v5147_v20 = vpop.f32.mrf.mxu1 }
 0x674   :  { %v4978_v50 = vpop.f32.mrf.mxu0 }
 0x675   :  { %v6328_v43 = vpop.eup %6327  ;;  %v4807_v52 = vadd.f32 %v4806_v24, %v4638_v60  ;;  %v4979_v2 = vadd.f32 %v4978_v50, %v11587_v34 }
 0x676   :  { %v5429_v42 = vmul.f32 %v6605_v12, %v6328_v43  ;;  %4848 = vmatmul.bf16.gmra.mxu3 %v11099_v0  ;;  %5186 = vmatmul.bf16.gmra.mxu1 %v11099_v0 }
 0x677   :  { %6331 = vtanh.f32 %v4807_v52  ;;  %4679 = vmatmul.bf16.gmra.mxu2 %v11127_v40  ;;  %5017 = vmatmul.bf16.gmra.mxu0 %v11127_v40  ;;  %v6330_v28 = vpop.eup %6329  ;;  %v5148_v33 = vadd.f32 %v5147_v20, %v4979_v2 }
 0x678   :  { %5557 = vst [vmem:[%s12607_s11 + $0x20] sm:$0xff] %v5429_v42  ;;  %v5432_v32 = vmul.f32 %v6606_v63, %v6330_v28  ;;  %v6610_v42 = vld [vmem:[%s12607_s11 + $0x58] sm:$0xff] }
 0x679   :  { %v4809_v37 = vpop.f32.mrf.mxu3  ;;  %6333 = vtanh.f32 %v5148_v33 }
 0x67a   :  { %v4640_v0 = vpop.f32.mrf.mxu2  ;;  %5560 = vst [vmem:[%s12607_s11 + $0x38] sm:$0xff] %v5432_v32 }
 0x67b   :  { %v4641_v10 = vadd.f32 %v4640_v0, %v11596_v16  ;;  %v5149_v44 = vpop.f32.mrf.mxu1 }
 0x67c   :  { %v4980_v22 = vpop.f32.mrf.mxu0 }
 0x67d   :  { %v6332_v40 = vpop.eup %6331  ;;  %v4810_v39 = vadd.f32 %v4809_v37, %v4641_v10  ;;  %v4981_v53 = vadd.f32 %v4980_v22, %v11587_v34  ;;  %v6611_v37 = vld [vmem:[%s12607_s11 + $0x50] sm:$0xff] }
 0x67e   :  { %v5431_v56 = vmul.f32 %v6607_v19, %v6332_v40 }
 0x67f   :  { %6335 = vtanh.f32 %v4810_v39  ;;  %v6334_v21 = vpop.eup %6333  ;;  %v5150_v62 = vadd.f32 %v5149_v44, %v4981_v53  ;;  %v6612_v39 = vld [vmem:[%s12607_s11 + $0x68] sm:$0xff] }
 0x680   :  { %5559 = vst [vmem:[%s12607_s11 + $0x30] sm:$0xff] %v5431_v56  ;;  %v5434_v51 = vmul.f32 %v6608_v41, %v6334_v21 }
 0x681   :  { %v4811_v14 = vpop.f32.mrf.mxu3  ;;  %6337 = vtanh.f32 %v5150_v62 }
 0x682   :  { %v4642_v31 = vpop.f32.mrf.mxu2  ;;  %5562 = vst [vmem:[%s12607_s11 + $0x48] sm:$0xff] %v5434_v51 }
 0x683   :  { %v4643_v23 = vadd.f32 %v4642_v31, %v11596_v16  ;;  %v5152_v1 = vpop.f32.mrf.mxu1 }
 0x684   :  { %v4983_v60 = vpop.f32.mrf.mxu0 }
 0x685   :  { %v6336_v24 = vpop.eup %6335  ;;  %v4812_v46 = vadd.f32 %v4811_v14, %v4643_v23  ;;  %v4984_v20 = vadd.f32 %v4983_v60, %v11587_v34  ;;  %v6613_v14 = vld [vmem:[%s12607_s11 + $0x60] sm:$0xff] }
 0x686   :  { %v5433_v57 = vmul.f32 %v6609_v36, %v6336_v24  ;;  %4853 = vmatmul.bf16.gmra.mxu3 %v11157_v7  ;;  %5191 = vmatmul.bf16.gmra.mxu1 %v11157_v7 }
 0x687   :  { %6339 = vtanh.f32 %v4812_v46  ;;  %4684 = vmatmul.bf16.gmra.mxu2 %v11175_v49  ;;  %5022 = vmatmul.bf16.gmra.mxu0 %v11175_v49  ;;  %v6338_v43 = vpop.eup %6337  ;;  %v5153_v52 = vadd.f32 %v5152_v1, %v4984_v20  ;;  %v6614_v46 = vld [vmem:[%s12607_s11 + $0x78] sm:$0xff] }
 0x688   :  { %5561 = vst [vmem:[%s12607_s11 + $0x40] sm:$0xff] %v5433_v57  ;;  %v5436_v50 = vmul.f32 %v6610_v42, %v6338_v43  ;;  %v6615_v43 = vld [vmem:[%s12607_s11 + $0x70] sm:$0xff] }
 0x689   :  { %v4814_v12 = vpop.f32.mrf.mxu3  ;;  %6341 = vtanh.f32 %v5153_v52 }
 0x68a   :  { %v4645_v7 = vpop.f32.mrf.mxu2  ;;  %5564 = vst [vmem:[%s12607_s11 + $0x58] sm:$0xff] %v5436_v50 }
 0x68b   :  { %v4646_v2 = vadd.f32 %v4645_v7, %v11596_v16  ;;  %v5154_v28 = vpop.f32.mrf.mxu1 }
 0x68c   :  { %v4985_v32 = vpop.f32.mrf.mxu0 }
 0x68d   :  { %v6340_v49 = vpop.eup %6339  ;;  %v4815_v33 = vadd.f32 %v4814_v12, %v4646_v2  ;;  %v4986_v0 = vadd.f32 %v4985_v32, %v11587_v34 }
 0x68e   :  { %v5435_v63 = vmul.f32 %v6611_v37, %v6340_v49 }
 0x68f   :  { %6343 = vtanh.f32 %v4815_v33  ;;  %v6342_v10 = vpop.eup %6341  ;;  %v5155_v44 = vadd.f32 %v5154_v28, %v4986_v0  ;;  %v6616_v28 = vld [vmem:[%s12607_s11 + $0x88] sm:$0xff] }
 0x690   :  { %5563 = vst [vmem:[%s12607_s11 + $0x50] sm:$0xff] %v5435_v63  ;;  %v5438_v19 = vmul.f32 %v6612_v39, %v6342_v10  ;;  %v6617_v10 = vld [vmem:[%s12607_s11 + $0x80] sm:$0xff] }
 0x691   :  { %v4816_v40 = vpop.f32.mrf.mxu3  ;;  %6345 = vtanh.f32 %v5155_v44 }
 0x692   :  { %v4647_v56 = vpop.f32.mrf.mxu2  ;;  %5566 = vst [vmem:[%s12607_s11 + $0x68] sm:$0xff] %v5438_v19  ;;  %v13169_v19 = vld [vmem:[#allocation31_spill] sm:$0xff] }
 0x693   :  { %v4648_v22 = vadd.f32 %v4647_v56, %v11596_v16  ;;  %v5157_v53 = vpop.f32.mrf.mxu1 }
 0x694   :  { %v4988_v51 = vpop.f32.mrf.mxu0 }
 0x695   :  { %v6344_v21 = vpop.eup %6343  ;;  %v4817_v62 = vadd.f32 %v4816_v40, %v4648_v22  ;;  %v4989_v31 = vadd.f32 %v4988_v51, %v11587_v34 }
 0x696   :  { %v5437_v41 = vmul.f32 %v6613_v14, %v6344_v21  ;;  %4858 = vmatmul.bf16.gmra.mxu3 %v11196_v8  ;;  %5196 = vmatmul.bf16.gmra.mxu1 %v11196_v8  ;;  %v6618_v21 = vld [vmem:[%s12607_s11 + $0x98] sm:$0xff] }
 0x697   :  { %6347 = vtanh.f32 %v4817_v62  ;;  %4689 = vmatmul.bf16.gmra.mxu2 %v11203_v17  ;;  %5027 = vmatmul.bf16.gmra.mxu0 %v11203_v17  ;;  %v6346_v23 = vpop.eup %6345  ;;  %v5158_v1 = vadd.f32 %v5157_v53, %v4989_v31 }
 0x698   :  { %5565 = vst [vmem:[%s12607_s11 + $0x60] sm:$0xff] %v5437_v41  ;;  %v5440_v36 = vmul.f32 %v6614_v46, %v6346_v23  ;;  %v6619_v23 = vld [vmem:[%s12607_s11 + $0x90] sm:$0xff] }
 0x699   :  { %v4819_v24 = vpop.f32.mrf.mxu3  ;;  %6349 = vtanh.f32 %v5158_v1 }
 0x69a   :  { %v4650_v8 = vpop.f32.mrf.mxu2  ;;  %5568 = vst [vmem:[%s12607_s11 + $0x78] sm:$0xff] %v5440_v36 }
 0x69b   :  { %v4651_v57 = vadd.f32 %v4650_v8, %v11596_v16  ;;  %v5159_v60 = vpop.f32.mrf.mxu1 }
 0x69c   :  { %v4990_v12 = vpop.f32.mrf.mxu0 }
 0x69d   :  { %v6348_v17 = vpop.eup %6347  ;;  %v4820_v20 = vadd.f32 %v4819_v24, %v4651_v57  ;;  %v4991_v42 = vadd.f32 %v4990_v12, %v11587_v34 }
 0x69e   :  { %v5439_v52 = vmul.f32 %v6615_v43, %v6348_v17 }
 0x69f   :  { %6351 = vtanh.f32 %v4820_v20  ;;  %v6350_v50 = vpop.eup %6349  ;;  %v5160_v7 = vadd.f32 %v5159_v60, %v4991_v42  ;;  %v6620_v60 = vld [vmem:[%s12607_s11 + $0xa8] sm:$0xff] }
 0x6a0   :  { %5567 = vst [vmem:[%s12607_s11 + $0x70] sm:$0xff] %v5439_v52  ;;  %v5442_v49 = vmul.f32 %v6616_v28, %v6350_v50  ;;  %v6621_v50 = vld [vmem:[%s12607_s11 + $0xa0] sm:$0xff] }
 0x6a1   :  { %v4821_v2 = vpop.f32.mrf.mxu3  ;;  %6353 = vtanh.f32 %v5160_v7  ;;  %v13170_v28 = vld [vmem:[#allocation30_spill] sm:$0xff] }
 0x6a2   :  { %v4652_v33 = vpop.f32.mrf.mxu2  ;;  %5570 = vst [vmem:[%s12607_s11 + $0x88] sm:$0xff] %v5442_v49 }
 0x6a3   :  { %v4653_v37 = vadd.f32 %v4652_v33, %v11596_v16  ;;  %v5162_v63 = vpop.f32.mrf.mxu1  ;;  %v13171_v33 = vld [vmem:[#allocation59_spill] sm:$0xff] }
 0x6a4   :  { %v4993_v40 = vpop.f32.mrf.mxu0 }
 0x6a5   :  { %v6352_v32 = vpop.eup %6351  ;;  %v4822_v0 = vadd.f32 %v4821_v2, %v4653_v37  ;;  %v4994_v39 = vadd.f32 %v4993_v40, %v11587_v34 }
 0x6a6   :  { %v5441_v44 = vmul.f32 %v6617_v10, %v6352_v32  ;;  %4863 = vmatmul.bf16.gmra.mxu3 %v11226_v29  ;;  %5201 = vmatmul.bf16.gmra.mxu1 %v11226_v29 }
 0x6a7   :  { %6355 = vtanh.f32 %v4822_v0  ;;  %4694 = vmatmul.bf16.gmra.mxu2 %v13169_v19  ;;  %5032 = vmatmul.bf16.gmra.mxu0 %v13169_v19  ;;  %v6354_v56 = vpop.eup %6353  ;;  %v5163_v22 = vadd.f32 %v5162_v63, %v4994_v39  ;;  %v6622_v0 = vld [vmem:[%s12607_s11 + $0xb8] sm:$0xff] }
 0x6a8   :  { %5569 = vst [vmem:[%s12607_s11 + $0x80] sm:$0xff] %v5441_v44  ;;  %v5444_v62 = vmul.f32 %v6618_v21, %v6354_v56 }
 0x6a9   :  { %v4824_v53 = vpop.f32.mrf.mxu3  ;;  %6357 = vtanh.f32 %v5163_v22  ;;  %v6623_v22 = vld [vmem:[%s12607_s11 + $0xb0] sm:$0xff] }
 0x6aa   :  { %v4655_v29 = vpop.f32.mrf.mxu2  ;;  %5572 = vst [vmem:[%s12607_s11 + $0x98] sm:$0xff] %v5444_v62 }
 0x6ab   :  { %v4656_v14 = vadd.f32 %v4655_v29, %v11596_v16  ;;  %v5164_v41 = vpop.f32.mrf.mxu1 }
 0x6ac   :  { %v4995_v24 = vpop.f32.mrf.mxu0 }
 0x6ad   :  { %v6356_v51 = vpop.eup %6355  ;;  %v4825_v31 = vadd.f32 %v4824_v53, %v4656_v14  ;;  %v4996_v46 = vadd.f32 %v4995_v24, %v11587_v34 }
 0x6ae   :  { %v5443_v1 = vmul.f32 %v6619_v23, %v6356_v51  ;;  %v6624_v51 = vld [vmem:[%s12607_s11 + $0xc8] sm:$0xff] }
 0x6af   :  { %6359 = vtanh.f32 %v4825_v31  ;;  %v6358_v36 = vpop.eup %6357  ;;  %v5165_v8 = vadd.f32 %v5164_v41, %v4996_v46 }
 0x6b0   :  { %5571 = vst [vmem:[%s12607_s11 + $0x90] sm:$0xff] %v5443_v1  ;;  %v5446_v17 = vmul.f32 %v6620_v60, %v6358_v36 }
 0x6b1   :  { %v4826_v57 = vpop.f32.mrf.mxu3  ;;  %6361 = vtanh.f32 %v5165_v8  ;;  %v6625_v8 = vld [vmem:[%s12607_s11 + $0xc0] sm:$0xff] }
 0x6b2   :  { %v4657_v20 = vpop.f32.mrf.mxu2  ;;  %5574 = vst [vmem:[%s12607_s11 + $0xa8] sm:$0xff] %v5446_v17  ;;  %v13172_v17 = vld [vmem:[#allocation54_spill] sm:$0xff] }
 0x6b3   :  { %v4658_v43 = vadd.f32 %v4657_v20, %v11596_v16  ;;  %v5167_v52 = vpop.f32.mrf.mxu1 }
 0x6b4   :  { %v4998_v2 = vpop.f32.mrf.mxu0 }
 0x6b5   :  { %v6360_v12 = vpop.eup %6359  ;;  %v4827_v42 = vadd.f32 %v4826_v57, %v4658_v43  ;;  %v4999_v49 = vadd.f32 %v4998_v2, %v11587_v34  ;;  %v13173_v43 = vld [vmem:[#allocation60_spill] sm:$0xff] }
 0x6b6   :  { %v5445_v7 = vmul.f32 %v6621_v50, %v6360_v12  ;;  %4868 = vmatmul.bf16.gmra.mxu3 %v13170_v28  ;;  %5206 = vmatmul.bf16.gmra.mxu1 %v13170_v28  ;;  %v6626_v50 = vld [vmem:[%s12607_s11 + $0xd8] sm:$0xff] }
 0x6b7   :  { %6363 = vtanh.f32 %v4827_v42  ;;  %4699 = vmatmul.bf16.gmra.mxu2 %v13171_v33  ;;  %5037 = vmatmul.bf16.gmra.mxu0 %v13171_v33  ;;  %v6362_v37 = vpop.eup %6361  ;;  %v5168_v63 = vadd.f32 %v5167_v52, %v4999_v49 }
 0x6b8   :  { %5573 = vst [vmem:[%s12607_s11 + $0xa0] sm:$0xff] %v5445_v7  ;;  %v5448_v10 = vmul.f32 %v6622_v0, %v6362_v37 }
 0x6b9   :  { %v4829_v32 = vpop.f32.mrf.mxu3  ;;  %6365 = vtanh.f32 %v5168_v63  ;;  %v6627_v63 = vld [vmem:[%s12607_s11 + $0xd0] sm:$0xff] }
 0x6ba   :  { %v4660_v44 = vpop.f32.mrf.mxu2  ;;  %5576 = vst [vmem:[%s12607_s11 + $0xb8] sm:$0xff] %v5448_v10 }
 0x6bb   :  { %v4661_v40 = vadd.f32 %v4660_v44, %v11596_v16  ;;  %v5169_v39 = vpop.f32.mrf.mxu1 }
 0x6bc   :  { %v5000_v21 = vpop.f32.mrf.mxu0 }
 0x6bd   :  { %v6364_v19 = vpop.eup %6363  ;;  %v4830_v56 = vadd.f32 %v4829_v32, %v4661_v40  ;;  %v5001_v62 = vadd.f32 %v5000_v21, %v11587_v34 }
 0x6be   :  { %v5447_v53 = vmul.f32 %v6623_v22, %v6364_v19  ;;  %v6628_v19 = vld [vmem:[%s12607_s11 + $0xe8] sm:$0xff] }
 0x6bf   :  { %6367 = vtanh.f32 %v4830_v56  ;;  %v6366_v29 = vpop.eup %6365  ;;  %v5170_v14 = vadd.f32 %v5169_v39, %v5001_v62 }
 0x6c0   :  { %5575 = vst [vmem:[%s12607_s11 + $0xb0] sm:$0xff] %v5447_v53  ;;  %v5450_v31 = vmul.f32 %v6624_v51, %v6366_v29 }
 0x6c1   :  { %v4831_v41 = vpop.f32.mrf.mxu3  ;;  %6369 = vtanh.f32 %v5170_v14  ;;  %v6629_v14 = vld [vmem:[%s12607_s11 + $0xe0] sm:$0xff] }
 0x6c2   :  { %v4662_v23 = vpop.f32.mrf.mxu2  ;;  %5578 = vst [vmem:[%s12607_s11 + $0xc8] sm:$0xff] %v5450_v31  ;;  %v13174_v31 = vld [vmem:[#allocation99_spill] sm:$0xff] }
 0x6c3   :  { %v4663_v1 = vadd.f32 %v4662_v23, %v11596_v16  ;;  %v5172_v24 = vpop.f32.mrf.mxu1 }
 0x6c4   :  { %v5003_v60 = vpop.f32.mrf.mxu0 }
 0x6c5   :  { %v6368_v46 = vpop.eup %6367  ;;  %v4832_v36 = vadd.f32 %v4831_v41, %v4663_v1  ;;  %v5004_v20 = vadd.f32 %v5003_v60, %v11587_v34  ;;  %v13175_v1 = vld [vmem:[#allocation50_spill] sm:$0xff] }
 0x6c6   :  { %v5449_v57 = vmul.f32 %v6625_v8, %v6368_v46  ;;  %4873 = vmatmul.bf16.gmra.mxu3 %v13172_v17  ;;  %5211 = vmatmul.bf16.gmra.mxu1 %v13172_v17  ;;  %v6630_v8 = vld [vmem:[%s12607_s11 + $0xf8] sm:$0xff] }
 0x6c7   :  { %6371 = vtanh.f32 %v4832_v36  ;;  %4704 = vmatmul.bf16.gmra.mxu2 %v13173_v43  ;;  %5042 = vmatmul.bf16.gmra.mxu0 %v13173_v43  ;;  %v6370_v52 = vpop.eup %6369  ;;  %v5173_v12 = vadd.f32 %v5172_v24, %v5004_v20 }
 0x6c8   :  { %5577 = vst [vmem:[%s12607_s11 + $0xc0] sm:$0xff] %v5449_v57  ;;  %v5452_v7 = vmul.f32 %v6626_v50, %v6370_v52 }
 0x6c9   :  { %v4834_v42 = vpop.f32.mrf.mxu3  ;;  %6373 = vtanh.f32 %v5173_v12  ;;  %v6631_v12 = vld [vmem:[%s12607_s11 + $0xf0] sm:$0xff] }
 0x6ca   :  { %v4665_v2 = vpop.f32.mrf.mxu2  ;;  %5580 = vst [vmem:[%s12607_s11 + $0xd8] sm:$0xff] %v5452_v7 }
 0x6cb   :  { %v4666_v28 = vadd.f32 %v4665_v2, %v11596_v16  ;;  %v5174_v49 = vpop.f32.mrf.mxu1 }
 0x6cc   :  { %v5005_v0 = vpop.f32.mrf.mxu0 }
 0x6cd   :  { %v6372_v33 = vpop.eup %6371  ;;  %v4835_v37 = vadd.f32 %v4834_v42, %v4666_v28  ;;  %v5006_v10 = vadd.f32 %v5005_v0, %v11587_v34 }
 0x6ce   :  { %v5451_v32 = vmul.f32 %v6627_v63, %v6372_v33  ;;  %v6632_v33 = vld [vmem:[%s12607_s11 + $0x108] sm:$0xff] }
 0x6cf   :  { %6375 = vtanh.f32 %v4835_v37  ;;  %v6374_v44 = vpop.eup %6373  ;;  %v5175_v40 = vadd.f32 %v5174_v49, %v5006_v10 }
 0x6d0   :  { %5579 = vst [vmem:[%s12607_s11 + $0xd0] sm:$0xff] %v5451_v32  ;;  %v5454_v56 = vmul.f32 %v6628_v19, %v6374_v44 }
 0x6d1   :  { %v4836_v39 = vpop.f32.mrf.mxu3  ;;  %6377 = vtanh.f32 %v5175_v40  ;;  %v6633_v40 = vld [vmem:[%s12607_s11 + $0x100] sm:$0xff] }
 0x6d2   :  { %v4667_v22 = vpop.f32.mrf.mxu2  ;;  %5582 = vst [vmem:[%s12607_s11 + $0xe8] sm:$0xff] %v5454_v56  ;;  %v13176_v56 = vld [vmem:[#allocation27_spill] sm:$0xff] }
 0x6d3   :  { %v4668_v53 = vadd.f32 %v4667_v22, %v11596_v16  ;;  %v5177_v21 = vpop.f32.mrf.mxu1 }
 0x6d4   :  { %v5008_v51 = vpop.f32.mrf.mxu0 }
 0x6d5   :  { %v6376_v62 = vpop.eup %6375  ;;  %v4837_v29 = vadd.f32 %v4836_v39, %v4668_v53  ;;  %v5009_v23 = vadd.f32 %v5008_v51, %v11587_v34  ;;  %v13177_v53 = vld [vmem:[#allocation24_spill] sm:$0xff] }
 0x6d6   :  { %v5453_v41 = vmul.f32 %v6629_v14, %v6376_v62  ;;  %4878 = vmatmul.bf16.gmra.mxu3 %v13174_v31  ;;  %5216 = vmatmul.bf16.gmra.mxu1 %v13174_v31  ;;  %v6634_v14 = vld [vmem:[%s12607_s11 + $0x118] sm:$0xff] }
 0x6d7   :  { %6379 = vtanh.f32 %v4837_v29  ;;  %4709 = vmatmul.bf16.gmra.mxu2 %v13175_v1  ;;  %5047 = vmatmul.bf16.gmra.mxu0 %v13175_v1  ;;  %v6378_v24 = vpop.eup %6377  ;;  %v5178_v46 = vadd.f32 %v5177_v21, %v5009_v23 }
 0x6d8   :  { %5581 = vst [vmem:[%s12607_s11 + $0xe0] sm:$0xff] %v5453_v41  ;;  %v5456_v57 = vmul.f32 %v6630_v8, %v6378_v24 }
 0x6d9   :  { %v4839_v36 = vpop.f32.mrf.mxu3  ;;  %6381 = vtanh.f32 %v5178_v46  ;;  %v6635_v46 = vld [vmem:[%s12607_s11 + $0x110] sm:$0xff] }
 0x6da   :  { %v4670_v60 = vpop.f32.mrf.mxu2  ;;  %5584 = vst [vmem:[%s12607_s11 + $0xf8] sm:$0xff] %v5456_v57 }
 0x6db   :  { %v4671_v17 = vadd.f32 %v4670_v60, %v11596_v16  ;;  %v5179_v20 = vpop.f32.mrf.mxu1 }
 0x6dc   :  { %v5010_v50 = vpop.f32.mrf.mxu0 }
 0x6dd   :  { %v6380_v43 = vpop.eup %6379  ;;  %v4840_v52 = vadd.f32 %v4839_v36, %v4671_v17  ;;  %v5011_v7 = vadd.f32 %v5010_v50, %v11587_v34 }
 0x6de   :  { %v5455_v42 = vmul.f32 %v6631_v12, %v6380_v43  ;;  %v6636_v43 = vld [vmem:[%s12607_s11 + $0x128] sm:$0xff] }
 0x6df   :  { %6383 = vtanh.f32 %v4840_v52  ;;  %v6382_v2 = vpop.eup %6381  ;;  %v5180_v28 = vadd.f32 %v5179_v20, %v5011_v7 }
 0x6e0   :  { %5583 = vst [vmem:[%s12607_s11 + $0xf0] sm:$0xff] %v5455_v42  ;;  %v5458_v37 = vmul.f32 %v6632_v33, %v6382_v2 }
 0x6e1   :  { %v4841_v49 = vpop.f32.mrf.mxu3  ;;  %6385 = vtanh.f32 %v5180_v28  ;;  %v6637_v28 = vld [vmem:[%s12607_s11 + $0x120] sm:$0xff] }
 0x6e2   :  { %v4672_v63 = vpop.f32.mrf.mxu2  ;;  %5586 = vst [vmem:[%s12607_s11 + $0x108] sm:$0xff] %v5458_v37 }
 0x6e3   :  { %v4673_v32 = vadd.f32 %v4672_v63, %v11596_v16  ;;  %v5182_v0 = vpop.f32.mrf.mxu1 }
 0x6e4   :  { %v5013_v19 = vpop.f32.mrf.mxu0 }
 0x6e5   :  { %v6384_v10 = vpop.eup %6383  ;;  %v4842_v44 = vadd.f32 %v4841_v49, %v4673_v32  ;;  %v5014_v22 = vadd.f32 %v5013_v19, %v11587_v34 }
 0x6e6   :  { %v5457_v39 = vmul.f32 %v6633_v40, %v6384_v10  ;;  %4883 = vmatmul.bf16.gmra.mxu3 %v13176_v56  ;;  %5221 = vmatmul.bf16.gmra.mxu1 %v13176_v56  ;;  %v6638_v10 = vld [vmem:[%s12607_s11 + $0x138] sm:$0xff]  ;;  %v6639_v56 = vld [vmem:[%s12607_s11 + $0x130] sm:$0xff] }
 0x6e7   :  { %6387 = vtanh.f32 %v4842_v44  ;;  %4714 = vmatmul.bf16.gmra.mxu2 %v13177_v53  ;;  %5052 = vmatmul.bf16.gmra.mxu0 %v13177_v53  ;;  %v6386_v21 = vpop.eup %6385  ;;  %v5183_v62 = vadd.f32 %v5182_v0, %v5014_v22 }
 0x6e8   :  { %5585 = vst [vmem:[%s12607_s11 + $0x100] sm:$0xff] %v5457_v39  ;;  %v5460_v41 = vmul.f32 %v6634_v14, %v6386_v21 }
 0x6e9   :  { %v4844_v29 = vpop.f32.mrf.mxu3  ;;  %6389 = vtanh.f32 %v5183_v62 }
 0x6ea   :  { %v4675_v51 = vpop.f32.mrf.mxu2  ;;  %5588 = vst [vmem:[%s12607_s11 + $0x118] sm:$0xff] %v5460_v41  ;;  %v6640_v41 = vld [vmem:[%s12607_s11 + $0x148] sm:$0xff] }
 0x6eb   :  { %v4676_v31 = vadd.f32 %v4675_v51, %v11596_v16  ;;  %v5184_v23 = vpop.f32.mrf.mxu1 }
 0x6ec   :  { %v5015_v8 = vpop.f32.mrf.mxu0 }
 0x6ed   :  { %v6388_v1 = vpop.eup %6387  ;;  %v4845_v24 = vadd.f32 %v4844_v29, %v4676_v31  ;;  %v5016_v57 = vadd.f32 %v5015_v8, %v11587_v34 }
 0x6ee   :  { %v5459_v36 = vmul.f32 %v6635_v46, %v6388_v1 }
 0x6ef   :  { %6391 = vtanh.f32 %v4845_v24  ;;  %v6390_v60 = vpop.eup %6389  ;;  %v5185_v17 = vadd.f32 %v5184_v23, %v5016_v57 }
 0x6f0   :  { %5587 = vst [vmem:[%s12607_s11 + $0x110] sm:$0xff] %v5459_v36  ;;  %v5462_v52 = vmul.f32 %v6636_v43, %v6390_v60  ;;  %v6641_v36 = vld [vmem:[%s12607_s11 + $0x140] sm:$0xff] }
 0x6f1   :  { %v4846_v20 = vpop.f32.mrf.mxu3  ;;  %6393 = vtanh.f32 %v5185_v17  ;;  %v13178_v60 = vld [vmem:[#allocation46_spill] sm:$0xff] }
 0x6f2   :  { %v4677_v12 = vpop.f32.mrf.mxu2  ;;  %5590 = vst [vmem:[%s12607_s11 + $0x128] sm:$0xff] %v5462_v52 }
 0x6f3   :  { %v4678_v42 = vadd.f32 %v4677_v12, %v11596_v16  ;;  %v5187_v50 = vpop.f32.mrf.mxu1 }
 0x6f4   :  { %v5018_v33 = vpop.f32.mrf.mxu0 }
 0x6f5   :  { %v6392_v7 = vpop.eup %6391  ;;  %v4847_v2 = vadd.f32 %v4846_v20, %v4678_v42  ;;  %v5019_v37 = vadd.f32 %v5018_v33, %v11587_v34  ;;  %v13179_v20 = vld [vmem:[#allocation25_spill] sm:$0xff] }
 0x6f6   :  { %v5461_v49 = vmul.f32 %v6637_v28, %v6392_v7  ;;  %4888 = vmatmul.bf16.gmra.mxu3 %v11367_v26  ;;  %5226 = vmatmul.bf16.gmra.mxu1 %v11367_v26  ;;  %v6642_v42 = vld [vmem:[%s12607_s11 + $0x158] sm:$0xff] }
 0x6f7   :  { %6395 = vtanh.f32 %v4847_v2  ;;  %4719 = vmatmul.bf16.gmra.mxu2 %v11375_v6  ;;  %5057 = vmatmul.bf16.gmra.mxu0 %v11375_v6  ;;  %v6394_v63 = vpop.eup %6393  ;;  %v5188_v32 = vadd.f32 %v5187_v50, %v5019_v37  ;;  %v6643_v37 = vld [vmem:[%s12607_s11 + $0x150] sm:$0xff] }
 0x6f8   :  { %5589 = vst [vmem:[%s12607_s11 + $0x120] sm:$0xff] %v5461_v49  ;;  %v5464_v44 = vmul.f32 %v6638_v10, %v6394_v63 }
 0x6f9   :  { %v4849_v0 = vpop.f32.mrf.mxu3  ;;  %6397 = vtanh.f32 %v5188_v32 }
 0x6fa   :  { %v4680_v26 = vpop.f32.mrf.mxu2  ;;  %5592 = vst [vmem:[%s12607_s11 + $0x138] sm:$0xff] %v5464_v44 }
 0x6fb   :  { %v4681_v40 = vadd.f32 %v4680_v26, %v11596_v16  ;;  %v5189_v39 = vpop.f32.mrf.mxu1 }
 0x6fc   :  { %v5020_v53 = vpop.f32.mrf.mxu0 }
 0x6fd   :  { %v6396_v6 = vpop.eup %6395  ;;  %v4850_v19 = vadd.f32 %v4849_v0, %v4681_v40  ;;  %v5021_v21 = vadd.f32 %v5020_v53, %v11587_v34  ;;  %v6644_v40 = vld [vmem:[%s12607_s11 + $0x168] sm:$0xff] }
 0x6fe   :  { %v5463_v22 = vmul.f32 %v6639_v56, %v6396_v6 }
 0x6ff   :  { %6399 = vtanh.f32 %v4850_v19  ;;  %v6398_v62 = vpop.eup %6397  ;;  %v5190_v29 = vadd.f32 %v5189_v39, %v5021_v21  ;;  %v6645_v21 = vld [vmem:[%s12607_s11 + $0x160] sm:$0xff] }
 0x700   :  { %5591 = vst [vmem:[%s12607_s11 + $0x130] sm:$0xff] %v5463_v22  ;;  %v5466_v51 = vmul.f32 %v6640_v41, %v6398_v62 }
 0x701   :  { %v4851_v14 = vpop.f32.mrf.mxu3  ;;  %6401 = vtanh.f32 %v5190_v29 }
 0x702   :  { %v4682_v31 = vpop.f32.mrf.mxu2  ;;  %5594 = vst [vmem:[%s12607_s11 + $0x148] sm:$0xff] %v5466_v51  ;;  %v13181_v51 = vld [vmem:[#allocation75_spill] sm:$0xff] }
 0x703   :  { %v4683_v23 = vadd.f32 %v4682_v31, %v11596_v16  ;;  %v5192_v1 = vpop.f32.mrf.mxu1 }
 0x704   :  { %v5023_v57 = vpop.f32.mrf.mxu0 }
 0x705   :  { %v6400_v24 = vpop.eup %6399  ;;  %v4852_v46 = vadd.f32 %v4851_v14, %v4683_v23  ;;  %v5024_v17 = vadd.f32 %v5023_v57, %v11587_v34  ;;  %v13180_v14 = vld [vmem:[#allocation47_spill] sm:$0xff] }
 0x706   :  { %v5465_v8 = vmul.f32 %v6641_v36, %v6400_v24  ;;  %4893 = vmatmul.bf16.gmra.mxu3 %v13178_v60  ;;  %5231 = vmatmul.bf16.gmra.mxu1 %v13178_v60  ;;  %v6646_v24 = vld [vmem:[%s12607_s11 + $0x178] sm:$0xff] }
 0x707   :  { %6403 = vtanh.f32 %v4852_v46  ;;  %4724 = vmatmul.bf16.gmra.mxu2 %v13179_v20  ;;  %5062 = vmatmul.bf16.gmra.mxu0 %v13179_v20  ;;  %v6402_v43 = vpop.eup %6401  ;;  %v5193_v52 = vadd.f32 %v5192_v1, %v5024_v17  ;;  %v6647_v20 = vld [vmem:[%s12607_s11 + $0x170] sm:$0xff] }
 0x708   :  { %5593 = vst [vmem:[%s12607_s11 + $0x140] sm:$0xff] %v5465_v8  ;;  %v5468_v50 = vmul.f32 %v6642_v42, %v6402_v43 }
 0x709   :  { %v4854_v12 = vpop.f32.mrf.mxu3  ;;  %6405 = vtanh.f32 %v5193_v52 }
 0x70a   :  { %v4685_v7 = vpop.f32.mrf.mxu2  ;;  %5596 = vst [vmem:[%s12607_s11 + $0x158] sm:$0xff] %v5468_v50 }
 0x70b   :  { %v4686_v2 = vadd.f32 %v4685_v7, %v11596_v16  ;;  %v5194_v28 = vpop.f32.mrf.mxu1 }
 0x70c   :  { %v5025_v32 = vpop.f32.mrf.mxu0 }
 0x70d   :  { %v6404_v49 = vpop.eup %6403  ;;  %v4855_v33 = vadd.f32 %v4854_v12, %v4686_v2  ;;  %v5026_v0 = vadd.f32 %v5025_v32, %v11587_v34  ;;  %v6648_v2 = vld [vmem:[%s12607_s11 + $0x188] sm:$0xff] }
 0x70e   :  { %v5467_v63 = vmul.f32 %v6643_v37, %v6404_v49 }
 0x70f   :  { %6407 = vtanh.f32 %v4855_v33  ;;  %v6406_v10 = vpop.eup %6405  ;;  %v5195_v44 = vadd.f32 %v5194_v28, %v5026_v0  ;;  %v6649_v0 = vld [vmem:[%s12607_s11 + $0x180] sm:$0xff] }
 0x710   :  { %5595 = vst [vmem:[%s12607_s11 + $0x150] sm:$0xff] %v5467_v63  ;;  %v5470_v39 = vmul.f32 %v6644_v40, %v6406_v10 }
 0x711   :  { %v4856_v26 = vpop.f32.mrf.mxu3  ;;  %6409 = vtanh.f32 %v5195_v44 }
 0x712   :  { %v4687_v6 = vpop.f32.mrf.mxu2  ;;  %5598 = vst [vmem:[%s12607_s11 + $0x168] sm:$0xff] %v5470_v39 }
 0x713   :  { %v4688_v19 = vadd.f32 %v4687_v6, %v11596_v16  ;;  %v5197_v56 = vpop.f32.mrf.mxu1 }
 0x714   :  { %v5028_v29 = vpop.f32.mrf.mxu0 }
 0x715   :  { %v6408_v22 = vpop.eup %6407  ;;  %v4857_v53 = vadd.f32 %v4856_v26, %v4688_v19  ;;  %v5029_v41 = vadd.f32 %v5028_v29, %v11587_v34  ;;  %v13182_v26 = vld [vmem:[#allocation103_spill] sm:$0xff] }
 0x716   :  { %v5469_v62 = vmul.f32 %v6645_v21, %v6408_v22  ;;  %4898 = vmatmul.bf16.gmra.mxu3 %v13180_v14  ;;  %5236 = vmatmul.bf16.gmra.mxu1 %v13180_v14  ;;  %v6651_v14 = vld [vmem:[%s12607_s11 + $0x190] sm:$0xff] }
 0x717   :  { %6411 = vtanh.f32 %v4857_v53  ;;  %4729 = vmatmul.bf16.gmra.mxu2 %v13181_v51  ;;  %5067 = vmatmul.bf16.gmra.mxu0 %v13181_v51  ;;  %v6410_v31 = vpop.eup %6409  ;;  %v5198_v23 = vadd.f32 %v5197_v56, %v5029_v41  ;;  %v6650_v56 = vld [vmem:[%s12607_s11 + $0x198] sm:$0xff] }
 0x718   :  { %5597 = vst [vmem:[%s12607_s11 + $0x160] sm:$0xff] %v5469_v62  ;;  %v5472_v46 = vmul.f32 %v6646_v24, %v6410_v31 }
 0x719   :  { %v4859_v1 = vpop.f32.mrf.mxu3  ;;  %6413 = vtanh.f32 %v5198_v23 }
 0x71a   :  { %v4690_v36 = vpop.f32.mrf.mxu2  ;;  %5600 = vst [vmem:[%s12607_s11 + $0x178] sm:$0xff] %v5472_v46  ;;  %v6652_v46 = vld [vmem:[%s12607_s11 + $0x1a8] sm:$0xff] }
 0x71b   :  { %v4691_v8 = vadd.f32 %v4690_v36, %v11596_v16  ;;  %v5199_v57 = vpop.f32.mrf.mxu1 }
 0x71c   :  { %v5030_v52 = vpop.f32.mrf.mxu0 }
 0x71d   :  { %v6412_v60 = vpop.eup %6411  ;;  %v4860_v17 = vadd.f32 %v4859_v1, %v4691_v8  ;;  %v5031_v12 = vadd.f32 %v5030_v52, %v11587_v34 }
 0x71e   :  { %v5471_v43 = vmul.f32 %v6647_v20, %v6412_v60 }
 0x71f   :  { %6415 = vtanh.f32 %v4860_v17  ;;  %v6414_v42 = vpop.eup %6413  ;;  %v5200_v50 = vadd.f32 %v5199_v57, %v5031_v12 }
 0x720   :  { %5599 = vst [vmem:[%s12607_s11 + $0x170] sm:$0xff] %v5471_v43  ;;  %v5474_v28 = vmul.f32 %v6648_v2, %v6414_v42  ;;  %v6653_v43 = vld [vmem:[%s12607_s11 + $0x1a0] sm:$0xff] }
 0x721   :  { %v4861_v7 = vpop.f32.mrf.mxu3  ;;  %6417 = vtanh.f32 %v5200_v50 }
 0x722   :  { %v4692_v49 = vpop.f32.mrf.mxu2  ;;  %5602 = vst [vmem:[%s12607_s11 + $0x188] sm:$0xff] %v5474_v28  ;;  %v6654_v28 = vld [vmem:[%s12607_s11 + $0x1b8] sm:$0xff] }
 0x723   :  { %v4693_v33 = vadd.f32 %v4692_v49, %v11596_v16  ;;  %v5202_v37 = vpop.f32.mrf.mxu1 }
 0x724   :  { %v5033_v44 = vpop.f32.mrf.mxu0 }
 0x725   :  { %v6416_v63 = vpop.eup %6415  ;;  %v4862_v32 = vadd.f32 %v4861_v7, %v4693_v33  ;;  %v5034_v40 = vadd.f32 %v5033_v44, %v11587_v34 }
 0x726   :  { %v5473_v10 = vmul.f32 %v6649_v0, %v6416_v63  ;;  %4903 = vmatmul.bf16.gmra.mxu3 %v13182_v26  ;;  %5241 = vmatmul.bf16.gmra.mxu1 %v13182_v26 }
 0x727   :  { %6419 = vtanh.f32 %v4862_v32  ;;  %4734 = vmatmul.bf16.gmra.mxu2 %v11461_v9  ;;  %5072 = vmatmul.bf16.gmra.mxu0 %v11461_v9  ;;  %v6418_v39 = vpop.eup %6417  ;;  %v5203_v6 = vadd.f32 %v5202_v37, %v5034_v40  ;;  %v6655_v32 = vld [vmem:[%s12607_s11 + $0x1b0] sm:$0xff] }
 0x728   :  { %5601 = vst [vmem:[%s12607_s11 + $0x180] sm:$0xff] %v5473_v10  ;;  %v5476_v22 = vmul.f32 %v6650_v56, %v6418_v39 }
 0x729   :  { %v4864_v19 = vpop.f32.mrf.mxu3  ;;  %6421 = vtanh.f32 %v5203_v6  ;;  %v6656_v6 = vld [vmem:[%s12607_s11 + $0x1c8] sm:$0xff] }
 0x72a   :  { %v4695_v53 = vpop.f32.mrf.mxu2  ;;  %5604 = vst [vmem:[%s12607_s11 + $0x198] sm:$0xff] %v5476_v22 }
 0x72b   :  { %v4696_v21 = vadd.f32 %v4695_v53, %v11596_v16  ;;  %v5204_v62 = vpop.f32.mrf.mxu1 }
 0x72c   :  { %v5035_v51 = vpop.f32.mrf.mxu0 }
 0x72d   :  { %v6420_v9 = vpop.eup %6419  ;;  %v4865_v29 = vadd.f32 %v4864_v19, %v4696_v21  ;;  %v5036_v31 = vadd.f32 %v5035_v51, %v11587_v34 }
 0x72e   :  { %v5475_v41 = vmul.f32 %v6651_v14, %v6420_v9  ;;  %v6657_v9 = vld [vmem:[%s12607_s11 + $0x1c0] sm:$0xff] }
 0x72f   :  { %6423 = vtanh.f32 %v4865_v29  ;;  %v6422_v23 = vpop.eup %6421  ;;  %v5205_v1 = vadd.f32 %v5204_v62, %v5036_v31 }
 0x730   :  { %5603 = vst [vmem:[%s12607_s11 + $0x190] sm:$0xff] %v5475_v41  ;;  %v5478_v36 = vmul.f32 %v6652_v46, %v6422_v23 }
 0x731   :  { %v4866_v24 = vpop.f32.mrf.mxu3  ;;  %6425 = vtanh.f32 %v5205_v1  ;;  %v6658_v1 = vld [vmem:[%s12607_s11 + $0x1d8] sm:$0xff] }
 0x732   :  { %v4697_v8 = vpop.f32.mrf.mxu2  ;;  %5606 = vst [vmem:[%s12607_s11 + $0x1a8] sm:$0xff] %v5478_v36 }
 0x733   :  { %v4698_v57 = vadd.f32 %v4697_v8, %v11596_v16  ;;  %v5207_v60 = vpop.f32.mrf.mxu1 }
 0x734   :  { %v5038_v12 = vpop.f32.mrf.mxu0 }
 0x735   :  { %v6424_v17 = vpop.eup %6423  ;;  %v4867_v20 = vadd.f32 %v4866_v24, %v4698_v57  ;;  %v5039_v42 = vadd.f32 %v5038_v12, %v11587_v34  ;;  %v6659_v57 = vld [vmem:[%s12607_s11 + $0x1d0] sm:$0xff] }
 0x736   :  { %v5477_v52 = vmul.f32 %v6653_v43, %v6424_v17  ;;  %4908 = vmatmul.bf16.gmra.mxu3 %v11472_v3  ;;  %5246 = vmatmul.bf16.gmra.mxu1 %v11472_v3 }
 0x737   :  { %6427 = vtanh.f32 %v4867_v20  ;;  %4739 = vmatmul.bf16.gmra.mxu2 %v11484_v45  ;;  %5077 = vmatmul.bf16.gmra.mxu0 %v11484_v45  ;;  %v6426_v50 = vpop.eup %6425  ;;  %v5208_v7 = vadd.f32 %v5207_v60, %v5039_v42  ;;  %v6660_v42 = vld [vmem:[%s12607_s11 + $0x1e8] sm:$0xff] }
 0x738   :  { %5605 = vst [vmem:[%s12607_s11 + $0x1a0] sm:$0xff] %v5477_v52  ;;  %v5480_v49 = vmul.f32 %v6654_v28, %v6426_v50 }
 0x739   :  { %v4869_v2 = vpop.f32.mrf.mxu3  ;;  %6429 = vtanh.f32 %v5208_v7 }
 0x73a   :  { %v4700_v3 = vpop.f32.mrf.mxu2  ;;  %5608 = vst [vmem:[%s12607_s11 + $0x1b8] sm:$0xff] %v5480_v49 }
 0x73b   :  { %v4701_v33 = vadd.f32 %v4700_v3, %v11596_v16  ;;  %v5209_v37 = vpop.f32.mrf.mxu1 }
 0x73c   :  { %v5040_v10 = vpop.f32.mrf.mxu0 }
 0x73d   :  { %v6428_v45 = vpop.eup %6427  ;;  %v4870_v63 = vadd.f32 %v4869_v2, %v4701_v33  ;;  %v5041_v44 = vadd.f32 %v5040_v10, %v11587_v34  ;;  %v6661_v33 = vld [vmem:[%s12607_s11 + $0x1e0] sm:$0xff] }
 0x73e   :  { %v5479_v0 = vmul.f32 %v6655_v32, %v6428_v45 }
 0x73f   :  { %6431 = vtanh.f32 %v4870_v63  ;;  %v6430_v26 = vpop.eup %6429  ;;  %v5210_v40 = vadd.f32 %v5209_v37, %v5041_v44  ;;  %v6662_v44 = vld [vmem:[%s12607_s11 + $0x1f8] sm:$0xff] }
 0x740   :  { %5607 = vst [vmem:[%s12607_s11 + $0x1b0] sm:$0xff] %v5479_v0  ;;  %v5482_v19 = vmul.f32 %v6656_v6, %v6430_v26 }
 0x741   :  { %v4871_v39 = vpop.f32.mrf.mxu3  ;;  %6433 = vtanh.f32 %v5210_v40 }
 0x742   :  { %v4702_v56 = vpop.f32.mrf.mxu2  ;;  %5610 = vst [vmem:[%s12607_s11 + $0x1c8] sm:$0xff] %v5482_v19  ;;  %v6663_v19 = vld [vmem:[%s12607_s11 + $0x1f0] sm:$0xff] }
 0x743   :  { %v4703_v22 = vadd.f32 %v4702_v56, %v11596_v16  ;;  %v5212_v53 = vpop.f32.mrf.mxu1 }
 0x744   :  { %v5043_v14 = vpop.f32.mrf.mxu0 }
 0x745   :  { %v6432_v21 = vpop.eup %6431  ;;  %v4872_v62 = vadd.f32 %v4871_v39, %v4703_v22  ;;  %v5044_v41 = vadd.f32 %v5043_v14, %v11587_v34 }
 0x746   :  { %v5481_v29 = vmul.f32 %v6657_v9, %v6432_v21  ;;  %4913 = vmatmul.bf16.gmra.mxu3 %v11495_v27  ;;  %5251 = vmatmul.bf16.gmra.mxu1 %v11495_v27 }
 0x747   :  { %6435 = vtanh.f32 %v4872_v62  ;;  %4744 = vmatmul.bf16.gmra.mxu2 %v11506_v59  ;;  %5082 = vmatmul.bf16.gmra.mxu0 %v11506_v59  ;;  %v6434_v51 = vpop.eup %6433  ;;  %v5213_v31 = vadd.f32 %v5212_v53, %v5044_v41 }
 0x748   :  { %5609 = vst [vmem:[%s12607_s11 + $0x1c0] sm:$0xff] %v5481_v29  ;;  %v5484_v24 = vmul.f32 %v6658_v1, %v6434_v51  ;;  %v6664_v29 = vld [vmem:[%s12607_s11 + $0x208] sm:$0xff] }
 0x749   :  { %v4874_v23 = vpop.f32.mrf.mxu3  ;;  %6437 = vtanh.f32 %v5213_v31 }
 0x74a   :  { %v4705_v27 = vpop.f32.mrf.mxu2  ;;  %5612 = vst [vmem:[%s12607_s11 + $0x1d8] sm:$0xff] %v5484_v24  ;;  %v6665_v24 = vld [vmem:[%s12607_s11 + $0x200] sm:$0xff] }
 0x74b   :  { %v4706_v46 = vadd.f32 %v4705_v27, %v11596_v16  ;;  %v5214_v36 = vpop.f32.mrf.mxu1 }
 0x74c   :  { %v5045_v17 = vpop.f32.mrf.mxu0 }
 0x74d   :  { %v6436_v59 = vpop.eup %6435  ;;  %v4875_v8 = vadd.f32 %v4874_v23, %v4706_v46  ;;  %v5046_v20 = vadd.f32 %v5045_v17, %v11587_v34 }
 0x74e   :  { %v5483_v60 = vmul.f32 %v6659_v57, %v6436_v59 }
 0x74f   :  { %6439 = vtanh.f32 %v4875_v8  ;;  %v6438_v43 = vpop.eup %6437  ;;  %v5215_v52 = vadd.f32 %v5214_v36, %v5046_v20 }
 0x750   :  { %5611 = vst [vmem:[%s12607_s11 + $0x1d0] sm:$0xff] %v5483_v60  ;;  %v5486_v50 = vmul.f32 %v6660_v42, %v6438_v43  ;;  %v6666_v60 = vld [vmem:[%s12607_s11 + $0x218] sm:$0xff] }
 0x751   :  { %v4876_v12 = vpop.f32.mrf.mxu3  ;;  %6441 = vtanh.f32 %v5215_v52 }
 0x752   :  { %v4707_v7 = vpop.f32.mrf.mxu2  ;;  %5614 = vst [vmem:[%s12607_s11 + $0x1e8] sm:$0xff] %v5486_v50 }
 0x753   :  { %v4708_v2 = vadd.f32 %v4707_v7, %v11596_v16  ;;  %v5217_v28 = vpop.f32.mrf.mxu1 }
 0x754   :  { %v5048_v45 = vpop.f32.mrf.mxu0 }
 0x755   :  { %v6440_v49 = vpop.eup %6439  ;;  %v4877_v3 = vadd.f32 %v4876_v12, %v4708_v2  ;;  %v5049_v63 = vadd.f32 %v5048_v45, %v11587_v34  ;;  %v6667_v12 = vld [vmem:[%s12607_s11 + $0x210] sm:$0xff] }
 0x756   :  { %v5485_v37 = vmul.f32 %v6661_v33, %v6440_v49  ;;  %4918 = vmatmul.bf16.gmra.mxu3 %v11513_v54  ;;  %5256 = vmatmul.bf16.gmra.mxu1 %v11513_v54 }
 0x757   :  { %6443 = vtanh.f32 %v4877_v3  ;;  %4749 = vmatmul.bf16.gmra.mxu2 %v11518_v61  ;;  %5087 = vmatmul.bf16.gmra.mxu0 %v11518_v61  ;;  %v6442_v32 = vpop.eup %6441  ;;  %v5218_v0 = vadd.f32 %v5217_v28, %v5049_v63  ;;  %v6668_v3 = vld [vmem:[%s12607_s11 + $0x228] sm:$0xff] }
 0x758   :  { %5613 = vst [vmem:[%s12607_s11 + $0x1e0] sm:$0xff] %v5485_v37  ;;  %v5488_v26 = vmul.f32 %v6662_v44, %v6442_v32 }
 0x759   :  { %v4879_v10 = vpop.f32.mrf.mxu3  ;;  %6445 = vtanh.f32 %v5218_v0 }
 0x75a   :  { %v4710_v54 = vpop.f32.mrf.mxu2  ;;  %5616 = vst [vmem:[%s12607_s11 + $0x1f8] sm:$0xff] %v5488_v26 }
 0x75b   :  { %v4711_v40 = vadd.f32 %v4710_v54, %v11596_v16  ;;  %v5219_v39 = vpop.f32.mrf.mxu1 }
 0x75c   :  { %v5050_v22 = vpop.f32.mrf.mxu0 }
 0x75d   :  { %v6444_v61 = vpop.eup %6443  ;;  %v4880_v6 = vadd.f32 %v4879_v10, %v4711_v40  ;;  %v5051_v53 = vadd.f32 %v5050_v22, %v11587_v34  ;;  %v6669_v10 = vld [vmem:[%s12607_s11 + $0x220] sm:$0xff] }
 0x75e   :  { %v5487_v56 = vmul.f32 %v6663_v19, %v6444_v61 }
 0x75f   :  { %6447 = vtanh.f32 %v4880_v6  ;;  %v6446_v21 = vpop.eup %6445  ;;  %v5220_v62 = vadd.f32 %v5219_v39, %v5051_v53  ;;  %v6670_v6 = vld [vmem:[%s12607_s11 + $0x238] sm:$0xff] }
 0x760   :  { %5615 = vst [vmem:[%s12607_s11 + $0x1f0] sm:$0xff] %v5487_v56  ;;  %v5490_v14 = vmul.f32 %v6664_v29, %v6446_v21  ;;  %v6671_v21 = vld [vmem:[%s12607_s11 + $0x230] sm:$0xff] }
 0x761   :  { %v4881_v9 = vpop.f32.mrf.mxu3  ;;  %6449 = vtanh.f32 %v5220_v62 }
 0x762   :  { %v4712_v41 = vpop.f32.mrf.mxu2  ;;  %5618 = vst [vmem:[%s12607_s11 + $0x208] sm:$0xff] %v5490_v14 }
 0x763   :  { %v4713_v51 = vadd.f32 %v4712_v41, %v11596_v16  ;;  %v5222_v31 = vpop.f32.mrf.mxu1 }
 0x764   :  { %v5053_v46 = vpop.f32.mrf.mxu0 }
 0x765   :  { %v6448_v23 = vpop.eup %6447  ;;  %v4882_v1 = vadd.f32 %v4881_v9, %v4713_v51  ;;  %v5054_v36 = vadd.f32 %v5053_v46, %v11587_v34 }
 0x766   :  { %v5489_v27 = vmul.f32 %v6665_v24, %v6448_v23  ;;  %4923 = vmatmul.bf16.gmra.mxu3 %v11527_v18  ;;  %5261 = vmatmul.bf16.gmra.mxu1 %v11527_v18 }
 0x767   :  { %6451 = vtanh.f32 %v4882_v1  ;;  %4754 = vmatmul.bf16.gmra.mxu2 %v11532_v15  ;;  %5092 = vmatmul.bf16.gmra.mxu0 %v11532_v15  ;;  %v6450_v59 = vpop.eup %6449  ;;  %v5223_v8 = vadd.f32 %v5222_v31, %v5054_v36  ;;  %v6672_v31 = vld [vmem:[%s12607_s11 + $0x248] sm:$0xff] }
 0x768   :  { %5617 = vst [vmem:[%s12607_s11 + $0x200] sm:$0xff] %v5489_v27  ;;  %v5492_v17 = vmul.f32 %v6666_v60, %v6450_v59  ;;  %v6673_v59 = vld [vmem:[%s12607_s11 + $0x240] sm:$0xff] }
 0x769   :  { %v4884_v57 = vpop.f32.mrf.mxu3  ;;  %6453 = vtanh.f32 %v5223_v8 }
 0x76a   :  { %v4715_v18 = vpop.f32.mrf.mxu2  ;;  %5620 = vst [vmem:[%s12607_s11 + $0x218] sm:$0xff] %v5492_v17 }
 0x76b   :  { %v4716_v20 = vadd.f32 %v4715_v18, %v11596_v16  ;;  %v5224_v43 = vpop.f32.mrf.mxu1 }
 0x76c   :  { %v5055_v50 = vpop.f32.mrf.mxu0 }
 0x76d   :  { %v6452_v15 = vpop.eup %6451  ;;  %v4885_v52 = vadd.f32 %v4884_v57, %v4716_v20  ;;  %v5056_v7 = vadd.f32 %v5055_v50, %v11587_v34  ;;  %v6675_v50 = vld [vmem:[%s12607_s11 + $0x250] sm:$0xff] }
 0x76e   :  { %v5491_v42 = vmul.f32 %v6667_v12, %v6452_v15 }
 0x76f   :  { %6455 = vtanh.f32 %v4885_v52  ;;  %v6454_v2 = vpop.eup %6453  ;;  %v5225_v28 = vadd.f32 %v5224_v43, %v5056_v7  ;;  %v6674_v43 = vld [vmem:[%s12607_s11 + $0x258] sm:$0xff] }
 0x770   :  { %5619 = vst [vmem:[%s12607_s11 + $0x210] sm:$0xff] %v5491_v42  ;;  %v5494_v33 = vmul.f32 %v6668_v3, %v6454_v2 }
 0x771   :  { %v4886_v49 = vpop.f32.mrf.mxu3  ;;  %6457 = vtanh.f32 %v5225_v28 }
 0x772   :  { %v4717_v37 = vpop.f32.mrf.mxu2  ;;  %5622 = vst [vmem:[%s12607_s11 + $0x228] sm:$0xff] %v5494_v33 }
 0x773   :  { %v4718_v45 = vadd.f32 %v4717_v37, %v11596_v16  ;;  %v5227_v63 = vpop.f32.mrf.mxu1  ;;  %v6676_v37 = vld [vmem:[%s12607_s11 + $0x268] sm:$0xff] }
 0x774   :  { %v5058_v26 = vpop.f32.mrf.mxu0 }
 0x775   :  { %v6456_v32 = vpop.eup %6455  ;;  %v4887_v0 = vadd.f32 %v4886_v49, %v4718_v45  ;;  %v5059_v54 = vadd.f32 %v5058_v26, %v11587_v34  ;;  %v6677_v26 = vld [vmem:[%s12607_s11 + $0x260] sm:$0xff] }
 0x776   :  { %v5493_v44 = vmul.f32 %v6669_v10, %v6456_v32  ;;  %4928 = vmatmul.bf16.gmra.mxu3 %v11540_v4  ;;  %5266 = vmatmul.bf16.gmra.mxu1 %v11540_v4 }
 0x777   :  { %6459 = vtanh.f32 %v4887_v0  ;;  %4759 = vmatmul.bf16.gmra.mxu2 %v11544_v35  ;;  %5097 = vmatmul.bf16.gmra.mxu0 %v11544_v35  ;;  %v6458_v40 = vpop.eup %6457  ;;  %v5228_v39 = vadd.f32 %v5227_v63, %v5059_v54 }
 0x778   :  { %5621 = vst [vmem:[%s12607_s11 + $0x220] sm:$0xff] %v5493_v44  ;;  %v5496_v19 = vmul.f32 %v6670_v6, %v6458_v40 }
 0x779   :  { %v4889_v61 = vpop.f32.mrf.mxu3  ;;  %6461 = vtanh.f32 %v5228_v39 }
 0x77a   :  { %v4720_v4 = vpop.f32.mrf.mxu2  ;;  %5624 = vst [vmem:[%s12607_s11 + $0x238] sm:$0xff] %v5496_v19 }
 0x77b   :  { %v4721_v56 = vadd.f32 %v4720_v4, %v11596_v16  ;;  %v5229_v22 = vpop.f32.mrf.mxu1  ;;  %v6678_v4 = vld [vmem:[%s12607_s11 + $0x278] sm:$0xff] }
 0x77c   :  { %v5060_v9 = vpop.f32.mrf.mxu0 }
 0x77d   :  { %v6460_v35 = vpop.eup %6459  ;;  %v4890_v53 = vadd.f32 %v4889_v61, %v4721_v56  ;;  %v5061_v29 = vadd.f32 %v5060_v9, %v11587_v34 }
 0x77e   :  { %v5495_v62 = vmul.f32 %v6671_v21, %v6460_v35  ;;  %v6679_v21 = vld [vmem:[%s12607_s11 + $0x270] sm:$0xff] }
 0x77f   :  { %6463 = vtanh.f32 %v4890_v53  ;;  %v6462_v14 = vpop.eup %6461  ;;  %v5230_v41 = vadd.f32 %v5229_v22, %v5061_v29 }
 0x780   :  { %5623 = vst [vmem:[%s12607_s11 + $0x230] sm:$0xff] %v5495_v62  ;;  %v5498_v23 = vmul.f32 %v6672_v31, %v6462_v14  ;;  %v6680_v31 = vld [vmem:[%s12607_s11 + $0x288] sm:$0xff] }
 0x781   :  { %v4891_v51 = vpop.f32.mrf.mxu3  ;;  %6465 = vtanh.f32 %v5230_v41 }
 0x782   :  { %v4722_v1 = vpop.f32.mrf.mxu2  ;;  %5626 = vst [vmem:[%s12607_s11 + $0x248] sm:$0xff] %v5498_v23 }
 0x783   :  { %v4723_v24 = vadd.f32 %v4722_v1, %v11596_v16  ;;  %v5232_v27 = vpop.f32.mrf.mxu1 }
 0x784   :  { %v5063_v57 = vpop.f32.mrf.mxu0 }
 0x785   :  { %v6464_v46 = vpop.eup %6463  ;;  %v4892_v36 = vadd.f32 %v4891_v51, %v4723_v24  ;;  %v5064_v60 = vadd.f32 %v5063_v57, %v11587_v34 }
 0x786   :  { %v5497_v8 = vmul.f32 %v6673_v59, %v6464_v46  ;;  %4933 = vmatmul.bf16.gmra.mxu3 %v11552_v11  ;;  %5271 = vmatmul.bf16.gmra.mxu1 %v11552_v11  ;;  %v6681_v59 = vld [vmem:[%s12607_s11 + $0x280] sm:$0xff] }
 0x787   :  { %6467 = vtanh.f32 %v4892_v36  ;;  %4764 = vmatmul.bf16.gmra.mxu2 %v11556_v48  ;;  %5102 = vmatmul.bf16.gmra.mxu0 %v11556_v48  ;;  %v6466_v17 = vpop.eup %6465  ;;  %v5233_v18 = vadd.f32 %v5232_v27, %v5064_v60 }
 0x788   :  { %5625 = vst [vmem:[%s12607_s11 + $0x240] sm:$0xff] %v5497_v8  ;;  %v5500_v15 = vmul.f32 %v6674_v43, %v6466_v17  ;;  %v6682_v43 = vld [vmem:[%s12607_s11 + $0x298] sm:$0xff] }
 0x789   :  { %v4894_v20 = vpop.f32.mrf.mxu3  ;;  %6469 = vtanh.f32 %v5233_v18 }
 0x78a   :  { %v4725_v11 = vpop.f32.mrf.mxu2  ;;  %5628 = vst [vmem:[%s12607_s11 + $0x258] sm:$0xff] %v5500_v15 }
 0x78b   :  { %v4726_v52 = vadd.f32 %v4725_v11, %v11596_v16  ;;  %v5234_v12 = vpop.f32.mrf.mxu1 }
 0x78c   :  { %v5065_v2 = vpop.f32.mrf.mxu0 }
 0x78d   :  { %v6468_v48 = vpop.eup %6467  ;;  %v4895_v42 = vadd.f32 %v4894_v20, %v4726_v52  ;;  %v5066_v28 = vadd.f32 %v5065_v2, %v11587_v34 }
 0x78e   :  { %v5499_v7 = vmul.f32 %v6675_v50, %v6468_v48  ;;  %v6683_v48 = vld [vmem:[%s12607_s11 + $0x290] sm:$0xff] }
 0x78f   :  { %6471 = vtanh.f32 %v4895_v42  ;;  %v6470_v49 = vpop.eup %6469  ;;  %v5235_v3 = vadd.f32 %v5234_v12, %v5066_v28 }
 0x790   :  { %5627 = vst [vmem:[%s12607_s11 + $0x250] sm:$0xff] %v5499_v7  ;;  %v5502_v45 = vmul.f32 %v6676_v37, %v6470_v49 }
 0x791   :  { %v4896_v33 = vpop.f32.mrf.mxu3  ;;  %6473 = vtanh.f32 %v5235_v3  ;;  %v6684_v3 = vld [vmem:[%s12607_s11 + $0x2a8] sm:$0xff] }
 0x792   :  { %v4727_v63 = vpop.f32.mrf.mxu2  ;;  %5630 = vst [vmem:[%s12607_s11 + $0x268] sm:$0xff] %v5502_v45 }
 0x793   :  { %v4728_v32 = vadd.f32 %v4727_v63, %v11596_v16  ;;  %v5237_v0 = vpop.f32.mrf.mxu1 }
 0x794   :  { %v5068_v40 = vpop.f32.mrf.mxu0 }
 0x795   :  { %v6472_v10 = vpop.eup %6471  ;;  %v4897_v44 = vadd.f32 %v4896_v33, %v4728_v32  ;;  %v5069_v39 = vadd.f32 %v5068_v40, %v11587_v34 }
 0x796   :  { %v5501_v54 = vmul.f32 %v6677_v26, %v6472_v10  ;;  %4938 = vmatmul.bf16.gmra.mxu3 %v11564_v13  ;;  %5276 = vmatmul.bf16.gmra.mxu1 %v11564_v13  ;;  %v6685_v10 = vld [vmem:[%s12607_s11 + $0x2a0] sm:$0xff] }
 0x797   :  { %6475 = vtanh.f32 %v4897_v44  ;;  %4769 = vmatmul.bf16.gmra.mxu2 %v11568_v47  ;;  %5107 = vmatmul.bf16.gmra.mxu0 %v11568_v47  ;;  %v6474_v61 = vpop.eup %6473  ;;  %v5238_v6 = vadd.f32 %v5237_v0, %v5069_v39 }
 0x798   :  { %5629 = vst [vmem:[%s12607_s11 + $0x260] sm:$0xff] %v5501_v54  ;;  %v5504_v56 = vmul.f32 %v6678_v4, %v6474_v61 }
 0x799   :  { %v4899_v19 = vpop.f32.mrf.mxu3  ;;  %6477 = vtanh.f32 %v5238_v6  ;;  %v6686_v6 = vld [vmem:[%s12607_s11 + $0x2b8] sm:$0xff] }
 0x79a   :  { %v4730_v13 = vpop.f32.mrf.mxu2  ;;  %5632 = vst [vmem:[%s12607_s11 + $0x278] sm:$0xff] %v5504_v56 }
 0x79b   :  { %v4731_v22 = vadd.f32 %v4730_v13, %v11596_v16  ;;  %v5239_v35 = vpop.f32.mrf.mxu1 }
 0x79c   :  { %v5070_v9 = vpop.f32.mrf.mxu0 }
 0x79d   :  { %v6476_v47 = vpop.eup %6475  ;;  %v4900_v53 = vadd.f32 %v4899_v19, %v4731_v22  ;;  %v5071_v29 = vadd.f32 %v5070_v9, %v11587_v34  ;;  %v6687_v22 = vld [vmem:[%s12607_s11 + $0x2b0] sm:$0xff] }
 0x79e   :  { %v5503_v62 = vmul.f32 %v6679_v21, %v6476_v47 }
 0x79f   :  { %6479 = vtanh.f32 %v4900_v53  ;;  %v6478_v14 = vpop.eup %6477  ;;  %v5240_v41 = vadd.f32 %v5239_v35, %v5071_v29  ;;  %v6688_v29 = vld [vmem:[%s12607_s11 + $0x2c8] sm:$0xff] }
 0x7a0   :  { %5631 = vst [vmem:[%s12607_s11 + $0x270] sm:$0xff] %v5503_v62  ;;  %v5506_v23 = vmul.f32 %v6680_v31, %v6478_v14 }
 0x7a1   :  { %v4901_v51 = vpop.f32.mrf.mxu3  ;;  %6481 = vtanh.f32 %v5240_v41 }
 0x7a2   :  { %v4732_v1 = vpop.f32.mrf.mxu2  ;;  %5634 = vst [vmem:[%s12607_s11 + $0x288] sm:$0xff] %v5506_v23 }
 0x7a3   :  { %v4733_v24 = vadd.f32 %v4732_v1, %v11596_v16  ;;  %v5242_v27 = vpop.f32.mrf.mxu1 }
 0x7a4   :  { %v5073_v57 = vpop.f32.mrf.mxu0 }
 0x7a5   :  { %v6480_v46 = vpop.eup %6479  ;;  %v4902_v36 = vadd.f32 %v4901_v51, %v4733_v24  ;;  %v5074_v60 = vadd.f32 %v5073_v57, %v11587_v34  ;;  %v6689_v24 = vld [vmem:[%s12607_s11 + $0x2c0] sm:$0xff] }
 0x7a6   :  { %v5505_v8 = vmul.f32 %v6681_v59, %v6480_v46  ;;  %4943 = vmatmul.bf16.gmra.mxu3 %v11578_v30  ;;  %5281 = vmatmul.bf16.gmra.mxu1 %v11578_v30 }
 0x7a7   :  { %6483 = vtanh.f32 %v4902_v36  ;;  %4774 = vmatmul.bf16.gmra.mxu2 %v11584_v58  ;;  %5112 = vmatmul.bf16.gmra.mxu0 %v11584_v58  ;;  %v6482_v17 = vpop.eup %6481  ;;  %v5243_v18 = vadd.f32 %v5242_v27, %v5074_v60  ;;  %v6690_v60 = vld [vmem:[%s12607_s11 + $0x2d8] sm:$0xff] }
 0x7a8   :  { %5633 = vst [vmem:[%s12607_s11 + $0x280] sm:$0xff] %v5505_v8  ;;  %v5508_v15 = vmul.f32 %v6682_v43, %v6482_v17 }
 0x7a9   :  { %v4904_v20 = vpop.f32.mrf.mxu3  ;;  %6485 = vtanh.f32 %v5243_v18 }
 0x7aa   :  { %v4735_v30 = vpop.f32.mrf.mxu2  ;;  %5636 = vst [vmem:[%s12607_s11 + $0x298] sm:$0xff] %v5508_v15  ;;  %v6691_v15 = vld [vmem:[%s12607_s11 + $0x2d0] sm:$0xff] }
 0x7ab   :  { %v4736_v11 = vadd.f32 %v4735_v30, %v11596_v16  ;;  %v5244_v52 = vpop.f32.mrf.mxu1 }
 0x7ac   :  { %v5075_v50 = vpop.f32.mrf.mxu0 }
 0x7ad   :  { %v6484_v58 = vpop.eup %6483  ;;  %v4905_v12 = vadd.f32 %v4904_v20, %v4736_v11  ;;  %v5076_v7 = vadd.f32 %v5075_v50, %v11587_v34 }
 0x7ae   :  { %v5507_v42 = vmul.f32 %v6683_v48, %v6484_v58 }
 0x7af   :  { %6487 = vtanh.f32 %v4905_v12  ;;  %v6486_v2 = vpop.eup %6485  ;;  %v5245_v28 = vadd.f32 %v5244_v52, %v5076_v7 }
 0x7b0   :  { %5635 = vst [vmem:[%s12607_s11 + $0x290] sm:$0xff] %v5507_v42  ;;  %v5510_v33 = vmul.f32 %v6684_v3, %v6486_v2  ;;  %v6692_v42 = vld [vmem:[%s12607_s11 + $0x2e8] sm:$0xff] }
 0x7b1   :  { %v4906_v49 = vpop.f32.mrf.mxu3  ;;  %6489 = vtanh.f32 %v5245_v28 }
 0x7b2   :  { %v4737_v37 = vpop.f32.mrf.mxu2  ;;  %5638 = vst [vmem:[%s12607_s11 + $0x2a8] sm:$0xff] %v5510_v33  ;;  %v6693_v33 = vld [vmem:[%s12607_s11 + $0x2e0] sm:$0xff] }
 0x7b3   :  { %v4738_v45 = vadd.f32 %v4737_v37, %v11596_v16  ;;  %v5247_v63 = vpop.f32.mrf.mxu1 }
 0x7b4   :  { %v5078_v26 = vpop.f32.mrf.mxu0 }
 0x7b5   :  { %v6488_v32 = vpop.eup %6487  ;;  %v4907_v0 = vadd.f32 %v4906_v49, %v4738_v45  ;;  %v5079_v54 = vadd.f32 %v5078_v26, %v11587_v34 }
 0x7b6   :  { %v5509_v44 = vmul.f32 %v6685_v10, %v6488_v32  ;;  %4948 = vmatmul.bf16.gmra.mxu3 %v11598_v38  ;;  %5286 = vmatmul.bf16.gmra.mxu1 %v11598_v38 }
 0x7b7   :  { %6491 = vtanh.f32 %v4907_v0  ;;  %4779 = vmatmul.bf16.gmra.mxu2 %v11602_v25  ;;  %5117 = vmatmul.bf16.gmra.mxu0 %v11602_v25  ;;  %v6490_v40 = vpop.eup %6489  ;;  %v5248_v39 = vadd.f32 %v5247_v63, %v5079_v54 }
 0x7b8   :  { %5637 = vst [vmem:[%s12607_s11 + $0x2a0] sm:$0xff] %v5509_v44  ;;  %v5512_v19 = vmul.f32 %v6686_v6, %v6490_v40  ;;  %v6694_v44 = vld [vmem:[%s12607_s11 + $0x2f8] sm:$0xff] }
 0x7b9   :  { %v4909_v61 = vpop.f32.mrf.mxu3  ;;  %6493 = vtanh.f32 %v5248_v39 }
 0x7ba   :  { %v4740_v38 = vpop.f32.mrf.mxu2  ;;  %5640 = vst [vmem:[%s12607_s11 + $0x2b8] sm:$0xff] %v5512_v19  ;;  %v6695_v19 = vld [vmem:[%s12607_s11 + $0x2f0] sm:$0xff] }
 0x7bb   :  { %v4741_v4 = vadd.f32 %v4740_v38, %v11596_v16  ;;  %v5249_v56 = vpop.f32.mrf.mxu1 }
 0x7bc   :  { %v5080_v47 = vpop.f32.mrf.mxu0 }
 0x7bd   :  { %v6492_v25 = vpop.eup %6491  ;;  %v4910_v13 = vadd.f32 %v4909_v61, %v4741_v4  ;;  %v5081_v53 = vadd.f32 %v5080_v47, %v11587_v34 }
 0x7be   :  { %v5511_v35 = vmul.f32 %v6687_v22, %v6492_v25 }
 0x7bf   :  { %6495 = vtanh.f32 %v4910_v13  ;;  %v6494_v21 = vpop.eup %6493  ;;  %v5250_v62 = vadd.f32 %v5249_v56, %v5081_v53 }
 0x7c0   :  { %5639 = vst [vmem:[%s12607_s11 + $0x2b0] sm:$0xff] %v5511_v35  ;;  %v5514_v14 = vmul.f32 %v6688_v29, %v6494_v21  ;;  %v6696_v35 = vld [vmem:[%s12607_s11 + $0x308] sm:$0xff] }
 0x7c1   :  { %v4911_v9 = vpop.f32.mrf.mxu3  ;;  %6497 = vtanh.f32 %v5250_v62 }
 0x7c2   :  { %v4742_v41 = vpop.f32.mrf.mxu2  ;;  %5642 = vst [vmem:[%s12607_s11 + $0x2c8] sm:$0xff] %v5514_v14  ;;  %v6697_v14 = vld [vmem:[%s12607_s11 + $0x300] sm:$0xff] }
 0x7c3   :  { %v4743_v51 = vadd.f32 %v4742_v41, %v11596_v16  ;;  %v5252_v31 = vpop.f32.mrf.mxu1 }
 0x7c4   :  { %v5083_v46 = vpop.f32.mrf.mxu0 }
 0x7c5   :  { %v6496_v23 = vpop.eup %6495  ;;  %v4912_v1 = vadd.f32 %v4911_v9, %v4743_v51  ;;  %v5084_v36 = vadd.f32 %v5083_v46, %v11587_v34 }
 0x7c6   :  { %v5513_v27 = vmul.f32 %v6689_v24, %v6496_v23  ;;  %4953 = vmatmul.bf16.gmra.mxu3 %v11626_v55  ;;  %5291 = vmatmul.bf16.gmra.mxu1 %v11626_v55 }
 0x7c7   :  { %6499 = vtanh.f32 %v4912_v1  ;;  %4784 = vmatmul.bf16.gmra.mxu2 %v11641_v5  ;;  %5122 = vmatmul.bf16.gmra.mxu0 %v11641_v5  ;;  %v6498_v59 = vpop.eup %6497  ;;  %v5253_v8 = vadd.f32 %v5252_v31, %v5084_v36 }
 0x7c8   :  { %5641 = vst [vmem:[%s12607_s11 + $0x2c0] sm:$0xff] %v5513_v27  ;;  %v5516_v17 = vmul.f32 %v6690_v60, %v6498_v59  ;;  %v6698_v27 = vld [vmem:[%s12607_s11 + $0x318] sm:$0xff] }
 0x7c9   :  { %v4914_v57 = vpop.f32.mrf.mxu3  ;;  %6501 = vtanh.f32 %v5253_v8 }
 0x7ca   :  { %v4745_v55 = vpop.f32.mrf.mxu2  ;;  %5644 = vst [vmem:[%s12607_s11 + $0x2d8] sm:$0xff] %v5516_v17  ;;  %v6699_v17 = vld [vmem:[%s12607_s11 + $0x310] sm:$0xff] }
 0x7cb   :  { %v4746_v18 = vadd.f32 %v4745_v55, %v11596_v16  ;;  %v5254_v20 = vpop.f32.mrf.mxu1 }
 0x7cc   :  { %v5085_v11 = vpop.f32.mrf.mxu0 }
 0x7cd   :  { %v6500_v5 = vpop.eup %6499  ;;  %v4915_v43 = vadd.f32 %v4914_v57, %v4746_v18  ;;  %v5086_v52 = vadd.f32 %v5085_v11, %v11587_v34 }
 0x7ce   :  { %v5515_v30 = vmul.f32 %v6691_v15, %v6500_v5 }
 0x7cf   :  { %6503 = vtanh.f32 %v4915_v43  ;;  %v6502_v58 = vpop.eup %6501  ;;  %v5255_v12 = vadd.f32 %v5254_v20, %v5086_v52 }
 0x7d0   :  { %5643 = vst [vmem:[%s12607_s11 + $0x2d0] sm:$0xff] %v5515_v30  ;;  %v5518_v50 = vmul.f32 %v6692_v42, %v6502_v58  ;;  %v6700_v30 = vld [vmem:[%s12607_s11 + $0x328] sm:$0xff] }
 0x7d1   :  { %v4916_v48 = vpop.f32.mrf.mxu3  ;;  %6505 = vtanh.f32 %v5255_v12 }
 0x7d2   :  { %v4747_v7 = vpop.f32.mrf.mxu2  ;;  %5646 = vst [vmem:[%s12607_s11 + $0x2e8] sm:$0xff] %v5518_v50  ;;  %v6701_v50 = vld [vmem:[%s12607_s11 + $0x320] sm:$0xff] }
 0x7d3   :  { %v4748_v2 = vadd.f32 %v4747_v7, %v11596_v16  ;;  %v5257_v28 = vpop.f32.mrf.mxu1 }
 0x7d4   :  { %v5088_v45 = vpop.f32.mrf.mxu0 }
 0x7d5   :  { %v6504_v49 = vpop.eup %6503  ;;  %v4917_v3 = vadd.f32 %v4916_v48, %v4748_v2  ;;  %v5089_v63 = vadd.f32 %v5088_v45, %v11587_v34 }
 0x7d6   :  { %v5517_v37 = vmul.f32 %v6693_v33, %v6504_v49 }
 0x7d7   :  { %6507 = vtanh.f32 %v4917_v3  ;;  %v6506_v32 = vpop.eup %6505  ;;  %v5258_v0 = vadd.f32 %v5257_v28, %v5089_v63 }
 0x7d8   :  { %5645 = vst [vmem:[%s12607_s11 + $0x2e0] sm:$0xff] %v5517_v37  ;;  %v5520_v26 = vmul.f32 %v6694_v44, %v6506_v32  ;;  %v6702_v37 = vld [vmem:[%s12607_s11 + $0x338] sm:$0xff] }
 0x7d9   :  { %v4919_v10 = vpop.f32.mrf.mxu3  ;;  %6509 = vtanh.f32 %v5258_v0 }
 0x7da   :  { %v4750_v54 = vpop.f32.mrf.mxu2  ;;  %5648 = vst [vmem:[%s12607_s11 + $0x2f8] sm:$0xff] %v5520_v26  ;;  %v6703_v26 = vld [vmem:[%s12607_s11 + $0x330] sm:$0xff] }
 0x7db   :  { %v4751_v40 = vadd.f32 %v4750_v54, %v11596_v16  ;;  %v5259_v39 = vpop.f32.mrf.mxu1 }
 0x7dc   :  { %v5090_v4 = vpop.f32.mrf.mxu0 }
 0x7dd   :  { %v6508_v61 = vpop.eup %6507  ;;  %v4920_v6 = vadd.f32 %v4919_v10, %v4751_v40  ;;  %v5091_v56 = vadd.f32 %v5090_v4, %v11587_v34 }
 0x7de   :  { %v5519_v38 = vmul.f32 %v6695_v19, %v6508_v61 }
 0x7df   :  { %6511 = vtanh.f32 %v4920_v6  ;;  %v6510_v25 = vpop.eup %6509  ;;  %v5260_v13 = vadd.f32 %v5259_v39, %v5091_v56 }
 0x7e0   :  { %5647 = vst [vmem:[%s12607_s11 + $0x2f0] sm:$0xff] %v5519_v38  ;;  %v5522_v47 = vmul.f32 %v6696_v35, %v6510_v25  ;;  %v6704_v38 = vld [vmem:[%s12607_s11 + $0x348] sm:$0xff] }
 0x7e1   :  { %v4921_v22 = vpop.f32.mrf.mxu3  ;;  %6513 = vtanh.f32 %v5260_v13 }
 0x7e2   :  { %v4752_v53 = vpop.f32.mrf.mxu2  ;;  %5650 = vst [vmem:[%s12607_s11 + $0x308] sm:$0xff] %v5522_v47  ;;  %v6705_v47 = vld [vmem:[%s12607_s11 + $0x340] sm:$0xff] }
 0x7e3   :  { %v4753_v21 = vadd.f32 %v4752_v53, %v11596_v16  ;;  %v5262_v62 = vpop.f32.mrf.mxu1 }
 0x7e4   :  { %v5093_v51 = vpop.f32.mrf.mxu0 }
 0x7e5   :  { %v6512_v9 = vpop.eup %6511  ;;  %v4922_v29 = vadd.f32 %v4921_v22, %v4753_v21  ;;  %v5094_v31 = vadd.f32 %v5093_v51, %v11587_v34 }
 0x7e6   :  { %v5521_v41 = vmul.f32 %v6697_v14, %v6512_v9 }
 0x7e7   :  { %6515 = vtanh.f32 %v4922_v29  ;;  %v6514_v23 = vpop.eup %6513  ;;  %v5263_v1 = vadd.f32 %v5262_v62, %v5094_v31 }
 0x7e8   :  { %5649 = vst [vmem:[%s12607_s11 + $0x300] sm:$0xff] %v5521_v41  ;;  %v5524_v46 = vmul.f32 %v6698_v27, %v6514_v23  ;;  %v6706_v41 = vld [vmem:[%s12607_s11 + $0x358] sm:$0xff] }
 0x7e9   :  { %v4924_v24 = vpop.f32.mrf.mxu3  ;;  %6517 = vtanh.f32 %v5263_v1 }
 0x7ea   :  { %v4755_v36 = vpop.f32.mrf.mxu2  ;;  %5652 = vst [vmem:[%s12607_s11 + $0x318] sm:$0xff] %v5524_v46  ;;  %v6707_v46 = vld [vmem:[%s12607_s11 + $0x350] sm:$0xff] }
 0x7eb   :  { %v4756_v59 = vadd.f32 %v4755_v36, %v11596_v16  ;;  %v5264_v8 = vpop.f32.mrf.mxu1 }
 0x7ec   :  { %v5095_v18 = vpop.f32.mrf.mxu0 }
 0x7ed   :  { %v6516_v57 = vpop.eup %6515  ;;  %v4925_v60 = vadd.f32 %v4924_v24, %v4756_v59  ;;  %v5096_v20 = vadd.f32 %v5095_v18, %v11587_v34 }
 0x7ee   :  { %v5523_v55 = vmul.f32 %v6699_v17, %v6516_v57 }
 0x7ef   :  { %6519 = vtanh.f32 %v4925_v60  ;;  %v6518_v5 = vpop.eup %6517  ;;  %v5265_v43 = vadd.f32 %v5264_v8, %v5096_v20 }
 0x7f0   :  { %5651 = vst [vmem:[%s12607_s11 + $0x310] sm:$0xff] %v5523_v55  ;;  %v5526_v11 = vmul.f32 %v6700_v30, %v6518_v5  ;;  %v6708_v55 = vld [vmem:[%s12607_s11 + $0x368] sm:$0xff] }
 0x7f1   :  { %v4926_v15 = vpop.f32.mrf.mxu3  ;;  %6521 = vtanh.f32 %v5265_v43 }
 0x7f2   :  { %v4757_v52 = vpop.f32.mrf.mxu2  ;;  %5654 = vst [vmem:[%s12607_s11 + $0x328] sm:$0xff] %v5526_v11  ;;  %v6709_v11 = vld [vmem:[%s12607_s11 + $0x360] sm:$0xff] }
 0x7f3   :  { %v4758_v58 = vadd.f32 %v4757_v52, %v11596_v16  ;;  %v5267_v12 = vpop.f32.mrf.mxu1 }
 0x7f4   :  { %v5098_v2 = vpop.f32.mrf.mxu0 }
 0x7f5   :  { %v6520_v48 = vpop.eup %6519  ;;  %v4927_v42 = vadd.f32 %v4926_v15, %v4758_v58  ;;  %v5099_v28 = vadd.f32 %v5098_v2, %v11587_v34 }
 0x7f6   :  { %v5525_v7 = vmul.f32 %v6701_v50, %v6520_v48 }
 0x7f7   :  { %6523 = vtanh.f32 %v4927_v42  ;;  %v6522_v49 = vpop.eup %6521  ;;  %v5268_v3 = vadd.f32 %v5267_v12, %v5099_v28 }
 0x7f8   :  { %5653 = vst [vmem:[%s12607_s11 + $0x320] sm:$0xff] %v5525_v7  ;;  %v5528_v45 = vmul.f32 %v6702_v37, %v6522_v49  ;;  %v6710_v7 = vld [vmem:[%s12607_s11 + $0x378] sm:$0xff] }
 0x7f9   :  { %v4929_v33 = vpop.f32.mrf.mxu3  ;;  %6525 = vtanh.f32 %v5268_v3 }
 0x7fa   :  { %v4760_v63 = vpop.f32.mrf.mxu2  ;;  %5656 = vst [vmem:[%s12607_s11 + $0x338] sm:$0xff] %v5528_v45  ;;  %v6711_v45 = vld [vmem:[%s12607_s11 + $0x370] sm:$0xff] }
 0x7fb   :  { %v4761_v32 = vadd.f32 %v4760_v63, %v11596_v16  ;;  %v5269_v0 = vpop.f32.mrf.mxu1 }
 0x7fc   :  { %v5100_v40 = vpop.f32.mrf.mxu0 }
 0x7fd   :  { %v6524_v10 = vpop.eup %6523  ;;  %v4930_v44 = vadd.f32 %v4929_v33, %v4761_v32  ;;  %v5101_v39 = vadd.f32 %v5100_v40, %v11587_v34 }
 0x7fe   :  { %v5527_v54 = vmul.f32 %v6703_v26, %v6524_v10 }
 0x7ff   :  { %6527 = vtanh.f32 %v4930_v44  ;;  %v6526_v61 = vpop.eup %6525  ;;  %v5270_v6 = vadd.f32 %v5269_v0, %v5101_v39 }
 0x800   :  { %5655 = vst [vmem:[%s12607_s11 + $0x330] sm:$0xff] %v5527_v54  ;;  %v5530_v4 = vmul.f32 %v6704_v38, %v6526_v61  ;;  %v6712_v54 = vld [vmem:[%s12607_s11 + $0x388] sm:$0xff] }
 0x801   :  { %v4931_v19 = vpop.f32.mrf.mxu3  ;;  %6529 = vtanh.f32 %v5270_v6 }
 0x802   :  { %v4762_v56 = vpop.f32.mrf.mxu2  ;;  %5658 = vst [vmem:[%s12607_s11 + $0x348] sm:$0xff] %v5530_v4  ;;  %v6713_v4 = vld [vmem:[%s12607_s11 + $0x380] sm:$0xff] }
 0x803   :  { %v4763_v25 = vadd.f32 %v4762_v56, %v11596_v16  ;;  %v5272_v13 = vpop.f32.mrf.mxu1 }
 0x804   :  { %v5103_v21 = vpop.f32.mrf.mxu0 }
 0x805   :  { %v6528_v22 = vpop.eup %6527  ;;  %v4932_v35 = vadd.f32 %v4931_v19, %v4763_v25  ;;  %v5104_v62 = vadd.f32 %v5103_v21, %v11587_v34 }
 0x806   :  { %v5529_v53 = vmul.f32 %v6705_v47, %v6528_v22 }
 0x807   :  { %6531 = vtanh.f32 %v4932_v35  ;;  %v6530_v9 = vpop.eup %6529  ;;  %v5273_v29 = vadd.f32 %v5272_v13, %v5104_v62 }
 0x808   :  { %5657 = vst [vmem:[%s12607_s11 + $0x340] sm:$0xff] %v5529_v53  ;;  %v5532_v51 = vmul.f32 %v6706_v41, %v6530_v9  ;;  %v6714_v53 = vld [vmem:[%s12607_s11 + $0x398] sm:$0xff] }
 0x809   :  { %v4934_v14 = vpop.f32.mrf.mxu3  ;;  %6533 = vtanh.f32 %v5273_v29 }
 0x80a   :  { %v4765_v31 = vpop.f32.mrf.mxu2  ;;  %5660 = vst [vmem:[%s12607_s11 + $0x358] sm:$0xff] %v5532_v51  ;;  %v6715_v51 = vld [vmem:[%s12607_s11 + $0x390] sm:$0xff] }
 0x80b   :  { %v4766_v23 = vadd.f32 %v4765_v31, %v11596_v16  ;;  %v5274_v1 = vpop.f32.mrf.mxu1 }
 0x80c   :  { %v5105_v59 = vpop.f32.mrf.mxu0 }
 0x80d   :  { %v6532_v24 = vpop.eup %6531  ;;  %v4935_v27 = vadd.f32 %v4934_v14, %v4766_v23  ;;  %v5106_v8 = vadd.f32 %v5105_v59, %v11587_v34 }
 0x80e   :  { %v5531_v36 = vmul.f32 %v6707_v46, %v6532_v24 }
 0x80f   :  { %6535 = vtanh.f32 %v4935_v27  ;;  %v6534_v57 = vpop.eup %6533  ;;  %v5275_v60 = vadd.f32 %v5274_v1, %v5106_v8 }
 0x810   :  { %5659 = vst [vmem:[%s12607_s11 + $0x350] sm:$0xff] %v5531_v36  ;;  %v5534_v18 = vmul.f32 %v6708_v55, %v6534_v57  ;;  %v6716_v36 = vld [vmem:[%s12607_s11 + $0x3a8] sm:$0xff] }
 0x811   :  { %v4936_v17 = vpop.f32.mrf.mxu3  ;;  %6537 = vtanh.f32 %v5275_v60 }
 0x812   :  { %v4767_v20 = vpop.f32.mrf.mxu2  ;;  %5662 = vst [vmem:[%s12607_s11 + $0x368] sm:$0xff] %v5534_v18  ;;  %v6717_v18 = vld [vmem:[%s12607_s11 + $0x3a0] sm:$0xff] }
 0x813   :  { %v4768_v5 = vadd.f32 %v4767_v20, %v11596_v16  ;;  %v5277_v43 = vpop.f32.mrf.mxu1 }
 0x814   :  { %v5108_v58 = vpop.f32.mrf.mxu0 }
 0x815   :  { %v6536_v15 = vpop.eup %6535  ;;  %v4937_v30 = vadd.f32 %v4936_v17, %v4768_v5  ;;  %v5109_v12 = vadd.f32 %v5108_v58, %v11587_v34 }
 0x816   :  { %v5533_v52 = vmul.f32 %v6709_v11, %v6536_v15 }
 0x817   :  { %6539 = vtanh.f32 %v4937_v30  ;;  %v6538_v48 = vpop.eup %6537  ;;  %v5278_v42 = vadd.f32 %v5277_v43, %v5109_v12 }
 0x818   :  { %5661 = vst [vmem:[%s12607_s11 + $0x360] sm:$0xff] %v5533_v52  ;;  %v5536_v2 = vmul.f32 %v6710_v7, %v6538_v48  ;;  %v6718_v52 = vld [vmem:[%s12607_s11 + $0x3b8] sm:$0xff] }
 0x819   :  { %v4939_v50 = vpop.f32.mrf.mxu3  ;;  %6541 = vtanh.f32 %v5278_v42 }
 0x81a   :  { %v4770_v28 = vpop.f32.mrf.mxu2  ;;  %5664 = vst [vmem:[%s12607_s11 + $0x378] sm:$0xff] %v5536_v2  ;;  %v6719_v2 = vld [vmem:[%s12607_s11 + $0x3b0] sm:$0xff] }
 0x81b   :  { %v4771_v49 = vadd.f32 %v4770_v28, %v11596_v16  ;;  %v5279_v3 = vpop.f32.mrf.mxu1 }
 0x81c   :  { %v5110_v32 = vpop.f32.mrf.mxu0 }
 0x81d   :  { %v6540_v33 = vpop.eup %6539  ;;  %v4940_v37 = vadd.f32 %v4939_v50, %v4771_v49  ;;  %v5111_v0 = vadd.f32 %v5110_v32, %v11587_v34 }
 0x81e   :  { %v5535_v63 = vmul.f32 %v6711_v45, %v6540_v33 }
 0x81f   :  { %6543 = vtanh.f32 %v4940_v37  ;;  %v6542_v10 = vpop.eup %6541  ;;  %v5280_v44 = vadd.f32 %v5279_v3, %v5111_v0 }
 0x820   :  { %5663 = vst [vmem:[%s12607_s11 + $0x370] sm:$0xff] %v5535_v63  ;;  %v5538_v40 = vmul.f32 %v6712_v54, %v6542_v10  ;;  %v6720_v63 = vld [vmem:[%s12607_s11 + $0x3c8] sm:$0xff]  ;;  %v6721_v54 = vld [vmem:[%s12607_s11 + $0x3c0] sm:$0xff] }
 0x821   :  { %v4941_v26 = vpop.f32.mrf.mxu3  ;;  %6545 = vtanh.f32 %v5280_v44 }
 0x822   :  { %v4772_v39 = vpop.f32.mrf.mxu2  ;;  %5666 = vst [vmem:[%s12607_s11 + $0x388] sm:$0xff] %v5538_v40 }
 0x823   :  { %v4773_v61 = vadd.f32 %v4772_v39, %v11596_v16  ;;  %v5282_v6 = vpop.f32.mrf.mxu1 }
 0x824   :  { %v5113_v25 = vpop.f32.mrf.mxu0 }
 0x825   :  { %v6544_v19 = vpop.eup %6543  ;;  %v4942_v38 = vadd.f32 %v4941_v26, %v4773_v61  ;;  %v5114_v13 = vadd.f32 %v5113_v25, %v11587_v34 }
 0x826   :  { %v5537_v56 = vmul.f32 %v6713_v4, %v6544_v19  ;;  %v6722_v4 = vld [vmem:[%s12607_s11 + $0x3d8] sm:$0xff] }
 0x827   :  { %6547 = vtanh.f32 %v4942_v38  ;;  %v6546_v22 = vpop.eup %6545  ;;  %v5283_v35 = vadd.f32 %v5282_v6, %v5114_v13 }
 0x828   :  { %5665 = vst [vmem:[%s12607_s11 + $0x380] sm:$0xff] %v5537_v56  ;;  %v5540_v21 = vmul.f32 %v6714_v53, %v6546_v22  ;;  %v6723_v53 = vld [vmem:[%s12607_s11 + $0x3d0] sm:$0xff] }
 0x829   :  { %v4944_v47 = vpop.f32.mrf.mxu3  ;;  %6549 = vtanh.f32 %v5283_v35 }
 0x82a   :  { %v4775_v62 = vpop.f32.mrf.mxu2  ;;  %5668 = vst [vmem:[%s12607_s11 + $0x398] sm:$0xff] %v5540_v21 }
 0x82b   :  { %v4776_v9 = vadd.f32 %v4775_v62, %v11596_v16  ;;  %v5284_v29 = vpop.f32.mrf.mxu1 }
 0x82c   :  { %v5115_v23 = vpop.f32.mrf.mxu0 }
 0x82d   :  { %v6548_v14 = vpop.eup %6547  ;;  %v4945_v41 = vadd.f32 %v4944_v47, %v4776_v9  ;;  %v5116_v1 = vadd.f32 %v5115_v23, %v11587_v34 }
 0x82e   :  { %v5539_v31 = vmul.f32 %v6715_v51, %v6548_v14  ;;  %v6724_v51 = vld [vmem:[%s12607_s11 + $0x3e8] sm:$0xff] }
 0x82f   :  { %6551 = vtanh.f32 %v4945_v41  ;;  %v6550_v24 = vpop.eup %6549  ;;  %v5285_v27 = vadd.f32 %v5284_v29, %v5116_v1 }
 0x830   :  { %5667 = vst [vmem:[%s12607_s11 + $0x390] sm:$0xff] %v5539_v31  ;;  %v5542_v59 = vmul.f32 %v6716_v36, %v6550_v24 }
 0x831   :  { %v4946_v46 = vpop.f32.mrf.mxu3  ;;  %6553 = vtanh.f32 %v5285_v27 }
 0x832   :  { %v4777_v8 = vpop.f32.mrf.mxu2  ;;  %5670 = vst [vmem:[%s12607_s11 + $0x3a8] sm:$0xff] %v5542_v59 }
 0x833   :  { %v4778_v57 = vadd.f32 %v4777_v8, %v11596_v16  ;;  %v5287_v60 = vpop.f32.mrf.mxu1 }
 0x834   :  { %v5118_v5 = vpop.f32.mrf.mxu0 }
 0x835   :  { %v6552_v17 = vpop.eup %6551  ;;  %v4947_v55 = vadd.f32 %v4946_v46, %v4778_v57  ;;  %v5119_v43 = vadd.f32 %v5118_v5, %v11587_v34  ;;  %v6725_v46 = vld [vmem:[%s12607_s11 + $0x3e0] sm:$0xff] }
 0x836   :  { %v5541_v20 = vmul.f32 %v6717_v18, %v6552_v17 }
 0x837   :  { %6555 = vtanh.f32 %v4947_v55  ;;  %v6554_v15 = vpop.eup %6553  ;;  %v5288_v30 = vadd.f32 %v5287_v60, %v5119_v43  ;;  %v6727_v60 = vld [vmem:[%s12607_s11 + $0x3f0] sm:$0xff] }
 0x838   :  { %5669 = vst [vmem:[%s12607_s11 + $0x3a0] sm:$0xff] %v5541_v20  ;;  %v5544_v58 = vmul.f32 %v6718_v52, %v6554_v15 }
 0x839   :  { %v4949_v11 = vpop.f32.mrf.mxu3  ;;  %6557 = vtanh.f32 %v5288_v30 }
 0x83a   :  { %v4780_v12 = vpop.f32.mrf.mxu2  ;;  %5672 = vst [vmem:[%s12607_s11 + $0x3b8] sm:$0xff] %v5544_v58 }
 0x83b   :  { %v4781_v48 = vadd.f32 %v4780_v12, %v11596_v16  ;;  %v5289_v42 = vpop.f32.mrf.mxu1 }
 0x83c   :  { %v5120_v49 = vpop.f32.mrf.mxu0 }
 0x83d   :  { %v6556_v50 = vpop.eup %6555  ;;  %v4950_v7 = vadd.f32 %v4949_v11, %v4781_v48  ;;  %v5121_v3 = vadd.f32 %v5120_v49, %v11587_v34 }
 0x83e   :  { %v5543_v28 = vmul.f32 %v6719_v2, %v6556_v50 }
 0x83f   :  { %6559 = vtanh.f32 %v4950_v7  ;;  %v6558_v33 = vpop.eup %6557  ;;  %v5290_v37 = vadd.f32 %v5289_v42, %v5121_v3 }
 0x840   :  { %5671 = vst [vmem:[%s12607_s11 + $0x3b0] sm:$0xff] %v5543_v28  ;;  %v5546_v32 = vmul.f32 %v6720_v63, %v6558_v33 }
 0x841   :  { %v4951_v45 = vpop.f32.mrf.mxu3  ;;  %6561 = vtanh.f32 %v5290_v37 }
 0x842   :  { %v4782_v0 = vpop.f32.mrf.mxu2  ;;  %5674 = vst [vmem:[%s12607_s11 + $0x3c8] sm:$0xff] %v5546_v32 }
 0x843   :  { %v4783_v10 = vadd.f32 %v4782_v0, %v11596_v16  ;;  %v5292_v39 = vpop.f32.mrf.mxu1 }
 0x844   :  { %v5123_v61 = vpop.f32.mrf.mxu0 }
 0x845   :  { %v6560_v44 = vpop.eup %6559  ;;  %v4952_v26 = vadd.f32 %v4951_v45, %v4783_v10  ;;  %v5124_v6 = vadd.f32 %v5123_v61, %v11587_v34 }
 0x846   :  { %v5545_v40 = vmul.f32 %v6721_v54, %v6560_v44 }
 0x847   :  { %6563 = vtanh.f32 %v4952_v26  ;;  %v6562_v19 = vpop.eup %6561  ;;  %v5293_v38 = vadd.f32 %v5292_v39, %v5124_v6 }
 0x848   :  { %5673 = vst [vmem:[%s12607_s11 + $0x3c0] sm:$0xff] %v5545_v40  ;;  %v5548_v56 = vmul.f32 %v6722_v4, %v6562_v19 }
 0x849   :  { %v4954_v25 = vpop.f32.mrf.mxu3  ;;  %6565 = vtanh.f32 %v5293_v38 }
 0x84a   :  { %v4785_v13 = vpop.f32.mrf.mxu2  ;;  %5676 = vst [vmem:[%s12607_s11 + $0x3d8] sm:$0xff] %v5548_v56 }
 0x84b   :  { %v4786_v22 = vadd.f32 %v4785_v13, %v11596_v16  ;;  %v5294_v29 = vpop.f32.mrf.mxu1 }
 0x84c   :  { %v5125_v62 = vpop.f32.mrf.mxu0 }
 0x84d   :  { %v6564_v35 = vpop.eup %6563  ;;  %v4955_v47 = vadd.f32 %v4954_v25, %v4786_v22  ;;  %v5126_v9 = vadd.f32 %v5125_v62, %v11587_v34 }
 0x84e   :  { %v5547_v21 = vmul.f32 %v6723_v53, %v6564_v35 }
 0x84f   :  { %6567 = vtanh.f32 %v4955_v47  ;;  %v6566_v14 = vpop.eup %6565  ;;  %v5295_v41 = vadd.f32 %v5294_v29, %v5126_v9 }
 0x850   :  { %5675 = vst [vmem:[%s12607_s11 + $0x3d0] sm:$0xff] %v5547_v21  ;;  %v5550_v31 = vmul.f32 %v6724_v51, %v6566_v14 }
 0x851   :  { %6569 = vtanh.f32 %v5295_v41  ;;  %v4956_v34 = vpop.f32.mrf.mxu3 }
 0x852   :  { %v4787_v23 = vpop.f32.mrf.mxu2  ;;  %5678 = vst [vmem:[%s12607_s11 + $0x3e8] sm:$0xff] %v5550_v31 }
 0x853   :  { %v4788_v1 = vadd.f32 %v4787_v23, %v11596_v16  ;;  %v6726_v16 = vld [vmem:[%s12607_s11 + $0x3f8] sm:$0xff] }
 0x855   :  { %v6568_v24 = vpop.eup %6567  ;;  %v4957_v27 = vadd.f32 %v4956_v34, %v4788_v1 }
 0x856   :  { %v5549_v36 = vmul.f32 %v6725_v46, %v6568_v24 }
 0x857   :  { %6571 = vtanh.f32 %v4957_v27  ;;  %v6570_v59 = vpop.eup %6569 }
 0x858   :  { %5677 = vst [vmem:[%s12607_s11 + $0x3e0] sm:$0xff] %v5549_v36  ;;  %v5552_v8 = vmul.f32 %v6726_v16, %v6570_v59 }
 0x85a   :  { %5680 = vst [vmem:[%s12607_s11 + $0x3f8] sm:$0xff] %v5552_v8 }
 0x85d   :  { %v6572_v57 = vpop.eup %6571 }
 0x85e   :  { %v5551_v17 = vmul.f32 %v6727_v60, %v6572_v57 }
 0x860   :  { %5679 = vst [vmem:[%s12607_s11 + $0x3f0] sm:$0xff] %v5551_v17 }
 0x861   :  { %5689 = vsyncpa [#allocation4], 1 }
 0x862   :  { %5690 = vsyncpa [#allocation6], 1 }
 0x863   :  { %5691 = vsyncpa [#allocation9], 1 }
 0x864   :  { %5692 = vsyncpa [#allocation12], 1 }
 0x865   :  { %5693 = vsyncpa [#allocation15], 1 }

</bundles_post_ra>
